<compile_context>
chip_gen: v7x
topology: tpu7x:2x2x1
jax: 0.10.0
libtpu: 0.0.40
codegen_flags: <defaults>
</compile_context>

<pallas_src>
import jax
import jax.numpy as jnp
from jax import lax
from jax.experimental import pallas as pl
from jax.experimental.pallas import tpu as pltpu


def _ridge_kernel(reg_ref, alpha_ref, beta_ref, s_ref, q_ref, out_ref):
    # Scalars from SMEM.
    lam = reg_ref[0] * jnp.exp(alpha_ref[0]) + 1e-6
    rho = jnp.exp(beta_ref[0])

    N, D, Bt = s_ref.shape          # batch Bt lives on the lane axis
    M = q_ref.shape[0]
    R = N + M

    s = s_ref[...].astype(jnp.float32)   # (N, D, Bt)
    q = q_ref[...].astype(jnp.float32)   # (M, D, Bt)

    # ---- Fused Gram:  G[r, n, b] = <row r of [s; q], row n of s>  -----------
    r_all = jnp.concatenate([s, q], axis=0)            # (R, D, Bt)
    g_rows = []
    for r in range(R):                                  # static, fully unrolled
        # (1, D, Bt) * (N, D, Bt) -> sum over D -> (N, Bt)
        g_rows.append(jnp.sum(r_all[r:r + 1] * s, axis=1))
    G = jnp.stack(g_rows, axis=0)                       # (R, N, Bt)
    sst = G[:N]                                         # (N, N, Bt) = s s^T
    qst = G[N:]                                         # (M, N, Bt) = q s^T

    # ---- A = s s^T + lam * I  (batch-free diagonal mask) ---------------------
    eye = (lax.broadcasted_iota(jnp.int32, (N, N, 1), 0)
           == lax.broadcasted_iota(jnp.int32, (N, N, 1), 1))
    A = jnp.where(eye, sst + lam, sst)                  # (N, N, Bt)

    # ---- Gauss-Jordan on [A | S]  ->  right block becomes X = A^{-1} S ------
    # A is SPD (s s^T + lam I, lam >= 1e-6) so no pivoting is required.
    aug = jnp.concatenate([A, s], axis=1)               # (N, N+D, Bt)
    rows3 = lax.broadcasted_iota(jnp.int32, (N, 1, 1), 0)
    for k in range(N):                                  # static, fully unrolled
        prow = aug[k]                                   # (N+D, Bt)
        pivot = prow[k:k + 1, :]                        # (1, Bt)
        prow = prow * pl.reciprocal(pivot)              # normalized pivot row
        colk = aug[:, k:k + 1, :]                       # (N, 1, Bt)
        upd = aug - colk * prow[None, :, :]             # eliminate column k
        aug = jnp.where(rows3 == k, prow[None, :, :], upd)

    X = aug[:, N:, :]                                   # (N, D, Bt) = A^{-1} S

    # ---- Q_bar = rho * qst @ X  (per-lane contraction over N) ---------------
    out_rows = []
    for m in range(M):                                  # static, fully unrolled
        # (N, 1, Bt) * (N, D, Bt) -> sum over N -> (D, Bt)
        out_rows.append(jnp.sum(qst[m][:, None, :] * X, axis=0))
    q_bar = jnp.stack(out_rows, axis=0) * rho           # (M, D, Bt)

    out_ref[...] = q_bar.astype(out_ref.dtype)


def ridge_regression_forward(reg, alpha, beta, s, q, *, block_b=None):
    B, N, D = s.shape
    M = q.shape[1]

    # Batch goes on the minor (lane) axis inside the kernel.
    s_t = jnp.transpose(s, (1, 2, 0))                   # (N, D, B)
    q_t = jnp.transpose(q, (1, 2, 0))                   # (M, D, B)

    if block_b is None:
        # 128 problems per lane-block when possible (full lane utilization,
        # grid >= 2 for B >= 256 so both v7x TensorCores get work); otherwise
        # take the whole batch in one step (block == full array dim is always
        # a legal block shape).
        block_b = 128 if (B % 128 == 0) else B
    assert B % block_b == 0
    assert block_b == B or block_b % 128 == 0, "lane blocks must be 128-aligned"

    out_t = pl.pallas_call(
        _ridge_kernel,
        out_shape=jax.ShapeDtypeStruct((M, D, B), s.dtype),
        grid=(B // block_b,),
        in_specs=[
            pl.BlockSpec(memory_space=pltpu.MemorySpace.SMEM),      # reg
            pl.BlockSpec(memory_space=pltpu.MemorySpace.SMEM),      # alpha
            pl.BlockSpec(memory_space=pltpu.MemorySpace.SMEM),      # beta
            pl.BlockSpec((N, D, block_b), lambda b: (0, 0, b)),     # s (N,D,B)
            pl.BlockSpec((M, D, block_b), lambda b: (0, 0, b)),     # q (M,D,B)
        ],
        out_specs=pl.BlockSpec((M, D, block_b), lambda b: (0, 0, b)),
        compiler_params=pltpu.CompilerParams(
            dimension_semantics=("parallel",)),                     # batches independent
    )(reg, alpha, beta, s_t, q_t)

    return jnp.transpose(out_t, (2, 0, 1))              # (B, M, D)


def ridge_regression_reference(reg, alpha, beta, s, q):
    N = s.shape[1]
    lam = reg * jnp.exp(alpha) + 1e-6
    rho = jnp.exp(beta)
    st = jnp.swapaxes(s, 1, 2)
    sst = jnp.matmul(s, st)
    inv = jnp.linalg.inv(sst + jnp.eye(N, dtype=s.dtype)[None] * lam)
    w_bar = jnp.matmul(jnp.matmul(st, inv), s)
    return jnp.matmul(q, w_bar) * rho


if __name__ == "__main__":
    key = jax.random.PRNGKey(0)
    k_s, k_q = jax.random.split(key)

    B, N, M, D = 2, 8, 8, 32
    s = jax.random.normal(k_s, (B, N, D), dtype=jnp.float32)
    q = jax.random.normal(k_q, (B, M, D), dtype=jnp.float32)
    reg = jnp.array([0.5], dtype=jnp.float32)

    # nn.Parameter init (deterministic, as in the module __init__)
    alpha = jnp.zeros((1,), dtype=jnp.float32)
    beta = jnp.zeros((1,), dtype=jnp.float32)
    gamma = jnp.array([1.0], dtype=jnp.float32)  # unused in forward (as in PyTorch)

    out = ridge_regression_forward(reg, alpha, beta, s, q)
    out = jax.block_until_ready(out)

    ref = ridge_regression_reference(reg, alpha, beta, s, q)
    assert out.shape == (B, M, D)
    assert jnp.allclose(out, ref, atol=1e-3, rtol=1e-3), "mismatch vs reference"

    print("KERNEL_OK")
</pallas_src>

<mosaic_0001>
module attributes {stable_mosaic.version = 11 : i64} {
  func.func @_ridge_kernel(%arg0: i32, %arg1: memref<1xf32, #tpu.memory_space<smem>>, %arg2: memref<1xf32, #tpu.memory_space<smem>>, %arg3: memref<1xf32, #tpu.memory_space<smem>>, %arg4: memref<8x32x2xf32, #tpu.memory_space<vmem>>, %arg5: memref<8x32x2xf32, #tpu.memory_space<vmem>>, %arg6: memref<8x32x2xf32, #tpu.memory_space<vmem>>) attributes {dimension_semantics = [#tpu.dimension_semantics<parallel>], iteration_bounds = array<i64: 1>, scalar_prefetch = 0 : i64, scratch_operands = 0 : i64, tpu.core_type = #tpu.core_type<tc>, window_params = [{transform_indices = @transform_0, window_bounds = array<i64: 1>}, {transform_indices = @transform_1, window_bounds = array<i64: 1>}, {transform_indices = @transform_2, window_bounds = array<i64: 1>}, {transform_indices = @transform_3, window_bounds = array<i64: 8, 32, 2>}, {transform_indices = @transform_4, window_bounds = array<i64: 8, 32, 2>}, {transform_indices = @transform_5, window_bounds = array<i64: 8, 32, 2>}]} {
    %c0 = arith.constant 0 : index
    %0 = memref.load %arg1[%c0] : memref<1xf32, #tpu.memory_space<smem>>
    %c0_0 = arith.constant 0 : index
    %1 = memref.load %arg2[%c0_0] : memref<1xf32, #tpu.memory_space<smem>>
    %2 = math.exp %1 : f32
    %3 = arith.mulf %0, %2 : f32
    %cst = arith.constant 9.99999997E-7 : f32
    %4 = arith.addf %3, %cst : f32
    %c0_1 = arith.constant 0 : index
    %5 = memref.load %arg3[%c0_1] : memref<1xf32, #tpu.memory_space<smem>>
    %6 = math.exp %5 : f32
    %c0_2 = arith.constant 0 : index
    %c0_3 = arith.constant 0 : index
    %c0_4 = arith.constant 0 : index
    %7 = vector.load %arg4[%c0_2, %c0_3, %c0_4] : memref<8x32x2xf32, #tpu.memory_space<vmem>>, vector<8x32x2xf32>
    %c0_5 = arith.constant 0 : index
    %c0_6 = arith.constant 0 : index
    %c0_7 = arith.constant 0 : index
    %8 = vector.load %arg5[%c0_5, %c0_6, %c0_7] : memref<8x32x2xf32, #tpu.memory_space<vmem>>, vector<8x32x2xf32>
    %9 = tpu.concatenate %7, %8 in 0 : vector<8x32x2xf32>, vector<8x32x2xf32> -> vector<16x32x2xf32>
    %10 = vector.extract_strided_slice %9 {offsets = [0, 0, 0], sizes = [1, 32, 2], strides = [1, 1, 1]} : vector<16x32x2xf32> to vector<1x32x2xf32>
    %11 = vector.broadcast %10 : vector<1x32x2xf32> to vector<8x32x2xf32>
    %12 = arith.mulf %11, %7 : vector<8x32x2xf32>
    %cst_8 = arith.constant dense<0.000000e+00> : vector<8x2xf32>
    %13 = vector.multi_reduction <add>, %12, %cst_8 [1] : vector<8x32x2xf32> to vector<8x2xf32>
    %14 = vector.extract_strided_slice %9 {offsets = [1, 0, 0], sizes = [1, 32, 2], strides = [1, 1, 1]} : vector<16x32x2xf32> to vector<1x32x2xf32>
    %15 = vector.broadcast %14 : vector<1x32x2xf32> to vector<8x32x2xf32>
    %16 = arith.mulf %15, %7 : vector<8x32x2xf32>
    %cst_9 = arith.constant dense<0.000000e+00> : vector<8x2xf32>
    %17 = vector.multi_reduction <add>, %16, %cst_9 [1] : vector<8x32x2xf32> to vector<8x2xf32>
    %18 = vector.extract_strided_slice %9 {offsets = [2, 0, 0], sizes = [1, 32, 2], strides = [1, 1, 1]} : vector<16x32x2xf32> to vector<1x32x2xf32>
    %19 = vector.broadcast %18 : vector<1x32x2xf32> to vector<8x32x2xf32>
    %20 = arith.mulf %19, %7 : vector<8x32x2xf32>
    %cst_10 = arith.constant dense<0.000000e+00> : vector<8x2xf32>
    %21 = vector.multi_reduction <add>, %20, %cst_10 [1] : vector<8x32x2xf32> to vector<8x2xf32>
    %22 = vector.extract_strided_slice %9 {offsets = [3, 0, 0], sizes = [1, 32, 2], strides = [1, 1, 1]} : vector<16x32x2xf32> to vector<1x32x2xf32>
    %23 = vector.broadcast %22 : vector<1x32x2xf32> to vector<8x32x2xf32>
    %24 = arith.mulf %23, %7 : vector<8x32x2xf32>
    %cst_11 = arith.constant dense<0.000000e+00> : vector<8x2xf32>
    %25 = vector.multi_reduction <add>, %24, %cst_11 [1] : vector<8x32x2xf32> to vector<8x2xf32>
    %26 = vector.extract_strided_slice %9 {offsets = [4, 0, 0], sizes = [1, 32, 2], strides = [1, 1, 1]} : vector<16x32x2xf32> to vector<1x32x2xf32>
    %27 = vector.broadcast %26 : vector<1x32x2xf32> to vector<8x32x2xf32>
    %28 = arith.mulf %27, %7 : vector<8x32x2xf32>
    %cst_12 = arith.constant dense<0.000000e+00> : vector<8x2xf32>
    %29 = vector.multi_reduction <add>, %28, %cst_12 [1] : vector<8x32x2xf32> to vector<8x2xf32>
    %30 = vector.extract_strided_slice %9 {offsets = [5, 0, 0], sizes = [1, 32, 2], strides = [1, 1, 1]} : vector<16x32x2xf32> to vector<1x32x2xf32>
    %31 = vector.broadcast %30 : vector<1x32x2xf32> to vector<8x32x2xf32>
    %32 = arith.mulf %31, %7 : vector<8x32x2xf32>
    %cst_13 = arith.constant dense<0.000000e+00> : vector<8x2xf32>
    %33 = vector.multi_reduction <add>, %32, %cst_13 [1] : vector<8x32x2xf32> to vector<8x2xf32>
    %34 = vector.extract_strided_slice %9 {offsets = [6, 0, 0], sizes = [1, 32, 2], strides = [1, 1, 1]} : vector<16x32x2xf32> to vector<1x32x2xf32>
    %35 = vector.broadcast %34 : vector<1x32x2xf32> to vector<8x32x2xf32>
    %36 = arith.mulf %35, %7 : vector<8x32x2xf32>
    %cst_14 = arith.constant dense<0.000000e+00> : vector<8x2xf32>
    %37 = vector.multi_reduction <add>, %36, %cst_14 [1] : vector<8x32x2xf32> to vector<8x2xf32>
    %38 = vector.extract_strided_slice %9 {offsets = [7, 0, 0], sizes = [1, 32, 2], strides = [1, 1, 1]} : vector<16x32x2xf32> to vector<1x32x2xf32>
    %39 = vector.broadcast %38 : vector<1x32x2xf32> to vector<8x32x2xf32>
    %40 = arith.mulf %39, %7 : vector<8x32x2xf32>
    %cst_15 = arith.constant dense<0.000000e+00> : vector<8x2xf32>
    %41 = vector.multi_reduction <add>, %40, %cst_15 [1] : vector<8x32x2xf32> to vector<8x2xf32>
    %42 = vector.extract_strided_slice %9 {offsets = [8, 0, 0], sizes = [1, 32, 2], strides = [1, 1, 1]} : vector<16x32x2xf32> to vector<1x32x2xf32>
    %43 = vector.broadcast %42 : vector<1x32x2xf32> to vector<8x32x2xf32>
    %44 = arith.mulf %43, %7 : vector<8x32x2xf32>
    %cst_16 = arith.constant dense<0.000000e+00> : vector<8x2xf32>
    %45 = vector.multi_reduction <add>, %44, %cst_16 [1] : vector<8x32x2xf32> to vector<8x2xf32>
    %46 = vector.extract_strided_slice %9 {offsets = [9, 0, 0], sizes = [1, 32, 2], strides = [1, 1, 1]} : vector<16x32x2xf32> to vector<1x32x2xf32>
    %47 = vector.broadcast %46 : vector<1x32x2xf32> to vector<8x32x2xf32>
    %48 = arith.mulf %47, %7 : vector<8x32x2xf32>
    %cst_17 = arith.constant dense<0.000000e+00> : vector<8x2xf32>
    %49 = vector.multi_reduction <add>, %48, %cst_17 [1] : vector<8x32x2xf32> to vector<8x2xf32>
    %50 = vector.extract_strided_slice %9 {offsets = [10, 0, 0], sizes = [1, 32, 2], strides = [1, 1, 1]} : vector<16x32x2xf32> to vector<1x32x2xf32>
    %51 = vector.broadcast %50 : vector<1x32x2xf32> to vector<8x32x2xf32>
    %52 = arith.mulf %51, %7 : vector<8x32x2xf32>
    %cst_18 = arith.constant dense<0.000000e+00> : vector<8x2xf32>
    %53 = vector.multi_reduction <add>, %52, %cst_18 [1] : vector<8x32x2xf32> to vector<8x2xf32>
    %54 = vector.extract_strided_slice %9 {offsets = [11, 0, 0], sizes = [1, 32, 2], strides = [1, 1, 1]} : vector<16x32x2xf32> to vector<1x32x2xf32>
    %55 = vector.broadcast %54 : vector<1x32x2xf32> to vector<8x32x2xf32>
    %56 = arith.mulf %55, %7 : vector<8x32x2xf32>
    %cst_19 = arith.constant dense<0.000000e+00> : vector<8x2xf32>
    %57 = vector.multi_reduction <add>, %56, %cst_19 [1] : vector<8x32x2xf32> to vector<8x2xf32>
    %58 = vector.extract_strided_slice %9 {offsets = [12, 0, 0], sizes = [1, 32, 2], strides = [1, 1, 1]} : vector<16x32x2xf32> to vector<1x32x2xf32>
    %59 = vector.broadcast %58 : vector<1x32x2xf32> to vector<8x32x2xf32>
    %60 = arith.mulf %59, %7 : vector<8x32x2xf32>
    %cst_20 = arith.constant dense<0.000000e+00> : vector<8x2xf32>
    %61 = vector.multi_reduction <add>, %60, %cst_20 [1] : vector<8x32x2xf32> to vector<8x2xf32>
    %62 = vector.extract_strided_slice %9 {offsets = [13, 0, 0], sizes = [1, 32, 2], strides = [1, 1, 1]} : vector<16x32x2xf32> to vector<1x32x2xf32>
    %63 = vector.broadcast %62 : vector<1x32x2xf32> to vector<8x32x2xf32>
    %64 = arith.mulf %63, %7 : vector<8x32x2xf32>
    %cst_21 = arith.constant dense<0.000000e+00> : vector<8x2xf32>
    %65 = vector.multi_reduction <add>, %64, %cst_21 [1] : vector<8x32x2xf32> to vector<8x2xf32>
    %66 = vector.extract_strided_slice %9 {offsets = [14, 0, 0], sizes = [1, 32, 2], strides = [1, 1, 1]} : vector<16x32x2xf32> to vector<1x32x2xf32>
    %67 = vector.broadcast %66 : vector<1x32x2xf32> to vector<8x32x2xf32>
    %68 = arith.mulf %67, %7 : vector<8x32x2xf32>
    %cst_22 = arith.constant dense<0.000000e+00> : vector<8x2xf32>
    %69 = vector.multi_reduction <add>, %68, %cst_22 [1] : vector<8x32x2xf32> to vector<8x2xf32>
    %70 = vector.extract_strided_slice %9 {offsets = [15, 0, 0], sizes = [1, 32, 2], strides = [1, 1, 1]} : vector<16x32x2xf32> to vector<1x32x2xf32>
    %71 = vector.broadcast %70 : vector<1x32x2xf32> to vector<8x32x2xf32>
    %72 = arith.mulf %71, %7 : vector<8x32x2xf32>
    %cst_23 = arith.constant dense<0.000000e+00> : vector<8x2xf32>
    %73 = vector.multi_reduction <add>, %72, %cst_23 [1] : vector<8x32x2xf32> to vector<8x2xf32>
    %74 = vector.shape_cast %13 : vector<8x2xf32> to vector<1x8x2xf32>
    %75 = vector.shape_cast %17 : vector<8x2xf32> to vector<1x8x2xf32>
    %76 = vector.shape_cast %21 : vector<8x2xf32> to vector<1x8x2xf32>
    %77 = vector.shape_cast %25 : vector<8x2xf32> to vector<1x8x2xf32>
    %78 = vector.shape_cast %29 : vector<8x2xf32> to vector<1x8x2xf32>
    %79 = vector.shape_cast %33 : vector<8x2xf32> to vector<1x8x2xf32>
    %80 = vector.shape_cast %37 : vector<8x2xf32> to vector<1x8x2xf32>
    %81 = vector.shape_cast %41 : vector<8x2xf32> to vector<1x8x2xf32>
    %82 = vector.shape_cast %45 : vector<8x2xf32> to vector<1x8x2xf32>
    %83 = vector.shape_cast %49 : vector<8x2xf32> to vector<1x8x2xf32>
    %84 = vector.shape_cast %53 : vector<8x2xf32> to vector<1x8x2xf32>
    %85 = vector.shape_cast %57 : vector<8x2xf32> to vector<1x8x2xf32>
    %86 = vector.shape_cast %61 : vector<8x2xf32> to vector<1x8x2xf32>
    %87 = vector.shape_cast %65 : vector<8x2xf32> to vector<1x8x2xf32>
    %88 = vector.shape_cast %69 : vector<8x2xf32> to vector<1x8x2xf32>
    %89 = vector.shape_cast %73 : vector<8x2xf32> to vector<1x8x2xf32>
    %90 = tpu.concatenate %74, %75, %76, %77, %78, %79, %80, %81, %82, %83, %84, %85, %86, %87, %88, %89 in 0 : vector<1x8x2xf32>, vector<1x8x2xf32>, vector<1x8x2xf32>, vector<1x8x2xf32>, vector<1x8x2xf32>, vector<1x8x2xf32>, vector<1x8x2xf32>, vector<1x8x2xf32>, vector<1x8x2xf32>, vector<1x8x2xf32>, vector<1x8x2xf32>, vector<1x8x2xf32>, vector<1x8x2xf32>, vector<1x8x2xf32>, vector<1x8x2xf32>, vector<1x8x2xf32> -> vector<16x8x2xf32>
    %91 = vector.extract_strided_slice %90 {offsets = [0, 0, 0], sizes = [8, 8, 2], strides = [1, 1, 1]} : vector<16x8x2xf32> to vector<8x8x2xf32>
    %92 = vector.extract_strided_slice %90 {offsets = [8, 0, 0], sizes = [8, 8, 2], strides = [1, 1, 1]} : vector<16x8x2xf32> to vector<8x8x2xf32>
    %93 = tpu.iota {dimensions = array<i32: 0>} : vector<8x8x1xi32>
    %94 = tpu.iota {dimensions = array<i32: 1>} : vector<8x8x1xi32>
    %95 = arith.cmpi eq, %93, %94 : vector<8x8x1xi32>
    %96 = vector.broadcast %4 : f32 to vector<8x8x2xf32>
    %97 = arith.addf %91, %96 : vector<8x8x2xf32>
    %98 = vector.shape_cast %95 : vector<8x8x1xi1> to vector<8x8x1xi1>
    %99 = vector.broadcast %98 : vector<8x8x1xi1> to vector<8x8x2xi1>
    %100 = arith.select %99, %97, %91 : vector<8x8x2xi1>, vector<8x8x2xf32>
    %101 = tpu.concatenate %100, %7 in 1 : vector<8x8x2xf32>, vector<8x32x2xf32> -> vector<8x40x2xf32>
    %102 = tpu.iota {dimensions = array<i32: 0>} : vector<8x1x1xi32>
    %103 = vector.extract_strided_slice %101 {offsets = [0, 0, 0], sizes = [1, 40, 2], strides = [1, 1, 1]} : vector<8x40x2xf32> to vector<1x40x2xf32>
    %104 = vector.shape_cast %103 : vector<1x40x2xf32> to vector<40x2xf32>
    %105 = vector.extract_strided_slice %104 {offsets = [0, 0], sizes = [1, 2], strides = [1, 1]} : vector<40x2xf32> to vector<1x2xf32>
    %106 = tpu.reciprocal %105 : vector<1x2xf32> -> vector<1x2xf32>
    %107 = vector.broadcast %106 : vector<1x2xf32> to vector<40x2xf32>
    %108 = arith.mulf %104, %107 : vector<40x2xf32>
    %109 = vector.extract_strided_slice %101 {offsets = [0, 0, 0], sizes = [8, 1, 2], strides = [1, 1, 1]} : vector<8x40x2xf32> to vector<8x1x2xf32>
    %110 = vector.shape_cast %108 : vector<40x2xf32> to vector<1x40x2xf32>
    %111 = vector.broadcast %109 : vector<8x1x2xf32> to vector<8x40x2xf32>
    %112 = vector.broadcast %110 : vector<1x40x2xf32> to vector<8x40x2xf32>
    %113 = arith.mulf %111, %112 : vector<8x40x2xf32>
    %114 = arith.subf %101, %113 : vector<8x40x2xf32>
    %c0_i32 = arith.constant 0 : i32
    %115 = vector.broadcast %c0_i32 : i32 to vector<8x1x1xi32>
    %116 = arith.cmpi eq, %102, %115 : vector<8x1x1xi32>
    %117 = vector.shape_cast %108 : vector<40x2xf32> to vector<1x40x2xf32>
    %118 = vector.shape_cast %116 : vector<8x1x1xi1> to vector<8x1x1xi1>
    %119 = vector.broadcast %118 : vector<8x1x1xi1> to vector<8x40x2xi1>
    %120 = vector.shape_cast %117 : vector<1x40x2xf32> to vector<1x40x2xf32>
    %121 = vector.broadcast %120 : vector<1x40x2xf32> to vector<8x40x2xf32>
    %122 = arith.select %119, %121, %114 : vector<8x40x2xi1>, vector<8x40x2xf32>
    %123 = vector.extract_strided_slice %122 {offsets = [1, 0, 0], sizes = [1, 40, 2], strides = [1, 1, 1]} : vector<8x40x2xf32> to vector<1x40x2xf32>
    %124 = vector.shape_cast %123 : vector<1x40x2xf32> to vector<40x2xf32>
    %125 = vector.extract_strided_slice %124 {offsets = [1, 0], sizes = [1, 2], strides = [1, 1]} : vector<40x2xf32> to vector<1x2xf32>
    %126 = tpu.reciprocal %125 : vector<1x2xf32> -> vector<1x2xf32>
    %127 = vector.broadcast %126 : vector<1x2xf32> to vector<40x2xf32>
    %128 = arith.mulf %124, %127 : vector<40x2xf32>
    %129 = vector.extract_strided_slice %122 {offsets = [0, 1, 0], sizes = [8, 1, 2], strides = [1, 1, 1]} : vector<8x40x2xf32> to vector<8x1x2xf32>
    %130 = vector.shape_cast %128 : vector<40x2xf32> to vector<1x40x2xf32>
    %131 = vector.broadcast %129 : vector<8x1x2xf32> to vector<8x40x2xf32>
    %132 = vector.broadcast %130 : vector<1x40x2xf32> to vector<8x40x2xf32>
    %133 = arith.mulf %131, %132 : vector<8x40x2xf32>
    %134 = arith.subf %122, %133 : vector<8x40x2xf32>
    %c1_i32 = arith.constant 1 : i32
    %135 = vector.broadcast %c1_i32 : i32 to vector<8x1x1xi32>
    %136 = arith.cmpi eq, %102, %135 : vector<8x1x1xi32>
    %137 = vector.shape_cast %128 : vector<40x2xf32> to vector<1x40x2xf32>
    %138 = vector.shape_cast %136 : vector<8x1x1xi1> to vector<8x1x1xi1>
    %139 = vector.broadcast %138 : vector<8x1x1xi1> to vector<8x40x2xi1>
    %140 = vector.shape_cast %137 : vector<1x40x2xf32> to vector<1x40x2xf32>
    %141 = vector.broadcast %140 : vector<1x40x2xf32> to vector<8x40x2xf32>
    %142 = arith.select %139, %141, %134 : vector<8x40x2xi1>, vector<8x40x2xf32>
    %143 = vector.extract_strided_slice %142 {offsets = [2, 0, 0], sizes = [1, 40, 2], strides = [1, 1, 1]} : vector<8x40x2xf32> to vector<1x40x2xf32>
    %144 = vector.shape_cast %143 : vector<1x40x2xf32> to vector<40x2xf32>
    %145 = vector.extract_strided_slice %144 {offsets = [2, 0], sizes = [1, 2], strides = [1, 1]} : vector<40x2xf32> to vector<1x2xf32>
    %146 = tpu.reciprocal %145 : vector<1x2xf32> -> vector<1x2xf32>
    %147 = vector.broadcast %146 : vector<1x2xf32> to vector<40x2xf32>
    %148 = arith.mulf %144, %147 : vector<40x2xf32>
    %149 = vector.extract_strided_slice %142 {offsets = [0, 2, 0], sizes = [8, 1, 2], strides = [1, 1, 1]} : vector<8x40x2xf32> to vector<8x1x2xf32>
    %150 = vector.shape_cast %148 : vector<40x2xf32> to vector<1x40x2xf32>
    %151 = vector.broadcast %149 : vector<8x1x2xf32> to vector<8x40x2xf32>
    %152 = vector.broadcast %150 : vector<1x40x2xf32> to vector<8x40x2xf32>
    %153 = arith.mulf %151, %152 : vector<8x40x2xf32>
    %154 = arith.subf %142, %153 : vector<8x40x2xf32>
    %c2_i32 = arith.constant 2 : i32
    %155 = vector.broadcast %c2_i32 : i32 to vector<8x1x1xi32>
    %156 = arith.cmpi eq, %102, %155 : vector<8x1x1xi32>
    %157 = vector.shape_cast %148 : vector<40x2xf32> to vector<1x40x2xf32>
    %158 = vector.shape_cast %156 : vector<8x1x1xi1> to vector<8x1x1xi1>
    %159 = vector.broadcast %158 : vector<8x1x1xi1> to vector<8x40x2xi1>
    %160 = vector.shape_cast %157 : vector<1x40x2xf32> to vector<1x40x2xf32>
    %161 = vector.broadcast %160 : vector<1x40x2xf32> to vector<8x40x2xf32>
    %162 = arith.select %159, %161, %154 : vector<8x40x2xi1>, vector<8x40x2xf32>
    %163 = vector.extract_strided_slice %162 {offsets = [3, 0, 0], sizes = [1, 40, 2], strides = [1, 1, 1]} : vector<8x40x2xf32> to vector<1x40x2xf32>
    %164 = vector.shape_cast %163 : vector<1x40x2xf32> to vector<40x2xf32>
    %165 = vector.extract_strided_slice %164 {offsets = [3, 0], sizes = [1, 2], strides = [1, 1]} : vector<40x2xf32> to vector<1x2xf32>
    %166 = tpu.reciprocal %165 : vector<1x2xf32> -> vector<1x2xf32>
    %167 = vector.broadcast %166 : vector<1x2xf32> to vector<40x2xf32>
    %168 = arith.mulf %164, %167 : vector<40x2xf32>
    %169 = vector.extract_strided_slice %162 {offsets = [0, 3, 0], sizes = [8, 1, 2], strides = [1, 1, 1]} : vector<8x40x2xf32> to vector<8x1x2xf32>
    %170 = vector.shape_cast %168 : vector<40x2xf32> to vector<1x40x2xf32>
    %171 = vector.broadcast %169 : vector<8x1x2xf32> to vector<8x40x2xf32>
    %172 = vector.broadcast %170 : vector<1x40x2xf32> to vector<8x40x2xf32>
    %173 = arith.mulf %171, %172 : vector<8x40x2xf32>
    %174 = arith.subf %162, %173 : vector<8x40x2xf32>
    %c3_i32 = arith.constant 3 : i32
    %175 = vector.broadcast %c3_i32 : i32 to vector<8x1x1xi32>
    %176 = arith.cmpi eq, %102, %175 : vector<8x1x1xi32>
    %177 = vector.shape_cast %168 : vector<40x2xf32> to vector<1x40x2xf32>
    %178 = vector.shape_cast %176 : vector<8x1x1xi1> to vector<8x1x1xi1>
    %179 = vector.broadcast %178 : vector<8x1x1xi1> to vector<8x40x2xi1>
    %180 = vector.shape_cast %177 : vector<1x40x2xf32> to vector<1x40x2xf32>
    %181 = vector.broadcast %180 : vector<1x40x2xf32> to vector<8x40x2xf32>
    %182 = arith.select %179, %181, %174 : vector<8x40x2xi1>, vector<8x40x2xf32>
    %183 = vector.extract_strided_slice %182 {offsets = [4, 0, 0], sizes = [1, 40, 2], strides = [1, 1, 1]} : vector<8x40x2xf32> to vector<1x40x2xf32>
    %184 = vector.shape_cast %183 : vector<1x40x2xf32> to vector<40x2xf32>
    %185 = vector.extract_strided_slice %184 {offsets = [4, 0], sizes = [1, 2], strides = [1, 1]} : vector<40x2xf32> to vector<1x2xf32>
    %186 = tpu.reciprocal %185 : vector<1x2xf32> -> vector<1x2xf32>
    %187 = vector.broadcast %186 : vector<1x2xf32> to vector<40x2xf32>
    %188 = arith.mulf %184, %187 : vector<40x2xf32>
    %189 = vector.extract_strided_slice %182 {offsets = [0, 4, 0], sizes = [8, 1, 2], strides = [1, 1, 1]} : vector<8x40x2xf32> to vector<8x1x2xf32>
    %190 = vector.shape_cast %188 : vector<40x2xf32> to vector<1x40x2xf32>
    %191 = vector.broadcast %189 : vector<8x1x2xf32> to vector<8x40x2xf32>
    %192 = vector.broadcast %190 : vector<1x40x2xf32> to vector<8x40x2xf32>
    %193 = arith.mulf %191, %192 : vector<8x40x2xf32>
    %194 = arith.subf %182, %193 : vector<8x40x2xf32>
    %c4_i32 = arith.constant 4 : i32
    %195 = vector.broadcast %c4_i32 : i32 to vector<8x1x1xi32>
    %196 = arith.cmpi eq, %102, %195 : vector<8x1x1xi32>
    %197 = vector.shape_cast %188 : vector<40x2xf32> to vector<1x40x2xf32>
    %198 = vector.shape_cast %196 : vector<8x1x1xi1> to vector<8x1x1xi1>
    %199 = vector.broadcast %198 : vector<8x1x1xi1> to vector<8x40x2xi1>
    %200 = vector.shape_cast %197 : vector<1x40x2xf32> to vector<1x40x2xf32>
    %201 = vector.broadcast %200 : vector<1x40x2xf32> to vector<8x40x2xf32>
    %202 = arith.select %199, %201, %194 : vector<8x40x2xi1>, vector<8x40x2xf32>
    %203 = vector.extract_strided_slice %202 {offsets = [5, 0, 0], sizes = [1, 40, 2], strides = [1, 1, 1]} : vector<8x40x2xf32> to vector<1x40x2xf32>
    %204 = vector.shape_cast %203 : vector<1x40x2xf32> to vector<40x2xf32>
    %205 = vector.extract_strided_slice %204 {offsets = [5, 0], sizes = [1, 2], strides = [1, 1]} : vector<40x2xf32> to vector<1x2xf32>
    %206 = tpu.reciprocal %205 : vector<1x2xf32> -> vector<1x2xf32>
    %207 = vector.broadcast %206 : vector<1x2xf32> to vector<40x2xf32>
    %208 = arith.mulf %204, %207 : vector<40x2xf32>
    %209 = vector.extract_strided_slice %202 {offsets = [0, 5, 0], sizes = [8, 1, 2], strides = [1, 1, 1]} : vector<8x40x2xf32> to vector<8x1x2xf32>
    %210 = vector.shape_cast %208 : vector<40x2xf32> to vector<1x40x2xf32>
    %211 = vector.broadcast %209 : vector<8x1x2xf32> to vector<8x40x2xf32>
    %212 = vector.broadcast %210 : vector<1x40x2xf32> to vector<8x40x2xf32>
    %213 = arith.mulf %211, %212 : vector<8x40x2xf32>
    %214 = arith.subf %202, %213 : vector<8x40x2xf32>
    %c5_i32 = arith.constant 5 : i32
    %215 = vector.broadcast %c5_i32 : i32 to vector<8x1x1xi32>
    %216 = arith.cmpi eq, %102, %215 : vector<8x1x1xi32>
    %217 = vector.shape_cast %208 : vector<40x2xf32> to vector<1x40x2xf32>
    %218 = vector.shape_cast %216 : vector<8x1x1xi1> to vector<8x1x1xi1>
    %219 = vector.broadcast %218 : vector<8x1x1xi1> to vector<8x40x2xi1>
    %220 = vector.shape_cast %217 : vector<1x40x2xf32> to vector<1x40x2xf32>
    %221 = vector.broadcast %220 : vector<1x40x2xf32> to vector<8x40x2xf32>
    %222 = arith.select %219, %221, %214 : vector<8x40x2xi1>, vector<8x40x2xf32>
    %223 = vector.extract_strided_slice %222 {offsets = [6, 0, 0], sizes = [1, 40, 2], strides = [1, 1, 1]} : vector<8x40x2xf32> to vector<1x40x2xf32>
    %224 = vector.shape_cast %223 : vector<1x40x2xf32> to vector<40x2xf32>
    %225 = vector.extract_strided_slice %224 {offsets = [6, 0], sizes = [1, 2], strides = [1, 1]} : vector<40x2xf32> to vector<1x2xf32>
    %226 = tpu.reciprocal %225 : vector<1x2xf32> -> vector<1x2xf32>
    %227 = vector.broadcast %226 : vector<1x2xf32> to vector<40x2xf32>
    %228 = arith.mulf %224, %227 : vector<40x2xf32>
    %229 = vector.extract_strided_slice %222 {offsets = [0, 6, 0], sizes = [8, 1, 2], strides = [1, 1, 1]} : vector<8x40x2xf32> to vector<8x1x2xf32>
    %230 = vector.shape_cast %228 : vector<40x2xf32> to vector<1x40x2xf32>
    %231 = vector.broadcast %229 : vector<8x1x2xf32> to vector<8x40x2xf32>
    %232 = vector.broadcast %230 : vector<1x40x2xf32> to vector<8x40x2xf32>
    %233 = arith.mulf %231, %232 : vector<8x40x2xf32>
    %234 = arith.subf %222, %233 : vector<8x40x2xf32>
    %c6_i32 = arith.constant 6 : i32
    %235 = vector.broadcast %c6_i32 : i32 to vector<8x1x1xi32>
    %236 = arith.cmpi eq, %102, %235 : vector<8x1x1xi32>
    %237 = vector.shape_cast %228 : vector<40x2xf32> to vector<1x40x2xf32>
    %238 = vector.shape_cast %236 : vector<8x1x1xi1> to vector<8x1x1xi1>
    %239 = vector.broadcast %238 : vector<8x1x1xi1> to vector<8x40x2xi1>
    %240 = vector.shape_cast %237 : vector<1x40x2xf32> to vector<1x40x2xf32>
    %241 = vector.broadcast %240 : vector<1x40x2xf32> to vector<8x40x2xf32>
    %242 = arith.select %239, %241, %234 : vector<8x40x2xi1>, vector<8x40x2xf32>
    %243 = vector.extract_strided_slice %242 {offsets = [7, 0, 0], sizes = [1, 40, 2], strides = [1, 1, 1]} : vector<8x40x2xf32> to vector<1x40x2xf32>
    %244 = vector.shape_cast %243 : vector<1x40x2xf32> to vector<40x2xf32>
    %245 = vector.extract_strided_slice %244 {offsets = [7, 0], sizes = [1, 2], strides = [1, 1]} : vector<40x2xf32> to vector<1x2xf32>
    %246 = tpu.reciprocal %245 : vector<1x2xf32> -> vector<1x2xf32>
    %247 = vector.broadcast %246 : vector<1x2xf32> to vector<40x2xf32>
    %248 = arith.mulf %244, %247 : vector<40x2xf32>
    %249 = vector.extract_strided_slice %242 {offsets = [0, 7, 0], sizes = [8, 1, 2], strides = [1, 1, 1]} : vector<8x40x2xf32> to vector<8x1x2xf32>
    %250 = vector.shape_cast %248 : vector<40x2xf32> to vector<1x40x2xf32>
    %251 = vector.broadcast %249 : vector<8x1x2xf32> to vector<8x40x2xf32>
    %252 = vector.broadcast %250 : vector<1x40x2xf32> to vector<8x40x2xf32>
    %253 = arith.mulf %251, %252 : vector<8x40x2xf32>
    %254 = arith.subf %242, %253 : vector<8x40x2xf32>
    %c7_i32 = arith.constant 7 : i32
    %255 = vector.broadcast %c7_i32 : i32 to vector<8x1x1xi32>
    %256 = arith.cmpi eq, %102, %255 : vector<8x1x1xi32>
    %257 = vector.shape_cast %248 : vector<40x2xf32> to vector<1x40x2xf32>
    %258 = vector.shape_cast %256 : vector<8x1x1xi1> to vector<8x1x1xi1>
    %259 = vector.broadcast %258 : vector<8x1x1xi1> to vector<8x40x2xi1>
    %260 = vector.shape_cast %257 : vector<1x40x2xf32> to vector<1x40x2xf32>
    %261 = vector.broadcast %260 : vector<1x40x2xf32> to vector<8x40x2xf32>
    %262 = arith.select %259, %261, %254 : vector<8x40x2xi1>, vector<8x40x2xf32>
    %263 = vector.extract_strided_slice %262 {offsets = [0, 8, 0], sizes = [8, 32, 2], strides = [1, 1, 1]} : vector<8x40x2xf32> to vector<8x32x2xf32>
    %264 = vector.extract_strided_slice %92 {offsets = [0, 0, 0], sizes = [1, 8, 2], strides = [1, 1, 1]} : vector<8x8x2xf32> to vector<1x8x2xf32>
    %265 = vector.shape_cast %264 : vector<1x8x2xf32> to vector<8x2xf32>
    %266 = vector.shape_cast %265 : vector<8x2xf32> to vector<8x1x2xf32>
    %267 = vector.broadcast %266 : vector<8x1x2xf32> to vector<8x32x2xf32>
    %268 = arith.mulf %267, %263 : vector<8x32x2xf32>
    %cst_24 = arith.constant dense<0.000000e+00> : vector<32x2xf32>
    %269 = vector.multi_reduction <add>, %268, %cst_24 [0] : vector<8x32x2xf32> to vector<32x2xf32>
    %270 = vector.extract_strided_slice %92 {offsets = [1, 0, 0], sizes = [1, 8, 2], strides = [1, 1, 1]} : vector<8x8x2xf32> to vector<1x8x2xf32>
    %271 = vector.shape_cast %270 : vector<1x8x2xf32> to vector<8x2xf32>
    %272 = vector.shape_cast %271 : vector<8x2xf32> to vector<8x1x2xf32>
    %273 = vector.broadcast %272 : vector<8x1x2xf32> to vector<8x32x2xf32>
    %274 = arith.mulf %273, %263 : vector<8x32x2xf32>
    %cst_25 = arith.constant dense<0.000000e+00> : vector<32x2xf32>
    %275 = vector.multi_reduction <add>, %274, %cst_25 [0] : vector<8x32x2xf32> to vector<32x2xf32>
    %276 = vector.extract_strided_slice %92 {offsets = [2, 0, 0], sizes = [1, 8, 2], strides = [1, 1, 1]} : vector<8x8x2xf32> to vector<1x8x2xf32>
    %277 = vector.shape_cast %276 : vector<1x8x2xf32> to vector<8x2xf32>
    %278 = vector.shape_cast %277 : vector<8x2xf32> to vector<8x1x2xf32>
    %279 = vector.broadcast %278 : vector<8x1x2xf32> to vector<8x32x2xf32>
    %280 = arith.mulf %279, %263 : vector<8x32x2xf32>
    %cst_26 = arith.constant dense<0.000000e+00> : vector<32x2xf32>
    %281 = vector.multi_reduction <add>, %280, %cst_26 [0] : vector<8x32x2xf32> to vector<32x2xf32>
    %282 = vector.extract_strided_slice %92 {offsets = [3, 0, 0], sizes = [1, 8, 2], strides = [1, 1, 1]} : vector<8x8x2xf32> to vector<1x8x2xf32>
    %283 = vector.shape_cast %282 : vector<1x8x2xf32> to vector<8x2xf32>
    %284 = vector.shape_cast %283 : vector<8x2xf32> to vector<8x1x2xf32>
    %285 = vector.broadcast %284 : vector<8x1x2xf32> to vector<8x32x2xf32>
    %286 = arith.mulf %285, %263 : vector<8x32x2xf32>
    %cst_27 = arith.constant dense<0.000000e+00> : vector<32x2xf32>
    %287 = vector.multi_reduction <add>, %286, %cst_27 [0] : vector<8x32x2xf32> to vector<32x2xf32>
    %288 = vector.extract_strided_slice %92 {offsets = [4, 0, 0], sizes = [1, 8, 2], strides = [1, 1, 1]} : vector<8x8x2xf32> to vector<1x8x2xf32>
    %289 = vector.shape_cast %288 : vector<1x8x2xf32> to vector<8x2xf32>
    %290 = vector.shape_cast %289 : vector<8x2xf32> to vector<8x1x2xf32>
    %291 = vector.broadcast %290 : vector<8x1x2xf32> to vector<8x32x2xf32>
    %292 = arith.mulf %291, %263 : vector<8x32x2xf32>
    %cst_28 = arith.constant dense<0.000000e+00> : vector<32x2xf32>
    %293 = vector.multi_reduction <add>, %292, %cst_28 [0] : vector<8x32x2xf32> to vector<32x2xf32>
    %294 = vector.extract_strided_slice %92 {offsets = [5, 0, 0], sizes = [1, 8, 2], strides = [1, 1, 1]} : vector<8x8x2xf32> to vector<1x8x2xf32>
    %295 = vector.shape_cast %294 : vector<1x8x2xf32> to vector<8x2xf32>
    %296 = vector.shape_cast %295 : vector<8x2xf32> to vector<8x1x2xf32>
    %297 = vector.broadcast %296 : vector<8x1x2xf32> to vector<8x32x2xf32>
    %298 = arith.mulf %297, %263 : vector<8x32x2xf32>
    %cst_29 = arith.constant dense<0.000000e+00> : vector<32x2xf32>
    %299 = vector.multi_reduction <add>, %298, %cst_29 [0] : vector<8x32x2xf32> to vector<32x2xf32>
    %300 = vector.extract_strided_slice %92 {offsets = [6, 0, 0], sizes = [1, 8, 2], strides = [1, 1, 1]} : vector<8x8x2xf32> to vector<1x8x2xf32>
    %301 = vector.shape_cast %300 : vector<1x8x2xf32> to vector<8x2xf32>
    %302 = vector.shape_cast %301 : vector<8x2xf32> to vector<8x1x2xf32>
    %303 = vector.broadcast %302 : vector<8x1x2xf32> to vector<8x32x2xf32>
    %304 = arith.mulf %303, %263 : vector<8x32x2xf32>
    %cst_30 = arith.constant dense<0.000000e+00> : vector<32x2xf32>
    %305 = vector.multi_reduction <add>, %304, %cst_30 [0] : vector<8x32x2xf32> to vector<32x2xf32>
    %306 = vector.extract_strided_slice %92 {offsets = [7, 0, 0], sizes = [1, 8, 2], strides = [1, 1, 1]} : vector<8x8x2xf32> to vector<1x8x2xf32>
    %307 = vector.shape_cast %306 : vector<1x8x2xf32> to vector<8x2xf32>
    %308 = vector.shape_cast %307 : vector<8x2xf32> to vector<8x1x2xf32>
    %309 = vector.broadcast %308 : vector<8x1x2xf32> to vector<8x32x2xf32>
    %310 = arith.mulf %309, %263 : vector<8x32x2xf32>
    %cst_31 = arith.constant dense<0.000000e+00> : vector<32x2xf32>
    %311 = vector.multi_reduction <add>, %310, %cst_31 [0] : vector<8x32x2xf32> to vector<32x2xf32>
    %312 = vector.shape_cast %269 : vector<32x2xf32> to vector<1x32x2xf32>
    %313 = vector.shape_cast %275 : vector<32x2xf32> to vector<1x32x2xf32>
    %314 = vector.shape_cast %281 : vector<32x2xf32> to vector<1x32x2xf32>
    %315 = vector.shape_cast %287 : vector<32x2xf32> to vector<1x32x2xf32>
    %316 = vector.shape_cast %293 : vector<32x2xf32> to vector<1x32x2xf32>
    %317 = vector.shape_cast %299 : vector<32x2xf32> to vector<1x32x2xf32>
    %318 = vector.shape_cast %305 : vector<32x2xf32> to vector<1x32x2xf32>
    %319 = vector.shape_cast %311 : vector<32x2xf32> to vector<1x32x2xf32>
    %320 = tpu.concatenate %312, %313, %314, %315, %316, %317, %318, %319 in 0 : vector<1x32x2xf32>, vector<1x32x2xf32>, vector<1x32x2xf32>, vector<1x32x2xf32>, vector<1x32x2xf32>, vector<1x32x2xf32>, vector<1x32x2xf32>, vector<1x32x2xf32> -> vector<8x32x2xf32>
    %321 = vector.broadcast %6 : f32 to vector<8x32x2xf32>
    %322 = arith.mulf %320, %321 : vector<8x32x2xf32>
    %c0_32 = arith.constant 0 : index
    %c0_33 = arith.constant 0 : index
    %c0_34 = arith.constant 0 : index
    %323 = vector.load %arg6[%c0_32, %c0_33, %c0_34] : memref<8x32x2xf32, #tpu.memory_space<vmem>>, vector<8x32x2xf32>
    tpu.vector_store %arg6[%c0_32, %c0_33, %c0_34], %322 {strides = array<i32>} : memref<8x32x2xf32, #tpu.memory_space<vmem>>, vector<8x32x2xf32>,
    return
  }
  func.func @transform_0(%arg0: i32) -> i32 {
    %c0_i32 = arith.constant 0 : i32
    %c0_i32_0 = arith.constant 0 : i32
    return %c0_i32 : i32
  }
  func.func @transform_1(%arg0: i32) -> i32 {
    %c0_i32 = arith.constant 0 : i32
    %c0_i32_0 = arith.constant 0 : i32
    return %c0_i32 : i32
  }
  func.func @transform_2(%arg0: i32) -> i32 {
    %c0_i32 = arith.constant 0 : i32
    %c0_i32_0 = arith.constant 0 : i32
    return %c0_i32 : i32
  }
  func.func @transform_3(%arg0: i32) -> (i32, i32, i32) {
    %c0_i32 = arith.constant 0 : i32
    %c0_i32_0 = arith.constant 0 : i32
    %c0_i32_1 = arith.constant 0 : i32
    return %c0_i32, %c0_i32_0, %arg0 : i32, i32, i32
  }
  func.func @transform_4(%arg0: i32) -> (i32, i32, i32) {
    %c0_i32 = arith.constant 0 : i32
    %c0_i32_0 = arith.constant 0 : i32
    %c0_i32_1 = arith.constant 0 : i32
    return %c0_i32, %c0_i32_0, %arg0 : i32, i32, i32
  }
  func.func @transform_5(%arg0: i32) -> (i32, i32, i32) {
    %c0_i32 = arith.constant 0 : i32
    %c0_i32_0 = arith.constant 0 : i32
    %c0_i32_1 = arith.constant 0 : i32
    return %c0_i32, %c0_i32_0, %arg0 : i32, i32, i32
  }
}

</mosaic_0001>

<bundles_post_ra>
// kernel: tpu_custom_call.1
= control target key start
LH: loop header
LB: loop body
LE: loop exit
PB: predicated region body
PF: predicated region fallthrough
CT: control target
= control target key end

     0   :  { %vm132_vm0 = vcmask 15360   ;;  %vm1901_vm1 = vcmask 1041409   ;;  %vm1904_vm2 = vcmask 1042434   ;;  %vm1907_vm3 = vcmask 1043459   ;;  %s10899_s1 = inlined_call_operand.<no memory space> [shape: f32[1], index: 1, kind: input, shape index: {}]   ;;  %s10900_s2 = inlined_call_operand.<no memory space> [shape: f32[1], index: 2, kind: input, shape index: {}]   ;;  %s10901_s3 = inlined_call_operand.vmem [shape: f32[8,32,2], index: 3, kind: input, shape index: {}]   ;;  %s10902_s4 = inlined_call_operand.vmem [shape: f32[8,32,2], index: 4, kind: input, shape index: {}]   ;;  %s10903_s0 = inlined_call_operand.<no memory space> [shape: f32[1], index: 0, kind: input, shape index: {}]   ;;  %s10904_s5 = inlined_call_operand.vmem [shape: f32[8,32,2], index: 5, kind: output, shape index: {}]  }
   0x1   :  { %v25_v0 = vstv %s10899_s1  ;;  %v32_v1 = vstv %s10900_s2  ;;  %v4686_v6 = vld [vmem:[%s10901_s3] sm:$0xff]  ;;  %v4691_v7 = vld [vmem:[%s10901_s3 + $0x8] sm:$0xff]  ;;  %vm1910_vm4 = vcmask 1044484   ;;  %vm1913_vm5 = vcmask 1045509  }
   0x2   :  { %v26_v2 = vmul.f32 1.442695, %v25_v0  ;;  %v33_v3 = vmul.f32 1.442695, %v32_v1  ;;  %v4696_v8 = vld [vmem:[%s10901_s3 + $0x20] sm:$0xff]  ;;  %v4701_v9 = vld [vmem:[%s10901_s3 + $0x28] sm:$0xff]  ;;  %v100_v11 = vmul.f32 %v4686_v6, %v4686_v6  ;;  %v101_v12 = vmul.f32 %v4691_v7, %v4691_v7 }
   0x3   :  { %v4706_v10 = vld [vmem:[%s10901_s3 + $0x10] sm:$0xff]  ;;  %v4715_v13 = vld [vmem:[%s10901_s3 + $0x40] sm:$0xff]  ;;  %v4720_v14 = vld [vmem:[%s10901_s3 + $0x48] sm:$0xff]  ;;  %v104_v15 = vmul.f32 %v4696_v8, %v4686_v6  ;;  %v105_v16 = vmul.f32 %v4701_v9, %v4691_v7  ;;  %vm1916_vm6 = vcmask 1046534   ;;  %vm1919_vm7 = vcmask 1047559  }
   0x4   :  { %4527 = vpow2.f32 %v26_v2  ;;  %v4729_v17 = vld [vmem:[%s10901_s3 + $0x30] sm:$0xff]  ;;  %v102_v18 = vmul.f32 %v4706_v10, %v4706_v10  ;;  %v4736_v19 = vld [vmem:[%s10901_s3 + $0x18] sm:$0xff]  ;;  %v108_v20 = vmul.f32 %v4715_v13, %v4686_v6  ;;  %v109_v21 = vmul.f32 %v4720_v14, %v4691_v7  ;;  %v4752_v25 = vld [vmem:[%s10901_s3 + $0x60] sm:$0xff] }
   0x5   :  { %4529 = vpow2.f32 %v33_v3  ;;  %v133_v22 = vsel %vm132_vm0, %v100_v11, 0.0  ;;  %v134_v23 = vsel %vm132_vm0, %v101_v12, 0.0  ;;  %v4747_v24 = vld [vmem:[%s10901_s3 + $0x50] sm:$0xff]  ;;  %v4757_v26 = vld [vmem:[%s10901_s3 + $0x68] sm:$0xff]  ;;  %v106_v27 = vmul.f32 %v4729_v17, %v4706_v10  ;;  %v4766_v30 = vld [vmem:[%s10901_s3 + $0x38] sm:$0xff] }
   0x6   :  { %v146_v28 = vsel %vm132_vm0, %v104_v15, 0.0  ;;  %v147_v29 = vsel %vm132_vm0, %v105_v16, 0.0  ;;  %v4771_v31 = vld [vmem:[%s10901_s3 + $0x80] sm:$0xff]  ;;  %v4776_v32 = vld [vmem:[%s10901_s3 + $0x88] sm:$0xff]  ;;  %v103_v33 = vmul.f32 %v4736_v19, %v4736_v19  ;;  %v135_v34 = vadd.f32 %v134_v23, %v133_v22  ;;  %v4783_v35 = vld [vmem:[%s10901_s3 + $0x58] sm:$0xff] }
   0x7   :  { %v4788_v36 = vld [vmem:[%s10901_s3 + $0x70] sm:$0xff]  ;;  %v110_v37 = vmul.f32 %v4747_v24, %v4706_v10  ;;  %v136_v38 = vsel %vm132_vm0, %v102_v18, 0.0  ;;  %v159_v39 = vsel %vm132_vm0, %v108_v20, 0.0  ;;  %v160_v40 = vsel %vm132_vm0, %v109_v21, 0.0  ;;  %v4798_v41 = vld [vmem:[%s10901_s3 + $0xa0] sm:$0xff]  ;;  %v4803_v42 = vld [vmem:[%s10901_s3 + $0xa8] sm:$0xff] }
   0x8   :  { %v112_v43 = vmul.f32 %v4752_v25, %v4686_v6  ;;  %v113_v44 = vmul.f32 %v4757_v26, %v4691_v7  ;;  %v148_v45 = vadd.f32 %v147_v29, %v146_v28  ;;  %v4812_v46 = vld [vmem:[%s10901_s3 + $0x90] sm:$0xff]  ;;  %v107_v47 = vmul.f32 %v4766_v30, %v4736_v19  ;;  %v4833_v56 = vld [vmem:[%s10901_s3 + $0xc0] sm:$0xff]  ;;  %v4838_v57 = vld [vmem:[%s10901_s3 + $0xc8] sm:$0xff] }
   0x9   :  { %v116_v48 = vmul.f32 %v4771_v31, %v4686_v6  ;;  %v117_v49 = vmul.f32 %v4776_v32, %v4691_v7  ;;  %v149_v50 = vsel %vm132_vm0, %v106_v27, 0.0  ;;  %v4824_v51 = vld [vmem:[%s10901_s3 + $0xb0] sm:$0xff]  ;;  %v111_v52 = vmul.f32 %v4783_v35, %v4736_v19  ;;  %v4853_v2 = vld [vmem:[%s10901_s3 + $0x78] sm:$0xff] }
   0xa   :  { %v114_v53 = vmul.f32 %v4788_v36, %v4706_v10  ;;  %v137_v54 = vadd.f32 %v136_v38, %v135_v34  ;;  %v161_v55 = vadd.f32 %v160_v40, %v159_v39  ;;  %v120_v58 = vmul.f32 %v4798_v41, %v4686_v6  ;;  %v4863_v12 = vld [vmem:[%s10901_s3 + $0x98] sm:$0xff]  ;;  %v4877_v22 = vld [vmem:[%s10901_s3 + $0xd0] sm:$0xff] }
   0xb   :  { %v121_v59 = vmul.f32 %v4803_v42, %v4691_v7  ;;  %v138_v60 = vsel %vm132_vm0, %v103_v33, 0.0  ;;  %v162_v61 = vsel %vm132_vm0, %v110_v37, 0.0  ;;  %v118_v62 = vmul.f32 %v4812_v46, %v4706_v10  ;;  %v4868_v15 = vld [vmem:[%s10901_s3 + $0xb8] sm:$0xff] }
   0xc   :  { %v150_v63 = vadd.f32 %v149_v50, %v148_v45  ;;  %v172_v0 = vsel %vm132_vm0, %v112_v43, 0.0  ;;  %v173_v1 = vsel %vm132_vm0, %v113_v44, 0.0  ;;  %v122_v3 = vmul.f32 %v4824_v51, %v4706_v10 }
   0xd   :  { %v186_v11 = vsel %vm132_vm0, %v117_v49, 0.0  ;;  %v124_v16 = vmul.f32 %v4833_v56, %v4686_v6  ;;  %v125_v18 = vmul.f32 %v4838_v57, %v4691_v7  ;;  %v139_v20 = vadd.f32 %v138_v60, %v137_v54  ;;  %v4895_v49 = vld [vmem:[%s10901_s3 + $0xd8] sm:$0xff]  ;;  %v4904_v60 = vld [vmem:[%s10901_s3 + $0xe0] sm:$0xff] }
   0xe   :  { %v4528_v4 = vpop.eup %4527  ;;  %v163_v21 = vadd.f32 %v162_v61, %v161_v55  ;;  %v164_v23 = vsel %vm132_vm0, %v111_v52, 0.0  ;;  %v174_v27 = vadd.f32 %v173_v1, %v172_v0  ;;  %v198_v28 = vsel %vm132_vm0, %v120_v58, 0.0  ;;  %v4909_v61 = vld [vmem:[%s10901_s3 + $0xe8] sm:$0xff] }
   0xf   :  { %v4530_v5 = vpop.eup %4529  ;;  %4523 = vpush %v4528_v4  ;;  %v151_v4 = vsel %vm132_vm0, %v107_v47, 0.0  ;;  %v199_v29 = vsel %vm132_vm0, %v121_v59, 0.0  ;;  %v115_v33 = vmul.f32 %v4853_v2, %v4736_v19  ;;  %v175_v37 = vsel %vm132_vm0, %v114_v53, 0.0 }
  0x10   :  { %4525 = vpush %v4530_v5  ;;  %v185_v5 = vsel %vm132_vm0, %v116_v48, 0.0  ;;  %v152_v34 = vadd.f32 %v151_v4, %v150_v63  ;;  %v119_v39 = vmul.f32 %v4863_v12, %v4736_v19  ;;  %v123_v40 = vmul.f32 %v4868_v15, %v4736_v19  ;;  %v4917_v4 = vld [vmem:[%s10901_s3 + $0xf0] sm:$0xff] }
  0x11   :  { %v187_v38 = vadd.f32 %v186_v11, %v185_v5  ;;  %v188_v43 = vsel %vm132_vm0, %v118_v62, 0.0  ;;  %v126_v44 = vmul.f32 %v4877_v22, %v4706_v10  ;;  %v140_v45 = vrot.slane %v139_v20, 4 }
  0x12   :  { %v165_v47 = vadd.f32 %v164_v23, %v163_v21  ;;  %v200_v48 = vadd.f32 %v199_v29, %v198_v28  ;;  %v176_v50 = vadd.f32 %v175_v37, %v174_v27  ;;  %v201_v52 = vsel %vm132_vm0, %v122_v3, 0.0 }
  0x13   :  { %v211_v53 = vsel %vm132_vm0, %v124_v16, 0.0  ;;  %v212_v54 = vsel %vm132_vm0, %v125_v18, 0.0  ;;  %v153_v55 = vrot.slane %v152_v34, 4  ;;  %v177_v58 = vsel %vm132_vm0, %v115_v33, 0.0 }
  0x14   :  { %v189_v59 = vadd.f32 %v188_v43, %v187_v38  ;;  %v190_v62 = vsel %vm132_vm0, %v119_v39, 0.0  ;;  %v127_v63 = vmul.f32 %v4895_v49, %v4736_v19  ;;  %v141_v0 = vadd.f32 %v140_v45, %v139_v20 }
  0x15   :  { %v202_v1 = vadd.f32 %v201_v52, %v200_v48  ;;  %v213_v3 = vadd.f32 %v212_v54, %v211_v53  ;;  %v166_v5 = vrot.slane %v165_v47, 4  ;;  %v178_v11 = vadd.f32 %v177_v58, %v176_v50 }
  0x16   :  { %v203_v16 = vsel %vm132_vm0, %v123_v40, 0.0  ;;  %v214_v18 = vsel %vm132_vm0, %v126_v44, 0.0  ;;  %v128_v21 = vmul.f32 %v4904_v60, %v4686_v6  ;;  %v129_v23 = vmul.f32 %v4909_v61, %v4691_v7  ;;  %v4933_v7 = vld [vmem:[%s10901_s3 + $0xf8] sm:$0xff] }
  0x17   :  { %v154_v20 = vadd.f32 %v153_v55, %v152_v34  ;;  %v191_v27 = vadd.f32 %v190_v62, %v189_v59  ;;  %v130_v28 = vmul.f32 %v4917_v4, %v4706_v10  ;;  %v204_v29 = vadd.f32 %v203_v16, %v202_v1 }
  0x18   :  { %v215_v33 = vadd.f32 %v214_v18, %v213_v3  ;;  %v142_v37 = vrot.slane %v141_v0, 2  ;;  %v167_v38 = vadd.f32 %v166_v5, %v165_v47  ;;  %v179_v39 = vrot.slane %v178_v11, 4 }
  0x19   :  { %v216_v40 = vsel %vm132_vm0, %v127_v63, 0.0  ;;  %v155_v43 = vrot.slane %v154_v20, 2  ;;  %v192_v44 = vrot.slane %v191_v27, 4  ;;  %v224_v45 = vsel %vm132_vm0, %v128_v21, 0.0 }
  0x1a   :  { %v225_v6 = vsel %vm132_vm0, %v129_v23, 0.0  ;;  %v205_v34 = vrot.slane %v204_v29, 4  ;;  %v217_v10 = vadd.f32 %v216_v40, %v215_v33  ;;  %v143_v48 = vadd.f32 %v142_v37, %v141_v0 }
  0x1b   :  { %v168_v50 = vrot.slane %v167_v38, 2  ;;  %v180_v52 = vadd.f32 %v179_v39, %v178_v11  ;;  %v226_v47 = vadd.f32 %v225_v6, %v224_v45  ;;  %v131_v53 = vmul.f32 %v4933_v7, %v4736_v19 }
  0x1c   :  { %v156_v54 = vadd.f32 %v155_v43, %v154_v20  ;;  %v193_v55 = vadd.f32 %v192_v44, %v191_v27  ;;  %v227_v58 = vsel %vm132_vm0, %v130_v28, 0.0  ;;  %v206_v59 = vadd.f32 %v205_v34, %v204_v29 }
  0x1d   :  { %v218_v62 = vrot.slane %v217_v10, 4  ;;  %v237_v63 = vmul.f32 %v4696_v8, %v4696_v8  ;;  %v238_v1 = vmul.f32 %v4701_v9, %v4701_v9  ;;  %v144_v3 = vrot.slane %v143_v48, 1 }
  0x1e   :  { %v169_v0 = vadd.f32 %v168_v50, %v167_v38  ;;  %v181_v5 = vrot.slane %v180_v52, 2  ;;  %v228_v11 = vadd.f32 %v227_v58, %v226_v47  ;;  %v157_v16 = vrot.slane %v156_v54, 1 }
  0x1f   :  { %v194_v18 = vrot.slane %v193_v55, 2  ;;  %v229_v19 = vsel %vm132_vm0, %v131_v53, 0.0  ;;  %v239_v21 = vmul.f32 %v4729_v17, %v4729_v17  ;;  %v241_v23 = vmul.f32 %v4715_v13, %v4696_v8 }
  0x20   :  { %v242_v20 = vmul.f32 %v4720_v14, %v4701_v9  ;;  %v207_v27 = vrot.slane %v206_v59, 2  ;;  %v219_v28 = vadd.f32 %v218_v62, %v217_v10  ;;  %v265_v29 = vsel %vm132_vm0, %v237_v63, 0.0 }
  0x21   :  { %v266_v33 = vsel %vm132_vm0, %v238_v1, 0.0  ;;  %v4951_v37 = vadd.f32 %v144_v3, %v143_v48  ;;  %v170_v38 = vrot.slane %v169_v0, 1  ;;  %v182_v39 = vadd.f32 %v181_v5, %v180_v52 }
  0x22   :  { %v230_v40 = vadd.f32 %v229_v19, %v228_v11  ;;  %v4953_v43 = vadd.f32 %v157_v16, %v156_v54  ;;  %v195_v44 = vadd.f32 %v194_v18, %v193_v55  ;;  %v245_v45 = vmul.f32 %v4752_v25, %v4696_v8 }
  0x23   :  { %11341 = vst [vmem:[#allocation5_spill] sm:$0xff] %v4951_v37  ;;  %v246_v6 = vmul.f32 %v4757_v26, %v4701_v9  ;;  %v243_v34 = vmul.f32 %v4747_v24, %v4729_v17  ;;  %v267_v10 = vadd.f32 %v266_v33, %v265_v29  ;;  %v278_v50 = vsel %vm132_vm0, %v241_v23, 0.0 }
  0x24   :  { %11342 = vst [vmem:[#allocation6_spill] sm:$0xff] %v4953_v43  ;;  %v279_v48 = vsel %vm132_vm0, %v242_v20, 0.0  ;;  %v208_v47 = vadd.f32 %v207_v27, %v206_v59  ;;  %v220_v52 = vrot.slane %v219_v28, 2  ;;  %v240_v53 = vmul.f32 %v4766_v30, %v4766_v30 }
  0x25   :  { %v268_v54 = vsel %vm132_vm0, %v239_v21, 0.0  ;;  %v4966_v55 = vadd.f32 %v170_v38, %v169_v0  ;;  %v183_v58 = vrot.slane %v182_v39, 1  ;;  %v231_v62 = vrot.slane %v230_v40, 4 }
  0x26   :  { %v244_v63 = vmul.f32 %v4783_v35, %v4766_v30  ;;  %v247_v1 = vmul.f32 %v4788_v36, %v4729_v17  ;;  %v280_v3 = vadd.f32 %v279_v48, %v278_v50  ;;  %v291_v5 = vsel %vm132_vm0, %v245_v45, 0.0 }
  0x27   :  { %11343 = vst [vmem:[#allocation7_spill] sm:$0xff] %v4966_v55  ;;  %v292_v59 = vsel %vm132_vm0, %v246_v6, 0.0  ;;  %v249_v11 = vmul.f32 %v4771_v31, %v4696_v8  ;;  %v250_v0 = vmul.f32 %v4776_v32, %v4701_v9  ;;  %v269_v16 = vadd.f32 %v268_v54, %v267_v10 }
  0x28   :  { %v281_v18 = vsel %vm132_vm0, %v243_v34, 0.0  ;;  %v196_v19 = vrot.slane %v195_v44, 1  ;;  %v209_v21 = vrot.slane %v208_v47, 1  ;;  %v4979_v23 = vadd.f32 %v220_v52, %v219_v28 }
  0x29   :  { %v270_v20 = vsel %vm132_vm0, %v240_v53, 0.0  ;;  %v232_v27 = vadd.f32 %v231_v62, %v230_v40  ;;  %v248_v29 = vmul.f32 %v4853_v2, %v4766_v30  ;;  %v251_v33 = vmul.f32 %v4812_v46, %v4729_v17 }
  0x2a   :  { %v293_v38 = vadd.f32 %v292_v59, %v291_v5  ;;  %v253_v45 = vmul.f32 %v4798_v41, %v4696_v8  ;;  %v254_v6 = vmul.f32 %v4803_v42, %v4701_v9  ;;  %v282_v34 = vadd.f32 %v281_v18, %v280_v3 }
  0x2b   :  { %v294_v28 = vsel %vm132_vm0, %v247_v1, 0.0  ;;  %v271_v10 = vadd.f32 %v270_v20, %v269_v16  ;;  %v283_v50 = vsel %vm132_vm0, %v244_v63, 0.0  ;;  %v304_v40 = vsel %vm132_vm0, %v249_v11, 0.0 }
  0x2c   :  { %v305_v48 = vsel %vm132_vm0, %v250_v0, 0.0  ;;  %v4994_v52 = vadd.f32 %v183_v58, %v182_v39  ;;  %v4996_v53 = vadd.f32 %v196_v19, %v195_v44  ;;  %v4998_v54 = vadd.f32 %v209_v21, %v208_v47 }
  0x2d   :  { %v252_v62 = vmul.f32 %v4863_v12, %v4766_v30  ;;  %v233_v5 = vrot.slane %v232_v27, 2  ;;  %v255_v1 = vmul.f32 %v4824_v51, %v4729_v17  ;;  %v295_v3 = vadd.f32 %v294_v28, %v293_v38 }
  0x2e   :  { %11344 = vst [vmem:[#allocation8_spill] sm:$0xff] %v4994_v52  ;;  %11345 = vst [vmem:[#allocation9_spill] sm:$0xff] %v4996_v53  ;;  %v296_v63 = vsel %vm132_vm0, %v248_v29, 0.0  ;;  %v284_v59 = vadd.f32 %v283_v50, %v282_v34  ;;  %v306_v11 = vadd.f32 %v305_v48, %v304_v40  ;;  %v317_v0 = vsel %vm132_vm0, %v253_v45, 0.0 }
  0x2f   :  { %11346 = vst [vmem:[#allocation10_spill] sm:$0xff] %v4998_v54  ;;  %v318_v39 = vsel %vm132_vm0, %v254_v6, 0.0  ;;  %v256_v47 = vmul.f32 %v4868_v15, %v4766_v30  ;;  %v272_v58 = vrot.slane %v271_v10, 4  ;;  %v307_v16 = vsel %vm132_vm0, %v251_v33, 0.0 }
  0x30   :  { %v257_v18 = vmul.f32 %v4833_v56, %v4696_v8  ;;  %v258_v19 = vmul.f32 %v4838_v57, %v4701_v9  ;;  %v259_v21 = vmul.f32 %v4877_v22, %v4729_v17  ;;  %v260_v20 = vmul.f32 %v4895_v49, %v4766_v30 }
  0x31   :  { %v261_v29 = vmul.f32 %v4904_v60, %v4696_v8  ;;  %v262_v38 = vmul.f32 %v4909_v61, %v4701_v9  ;;  %v297_v45 = vadd.f32 %v296_v63, %v295_v3  ;;  %v319_v33 = vadd.f32 %v318_v39, %v317_v0 }
  0x32   :  { %v5023_v6 = vadd.f32 %v233_v5, %v232_v27  ;;  %v285_v34 = vrot.slane %v284_v59, 4  ;;  %v308_v28 = vadd.f32 %v307_v16, %v306_v11  ;;  %v320_v50 = vsel %vm132_vm0, %v255_v1, 0.0 }
  0x33   :  { %v263_v40 = vmul.f32 %v4917_v4, %v4729_v17  ;;  %v264_v48 = vmul.f32 %v4933_v7, %v4766_v30  ;;  %v5030_v44 = vadd.f32 %v272_v58, %v271_v10  ;;  %v309_v8 = vsel %vm132_vm0, %v252_v62, 0.0 }
  0x34   :  { %v330_v9 = vsel %vm132_vm0, %v257_v18, 0.0  ;;  %v331_v3 = vsel %vm132_vm0, %v258_v19, 0.0  ;;  %v356_v27 = vmul.f32 %v4715_v13, %v4715_v13  ;;  %v357_v5 = vmul.f32 %v4720_v14, %v4720_v14 }
  0x35   :  { %v298_v1 = vrot.slane %v297_v45, 4  ;;  %v321_v63 = vadd.f32 %v320_v50, %v319_v33  ;;  %v343_v17 = vsel %vm132_vm0, %v261_v29, 0.0  ;;  %v344_v30 = vsel %vm132_vm0, %v262_v38, 0.0 }
  0x36   :  { %v5041_v10 = vadd.f32 %v285_v34, %v284_v59  ;;  %v310_v11 = vadd.f32 %v309_v8, %v308_v28  ;;  %v322_v62 = vsel %vm132_vm0, %v256_v47, 0.0  ;;  %v333_v0 = vsel %vm132_vm0, %v259_v21, 0.0 }
  0x37   :  { %v332_v58 = vadd.f32 %v331_v3, %v330_v9  ;;  %v360_v16 = vmul.f32 %v4752_v25, %v4715_v13  ;;  %v361_v18 = vmul.f32 %v4757_v26, %v4720_v14  ;;  %v345_v19 = vadd.f32 %v344_v30, %v343_v17 }
  0x38   :  { %v358_v29 = vmul.f32 %v4747_v24, %v4747_v24  ;;  %v380_v59 = vsel %vm132_vm0, %v356_v27, 0.0  ;;  %v381_v38 = vsel %vm132_vm0, %v357_v5, 0.0  ;;  %v5054_v47 = vadd.f32 %v298_v1, %v297_v45 }
  0x39   :  { %v323_v21 = vadd.f32 %v322_v62, %v321_v63  ;;  %v335_v33 = vsel %vm132_vm0, %v260_v20, 0.0  ;;  %v346_v34 = vsel %vm132_vm0, %v263_v40, 0.0  ;;  %v311_v50 = vrot.slane %v310_v11, 4 }
  0x3a   :  { %v362_v8 = vmul.f32 %v4788_v36, %v4747_v24  ;;  %v364_v9 = vmul.f32 %v4771_v31, %v4715_v13  ;;  %v365_v3 = vmul.f32 %v4776_v32, %v4720_v14  ;;  %v382_v27 = vadd.f32 %v381_v38, %v380_v59 }
  0x3b   :  { %v393_v45 = vsel %vm132_vm0, %v360_v16, 0.0  ;;  %v394_v5 = vsel %vm132_vm0, %v361_v18, 0.0  ;;  %v334_v20 = vadd.f32 %v333_v0, %v332_v58  ;;  %v347_v1 = vadd.f32 %v346_v34, %v345_v19 }
  0x3c   :  { %v359_v40 = vmul.f32 %v4783_v35, %v4783_v35  ;;  %v383_v63 = vsel %vm132_vm0, %v358_v29, 0.0  ;;  %v300_v17 = vrot.slane %v5054_v47, 2  ;;  %v324_v30 = vrot.slane %v323_v21, 4 }
  0x3d   :  { %v348_v62 = vsel %vm132_vm0, %v264_v48, 0.0  ;;  %v363_v28 = vmul.f32 %v4853_v2, %v4783_v35  ;;  %v366_v16 = vmul.f32 %v4812_v46, %v4747_v24  ;;  %v368_v0 = vmul.f32 %v4798_v41, %v4715_v13 }
  0x3e   :  { %v369_v58 = vmul.f32 %v4803_v42, %v4720_v14  ;;  %v395_v18 = vadd.f32 %v394_v5, %v393_v45  ;;  %v384_v19 = vadd.f32 %v383_v63, %v382_v27  ;;  %v396_v29 = vsel %vm132_vm0, %v362_v8, 0.0 }
  0x3f   :  { %v406_v59 = vsel %vm132_vm0, %v364_v9, 0.0  ;;  %v407_v48 = vsel %vm132_vm0, %v365_v3, 0.0  ;;  %v312_v38 = vadd.f32 %v311_v50, %v310_v11  ;;  %v336_v34 = vadd.f32 %v335_v33, %v334_v20 }
  0x40   :  { %v349_v39 = vadd.f32 %v348_v62, %v347_v1  ;;  %v385_v54 = vsel %vm132_vm0, %v359_v40, 0.0  ;;  %v325_v53 = vadd.f32 %v324_v30, %v323_v21  ;;  %v370_v52 = vmul.f32 %v4824_v51, %v4747_v24  ;;  %s6584_s19 = spop %4523 }
  0x41   :  { %v372_v37 = vmul.f32 %v4833_v56, %v4715_v13  ;;  %v373_v27 = vmul.f32 %v4838_v57, %v4720_v14  ;;  %v397_v8 = vadd.f32 %v396_v29, %v395_v18  ;;  %v408_v45 = vadd.f32 %v407_v48, %v406_v59  ;;  %s29_s22 = smul.f32 %s6584_s19, %s10903_s0 }
  0x42   :  { %v419_v9 = vsel %vm132_vm0, %v368_v0, 0.0  ;;  %v420_v11 = vsel %vm132_vm0, %v369_v58, 0.0  ;;  %v367_v33 = vmul.f32 %v4863_v12, %v4783_v35  ;;  %v386_v50 = vadd.f32 %v385_v54, %v384_v19 }
  0x43   :  { %v398_v21 = vsel %vm132_vm0, %v363_v28, 0.0  ;;  %v409_v3 = vsel %vm132_vm0, %v366_v16, 0.0  ;;  %v337_v5 = vrot.slane %v336_v34, 4  ;;  %v350_v20 = vrot.slane %v349_v39, 4  ;;  %s30_s23 = sadd.f32 1e-06, %s29_s22 }
  0x44   :  { %v371_v1 = vmul.f32 %v4868_v15, %v4783_v35  ;;  %v374_v40 = vmul.f32 %v4877_v22, %v4747_v24  ;;  %v376_v63 = vmul.f32 %v4904_v60, %v4715_v13  ;;  %v377_v30 = vmul.f32 %v4909_v61, %v4720_v14 }
  0x45   :  { %v421_v62 = vadd.f32 %v420_v11, %v419_v9  ;;  %v422_v54 = vsel %vm132_vm0, %v370_v52, 0.0  ;;  %v399_v28 = vadd.f32 %v398_v21, %v397_v8  ;;  %v410_v0 = vadd.f32 %v409_v3, %v408_v45 }
  0x46   :  { %v432_v16 = vsel %vm132_vm0, %v372_v37, 0.0  ;;  %v433_v58 = vsel %vm132_vm0, %v373_v27, 0.0  ;;  %v313_v18 = vrot.slane %v312_v38, 2  ;;  %v326_v19 = vrot.slane %v325_v53, 2 }
  0x47   :  { %v387_v29 = vrot.slane %v386_v50, 4  ;;  %v411_v59 = vsel %vm132_vm0, %v367_v33, 0.0  ;;  %v338_v48 = vadd.f32 %v337_v5, %v336_v34  ;;  %v351_v55 = vadd.f32 %v350_v20, %v349_v39 }
  0x48   :  { %v375_v13 = vmul.f32 %v4895_v49, %v4783_v35  ;;  %v378_v14 = vmul.f32 %v4917_v4, %v4747_v24  ;;  %v423_v52 = vadd.f32 %v422_v54, %v421_v62  ;;  %v424_v8 = vsel %vm132_vm0, %v371_v1, 0.0 }
  0x49   :  { %v434_v45 = vadd.f32 %v433_v58, %v432_v16  ;;  %v435_v37 = vsel %vm132_vm0, %v374_v40, 0.0  ;;  %v400_v27 = vrot.slane %v399_v28, 4  ;;  %v412_v9 = vadd.f32 %v411_v59, %v410_v0 }
  0x4a   :  { %v445_v11 = vsel %vm132_vm0, %v376_v63, 0.0  ;;  %v446_v33 = vsel %vm132_vm0, %v377_v30, 0.0  ;;  %v11347_v39 = vrot.slane %v5030_v44, 2  ;;  %v11348_v21 = vrot.slane %v5041_v10, 2 }
  0x4b   :  { %v301_v3 = vadd.f32 %v300_v17, %v5054_v47  ;;  %v388_v5 = vadd.f32 %v387_v29, %v386_v50  ;;  %v314_v20 = vadd.f32 %v313_v18, %v312_v38  ;;  %v327_v1 = vadd.f32 %v326_v19, %v325_v53 }
  0x4c   :  { %v275_v34 = vadd.f32 %v11347_v39, %v5030_v44  ;;  %v288_v24 = vadd.f32 %v11348_v21, %v5041_v10  ;;  %v339_v40 = vrot.slane %v338_v48, 2  ;;  %v352_v62 = vrot.slane %v351_v55, 2 }
  0x4d   :  { %v379_v63 = vmul.f32 %v4933_v7, %v4783_v35  ;;  %v425_v54 = vadd.f32 %v424_v8, %v423_v52  ;;  %v436_v30 = vadd.f32 %v435_v37, %v434_v45  ;;  %v447_v0 = vadd.f32 %v446_v33, %v445_v11 }
  0x4e   :  { %v401_v16 = vadd.f32 %v400_v27, %v399_v28  ;;  %v413_v58 = vrot.slane %v412_v9, 4  ;;  %v437_v44 = vsel %vm132_vm0, %v375_v13, 0.0  ;;  %v448_v59 = vsel %vm132_vm0, %v378_v14, 0.0 }
  0x4f   :  { %v235_v10 = vrot.slane %v5023_v6, 1  ;;  %v276_v47 = vrot.slane %v275_v34, 1  ;;  %v289_v17 = vrot.slane %v288_v24, 1  ;;  %v389_v38 = vrot.slane %v388_v5, 2 }
  0x50   :  { %v11349_v53 = vrot.slane %v4979_v23, 1  ;;  %v302_v35 = vrot.slane %v301_v3, 1  ;;  %v315_v18 = vrot.slane %v314_v20, 1  ;;  %v328_v19 = vrot.slane %v327_v1, 1 }
  0x51   :  { %v5133_v29 = vadd.f32 %v339_v40, %v338_v48  ;;  %v426_v28 = vrot.slane %v425_v54, 4  ;;  %v438_v52 = vadd.f32 %v437_v44, %v436_v30  ;;  %v449_v13 = vadd.f32 %v448_v59, %v447_v0 }
  0x52   :  { %v5131_v50 = vadd.f32 %v11349_v53, %v4979_v23  ;;  %v5135_v8 = vadd.f32 %v352_v62, %v351_v55  ;;  %v402_v14 = vrot.slane %v401_v16, 2  ;;  %v414_v45 = vadd.f32 %v413_v58, %v412_v9 }
  0x53   :  { %v450_v37 = vsel %vm132_vm0, %v379_v63, 0.0  ;;  %v5139_v27 = vadd.f32 %v235_v10, %v5023_v6  ;;  %v5141_v11 = vadd.f32 %v276_v47, %v275_v34  ;;  %v5143_v23 = vadd.f32 %v289_v17, %v288_v24 }
  0x54   :  { %11350 = vst [vmem:[#allocation11_spill] sm:$0xff] %v5131_v50  ;;  %v5145_v33 = vadd.f32 %v389_v38, %v388_v5  ;;  %v5147_v48 = vadd.f32 %v302_v35, %v301_v3  ;;  %v5149_v39 = vadd.f32 %v315_v18, %v314_v20  ;;  %v458_v55 = vmul.f32 %v4752_v25, %v4752_v25 }
  0x55   :  { %11351 = vst [vmem:[#allocation12_spill] sm:$0xff] %v5139_v27  ;;  %11352 = vst [vmem:[#allocation13_spill] sm:$0xff] %v5141_v11  ;;  %v459_v9 = vmul.f32 %v4757_v26, %v4757_v26  ;;  %v5155_v21 = vadd.f32 %v328_v19, %v327_v1  ;;  %v427_v6 = vadd.f32 %v426_v28, %v425_v54  ;;  %v439_v40 = vrot.slane %v438_v52, 4  ;;  %v5606_v27 = vld [vmem:[%s10901_s3 + $0xb8] sm:$0xff] }
  0x56   :  { %11353 = vst [vmem:[#allocation14_spill] sm:$0xff] %v5143_v23  ;;  %11354 = vst [vmem:[#allocation15_spill] sm:$0xff] %v5147_v48  ;;  %v451_v34 = vadd.f32 %v450_v37, %v449_v13  ;;  %v341_v24 = vrot.slane %v5133_v29, 1  ;;  %v5159_v62 = vadd.f32 %v402_v14, %v401_v16  ;;  %v415_v3 = vrot.slane %v414_v45, 2 }
  0x57   :  { %11355 = vst [vmem:[#allocation16_spill] sm:$0xff] %v5149_v39  ;;  %11356 = vst [vmem:[#allocation17_spill] sm:$0xff] %v5155_v21  ;;  %v391_v20 = vrot.slane %v5145_v33, 1  ;;  %v460_v63 = vmul.f32 %v4788_v36, %v4788_v36  ;;  %v462_v30 = vmul.f32 %v4771_v31, %v4752_v25  ;;  %v463_v1 = vmul.f32 %v4776_v32, %v4757_v26 }
  0x58   :  { %v466_v54 = vmul.f32 %v4798_v41, %v4752_v25  ;;  %v467_v0 = vmul.f32 %v4803_v42, %v4757_v26  ;;  %v478_v16 = vsel %vm132_vm0, %v458_v55, 0.0  ;;  %v479_v58 = vsel %vm132_vm0, %v459_v9, 0.0 }
  0x59   :  { %v428_v44 = vrot.slane %v427_v6, 2  ;;  %v440_v59 = vadd.f32 %v439_v40, %v438_v52  ;;  %v452_v10 = vrot.slane %v451_v34, 4  ;;  %v461_v47 = vmul.f32 %v4853_v2, %v4853_v2 }
  0x5a   :  { %v404_v17 = vrot.slane %v5159_v62, 1  ;;  %v416_v38 = vadd.f32 %v415_v3, %v414_v45  ;;  %v464_v53 = vmul.f32 %v4812_v46, %v4788_v36  ;;  %v468_v35 = vmul.f32 %v4824_v51, %v4788_v36 }
  0x5b   :  { %v470_v18 = vmul.f32 %v4833_v56, %v4752_v25  ;;  %v471_v19 = vmul.f32 %v4838_v57, %v4757_v26  ;;  %v480_v28 = vadd.f32 %v479_v58, %v478_v16  ;;  %v481_v52 = vsel %vm132_vm0, %v460_v63, 0.0 }
  0x5c   :  { %v491_v13 = vsel %vm132_vm0, %v462_v30, 0.0  ;;  %v492_v14 = vsel %vm132_vm0, %v463_v1, 0.0  ;;  %v504_v45 = vsel %vm132_vm0, %v466_v54, 0.0  ;;  %v505_v37 = vsel %vm132_vm0, %v467_v0, 0.0 }
  0x5d   :  { %v429_v55 = vadd.f32 %v428_v44, %v427_v6  ;;  %v453_v9 = vadd.f32 %v452_v10, %v451_v34  ;;  %v474_v40 = vmul.f32 %v4904_v60, %v4752_v25  ;;  %v475_v3 = vmul.f32 %v4909_v61, %v4757_v26 }
  0x5e   :  { %v441_v5 = vrot.slane %v440_v59, 2  ;;  %v465_v63 = vmul.f32 %v4863_v12, %v4853_v2  ;;  %v469_v30 = vmul.f32 %v4868_v15, %v4853_v2  ;;  %v472_v1 = vmul.f32 %v4877_v22, %v4788_v36 }
  0x5f   :  { %v482_v54 = vadd.f32 %v481_v52, %v480_v28  ;;  %v483_v6 = vsel %vm132_vm0, %v461_v47, 0.0  ;;  %v493_v34 = vadd.f32 %v492_v14, %v491_v13  ;;  %v506_v0 = vadd.f32 %v505_v37, %v504_v45 }
  0x60   :  { %v494_v25 = vsel %vm132_vm0, %v464_v53, 0.0  ;;  %v507_v16 = vsel %vm132_vm0, %v468_v35, 0.0  ;;  %v517_v26 = vsel %vm132_vm0, %v470_v18, 0.0  ;;  %v518_v58 = vsel %vm132_vm0, %v471_v19, 0.0 }
  0x61   :  { %v454_v44 = vrot.slane %v453_v9, 2  ;;  %v476_v10 = vmul.f32 %v4917_v4, %v4788_v36  ;;  %v530_v21 = vsel %vm132_vm0, %v474_v40, 0.0  ;;  %v531_v28 = vsel %vm132_vm0, %v475_v3, 0.0 }
  0x62   :  { %v417_v52 = vrot.slane %v416_v38, 1  ;;  %v430_v47 = vrot.slane %v429_v55, 1  ;;  %v5209_v13 = vadd.f32 %v441_v5, %v440_v59  ;;  %v473_v53 = vmul.f32 %v4895_v49, %v4853_v2 }
  0x63   :  { %v484_v35 = vadd.f32 %v483_v6, %v482_v54  ;;  %v495_v14 = vadd.f32 %v494_v25, %v493_v34  ;;  %v508_v18 = vadd.f32 %v507_v16, %v506_v0  ;;  %v519_v45 = vadd.f32 %v518_v58, %v517_v26 }
  0x64   :  { %v496_v19 = vsel %vm132_vm0, %v465_v63, 0.0  ;;  %v509_v37 = vsel %vm132_vm0, %v469_v30, 0.0  ;;  %v520_v36 = vsel %vm132_vm0, %v472_v1, 0.0  ;;  %v532_v40 = vadd.f32 %v531_v28, %v530_v21 }
  0x65   :  { %v5217_v3 = vadd.f32 %v341_v24, %v5133_v29  ;;  %v5219_v39 = vadd.f32 %v454_v44, %v453_v9  ;;  %v477_v5 = vmul.f32 %v4933_v7, %v4853_v2  ;;  %v533_v59 = vsel %vm132_vm0, %v476_v10, 0.0 }
  0x66   :  { %v11358_v54 = vrot.slane %v5135_v8, 1  ;;  %v5230_v63 = vadd.f32 %v391_v20, %v5145_v33  ;;  %v5233_v21 = vadd.f32 %v404_v17, %v5159_v62  ;;  %v5235_v29 = vadd.f32 %v417_v52, %v416_v38 }
  0x67   :  { %11357 = vst [vmem:[#allocation18_spill] sm:$0xff] %v5217_v3  ;;  %v485_v24 = vrot.slane %v484_v35, 4  ;;  %v497_v9 = vadd.f32 %v496_v19, %v495_v14  ;;  %v510_v30 = vadd.f32 %v509_v37, %v508_v18  ;;  %v521_v1 = vadd.f32 %v520_v36, %v519_v45 }
  0x68   :  { %v5227_v6 = vadd.f32 %v11358_v54, %v5135_v8  ;;  %11360 = vst [vmem:[#allocation20_spill] sm:$0xff] %v5230_v63  ;;  %11361 = vst [vmem:[#allocation21_spill] sm:$0xff] %v5233_v21  ;;  %v5237_v2 = vadd.f32 %v430_v47, %v429_v55  ;;  %v443_v34 = vrot.slane %v5209_v13, 1  ;;  %v522_v0 = vsel %vm132_vm0, %v473_v53, 0.0  ;;  %v5585_v21 = vld [vmem:[%s10901_s3 + $0x98] sm:$0xff] }
  0x69   :  { %11362 = vst [vmem:[#allocation22_spill] sm:$0xff] %v5235_v29  ;;  %v534_v8 = vadd.f32 %v533_v59, %v532_v40  ;;  %v535_v33 = vsel %vm132_vm0, %v477_v5, 0.0  ;;  %v543_v62 = vmul.f32 %v4771_v31, %v4771_v31  ;;  %v544_v20 = vmul.f32 %v4776_v32, %v4776_v32 }
  0x6a   :  { %11359 = vst [vmem:[#allocation19_spill] sm:$0xff] %v5227_v6  ;;  %11363 = vst [vmem:[#allocation23_spill] sm:$0xff] %v5237_v2  ;;  %v547_v17 = vmul.f32 %v4798_v41, %v4771_v31  ;;  %v548_v38 = vmul.f32 %v4803_v42, %v4776_v32  ;;  %v551_v55 = vmul.f32 %v4833_v56, %v4771_v31  ;;  %v498_v58 = vrot.slane %v497_v9, 4 }
  0x6b   :  { %v552_v16 = vmul.f32 %v4838_v57, %v4776_v32  ;;  %v486_v26 = vadd.f32 %v485_v24, %v484_v35  ;;  %v511_v44 = vrot.slane %v510_v30, 4  ;;  %v523_v10 = vadd.f32 %v522_v0, %v521_v1 }
  0x6c   :  { %v536_v28 = vadd.f32 %v535_v33, %v534_v8  ;;  %v545_v52 = vmul.f32 %v4812_v46, %v4812_v46  ;;  %v549_v47 = vmul.f32 %v4824_v51, %v4812_v46  ;;  %v553_v53 = vmul.f32 %v4877_v22, %v4812_v46 }
  0x6d   :  { %v555_v14 = vmul.f32 %v4904_v60, %v4771_v31  ;;  %v556_v18 = vmul.f32 %v4909_v61, %v4776_v32  ;;  %v559_v35 = vsel %vm132_vm0, %v543_v62, 0.0  ;;  %v560_v45 = vsel %vm132_vm0, %v544_v20, 0.0 }
  0x6e   :  { %v572_v19 = vsel %vm132_vm0, %v547_v17, 0.0  ;;  %v573_v37 = vsel %vm132_vm0, %v548_v38, 0.0  ;;  %v585_v36 = vsel %vm132_vm0, %v551_v55, 0.0  ;;  %v586_v40 = vsel %vm132_vm0, %v552_v16, 0.0 }
  0x6f   :  { %v499_v5 = vadd.f32 %v498_v58, %v497_v9  ;;  %v512_v59 = vadd.f32 %v511_v44, %v510_v30  ;;  %v524_v54 = vrot.slane %v523_v10, 4  ;;  %v546_v31 = vmul.f32 %v4863_v12, %v4863_v12 }
  0x70   :  { %v537_v24 = vrot.slane %v536_v28, 4  ;;  %v550_v32 = vmul.f32 %v4868_v15, %v4863_v12  ;;  %v554_v1 = vmul.f32 %v4895_v49, %v4863_v12  ;;  %v557_v0 = vmul.f32 %v4917_v4, %v4812_v46 }
  0x71   :  { %v561_v8 = vadd.f32 %v560_v45, %v559_v35  ;;  %v562_v33 = vsel %vm132_vm0, %v545_v52, 0.0  ;;  %v574_v62 = vadd.f32 %v573_v37, %v572_v19  ;;  %v587_v9 = vadd.f32 %v586_v40, %v585_v36 }
  0x72   :  { %v575_v30 = vsel %vm132_vm0, %v549_v47, 0.0  ;;  %v588_v20 = vsel %vm132_vm0, %v553_v53, 0.0  ;;  %v598_v17 = vsel %vm132_vm0, %v555_v14, 0.0  ;;  %v599_v38 = vsel %vm132_vm0, %v556_v18, 0.0 }
  0x73   :  { %v487_v55 = vrot.slane %v486_v26, 2  ;;  %v500_v16 = vrot.slane %v499_v5, 2  ;;  %v611_v58 = vmul.f32 %v4798_v41, %v4798_v41  ;;  %v612_v46 = vmul.f32 %v4803_v42, %v4803_v42 }
  0x74   :  { %v513_v44 = vrot.slane %v512_v59, 2  ;;  %v525_v52 = vadd.f32 %v524_v54, %v523_v10  ;;  %v538_v35 = vadd.f32 %v537_v24, %v536_v28  ;;  %v558_v47 = vmul.f32 %v4933_v7, %v4863_v12 }
  0x75   :  { %v563_v45 = vadd.f32 %v562_v33, %v561_v8  ;;  %v576_v53 = vadd.f32 %v575_v30, %v574_v62  ;;  %v589_v19 = vadd.f32 %v588_v20, %v587_v9  ;;  %v600_v14 = vadd.f32 %v599_v38, %v598_v17 }
  0x76   :  { %v564_v18 = vsel %vm132_vm0, %v546_v31, 0.0  ;;  %v577_v37 = vsel %vm132_vm0, %v550_v32, 0.0  ;;  %v590_v36 = vsel %vm132_vm0, %v554_v1, 0.0  ;;  %v601_v40 = vsel %vm132_vm0, %v557_v0, 0.0 }
  0x77   :  { %v5295_v25 = vadd.f32 %v443_v34, %v5209_v13  ;;  %v613_v10 = vmul.f32 %v4824_v51, %v4824_v51  ;;  %v623_v12 = vsel %vm132_vm0, %v611_v58, 0.0  ;;  %v624_v28 = vsel %vm132_vm0, %v612_v46, 0.0 }
  0x78   :  { %v488_v54 = vadd.f32 %v487_v55, %v486_v26  ;;  %v501_v24 = vadd.f32 %v500_v16, %v499_v5  ;;  %v514_v8 = vadd.f32 %v513_v44, %v512_v59  ;;  %v526_v31 = vrot.slane %v525_v52, 2 }
  0x79   :  { %11364 = vst [vmem:[#allocation24_spill] sm:$0xff] %v5295_v25  ;;  %v565_v33 = vadd.f32 %v564_v18, %v563_v45  ;;  %v578_v32 = vadd.f32 %v577_v37, %v576_v53  ;;  %v591_v62 = vadd.f32 %v590_v36, %v589_v19  ;;  %v602_v1 = vadd.f32 %v601_v40, %v600_v14 }
  0x7a   :  { %v11365_v0 = vrot.slane %v5219_v39, 1  ;;  %v539_v34 = vrot.slane %v538_v35, 2  ;;  %v603_v9 = vsel %vm132_vm0, %v558_v47, 0.0  ;;  %v625_v30 = vadd.f32 %v624_v28, %v623_v12 }
  0x7b   :  { %v614_v20 = vmul.f32 %v4868_v15, %v4868_v15  ;;  %v615_v26 = vmul.f32 %v4833_v56, %v4798_v41  ;;  %v616_v5 = vmul.f32 %v4838_v57, %v4803_v42  ;;  %v626_v59 = vsel %vm132_vm0, %v613_v10, 0.0 }
  0x7c   :  { %v5304_v13 = vadd.f32 %v11365_v0, %v5219_v39  ;;  %v489_v17 = vrot.slane %v488_v54, 1  ;;  %v502_v38 = vrot.slane %v501_v24, 1  ;;  %v515_v55 = vrot.slane %v514_v8, 1 }
  0x7d   :  { %v5314_v39 = vadd.f32 %v526_v31, %v525_v52  ;;  %v566_v16 = vrot.slane %v565_v33, 4  ;;  %v579_v58 = vrot.slane %v578_v32, 4  ;;  %v592_v46 = vrot.slane %v591_v62, 4 }
  0x7e   :  { %11366 = vst [vmem:[#allocation25_spill] sm:$0xff] %v5304_v13  ;;  %v604_v44 = vadd.f32 %v603_v9, %v602_v1  ;;  %v540_v47 = vadd.f32 %v539_v34, %v538_v35  ;;  %v617_v45 = vmul.f32 %v4877_v22, %v4824_v51  ;;  %v619_v53 = vmul.f32 %v4904_v60, %v4798_v41  ;;  %v5559_v13 = vld [vmem:[%s10901_s3 + $0x90] sm:$0xff] }
  0x7f   :  { %v627_v19 = vadd.f32 %v626_v59, %v625_v30  ;;  %v620_v14 = vmul.f32 %v4909_v61, %v4803_v42  ;;  %v628_v18 = vsel %vm132_vm0, %v614_v20, 0.0  ;;  %v636_v52 = vsel %vm132_vm0, %v615_v26, 0.0 }
  0x80   :  { %v637_v37 = vsel %vm132_vm0, %v616_v5, 0.0  ;;  %v5325_v36 = vadd.f32 %v489_v17, %v488_v54  ;;  %v5327_v40 = vadd.f32 %v502_v38, %v501_v24  ;;  %v5329_v35 = vadd.f32 %v515_v55, %v514_v8 }
  0x81   :  { %v528_v10 = vrot.slane %v5314_v39, 1  ;;  %v567_v12 = vadd.f32 %v566_v16, %v565_v33  ;;  %v580_v41 = vadd.f32 %v579_v58, %v578_v32  ;;  %v593_v28 = vadd.f32 %v592_v46, %v591_v62 }
  0x82   :  { %11367 = vst [vmem:[#allocation26_spill] sm:$0xff] %v5325_v36  ;;  %11368 = vst [vmem:[#allocation27_spill] sm:$0xff] %v5327_v40  ;;  %v605_v31 = vrot.slane %v604_v44, 4  ;;  %v541_v1 = vrot.slane %v540_v47, 1  ;;  %v618_v42 = vmul.f32 %v4895_v49, %v4868_v15  ;;  %v629_v0 = vadd.f32 %v628_v18, %v627_v19 }
  0x83   :  { %11369 = vst [vmem:[#allocation28_spill] sm:$0xff] %v5329_v35  ;;  %v638_v34 = vadd.f32 %v637_v37, %v636_v52  ;;  %v621_v54 = vmul.f32 %v4917_v4, %v4824_v51  ;;  %v639_v24 = vsel %vm132_vm0, %v617_v45, 0.0  ;;  %v649_v8 = vsel %vm132_vm0, %v619_v53, 0.0 }
  0x84   :  { %v650_v9 = vsel %vm132_vm0, %v620_v14, 0.0  ;;  %v662_v33 = vmul.f32 %v4833_v56, %v4833_v56  ;;  %v663_v32 = vmul.f32 %v4838_v57, %v4838_v57  ;;  %v666_v62 = vmul.f32 %v4904_v60, %v4833_v56 }
  0x85   :  { %v667_v30 = vmul.f32 %v4909_v61, %v4838_v57  ;;  %v568_v20 = vrot.slane %v567_v12, 2  ;;  %v581_v51 = vrot.slane %v580_v41, 2  ;;  %v594_v26 = vrot.slane %v593_v28, 2 }
  0x86   :  { %v606_v5 = vadd.f32 %v605_v31, %v604_v44  ;;  %v622_v59 = vmul.f32 %v4933_v7, %v4868_v15  ;;  %v630_v17 = vrot.slane %v629_v0, 4  ;;  %v640_v38 = vadd.f32 %v639_v24, %v638_v34 }
  0x87   :  { %v651_v55 = vadd.f32 %v650_v9, %v649_v8  ;;  %v641_v16 = vsel %vm132_vm0, %v618_v42, 0.0  ;;  %v652_v58 = vsel %vm132_vm0, %v621_v54, 0.0  ;;  %v664_v56 = vmul.f32 %v4877_v22, %v4877_v22 }
  0x88   :  { %v668_v57 = vmul.f32 %v4917_v4, %v4877_v22  ;;  %v670_v46 = vsel %vm132_vm0, %v662_v33, 0.0  ;;  %v671_v44 = vsel %vm132_vm0, %v663_v32, 0.0  ;;  %v683_v45 = vsel %vm132_vm0, %v666_v62, 0.0 }
  0x89   :  { %v684_v15 = vsel %vm132_vm0, %v667_v30, 0.0  ;;  %v569_v53 = vadd.f32 %v568_v20, %v567_v12  ;;  %v582_v19 = vadd.f32 %v581_v51, %v580_v41  ;;  %v595_v14 = vadd.f32 %v594_v26, %v593_v28 }
  0x8a   :  { %v607_v18 = vrot.slane %v606_v5, 2  ;;  %v631_v52 = vadd.f32 %v630_v17, %v629_v0  ;;  %v642_v37 = vadd.f32 %v641_v16, %v640_v38  ;;  %v653_v31 = vadd.f32 %v652_v58, %v651_v55  ;;  %v5396_v55 = vld [vmem:[%s10901_s3] sm:$0xff]  ;;  %v5403_v58 = vld [vmem:[%s10901_s3 + $0x8] sm:$0xff] }
  0x8b   :  { %v654_v42 = vsel %vm132_vm0, %v622_v59, 0.0  ;;  %v665_v22 = vmul.f32 %v4895_v49, %v4895_v49  ;;  %v669_v34 = vmul.f32 %v4933_v7, %v4895_v49  ;;  %v672_v54 = vadd.f32 %v671_v44, %v670_v46  ;;  %11373 = vst [vmem:[#allocation32_spill] sm:$0xff] %v5403_v58  ;;  %v5412_v46 = vld [vmem:[%s10901_s3 + $0x20] sm:$0xff] }
  0x8c   :  { %v685_v24 = vadd.f32 %v684_v15, %v683_v45  ;;  %v673_v8 = vsel %vm132_vm0, %v664_v56, 0.0  ;;  %v686_v12 = vsel %vm132_vm0, %v668_v57, 0.0  ;;  %v696_v41 = vmul.f32 %v4904_v60, %v4904_v60  ;;  %v5379_v60 = vld [vmem:[%s10902_s4] sm:$0xff]  ;;  %11375 = vst [vmem:[#allocation34_spill] sm:$0xff] %v5412_v46  ;;  %v5419_v45 = vld [vmem:[%s10901_s3 + $0x28] sm:$0xff] }
  0x8d   :  { %v697_v28 = vmul.f32 %v4909_v61, %v4909_v61  ;;  %v5371_v0 = vadd.f32 %v528_v10, %v5314_v39  ;;  %v5373_v9 = vadd.f32 %v541_v1, %v540_v47  ;;  %v570_v33 = vrot.slane %v569_v53, 1  ;;  %v5384_v61 = vld [vmem:[%s10902_s4 + $0x8] sm:$0xff]  ;;  %11376 = vst [vmem:[#allocation35_spill] sm:$0xff] %v5419_v45 }
  0x8e   :  { %v608_v32 = vadd.f32 %v607_v18, %v606_v5  ;;  %v583_v49 = vrot.slane %v582_v19, 1  ;;  %v596_v62 = vrot.slane %v595_v14, 1  ;;  %v643_v30 = vrot.slane %v642_v37, 4 }
  0x8f   :  { %11370 = vst [vmem:[#allocation29_spill] sm:$0xff] %v5371_v0  ;;  %11371 = vst [vmem:[#allocation30_spill] sm:$0xff] %v5373_v9  ;;  %v655_v20 = vadd.f32 %v654_v42, %v653_v31  ;;  %v632_v51 = vrot.slane %v631_v52, 2  ;;  %v674_v26 = vadd.f32 %v673_v8, %v672_v54  ;;  %v675_v59 = vsel %vm132_vm0, %v665_v22, 0.0  ;;  %v5426_v31 = vld [vmem:[%s10902_s4 + $0x10] sm:$0xff] }
  0x90   :  { %v687_v17 = vadd.f32 %v686_v12, %v685_v24  ;;  %v688_v39 = vsel %vm132_vm0, %v669_v34, 0.0  ;;  %v698_v47 = vmul.f32 %v4917_v4, %v4917_v4  ;;  %v700_v10 = vsel %vm132_vm0, %v696_v41, 0.0  ;;  %v5438_v8 = vld [vmem:[%s10901_s3 + $0x10] sm:$0xff] }
  0x91   :  { %v701_v1 = vsel %vm132_vm0, %v697_v28, 0.0  ;;  %v5391_v5 = vadd.f32 %v570_v33, %v569_v53  ;;  %v609_v38 = vrot.slane %v608_v32, 1  ;;  %v713_v16 = vmul.f32 %v5396_v55, %v5379_v60  ;;  %11379 = vst [vmem:[#allocation38_spill] sm:$0xff] %v5438_v8 }
  0x92   :  { %v714_v4 = vmul.f32 %v5403_v58, %v5384_v61  ;;  %v5407_v56 = vadd.f32 %v583_v49, %v582_v19  ;;  %v644_v57 = vadd.f32 %v643_v30, %v642_v37  ;;  %v717_v44 = vmul.f32 %v5412_v46, %v5379_v60  ;;  %v5456_v49 = vld [vmem:[%s10902_s4 + $0x18] sm:$0xff] }
  0x93   :  { %11372 = vst [vmem:[#allocation31_spill] sm:$0xff] %v5391_v5  ;;  %v718_v15 = vmul.f32 %v5419_v45, %v5384_v61  ;;  %v656_v53 = vrot.slane %v655_v20, 4  ;;  %v676_v19 = vadd.f32 %v675_v59, %v674_v26  ;;  %v689_v18 = vadd.f32 %v688_v39, %v687_v17  ;;  %v5462_v39 = vld [vmem:[%s10901_s3 + $0x18] sm:$0xff]  ;;  %v5515_v5 = vld [vmem:[%s10901_s3 + $0x70] sm:$0xff] }
  0x94   :  { %11374 = vst [vmem:[#allocation33_spill] sm:$0xff] %v5407_v56  ;;  %v702_v37 = vadd.f32 %v701_v1, %v700_v10  ;;  %v5428_v42 = vadd.f32 %v596_v62, %v595_v14  ;;  %v633_v22 = vadd.f32 %v632_v51, %v631_v52  ;;  %v699_v34 = vmul.f32 %v4933_v7, %v4933_v7  ;;  %v5447_v7 = vld [vmem:[%s10901_s3 + $0x30] sm:$0xff]  ;;  %v5469_v1 = vld [vmem:[%s10901_s3 + $0x40] sm:$0xff] }
  0x95   :  { %v703_v54 = vsel %vm132_vm0, %v698_v47, 0.0  ;;  %v5433_v24 = vadd.f32 %v609_v38, %v608_v32  ;;  %v715_v12 = vmul.f32 %v5438_v8, %v5426_v31  ;;  %v745_v41 = vsel %vm132_vm0, %v713_v16, 0.0  ;;  %11380 = vst [vmem:[#allocation39_spill] sm:$0xff] %v5447_v7  ;;  %11381 = vst [vmem:[#allocation40_spill] sm:$0xff] %v5462_v39  ;;  %v5476_v38 = vld [vmem:[%s10901_s3 + $0x48] sm:$0xff] }
  0x96   :  { %11377 = vst [vmem:[#allocation36_spill] sm:$0xff] %v5428_v42  ;;  %v746_v14 = vsel %vm132_vm0, %v714_v4, 0.0  ;;  %v645_v52 = vrot.slane %v644_v57, 2  ;;  %v719_v28 = vmul.f32 %v5447_v7, %v5426_v31  ;;  %v758_v33 = vsel %vm132_vm0, %v717_v44, 0.0  ;;  %11382 = vst [vmem:[#allocation41_spill] sm:$0xff] %v5469_v1  ;;  %v5508_v42 = vld [vmem:[%s10901_s3 + $0x50] sm:$0xff] }
  0x97   :  { %11378 = vst [vmem:[#allocation37_spill] sm:$0xff] %v5433_v24  ;;  %v759_v32 = vsel %vm132_vm0, %v718_v15, 0.0  ;;  %v657_v62 = vadd.f32 %v656_v53, %v655_v20  ;;  %v677_v30 = vrot.slane %v676_v19, 4  ;;  %v690_v51 = vrot.slane %v689_v18, 4  ;;  %11383 = vst [vmem:[#allocation42_spill] sm:$0xff] %v5476_v38  ;;  %v5484_v15 = vld [vmem:[%s10901_s3 + $0x38] sm:$0xff] }
  0x98   :  { %v704_v26 = vadd.f32 %v703_v54, %v702_v37  ;;  %v634_v59 = vrot.slane %v633_v22, 1  ;;  %v705_v17 = vsel %vm132_vm0, %v699_v34, 0.0  ;;  %v716_v47 = vmul.f32 %v5462_v39, %v5456_v49  ;;  %11384 = vst [vmem:[#allocation43_spill] sm:$0xff] %v5484_v15  ;;  %v5491_v37 = vld [vmem:[%s10901_s3 + $0x60] sm:$0xff]  ;;  %v5498_v54 = vld [vmem:[%s10901_s3 + $0x68] sm:$0xff]  ;;  %11386 = vst [vmem:[#allocation45_spill] sm:$0xff] %v5508_v42 }
  0x99   :  { %v747_v10 = vadd.f32 %v746_v14, %v745_v41  ;;  %v721_v20 = vmul.f32 %v5469_v1, %v5379_v60  ;;  %v722_v16 = vmul.f32 %v5476_v38, %v5384_v61  ;;  %v748_v4 = vsel %vm132_vm0, %v715_v12, 0.0  ;;  %11385 = vst [vmem:[#allocation44_spill] sm:$0xff] %v5498_v54 }
  0x9a   :  { %v760_v44 = vadd.f32 %v759_v32, %v758_v33  ;;  %v720_v53 = vmul.f32 %v5484_v15, %v5456_v49  ;;  %v725_v34 = vmul.f32 %v5491_v37, %v5379_v60  ;;  %v726_v12 = vmul.f32 %v5498_v54, %v5384_v61 }
  0x9b   :  { %v761_v41 = vsel %vm132_vm0, %v719_v28, 0.0  ;;  %v5503_v14 = vadd.f32 %v645_v52, %v644_v57  ;;  %v678_v33 = vadd.f32 %v677_v30, %v676_v19  ;;  %v691_v32 = vadd.f32 %v690_v51, %v689_v18  ;;  %v5522_v19 = vld [vmem:[%s10901_s3 + $0x80] sm:$0xff] }
  0x9c   :  { %v706_v24 = vadd.f32 %v705_v17, %v704_v26  ;;  %v723_v56 = vmul.f32 %v5508_v42, %v5426_v31  ;;  %v727_v57 = vmul.f32 %v5515_v5, %v5426_v31  ;;  %v729_v18 = vmul.f32 %v5522_v19, %v5379_v60  ;;  %v5532_v17 = vld [vmem:[%s10901_s3 + $0x88] sm:$0xff] }
  0x9d   :  { %v749_v52 = vadd.f32 %v748_v4, %v747_v10  ;;  %v750_v28 = vsel %vm132_vm0, %v716_v47, 0.0  ;;  %v762_v30 = vadd.f32 %v761_v41, %v760_v44  ;;  %v771_v51 = vsel %vm132_vm0, %v721_v20, 0.0  ;;  %v5544_v41 = vld [vmem:[%s10901_s3 + $0x58] sm:$0xff] }
  0x9e   :  { %v772_v26 = vsel %vm132_vm0, %v722_v16, 0.0  ;;  %v730_v9 = vmul.f32 %v5532_v17, %v5384_v61  ;;  %v763_v0 = vsel %vm132_vm0, %v720_v53, 0.0  ;;  %v784_v35 = vsel %vm132_vm0, %v725_v34, 0.0  ;;  %v5551_v34 = vld [vmem:[%s10901_s3 + $0x78] sm:$0xff] }
  0x9f   :  { %v785_v10 = vsel %vm132_vm0, %v726_v12, 0.0  ;;  %v5539_v47 = vadd.f32 %v634_v59, %v633_v22  ;;  %v658_v4 = vrot.slane %v657_v62, 2  ;;  %v679_v20 = vrot.slane %v678_v33, 2 }
  0xa0   :  { %v707_v44 = vrot.slane %v706_v24, 4  ;;  %v692_v16 = vrot.slane %v691_v32, 2  ;;  %v724_v40 = vmul.f32 %v5544_v41, %v5456_v49  ;;  %v751_v36 = vadd.f32 %v750_v28, %v749_v52 }
  0xa1   :  { %11387 = vst [vmem:[#allocation46_spill] sm:$0xff] %v5539_v47  ;;  %v773_v53 = vadd.f32 %v772_v26, %v771_v51  ;;  %v728_v22 = vmul.f32 %v5551_v34, %v5456_v49  ;;  %v764_v59 = vadd.f32 %v763_v0, %v762_v30  ;;  %v774_v12 = vsel %vm132_vm0, %v723_v56, 0.0  ;;  %v5576_v56 = vld [vmem:[%s10901_s3 + $0xa8] sm:$0xff] }
  0xa2   :  { %v786_v47 = vadd.f32 %v785_v10, %v784_v35  ;;  %v731_v52 = vmul.f32 %v5559_v13, %v5426_v31  ;;  %v787_v28 = vsel %vm132_vm0, %v727_v57, 0.0  ;;  %v797_v51 = vsel %vm132_vm0, %v729_v18, 0.0  ;;  %v5569_v35 = vld [vmem:[%s10901_s3 + $0xa0] sm:$0xff] }
  0xa3   :  { %v798_v26 = vsel %vm132_vm0, %v730_v9, 0.0  ;;  %v659_v25 = vadd.f32 %v658_v4, %v657_v62  ;;  %v708_v2 = vadd.f32 %v707_v44, %v706_v24  ;;  %v733_v0 = vmul.f32 %v5569_v35, %v5379_v60 }
  0xa4   :  { %v734_v57 = vmul.f32 %v5576_v56, %v5384_v61  ;;  %v680_v18 = vadd.f32 %v679_v20, %v678_v33  ;;  %v693_v9 = vadd.f32 %v692_v16, %v691_v32  ;;  %v752_v62 = vrot.slane %v751_v36, 4 }
  0xa5   :  { %v775_v24 = vadd.f32 %v774_v12, %v773_v53  ;;  %v765_v30 = vrot.slane %v764_v59, 4  ;;  %v776_v10 = vsel %vm132_vm0, %v724_v40, 0.0  ;;  %v788_v4 = vadd.f32 %v787_v28, %v786_v47  ;;  %v5594_v40 = vld [vmem:[%s10901_s3 + $0xb0] sm:$0xff] }
  0xa6   :  { %v799_v44 = vadd.f32 %v798_v26, %v797_v51  ;;  %v647_v29 = vrot.slane %v5503_v14, 1  ;;  %v732_v63 = vmul.f32 %v5585_v21, %v5456_v49  ;;  %v789_v33 = vsel %vm132_vm0, %v728_v22, 0.0 }
  0xa7   :  { %v800_v32 = vsel %vm132_vm0, %v731_v52, 0.0  ;;  %v709_v20 = vrot.slane %v708_v2, 2  ;;  %v735_v47 = vmul.f32 %v5594_v40, %v5426_v31  ;;  %v810_v16 = vsel %vm132_vm0, %v733_v0, 0.0 }
  0xa8   :  { %v811_v53 = vsel %vm132_vm0, %v734_v57, 0.0  ;;  %v660_v12 = vrot.slane %v659_v25, 1  ;;  %v681_v28 = vrot.slane %v680_v18, 1  ;;  %v753_v51 = vadd.f32 %v752_v62, %v751_v36 }
  0xa9   :  { %v777_v26 = vadd.f32 %v776_v10, %v775_v24  ;;  %v694_v22 = vrot.slane %v693_v9, 1  ;;  %v766_v6 = vadd.f32 %v765_v30, %v764_v59  ;;  %v790_v52 = vadd.f32 %v789_v33, %v788_v4  ;;  %v5614_v59 = vld [vmem:[%s10901_s3 + $0xc0] sm:$0xff] }
  0xaa   :  { %v801_v3 = vadd.f32 %v800_v32, %v799_v44  ;;  %v5601_v48 = vadd.f32 %v647_v29, %v5503_v14  ;;  %v736_v0 = vmul.f32 %v5606_v27, %v5456_v49  ;;  %v802_v57 = vsel %vm132_vm0, %v732_v63, 0.0  ;;  %11389 = vst [vmem:[#allocation48_spill] sm:$0xff] %v5614_v59  ;;  %v5621_v14 = vld [vmem:[%s10901_s3 + $0xc8] sm:$0xff] }
  0xab   :  { %v812_v50 = vadd.f32 %v811_v53, %v810_v16  ;;  %v710_v36 = vadd.f32 %v709_v20, %v708_v2  ;;  %v737_v29 = vmul.f32 %v5614_v59, %v5379_v60  ;;  %11390 = vst [vmem:[#allocation49_spill] sm:$0xff] %v5621_v14  ;;  %v738_v62 = vmul.f32 %v5621_v14, %v5384_v61  ;;  %v5635_v20 = vld [vmem:[%s10901_s3 + $0xd0] sm:$0xff] }
  0xac   :  { %11388 = vst [vmem:[#allocation47_spill] sm:$0xff] %v5601_v48  ;;  %v813_v63 = vsel %vm132_vm0, %v735_v47, 0.0  ;;  %v5626_v24 = vadd.f32 %v660_v12, %v659_v25  ;;  %v5628_v2 = vadd.f32 %v681_v28, %v680_v18  ;;  %v754_v30 = vrot.slane %v753_v51, 2  ;;  %11394 = vst [vmem:[#allocation53_spill] sm:$0xff] %v5635_v20  ;;  %v5642_v25 = vld [vmem:[%s10901_s3 + $0xe0] sm:$0xff] }
  0xad   :  { %v778_v10 = vrot.slane %v777_v26, 4  ;;  %v5630_v4 = vadd.f32 %v694_v22, %v693_v9  ;;  %v767_v44 = vrot.slane %v766_v6, 2  ;;  %v791_v33 = vrot.slane %v790_v52, 4  ;;  %v5682_v48 = vld [vmem:[%s10902_s4 + $0x20] sm:$0xff] }
  0xae   :  { %11391 = vst [vmem:[#allocation50_spill] sm:$0xff] %v5626_v24  ;;  %11392 = vst [vmem:[#allocation51_spill] sm:$0xff] %v5628_v2  ;;  %v803_v32 = vadd.f32 %v802_v57, %v801_v3  ;;  %v739_v16 = vmul.f32 %v5635_v20, %v5426_v31  ;;  %v741_v18 = vmul.f32 %v5642_v25, %v5379_v60  ;;  %v5649_v3 = vld [vmem:[%s10901_s3 + $0xe8] sm:$0xff]  ;;  %v711_v53 = vrot.slane %v710_v36, 1  ;;  %v5659_v60 = vld [vmem:[%s10901_s3 + $0xd8] sm:$0xff] }
  0xaf   :  { %11393 = vst [vmem:[#allocation52_spill] sm:$0xff] %v5630_v4  ;;  %v742_v9 = vmul.f32 %v5649_v3, %v5384_v61  ;;  %v814_v47 = vadd.f32 %v813_v63, %v812_v50  ;;  %v815_v12 = vsel %vm132_vm0, %v736_v0, 0.0  ;;  %v823_v28 = vsel %vm132_vm0, %v737_v29, 0.0  ;;  %v5666_v61 = vld [vmem:[%s10901_s3 + $0xf0] sm:$0xff] }
  0xb0   :  { %v824_v22 = vsel %vm132_vm0, %v738_v62, 0.0  ;;  %v740_v57 = vmul.f32 %v5659_v60, %v5456_v49  ;;  %v743_v50 = vmul.f32 %v5666_v61, %v5426_v31  ;;  %v755_v0 = vadd.f32 %v754_v30, %v753_v51  ;;  %v5673_v62 = vld [vmem:[%s10901_s3 + $0xf8] sm:$0xff]  ;;  %v5687_v31 = vld [vmem:[%s10902_s4 + $0x28] sm:$0xff] }
  0xb1   :  { %v779_v29 = vadd.f32 %v778_v10, %v777_v26  ;;  %v744_v63 = vmul.f32 %v5673_v62, %v5456_v49  ;;  %v5677_v4 = vadd.f32 %v767_v44, %v766_v6  ;;  %v792_v2 = vadd.f32 %v791_v33, %v790_v52 }
  0xb2   :  { %v804_v24 = vrot.slane %v803_v32, 4  ;;  %v816_v51 = vadd.f32 %v815_v12, %v814_v47  ;;  %v825_v26 = vadd.f32 %v824_v22, %v823_v28  ;;  %v836_v30 = vsel %vm132_vm0, %v741_v18, 0.0 }
  0xb3   :  { %v837_v49 = vsel %vm132_vm0, %v742_v9, 0.0  ;;  %v5691_v6 = vadd.f32 %v711_v53, %v710_v36  ;;  %v826_v52 = vsel %vm132_vm0, %v739_v16, 0.0  ;;  %v849_v10 = vmul.f32 %v5396_v55, %v5682_v48  ;;  %v5706_v16 = vld [vmem:[%s10902_s4 + $0x30] sm:$0xff] }
  0xb4   :  { %v850_v44 = vmul.f32 %v5403_v58, %v5687_v31  ;;  %v756_v33 = vrot.slane %v755_v0, 1  ;;  %v780_v23 = vrot.slane %v779_v29, 2  ;;  %v853_v47 = vmul.f32 %v5412_v46, %v5682_v48 }
  0xb5   :  { %11395 = vst [vmem:[#allocation54_spill] sm:$0xff] %v5691_v6  ;;  %v854_v18 = vmul.f32 %v5419_v45, %v5687_v31  ;;  %v793_v12 = vrot.slane %v792_v2, 2  ;;  %v805_v9 = vadd.f32 %v804_v24, %v803_v32  ;;  %v828_v36 = vsel %vm132_vm0, %v740_v57, 0.0 }
  0xb6   :  { %v838_v53 = vadd.f32 %v837_v49, %v836_v30  ;;  %v769_v28 = vrot.slane %v5677_v4, 1  ;;  %v817_v22 = vrot.slane %v816_v51, 4  ;;  %v827_v6 = vadd.f32 %v826_v52, %v825_v26 }
  0xb7   :  { %v839_v11 = vsel %vm132_vm0, %v743_v50, 0.0  ;;  %v851_v43 = vmul.f32 %v5438_v8, %v5706_v16  ;;  %v855_v24 = vmul.f32 %v5447_v7, %v5706_v16  ;;  %v881_v32 = vsel %vm132_vm0, %v849_v10, 0.0  ;;  %v5725_v10 = vld [vmem:[%s10902_s4 + $0x38] sm:$0xff] }
  0xb8   :  { %v882_v57 = vsel %vm132_vm0, %v850_v44, 0.0  ;;  %v857_v30 = vmul.f32 %v5469_v1, %v5682_v48  ;;  %v858_v49 = vmul.f32 %v5476_v38, %v5687_v31  ;;  %v894_v26 = vsel %vm132_vm0, %v853_v47, 0.0 }
  0xb9   :  { %v895_v50 = vsel %vm132_vm0, %v854_v18, 0.0  ;;  %v781_v52 = vadd.f32 %v780_v23, %v779_v29  ;;  %v794_v45 = vadd.f32 %v793_v12, %v792_v2  ;;  %v806_v8 = vrot.slane %v805_v9, 2 }
  0xba   :  { %v840_v46 = vadd.f32 %v839_v11, %v838_v53  ;;  %v818_v44 = vadd.f32 %v817_v22, %v816_v51  ;;  %v829_v7 = vadd.f32 %v828_v36, %v827_v6  ;;  %v841_v1 = vsel %vm132_vm0, %v744_v63, 0.0 }
  0xbb   :  { %v883_v58 = vadd.f32 %v882_v57, %v881_v32  ;;  %v852_v38 = vmul.f32 %v5462_v39, %v5725_v10  ;;  %v856_v47 = vmul.f32 %v5484_v15, %v5725_v10  ;;  %v884_v23 = vsel %vm132_vm0, %v851_v43, 0.0 }
  0xbc   :  { %v896_v2 = vadd.f32 %v895_v50, %v894_v26  ;;  %v859_v11 = vmul.f32 %v5508_v42, %v5706_v16  ;;  %v897_v29 = vsel %vm132_vm0, %v855_v24, 0.0  ;;  %v907_v51 = vsel %vm132_vm0, %v857_v30, 0.0 }
  0xbd   :  { %v908_v6 = vsel %vm132_vm0, %v858_v49, 0.0  ;;  %v5738_v63 = vadd.f32 %v756_v33, %v755_v0  ;;  %v842_v18 = vadd.f32 %v841_v1, %v840_v46  ;;  %v861_v12 = vmul.f32 %v5491_v37, %v5682_v48 }
  0xbe   :  { %v862_v36 = vmul.f32 %v5498_v54, %v5687_v31  ;;  %v782_v43 = vrot.slane %v781_v52, 1  ;;  %v795_v53 = vrot.slane %v794_v45, 1  ;;  %v819_v22 = vrot.slane %v818_v44, 2 }
  0xbf   :  { %11396 = vst [vmem:[#allocation55_spill] sm:$0xff] %v5738_v63  ;;  %v885_v32 = vadd.f32 %v884_v23, %v883_v58  ;;  %v5744_v57 = vadd.f32 %v806_v8, %v805_v9  ;;  %v886_v24 = vsel %vm132_vm0, %v852_v38, 0.0  ;;  %v898_v30 = vadd.f32 %v897_v29, %v896_v2 }
  0xc0   :  { %v909_v26 = vadd.f32 %v908_v6, %v907_v51  ;;  %v830_v49 = vrot.slane %v829_v7, 4  ;;  %v860_v46 = vmul.f32 %v5544_v41, %v5725_v10  ;;  %v899_v1 = vsel %vm132_vm0, %v856_v47, 0.0 }
  0xc1   :  { %v910_v0 = vsel %vm132_vm0, %v859_v11, 0.0  ;;  %v843_v33 = vrot.slane %v842_v18, 4  ;;  %v863_v50 = vmul.f32 %v5515_v5, %v5706_v16  ;;  %v920_v58 = vsel %vm132_vm0, %v861_v12, 0.0 }
  0xc2   :  { %v921_v8 = vsel %vm132_vm0, %v862_v36, 0.0  ;;  %v5756_v38 = vadd.f32 %v769_v28, %v5677_v4  ;;  %v5758_v9 = vadd.f32 %v782_v43, %v781_v52  ;;  %v820_v23 = vadd.f32 %v819_v22, %v818_v44 }
  0xc3   :  { %v887_v2 = vadd.f32 %v886_v24, %v885_v32  ;;  %v865_v47 = vmul.f32 %v5522_v19, %v5682_v48  ;;  %v866_v11 = vmul.f32 %v5532_v17, %v5687_v31  ;;  %v900_v29 = vadd.f32 %v899_v1, %v898_v30 }
  0xc4   :  { %11397 = vst [vmem:[#allocation56_spill] sm:$0xff] %v5756_v38  ;;  %11398 = vst [vmem:[#allocation57_spill] sm:$0xff] %v5758_v9  ;;  %v911_v51 = vadd.f32 %v910_v0, %v909_v26  ;;  %v5764_v6 = vadd.f32 %v795_v53, %v794_v45  ;;  %v808_v12 = vrot.slane %v5744_v57, 1  ;;  %v912_v36 = vsel %vm132_vm0, %v860_v46, 0.0 }
  0xc5   :  { %v922_v4 = vadd.f32 %v921_v8, %v920_v58  ;;  %v831_v28 = vadd.f32 %v830_v49, %v829_v7  ;;  %v844_v52 = vadd.f32 %v843_v33, %v842_v18  ;;  %v864_v44 = vmul.f32 %v5551_v34, %v5725_v10 }
  0xc6   :  { %11399 = vst [vmem:[#allocation58_spill] sm:$0xff] %v5764_v6  ;;  %v923_v43 = vsel %vm132_vm0, %v863_v50, 0.0  ;;  %v821_v22 = vrot.slane %v820_v23, 1  ;;  %v867_v32 = vmul.f32 %v5559_v13, %v5706_v16  ;;  %v869_v45 = vmul.f32 %v5569_v35, %v5682_v48 }
  0xc7   :  { %v888_v53 = vrot.slane %v887_v2, 4  ;;  %v901_v24 = vrot.slane %v900_v29, 4  ;;  %v913_v30 = vadd.f32 %v912_v36, %v911_v51  ;;  %v933_v26 = vsel %vm132_vm0, %v865_v47, 0.0 }
  0xc8   :  { %v934_v7 = vsel %vm132_vm0, %v866_v11, 0.0  ;;  %v870_v18 = vmul.f32 %v5576_v56, %v5687_v31  ;;  %v873_v49 = vmul.f32 %v5614_v59, %v5682_v48  ;;  %v874_v46 = vmul.f32 %v5621_v14, %v5687_v31 }
  0xc9   :  { %v924_v1 = vadd.f32 %v923_v43, %v922_v4  ;;  %v832_v0 = vrot.slane %v831_v28, 2  ;;  %v845_v33 = vrot.slane %v844_v52, 2  ;;  %v868_v50 = vmul.f32 %v5585_v21, %v5725_v10 }
  0xca   :  { %v925_v58 = vsel %vm132_vm0, %v864_v44, 0.0  ;;  %v871_v8 = vmul.f32 %v5594_v40, %v5706_v16  ;;  %v875_v47 = vmul.f32 %v5635_v20, %v5706_v16  ;;  %v889_v11 = vadd.f32 %v888_v53, %v887_v2 }
  0xcb   :  { %v935_v51 = vadd.f32 %v934_v7, %v933_v26  ;;  %v902_v36 = vadd.f32 %v901_v24, %v900_v29  ;;  %v914_v6 = vrot.slane %v913_v30, 4  ;;  %v936_v9 = vsel %vm132_vm0, %v867_v32, 0.0 }
  0xcc   :  { %v946_v4 = vsel %vm132_vm0, %v869_v45, 0.0  ;;  %v926_v43 = vadd.f32 %v925_v58, %v924_v1  ;;  %v947_v38 = vsel %vm132_vm0, %v870_v18, 0.0  ;;  %v959_v63 = vsel %vm132_vm0, %v873_v49, 0.0 }
  0xcd   :  { %v960_v44 = vsel %vm132_vm0, %v874_v46, 0.0  ;;  %v833_v14 = vadd.f32 %v832_v0, %v831_v28  ;;  %v846_v59 = vadd.f32 %v845_v33, %v844_v52  ;;  %v872_v20 = vmul.f32 %v5606_v27, %v5725_v10 }
  0xce   :  { %v876_v2 = vmul.f32 %v5659_v60, %v5725_v10  ;;  %v877_v29 = vmul.f32 %v5642_v25, %v5682_v48  ;;  %v890_v32 = vrot.slane %v889_v11, 2  ;;  %v937_v45 = vadd.f32 %v936_v9, %v935_v51  ;;  %v11403_v51 = vld [vmem:[#allocation32_spill] sm:$0xff] }
  0xcf   :  { %v938_v53 = vsel %vm132_vm0, %v868_v50, 0.0  ;;  %v903_v24 = vrot.slane %v902_v36, 2  ;;  %v915_v26 = vadd.f32 %v914_v6, %v913_v30  ;;  %v948_v7 = vadd.f32 %v947_v38, %v946_v4 }
  0xd0   :  { %v961_v18 = vadd.f32 %v960_v44, %v959_v63  ;;  %v878_v28 = vmul.f32 %v5649_v3, %v5687_v31  ;;  %v927_v52 = vrot.slane %v926_v43, 4  ;;  %v949_v49 = vsel %vm132_vm0, %v871_v8, 0.0  ;;  %v11405_v44 = vld [vmem:[#allocation34_spill] sm:$0xff] }
  0xd1   :  { %v962_v46 = vsel %vm132_vm0, %v875_v47, 0.0  ;;  %v5807_v1 = vadd.f32 %v808_v12, %v5744_v57  ;;  %v5809_v48 = vadd.f32 %v821_v22, %v820_v23  ;;  %v834_v9 = vrot.slane %v833_v14, 1  ;;  %v5819_v57 = vld [vmem:[%s10902_s4 + $0x40] sm:$0xff]  ;;  %v5824_v23 = vld [vmem:[%s10902_s4 + $0x48] sm:$0xff] }
  0xd2   :  { %v879_v0 = vmul.f32 %v5666_v61, %v5706_v16  ;;  %v847_v6 = vrot.slane %v846_v59, 1  ;;  %v891_v38 = vadd.f32 %v890_v32, %v889_v11  ;;  %v939_v63 = vadd.f32 %v938_v53, %v937_v45 }
  0xd3   :  { %11400 = vst [vmem:[#allocation59_spill] sm:$0xff] %v5807_v1  ;;  %11401 = vst [vmem:[#allocation60_spill] sm:$0xff] %v5809_v48  ;;  %v951_v30 = vsel %vm132_vm0, %v872_v20, 0.0  ;;  %v5814_v31 = vadd.f32 %v903_v24, %v902_v36  ;;  %v916_v33 = vrot.slane %v915_v26, 2  ;;  %v950_v50 = vadd.f32 %v949_v49, %v948_v7 }
  0xd4   :  { %v963_v58 = vadd.f32 %v962_v46, %v961_v18  ;;  %v928_v16 = vadd.f32 %v927_v52, %v926_v43  ;;  %v964_v12 = vsel %vm132_vm0, %v876_v2, 0.0  ;;  %v972_v20 = vsel %vm132_vm0, %v877_v29, 0.0  ;;  %v11406_v29 = vld [vmem:[#allocation35_spill] sm:$0xff]  ;;  %v11407_v52 = vld [vmem:[#allocation38_spill] sm:$0xff] }
  0xd5   :  { %v973_v22 = vsel %vm132_vm0, %v878_v28, 0.0  ;;  %v5829_v8 = vadd.f32 %v834_v9, %v833_v14  ;;  %v880_v47 = vmul.f32 %v5673_v62, %v5725_v10  ;;  %v985_v11 = vmul.f32 %v5396_v55, %v5819_v57  ;;  %v5846_v10 = vld [vmem:[%s10902_s4 + $0x50] sm:$0xff] }
  0xd6   :  { %v986_v36 = vmul.f32 %v11403_v51, %v5824_v23  ;;  %v5837_v4 = vadd.f32 %v847_v6, %v846_v59  ;;  %v940_v43 = vrot.slane %v939_v63, 4  ;;  %v989_v2 = vmul.f32 %v11405_v44, %v5819_v57  ;;  %v11408_v46 = vld [vmem:[#allocation39_spill] sm:$0xff] }
  0xd7   :  { %11402 = vst [vmem:[#allocation61_spill] sm:$0xff] %v5829_v8  ;;  %v990_v32 = vmul.f32 %v11406_v29, %v5824_v23  ;;  %v892_v14 = vrot.slane %v891_v38, 1  ;;  %v952_v45 = vadd.f32 %v951_v30, %v950_v50  ;;  %v965_v53 = vadd.f32 %v964_v12, %v963_v58  ;;  %v11409_v50 = vld [vmem:[#allocation41_spill] sm:$0xff]  ;;  %v11410_v12 = vld [vmem:[#allocation42_spill] sm:$0xff] }
  0xd8   :  { %11404 = vst [vmem:[#allocation32_spill] sm:$0xff] %v5837_v4  ;;  %v974_v24 = vadd.f32 %v973_v22, %v972_v20  ;;  %v905_v7 = vrot.slane %v5814_v31, 1  ;;  %v5849_v59 = vadd.f32 %v916_v33, %v915_v26  ;;  %v929_v18 = vrot.slane %v928_v16, 2  ;;  %v5867_v20 = vld [vmem:[%s10902_s4 + $0x58] sm:$0xff] }
  0xd9   :  { %v975_v28 = vsel %vm132_vm0, %v879_v0, 0.0  ;;  %v987_v49 = vmul.f32 %v11407_v52, %v5846_v10  ;;  %v991_v9 = vmul.f32 %v11408_v46, %v5846_v10  ;;  %v1017_v6 = vsel %vm132_vm0, %v985_v11, 0.0 }
  0xda   :  { %v1018_v30 = vsel %vm132_vm0, %v986_v36, 0.0  ;;  %v993_v58 = vmul.f32 %v11409_v50, %v5819_v57  ;;  %v994_v26 = vmul.f32 %v11410_v12, %v5824_v23  ;;  %v1030_v33 = vsel %vm132_vm0, %v989_v2, 0.0 }
  0xdb   :  { %v1031_v0 = vsel %vm132_vm0, %v990_v32, 0.0  ;;  %v941_v22 = vadd.f32 %v940_v43, %v939_v63  ;;  %v953_v4 = vrot.slane %v952_v45, 4  ;;  %v966_v11 = vrot.slane %v965_v53, 4 }
  0xdc   :  { %v976_v8 = vadd.f32 %v975_v28, %v974_v24  ;;  %v977_v36 = vsel %vm132_vm0, %v880_v47, 0.0  ;;  %v988_v48 = vmul.f32 %v5462_v39, %v5867_v20  ;;  %v992_v1 = vmul.f32 %v5484_v15, %v5867_v20 }
  0xdd   :  { %v1019_v2 = vadd.f32 %v1018_v30, %v1017_v6  ;;  %v995_v32 = vmul.f32 %v5508_v42, %v5846_v10  ;;  %v997_v46 = vmul.f32 %v5491_v37, %v5819_v57  ;;  %v1020_v63 = vsel %vm132_vm0, %v987_v49, 0.0 }
  0xde   :  { %v1032_v43 = vadd.f32 %v1031_v0, %v1030_v33  ;;  %v998_v24 = vmul.f32 %v5498_v54, %v5824_v23  ;;  %v1033_v47 = vsel %vm132_vm0, %v991_v9, 0.0  ;;  %v1043_v28 = vsel %vm132_vm0, %v993_v58, 0.0 }
  0xdf   :  { %v1044_v39 = vsel %vm132_vm0, %v994_v26, 0.0  ;;  %v5884_v15 = vadd.f32 %v892_v14, %v891_v38  ;;  %v930_v6 = vadd.f32 %v929_v18, %v928_v16  ;;  %v942_v30 = vrot.slane %v941_v22, 2 }
  0xe0   :  { %v978_v42 = vadd.f32 %v977_v36, %v976_v8  ;;  %v954_v12 = vadd.f32 %v953_v4, %v952_v45  ;;  %v967_v50 = vadd.f32 %v966_v11, %v965_v53  ;;  %v996_v49 = vmul.f32 %v5544_v41, %v5867_v20 }
  0xe1   :  { %11411 = vst [vmem:[#allocation34_spill] sm:$0xff] %v5884_v15  ;;  %v1021_v33 = vadd.f32 %v1020_v63, %v1019_v2  ;;  %v999_v0 = vmul.f32 %v5515_v5, %v5846_v10  ;;  %v1022_v9 = vsel %vm132_vm0, %v988_v48, 0.0  ;;  %v1034_v54 = vadd.f32 %v1033_v47, %v1032_v43 }
  0xe2   :  { %v1045_v58 = vadd.f32 %v1044_v39, %v1043_v28  ;;  %v1035_v26 = vsel %vm132_vm0, %v992_v1, 0.0  ;;  %v1046_v38 = vsel %vm132_vm0, %v995_v32, 0.0  ;;  %v1056_v16 = vsel %vm132_vm0, %v997_v46, 0.0 }
  0xe3   :  { %v1057_v8 = vsel %vm132_vm0, %v998_v24, 0.0  ;;  %v5896_v4 = vadd.f32 %v905_v7, %v5814_v31  ;;  %v979_v14 = vrot.slane %v978_v42, 4  ;;  %v1001_v45 = vmul.f32 %v5522_v19, %v5819_v57 }
  0xe4   :  { %v1002_v48 = vmul.f32 %v5532_v17, %v5824_v23  ;;  %v918_v39 = vrot.slane %v5849_v59, 1  ;;  %v931_v53 = vrot.slane %v930_v6, 1  ;;  %v5903_v1 = vadd.f32 %v942_v30, %v941_v22 }
  0xe5   :  { %11412 = vst [vmem:[#allocation35_spill] sm:$0xff] %v5896_v4  ;;  %v1023_v18 = vadd.f32 %v1022_v9, %v1021_v33  ;;  %v955_v11 = vrot.slane %v954_v12, 2  ;;  %v1036_v46 = vadd.f32 %v1035_v26, %v1034_v54  ;;  %v1047_v36 = vadd.f32 %v1046_v38, %v1045_v58 }
  0xe6   :  { %v1058_v2 = vadd.f32 %v1057_v8, %v1056_v16  ;;  %v968_v32 = vrot.slane %v967_v50, 2  ;;  %v1000_v31 = vmul.f32 %v5551_v34, %v5867_v20  ;;  %v1048_v7 = vsel %vm132_vm0, %v996_v49, 0.0 }
  0xe7   :  { %v1059_v63 = vsel %vm132_vm0, %v999_v0, 0.0  ;;  %v980_v43 = vadd.f32 %v979_v14, %v978_v42  ;;  %v1003_v24 = vmul.f32 %v5559_v13, %v5846_v10  ;;  %v1069_v22 = vsel %vm132_vm0, %v1001_v45, 0.0 }
  0xe8   :  { %v1070_v47 = vsel %vm132_vm0, %v1002_v48, 0.0  ;;  %v5914_v54 = vadd.f32 %v918_v39, %v5849_v59  ;;  %v1005_v28 = vmul.f32 %v5569_v35, %v5819_v57  ;;  %v1006_v30 = vmul.f32 %v5576_v56, %v5824_v23 }
  0xe9   :  { %v1024_v49 = vrot.slane %v1023_v18, 4  ;;  %v5920_v33 = vadd.f32 %v931_v53, %v930_v6  ;;  %v1037_v42 = vrot.slane %v1036_v46, 4  ;;  %v1049_v0 = vadd.f32 %v1048_v7, %v1047_v36 }
  0xea   :  { %11413 = vst [vmem:[#allocation38_spill] sm:$0xff] %v5914_v54  ;;  %v1060_v9 = vadd.f32 %v1059_v63, %v1058_v2  ;;  %v944_v58 = vrot.slane %v5903_v1, 1  ;;  %v956_v26 = vadd.f32 %v955_v11, %v954_v12  ;;  %v1061_v38 = vsel %vm132_vm0, %v1000_v31, 0.0  ;;  %v11415_v12 = vld [vmem:[#allocation48_spill] sm:$0xff] }
  0xeb   :  { %11414 = vst [vmem:[#allocation62_spill] sm:$0xff] %v5920_v33  ;;  %v1071_v16 = vadd.f32 %v1070_v47, %v1069_v22  ;;  %v969_v59 = vadd.f32 %v968_v32, %v967_v50  ;;  %v981_v8 = vrot.slane %v980_v43, 2  ;;  %v1004_v14 = vmul.f32 %v5585_v21, %v5867_v20  ;;  %v11416_v32 = vld [vmem:[#allocation49_spill] sm:$0xff] }
  0xec   :  { %v1072_v45 = vsel %vm132_vm0, %v1003_v24, 0.0  ;;  %v1007_v6 = vmul.f32 %v5594_v40, %v5846_v10  ;;  %v1025_v48 = vadd.f32 %v1024_v49, %v1023_v18  ;;  %v1082_v39 = vsel %vm132_vm0, %v1005_v28, 0.0 }
  0xed   :  { %v1083_v53 = vsel %vm132_vm0, %v1006_v30, 0.0  ;;  %v1009_v11 = vmul.f32 %v11415_v12, %v5819_v57  ;;  %v1038_v36 = vadd.f32 %v1037_v42, %v1036_v46  ;;  %v1050_v2 = vrot.slane %v1049_v0, 4  ;;  %v11417_v46 = vld [vmem:[#allocation53_spill] sm:$0xff] }
  0xee   :  { %v1062_v50 = vadd.f32 %v1061_v38, %v1060_v9  ;;  %v1010_v31 = vmul.f32 %v11416_v32, %v5824_v23  ;;  %v1013_v7 = vmul.f32 %v5642_v25, %v5819_v57  ;;  %v1014_v63 = vmul.f32 %v5649_v3, %v5824_v23 }
  0xef   :  { %v1073_v18 = vadd.f32 %v1072_v45, %v1071_v16  ;;  %v982_v24 = vadd.f32 %v981_v8, %v980_v43  ;;  %v1008_v22 = vmul.f32 %v5606_v27, %v5867_v20  ;;  %v1074_v47 = vsel %vm132_vm0, %v1004_v14, 0.0 }
  0xf0   :  { %v1084_v28 = vadd.f32 %v1083_v53, %v1082_v39  ;;  %v1011_v30 = vmul.f32 %v11417_v46, %v5846_v10  ;;  %v1015_v49 = vmul.f32 %v5666_v61, %v5846_v10  ;;  %v1026_v42 = vrot.slane %v1025_v48, 2 }
  0xf1   :  { %v1085_v57 = vsel %vm132_vm0, %v1007_v6, 0.0  ;;  %v1039_v9 = vrot.slane %v1038_v36, 2  ;;  %v1051_v38 = vadd.f32 %v1050_v2, %v1049_v0  ;;  %v1063_v23 = vrot.slane %v1062_v50, 4 }
  0xf2   :  { %v1095_v43 = vsel %vm132_vm0, %v1009_v11, 0.0  ;;  %v1075_v16 = vadd.f32 %v1074_v47, %v1073_v18  ;;  %v1096_v8 = vsel %vm132_vm0, %v1010_v31, 0.0  ;;  %v1108_v14 = vsel %vm132_vm0, %v1013_v7, 0.0 }
  0xf3   :  { %v1109_v45 = vsel %vm132_vm0, %v1014_v63, 0.0  ;;  %v957_v39 = vrot.slane %v956_v26, 1  ;;  %v970_v53 = vrot.slane %v969_v59, 1  ;;  %v1012_v10 = vmul.f32 %v5659_v60, %v5867_v20 }
  0xf4   :  { %v1086_v33 = vadd.f32 %v1085_v57, %v1084_v28  ;;  %v983_v54 = vrot.slane %v982_v24, 1  ;;  %v1016_v0 = vmul.f32 %v5673_v62, %v5867_v20  ;;  %v5955_v6 = vadd.f32 %v1026_v42, %v1025_v48  ;;  %v5967_v20 = vld [vmem:[%s10902_s4 + $0x60] sm:$0xff]  ;;  %v5972_v48 = vld [vmem:[%s10902_s4 + $0x68] sm:$0xff] }
  0xf5   :  { %v1087_v11 = vsel %vm132_vm0, %v1008_v22, 0.0  ;;  %v5958_v2 = vadd.f32 %v1039_v9, %v1038_v36  ;;  %v1097_v31 = vadd.f32 %v1096_v8, %v1095_v43  ;;  %v1098_v7 = vsel %vm132_vm0, %v1011_v30, 0.0 }
  0xf6   :  { %v1110_v63 = vadd.f32 %v1109_v45, %v1108_v14  ;;  %v1052_v18 = vrot.slane %v1051_v38, 2  ;;  %v5961_v47 = vadd.f32 %v1063_v23, %v1062_v50  ;;  %v1076_v4 = vrot.slane %v1075_v16, 4  ;;  %v11423_v45 = vld [vmem:[#allocation42_spill] sm:$0xff] }
  0xf7   :  { %v1111_v28 = vsel %vm132_vm0, %v1015_v49, 0.0  ;;  %v5975_v36 = vadd.f32 %v944_v58, %v5903_v1  ;;  %v5977_v22 = vadd.f32 %v957_v39, %v956_v26  ;;  %v5979_v50 = vadd.f32 %v970_v53, %v969_v59 }
  0xf8   :  { %v5981_v30 = vadd.f32 %v1087_v11, %v1086_v33  ;;  %v5983_v49 = vadd.f32 %v983_v54, %v982_v24  ;;  %v1028_v42 = vrot.slane %v5955_v6, 1  ;;  %v1121_v57 = vmul.f32 %v5396_v55, %v5967_v20  ;;  %v5995_v33 = vld [vmem:[%s10902_s4 + $0x70] sm:$0xff] }
  0xf9   :  { %11418 = vst [vmem:[#allocation48_spill] sm:$0xff] %v5975_v36  ;;  %11419 = vst [vmem:[#allocation49_spill] sm:$0xff] %v5977_v22  ;;  %v1122_v9 = vmul.f32 %v11403_v51, %v5972_v48  ;;  %v1041_v23 = vrot.slane %v5958_v2, 1  ;;  %v1099_v1 = vadd.f32 %v1098_v7, %v1097_v31  ;;  %v1100_v58 = vsel %vm132_vm0, %v1012_v10, 0.0  ;;  %v11425_v11 = vld [vmem:[#allocation39_spill] sm:$0xff] }
  0xfa   :  { %11420 = vst [vmem:[#allocation53_spill] sm:$0xff] %v5979_v50  ;;  %11421 = vst [vmem:[#allocation63_spill] sm:$0xff] %v5983_v49  ;;  %v1112_v26 = vadd.f32 %v1111_v28, %v1110_v63  ;;  %v5997_v54 = vadd.f32 %v1052_v18, %v1051_v38  ;;  %v1065_v59 = vrot.slane %v5961_v47, 2  ;;  %v6000_v24 = vadd.f32 %v1076_v4, %v1075_v16  ;;  %v6013_v38 = vld [vmem:[%s10902_s4 + $0x78] sm:$0xff]  ;;  %v11422_v4 = vld [vmem:[#allocation41_spill] sm:$0xff] }
  0xfb   :  { %v1113_v55 = vsel %vm132_vm0, %v1016_v0, 0.0  ;;  %v1089_v51 = vrot.slane %v5981_v30, 4  ;;  %v1123_v43 = vmul.f32 %v11407_v52, %v5995_v33  ;;  %v1125_v8 = vmul.f32 %v11405_v44, %v5967_v20  ;;  %v11426_v7 = vld [vmem:[#allocation43_spill] sm:$0xff]  ;;  %v11427_v18 = vld [vmem:[#allocation45_spill] sm:$0xff] }
  0xfc   :  { %v1126_v14 = vmul.f32 %v11406_v29, %v5972_v48  ;;  %v1129_v16 = vmul.f32 %v11422_v4, %v5967_v20  ;;  %v1130_v39 = vmul.f32 %v11423_v45, %v5972_v48  ;;  %v1153_v53 = vsel %vm132_vm0, %v1121_v57, 0.0  ;;  %v11424_v29 = vld [vmem:[#allocation40_spill] sm:$0xff] }
  0xfd   :  { %v1154_v52 = vsel %vm132_vm0, %v1122_v9, 0.0  ;;  %v6021_v10 = vadd.f32 %v1100_v58, %v1099_v1  ;;  %v6023_v44 = vadd.f32 %v1113_v55, %v1112_v26  ;;  %v1124_v0 = vmul.f32 %v11424_v29, %v6013_v38  ;;  %v11428_v9 = vld [vmem:[#allocation44_spill] sm:$0xff] }
  0xfe   :  { %v1127_v31 = vmul.f32 %v11425_v11, %v5995_v33  ;;  %v1128_v63 = vmul.f32 %v11426_v7, %v6013_v38  ;;  %v1131_v28 = vmul.f32 %v11427_v18, %v5995_v33  ;;  %v1133_v57 = vmul.f32 %v5491_v37, %v5967_v20 }
  0xff   :  { %v1134_v1 = vmul.f32 %v11428_v9, %v5972_v48  ;;  %v1137_v58 = vmul.f32 %v5522_v19, %v5967_v20  ;;  %v1155_v26 = vadd.f32 %v1154_v52, %v1153_v53  ;;  %v1166_v55 = vsel %vm132_vm0, %v1125_v8, 0.0 }
 0x100   :  { %v1167_v4 = vsel %vm132_vm0, %v1126_v14, 0.0  ;;  %v1138_v45 = vmul.f32 %v5532_v17, %v5972_v48  ;;  %v1156_v29 = vsel %vm132_vm0, %v1123_v43, 0.0  ;;  %v1179_v11 = vsel %vm132_vm0, %v1129_v16, 0.0 }
 0x101   :  { %v1180_v37 = vsel %vm132_vm0, %v1130_v39, 0.0  ;;  %v1132_v7 = vmul.f32 %v5544_v41, %v6013_v38  ;;  %v1135_v19 = vmul.f32 %v5515_v5, %v5995_v33  ;;  %v1141_v8 = vmul.f32 %v5569_v35, %v5967_v20 }
 0x102   :  { %v1142_v14 = vmul.f32 %v5576_v56, %v5972_v48  ;;  %v1136_v17 = vmul.f32 %v5551_v34, %v6013_v38  ;;  %v1139_v43 = vmul.f32 %v5559_v13, %v5995_v33  ;;  %v1140_v16 = vmul.f32 %v5585_v21, %v6013_v38 }
 0x103   :  { %v1168_v39 = vadd.f32 %v1167_v4, %v1166_v55  ;;  %v1157_v41 = vadd.f32 %v1156_v29, %v1155_v26  ;;  %v1169_v53 = vsel %vm132_vm0, %v1127_v31, 0.0  ;;  %v1181_v5 = vadd.f32 %v1180_v37, %v1179_v11 }
 0x104   :  { %v1182_v52 = vsel %vm132_vm0, %v1131_v28, 0.0  ;;  %v1192_v35 = vsel %vm132_vm0, %v1133_v57, 0.0  ;;  %v1193_v56 = vsel %vm132_vm0, %v1134_v1, 0.0  ;;  %v1205_v18 = vsel %vm132_vm0, %v1137_v58, 0.0 }
 0x105   :  { %v1206_v34 = vsel %vm132_vm0, %v1138_v45, 0.0  ;;  %v1143_v13 = vmul.f32 %v5594_v40, %v5995_v33  ;;  %v1158_v21 = vsel %vm132_vm0, %v1124_v0, 0.0  ;;  %v1218_v9 = vsel %vm132_vm0, %v1141_v8, 0.0 }
 0x106   :  { %v1219_v31 = vsel %vm132_vm0, %v1142_v14, 0.0  ;;  %v1145_v28 = vmul.f32 %v11415_v12, %v5967_v20  ;;  %v1146_v57 = vmul.f32 %v11416_v32, %v5972_v48  ;;  %v1170_v1 = vadd.f32 %v1169_v53, %v1168_v39 }
 0x107   :  { %v1171_v58 = vsel %vm132_vm0, %v1128_v63, 0.0  ;;  %v1183_v26 = vadd.f32 %v1182_v52, %v1181_v5  ;;  %v1184_v55 = vsel %vm132_vm0, %v1132_v7, 0.0  ;;  %v1194_v4 = vadd.f32 %v1193_v56, %v1192_v35 }
 0x108   :  { %v1207_v40 = vadd.f32 %v1206_v34, %v1205_v18  ;;  %v1159_v45 = vadd.f32 %v1158_v21, %v1157_v41  ;;  %v1195_v0 = vsel %vm132_vm0, %v1135_v19, 0.0  ;;  %v1208_v29 = vsel %vm132_vm0, %v1139_v43, 0.0 }
 0x109   :  { %v1220_v11 = vadd.f32 %v1219_v31, %v1218_v9  ;;  %v1090_v37 = vadd.f32 %v1089_v51, %v5981_v30  ;;  %v1102_v12 = vrot.slane %v6021_v10, 4  ;;  %v1144_v32 = vmul.f32 %v5606_v27, %v6013_v38 }
 0x10a   :  { %v1221_v63 = vsel %vm132_vm0, %v1143_v13, 0.0  ;;  %v1115_v8 = vrot.slane %v6023_v44, 4  ;;  %v1147_v7 = vmul.f32 %v11417_v46, %v5995_v33  ;;  %v1231_v14 = vsel %vm132_vm0, %v1145_v28, 0.0 }
 0x10b   :  { %v1232_v19 = vsel %vm132_vm0, %v1146_v57, 0.0  ;;  %v1172_v43 = vadd.f32 %v1171_v58, %v1170_v1  ;;  %v1185_v39 = vadd.f32 %v1184_v55, %v1183_v26  ;;  %v1196_v41 = vadd.f32 %v1195_v0, %v1194_v4 }
 0x10c   :  { %v1209_v30 = vadd.f32 %v1208_v29, %v1207_v40  ;;  %v1160_v51 = vrot.slane %v1159_v45, 4  ;;  %v1197_v53 = vsel %vm132_vm0, %v1136_v17, 0.0  ;;  %v1210_v27 = vsel %vm132_vm0, %v1140_v16, 0.0 }
 0x10d   :  { %v1222_v5 = vadd.f32 %v1221_v63, %v1220_v11  ;;  %v6094_v52 = vadd.f32 %v1028_v42, %v5955_v6  ;;  %v1078_v46 = vrot.slane %v6000_v24, 2  ;;  %v1223_v35 = vsel %vm132_vm0, %v1144_v32, 0.0 }
 0x10e   :  { %v1233_v56 = vadd.f32 %v1232_v19, %v1231_v14  ;;  %v1103_v18 = vadd.f32 %v1102_v12, %v6021_v10  ;;  %v1116_v34 = vadd.f32 %v1115_v8, %v6023_v44  ;;  %v1148_v17 = vmul.f32 %v5659_v60, %v6013_v38 }
 0x10f   :  { %11429 = vst [vmem:[#allocation41_spill] sm:$0xff] %v6094_v52  ;;  %v1234_v16 = vsel %vm132_vm0, %v1147_v7, 0.0  ;;  %v1173_v13 = vrot.slane %v1172_v43, 4  ;;  %v1186_v21 = vrot.slane %v1185_v39, 4  ;;  %v1198_v9 = vadd.f32 %v1197_v53, %v1196_v41 }
 0x110   :  { %v1211_v31 = vadd.f32 %v1210_v27, %v1209_v30  ;;  %v6106_v6 = vadd.f32 %v1041_v23, %v5958_v2  ;;  %v1091_v42 = vrot.slane %v1090_v37, 2  ;;  %v1161_v28 = vadd.f32 %v1160_v51, %v1159_v45 }
 0x111   :  { %v1224_v57 = vadd.f32 %v1223_v35, %v1222_v5  ;;  %v1066_v10 = vadd.f32 %v1065_v59, %v5961_v47  ;;  %v1149_v60 = vmul.f32 %v5642_v25, %v5967_v20  ;;  %v1150_v44 = vmul.f32 %v5649_v3, %v5972_v48 }
 0x112   :  { %11430 = vst [vmem:[#allocation42_spill] sm:$0xff] %v6106_v6  ;;  %v1235_v1 = vadd.f32 %v1234_v16, %v1233_v56  ;;  %v1079_v58 = vadd.f32 %v1078_v46, %v6000_v24  ;;  %v1104_v26 = vrot.slane %v1103_v18, 2  ;;  %v1117_v55 = vrot.slane %v1116_v34, 2  ;;  %v6390_v6 = vld [vmem:[%s10901_s3 + $0xd0] sm:$0xff] }
 0x113   :  { %v1236_v2 = vsel %vm132_vm0, %v1148_v17, 0.0  ;;  %v1174_v23 = vadd.f32 %v1173_v13, %v1172_v43  ;;  %v1187_v4 = vadd.f32 %v1186_v21, %v1185_v39  ;;  %v1199_v40 = vrot.slane %v1198_v9, 4 }
 0x114   :  { %v1212_v45 = vrot.slane %v1211_v31, 4  ;;  %v1054_v0 = vrot.slane %v5997_v54, 1  ;;  %v1092_v47 = vadd.f32 %v1091_v42, %v1090_v37  ;;  %v1162_v59 = vrot.slane %v1161_v28, 2  ;;  %v6155_v42 = vld [vmem:[%s10901_s3 + $0x8] sm:$0xff] }
 0x115   :  { %v1225_v29 = vrot.slane %v1224_v57, 4  ;;  %v1151_v25 = vmul.f32 %v5666_v61, %v5995_v33  ;;  %v1237_v3 = vadd.f32 %v1236_v2, %v1235_v1  ;;  %v1244_v20 = vsel %vm132_vm0, %v1149_v60, 0.0  ;;  %v6166_v60 = vld [vmem:[%s10901_s3 + $0x20] sm:$0xff]  ;;  %v6173_v1 = vld [vmem:[%s10901_s3 + $0x28] sm:$0xff] }
 0x116   :  { %v1245_v48 = vsel %vm132_vm0, %v1150_v44, 0.0  ;;  %v1067_v24 = vrot.slane %v1066_v10, 1  ;;  %v1080_v11 = vrot.slane %v1079_v58, 1  ;;  %v1105_v12 = vadd.f32 %v1104_v26, %v1103_v18  ;;  %v6180_v26 = vld [vmem:[%s10902_s4 + $0x90] sm:$0xff] }
 0x117   :  { %v1118_v32 = vadd.f32 %v1117_v55, %v1116_v34  ;;  %v1175_v63 = vrot.slane %v1174_v23, 2  ;;  %v1188_v8 = vrot.slane %v1187_v4, 2  ;;  %v1200_v7 = vadd.f32 %v1199_v40, %v1198_v9  ;;  %v6148_v9 = vld [vmem:[%s10901_s3] sm:$0xff] }
 0x118   :  { %v1213_v14 = vadd.f32 %v1212_v45, %v1211_v31  ;;  %v1093_v19 = vrot.slane %v1092_v47, 1  ;;  %v1163_v37 = vadd.f32 %v1162_v59, %v1161_v28  ;;  %v1226_v43 = vadd.f32 %v1225_v29, %v1224_v57 }
 0x119   :  { %v1246_v39 = vadd.f32 %v1245_v48, %v1244_v20  ;;  %v6123_v41 = vadd.f32 %v1054_v0, %v5997_v54  ;;  %v1152_v61 = vmul.f32 %v5673_v62, %v6013_v38  ;;  %v1238_v33 = vrot.slane %v1237_v3, 4  ;;  %v6135_v54 = vld [vmem:[%s10902_s4 + $0x80] sm:$0xff]  ;;  %v6140_v62 = vld [vmem:[%s10902_s4 + $0x88] sm:$0xff] }
 0x11a   :  { %v1247_v30 = vsel %vm132_vm0, %v1151_v25, 0.0  ;;  %v6128_v51 = vadd.f32 %v1067_v24, %v1066_v10  ;;  %v6130_v53 = vadd.f32 %v1080_v11, %v1079_v58  ;;  %v1106_v27 = vrot.slane %v1105_v12, 1  ;;  %v6194_v25 = vld [vmem:[%s10901_s3 + $0x30] sm:$0xff]  ;;  %v6203_v24 = vld [vmem:[%s10901_s3 + $0x40] sm:$0xff] }
 0x11b   :  { %11431 = vst [vmem:[#allocation40_spill] sm:$0xff] %v6123_v41  ;;  %v1119_v5 = vrot.slane %v1118_v32, 1  ;;  %v1176_v46 = vadd.f32 %v1175_v63, %v1174_v23  ;;  %v1189_v35 = vadd.f32 %v1188_v8, %v1187_v4  ;;  %v1201_v56 = vrot.slane %v1200_v7, 2 }
 0x11c   :  { %11432 = vst [vmem:[#allocation39_spill] sm:$0xff] %v6128_v51  ;;  %11433 = vst [vmem:[#allocation43_spill] sm:$0xff] %v6130_v53  ;;  %v1214_v18 = vrot.slane %v1213_v14, 2  ;;  %v6142_v38 = vadd.f32 %v1093_v19, %v1092_v47  ;;  %v1164_v34 = vrot.slane %v1163_v37, 1  ;;  %v1227_v17 = vrot.slane %v1226_v43, 2  ;;  %v6187_v47 = vld [vmem:[%s10901_s3 + $0x10] sm:$0xff] }
 0x11d   :  { %v1248_v16 = vadd.f32 %v1247_v30, %v1246_v39  ;;  %v1239_v13 = vadd.f32 %v1238_v33, %v1237_v3  ;;  %v1249_v21 = vsel %vm132_vm0, %v1152_v61, 0.0  ;;  %v1257_v31 = vmul.f32 %v6148_v9, %v6135_v54  ;;  %v6228_v33 = vld [vmem:[%s10901_s3 + $0x18] sm:$0xff] }
 0x11e   :  { %11434 = vst [vmem:[#allocation45_spill] sm:$0xff] %v6142_v38  ;;  %v1258_v28 = vmul.f32 %v6155_v42, %v6140_v62  ;;  %v6159_v57 = vadd.f32 %v1106_v27, %v1105_v12  ;;  %v6161_v10 = vadd.f32 %v1119_v5, %v1118_v32  ;;  %v1261_v44 = vmul.f32 %v6166_v60, %v6135_v54  ;;  %v6210_v12 = vld [vmem:[%s10901_s3 + $0x48] sm:$0xff]  ;;  %v6235_v5 = vld [vmem:[%s10901_s3 + $0x38] sm:$0xff] }
 0x11f   :  { %v1262_v58 = vmul.f32 %v6173_v1, %v6140_v62  ;;  %v1177_v55 = vrot.slane %v1176_v46, 1  ;;  %v1190_v2 = vrot.slane %v1189_v35, 1  ;;  %v1202_v23 = vadd.f32 %v1201_v56, %v1200_v7  ;;  %v6219_v7 = vld [vmem:[%s10902_s4 + $0x98] sm:$0xff] }
 0x120   :  { %11435 = vst [vmem:[#allocation44_spill] sm:$0xff] %v6159_v57  ;;  %11436 = vst [vmem:[#allocation64_spill] sm:$0xff] %v6161_v10  ;;  %v1215_v4 = vadd.f32 %v1214_v18, %v1213_v14  ;;  %v6182_v40 = vadd.f32 %v1164_v34, %v1163_v37  ;;  %v1228_v45 = vadd.f32 %v1227_v17, %v1226_v43  ;;  %v1240_v29 = vrot.slane %v1239_v13, 2  ;;  %v6369_v51 = vld [vmem:[%s10901_s3 + $0xb8] sm:$0xff] }
 0x121   :  { %v1250_v0 = vadd.f32 %v1249_v21, %v1248_v16  ;;  %v1259_v59 = vmul.f32 %v6187_v47, %v6180_v26  ;;  %v1263_v3 = vmul.f32 %v6194_v25, %v6180_v26  ;;  %v1289_v20 = vsel %vm132_vm0, %v1257_v31, 0.0 }
 0x122   :  { %11437 = vst [vmem:[#allocation65_spill] sm:$0xff] %v6182_v40  ;;  %v1290_v48 = vsel %vm132_vm0, %v1258_v28, 0.0  ;;  %v1265_v11 = vmul.f32 %v6203_v24, %v6135_v54  ;;  %v1266_v32 = vmul.f32 %v6210_v12, %v6140_v62  ;;  %v1302_v63 = vsel %vm132_vm0, %v1261_v44, 0.0 }
 0x123   :  { %v1303_v8 = vsel %vm132_vm0, %v1262_v58, 0.0  ;;  %v6221_v14 = vadd.f32 %v1177_v55, %v1176_v46  ;;  %v6223_v19 = vadd.f32 %v1190_v2, %v1189_v35  ;;  %v1203_v37 = vrot.slane %v1202_v23, 1  ;;  %v6242_v35 = vld [vmem:[%s10901_s3 + $0x50] sm:$0xff]  ;;  %v6259_v58 = vld [vmem:[%s10901_s3 + $0x60] sm:$0xff] }
 0x124   :  { %v1216_v43 = vrot.slane %v1215_v4, 1  ;;  %v1229_v39 = vrot.slane %v1228_v45, 1  ;;  %v1251_v61 = vrot.slane %v1250_v0, 4  ;;  %v1260_v30 = vmul.f32 %v6228_v33, %v6219_v7 }
 0x125   :  { %11438 = vst [vmem:[#allocation66_spill] sm:$0xff] %v6221_v14  ;;  %11439 = vst [vmem:[#allocation67_spill] sm:$0xff] %v6223_v19  ;;  %v1291_v27 = vadd.f32 %v1290_v48, %v1289_v20  ;;  %v1264_v46 = vmul.f32 %v6235_v5, %v6219_v7  ;;  %v1267_v56 = vmul.f32 %v6242_v35, %v6180_v26  ;;  %v1292_v18 = vsel %vm132_vm0, %v1259_v59, 0.0  ;;  %v6275_v59 = vld [vmem:[%s10901_s3 + $0x58] sm:$0xff]  ;;  %v6282_v20 = vld [vmem:[%s10901_s3 + $0x70] sm:$0xff] }
 0x126   :  { %v1304_v34 = vadd.f32 %v1303_v8, %v1302_v63  ;;  %v6247_v17 = vadd.f32 %v1240_v29, %v1239_v13  ;;  %v1305_v16 = vsel %vm132_vm0, %v1263_v3, 0.0  ;;  %v1315_v21 = vsel %vm132_vm0, %v1265_v11, 0.0  ;;  %v6266_v13 = vld [vmem:[%s10901_s3 + $0x68] sm:$0xff]  ;;  %11443 = vst [vmem:[#allocation71_spill] sm:$0xff] %v6282_v20  ;;  %v6291_v63 = vld [vmem:[%s10901_s3 + $0x78] sm:$0xff]  ;;  %v6351_v14 = vld [vmem:[%s10901_s3 + $0xc0] sm:$0xff] }
 0x127   :  { %v1316_v31 = vsel %vm132_vm0, %v1266_v32, 0.0  ;;  %v6252_v28 = vadd.f32 %v1203_v37, %v1202_v23  ;;  %v6254_v44 = vadd.f32 %v1216_v43, %v1215_v4  ;;  %v1269_v55 = vmul.f32 %v6259_v58, %v6135_v54  ;;  %11444 = vst [vmem:[#allocation72_spill] sm:$0xff] %v6291_v63 }
 0x128   :  { %v1270_v2 = vmul.f32 %v6266_v13, %v6140_v62  ;;  %v6270_v23 = vadd.f32 %v1229_v39, %v1228_v45  ;;  %v1252_v4 = vadd.f32 %v1251_v61, %v1250_v0  ;;  %v1268_v29 = vmul.f32 %v6275_v59, %v6219_v7  ;;  %v6300_v39 = vld [vmem:[%s10901_s3 + $0x80] sm:$0xff] }
 0x129   :  { %11440 = vst [vmem:[#allocation68_spill] sm:$0xff] %v6252_v28  ;;  %11441 = vst [vmem:[#allocation69_spill] sm:$0xff] %v6254_v44  ;;  %v1293_v3 = vadd.f32 %v1292_v18, %v1291_v27  ;;  %v1271_v48 = vmul.f32 %v6282_v20, %v6180_v26  ;;  %v1294_v45 = vsel %vm132_vm0, %v1260_v30, 0.0  ;;  %v1306_v0 = vadd.f32 %v1305_v16, %v1304_v34  ;;  %v6307_v30 = vld [vmem:[%s10901_s3 + $0x88] sm:$0xff]  ;;  %v6316_v34 = vld [vmem:[%s10901_s3 + $0x90] sm:$0xff] }
 0x12a   :  { %11442 = vst [vmem:[#allocation70_spill] sm:$0xff] %v6270_v23  ;;  %v1317_v11 = vadd.f32 %v1316_v31, %v1315_v21  ;;  %v1272_v8 = vmul.f32 %v6291_v63, %v6219_v7  ;;  %v1307_v37 = vsel %vm132_vm0, %v1264_v46, 0.0  ;;  %v1318_v43 = vsel %vm132_vm0, %v1267_v56, 0.0  ;;  %v6323_v21 = vld [vmem:[%s10901_s3 + $0x98] sm:$0xff]  ;;  %v6337_v23 = vld [vmem:[%s10901_s3 + $0xa8] sm:$0xff] }
 0x12b   :  { %v1273_v61 = vmul.f32 %v6300_v39, %v6135_v54  ;;  %v1274_v27 = vmul.f32 %v6307_v30, %v6140_v62  ;;  %v1328_v46 = vsel %vm132_vm0, %v1269_v55, 0.0  ;;  %v1329_v56 = vsel %vm132_vm0, %v1270_v2, 0.0  ;;  %v6330_v2 = vld [vmem:[%s10901_s3 + $0xa0] sm:$0xff] }
 0x12c   :  { %v1253_v18 = vrot.slane %v1252_v4, 2  ;;  %v1275_v16 = vmul.f32 %v6316_v34, %v6180_v26  ;;  %v1276_v31 = vmul.f32 %v6323_v21, %v6219_v7  ;;  %v1295_v55 = vadd.f32 %v1294_v45, %v1293_v3  ;;  %v6344_v3 = vld [vmem:[%s10901_s3 + $0xb0] sm:$0xff] }
 0x12d   :  { %v1277_v32 = vmul.f32 %v6330_v2, %v6135_v54  ;;  %v1278_v44 = vmul.f32 %v6337_v23, %v6140_v62  ;;  %v1308_v28 = vadd.f32 %v1307_v37, %v1306_v0  ;;  %v1319_v19 = vadd.f32 %v1318_v43, %v1317_v11  ;;  %v6359_v11 = vld [vmem:[%s10901_s3 + $0xc8] sm:$0xff] }
 0x12e   :  { %v1279_v45 = vmul.f32 %v6344_v3, %v6180_v26  ;;  %v1281_v40 = vmul.f32 %v6351_v14, %v6135_v54  ;;  %v1320_v57 = vsel %vm132_vm0, %v1268_v29, 0.0  ;;  %v1330_v0 = vadd.f32 %v1329_v56, %v1328_v46  ;;  %v6376_v46 = vld [vmem:[%s10901_s3 + $0xe0] sm:$0xff] }
 0x12f   :  { %v1282_v37 = vmul.f32 %v6359_v11, %v6140_v62  ;;  %v1331_v43 = vsel %vm132_vm0, %v1271_v48, 0.0  ;;  %v1341_v38 = vsel %vm132_vm0, %v1273_v61, 0.0  ;;  %v1342_v53 = vsel %vm132_vm0, %v1274_v27, 0.0  ;;  %11445 = vst [vmem:[#allocation73_spill] sm:$0xff] %v6376_v46  ;;  %v6383_v61 = vld [vmem:[%s10901_s3 + $0xe8] sm:$0xff] }
 0x130   :  { %v1280_v29 = vmul.f32 %v6369_v51, %v6219_v7  ;;  %v1285_v48 = vmul.f32 %v6376_v46, %v6135_v54  ;;  %11446 = vst [vmem:[#allocation74_spill] sm:$0xff] %v6383_v61  ;;  %v1286_v27 = vmul.f32 %v6383_v61, %v6140_v62  ;;  %v1296_v56 = vrot.slane %v1295_v55, 4  ;;  %v6403_v61 = vld [vmem:[%s10901_s3 + $0xf0] sm:$0xff] }
 0x131   :  { %v1254_v41 = vadd.f32 %v1253_v18, %v1252_v4  ;;  %v1283_v10 = vmul.f32 %v6390_v6, %v6180_v26  ;;  %v1309_v52 = vrot.slane %v1308_v28, 4  ;;  %v1321_v54 = vadd.f32 %v1320_v57, %v1319_v19  ;;  %11447 = vst [vmem:[#allocation75_spill] sm:$0xff] %v6403_v61 }
 0x132   :  { %v1332_v50 = vadd.f32 %v1331_v43, %v1330_v0  ;;  %v1333_v22 = vsel %vm132_vm0, %v1272_v8, 0.0  ;;  %v1343_v36 = vadd.f32 %v1342_v53, %v1341_v38  ;;  %v1344_v49 = vsel %vm132_vm0, %v1275_v16, 0.0 }
 0x133   :  { %v1354_v62 = vsel %vm132_vm0, %v1277_v32, 0.0  ;;  %v1355_v4 = vsel %vm132_vm0, %v1278_v44, 0.0  ;;  %v1367_v18 = vsel %vm132_vm0, %v1281_v40, 0.0  ;;  %v1368_v15 = vsel %vm132_vm0, %v1282_v37, 0.0  ;;  %v6412_v40 = vld [vmem:[%s10901_s3 + $0xd8] sm:$0xff] }
 0x134   :  { %v1287_v57 = vmul.f32 %v6403_v61, %v6180_v26  ;;  %v1297_v19 = vadd.f32 %v1296_v56, %v1295_v55  ;;  %v1380_v53 = vsel %vm132_vm0, %v1285_v48, 0.0  ;;  %v1381_v38 = vsel %vm132_vm0, %v1286_v27, 0.0 }
 0x135   :  { %v1255_v32 = vrot.slane %v1254_v41, 1  ;;  %v1284_v44 = vmul.f32 %v6412_v40, %v6219_v7  ;;  %v1310_v8 = vadd.f32 %v1309_v52, %v1308_v28  ;;  %v1322_v16 = vrot.slane %v1321_v54, 4 }
 0x136   :  { %v6416_v0 = vadd.f32 %v1333_v22, %v1332_v50  ;;  %v1345_v37 = vadd.f32 %v1344_v49, %v1343_v36  ;;  %v1356_v26 = vadd.f32 %v1355_v4, %v1354_v62  ;;  %v1369_v55 = vadd.f32 %v1368_v15, %v1367_v18  ;;  %v6429_v22 = vld [vmem:[%s10901_s3 + $0xf8] sm:$0xff] }
 0x137   :  { %v1346_v43 = vsel %vm132_vm0, %v1276_v31, 0.0  ;;  %v1357_v48 = vsel %vm132_vm0, %v1279_v45, 0.0  ;;  %v1370_v27 = vsel %vm132_vm0, %v1283_v10, 0.0  ;;  %v1382_v56 = vadd.f32 %v1381_v38, %v1380_v53  ;;  %v6447_v31 = vld [vmem:[%s10902_s4 + $0xa8] sm:$0xff] }
 0x138   :  { %v11448_v61 = vrot.slane %v6247_v17, 1  ;;  %v1288_v15 = vmul.f32 %v6429_v22, %v6219_v7  ;;  %v1298_v36 = vrot.slane %v1297_v19, 2  ;;  %v1383_v50 = vsel %vm132_vm0, %v1287_v57, 0.0 }
 0x139   :  { %v6434_v49 = vadd.f32 %v1255_v32, %v1254_v41  ;;  %v1311_v52 = vrot.slane %v1310_v8, 2  ;;  %v6436_v10 = vadd.f32 %v1322_v16, %v1321_v54  ;;  %v1359_v28 = vsel %vm132_vm0, %v1280_v29, 0.0  ;;  %v6467_v32 = vld [vmem:[%s10902_s4 + $0xb0] sm:$0xff] }
 0x13a   :  { %v6424_v46 = vadd.f32 %v11448_v61, %v6247_v17  ;;  %v6442_v17 = vld [vmem:[%s10902_s4 + $0xa0] sm:$0xff]  ;;  %v6450_v45 = vadd.f32 %v1346_v43, %v1345_v37  ;;  %v1358_v41 = vadd.f32 %v1357_v48, %v1356_v26  ;;  %v1371_v61 = vadd.f32 %v1370_v27, %v1369_v55  ;;  %v6479_v26 = vld [vmem:[%s10902_s4 + $0xb8] sm:$0xff] }
 0x13b   :  { %11450 = vst [vmem:[#allocation77_spill] sm:$0xff] %v6434_v49  ;;  %v1372_v54 = vsel %vm132_vm0, %v1284_v44, 0.0  ;;  %v1384_v62 = vadd.f32 %v1383_v50, %v1382_v56  ;;  %v1393_v29 = vmul.f32 %v6148_v9, %v6442_v17  ;;  %v1394_v4 = vmul.f32 %v6155_v42, %v6447_v31 }
 0x13c   :  { %11449 = vst [vmem:[#allocation76_spill] sm:$0xff] %v6424_v46  ;;  %v6457_v18 = vadd.f32 %v1298_v36, %v1297_v19  ;;  %v1385_v57 = vsel %vm132_vm0, %v1288_v15, 0.0  ;;  %v1397_v53 = vmul.f32 %v6166_v60, %v6442_v17  ;;  %v1398_v38 = vmul.f32 %v6173_v1, %v6447_v31 }
 0x13d   :  { %v6469_v44 = vadd.f32 %v1311_v52, %v1310_v8  ;;  %v1401_v19 = vmul.f32 %v6203_v24, %v6442_v17  ;;  %v1402_v37 = vmul.f32 %v6210_v12, %v6447_v31  ;;  %v6482_v43 = vadd.f32 %v1359_v28, %v1358_v41 }
 0x13e   :  { %v6484_v48 = vadd.f32 %v1372_v54, %v1371_v61  ;;  %v1395_v8 = vmul.f32 %v6187_v47, %v6467_v32  ;;  %v6488_v27 = vadd.f32 %v1385_v57, %v1384_v62  ;;  %v1396_v56 = vmul.f32 %v6228_v33, %v6479_v26 }
 0x13f   :  { %v1425_v15 = vsel %vm132_vm0, %v1393_v29, 0.0  ;;  %v1426_v36 = vsel %vm132_vm0, %v1394_v4, 0.0  ;;  %v1399_v50 = vmul.f32 %v6194_v25, %v6467_v32  ;;  %v1403_v52 = vmul.f32 %v6242_v35, %v6467_v32 }
 0x140   :  { %v1438_v28 = vsel %vm132_vm0, %v1397_v53, 0.0  ;;  %v1439_v41 = vsel %vm132_vm0, %v1398_v38, 0.0  ;;  %v1405_v61 = vmul.f32 %v6259_v58, %v6442_v17  ;;  %v1406_v54 = vmul.f32 %v6266_v13, %v6447_v31 }
 0x141   :  { %v1451_v62 = vsel %vm132_vm0, %v1401_v19, 0.0  ;;  %v1452_v29 = vsel %vm132_vm0, %v1402_v37, 0.0  ;;  %v1400_v4 = vmul.f32 %v6235_v5, %v6479_v26  ;;  %v1409_v57 = vmul.f32 %v6300_v39, %v6442_v17 }
 0x142   :  { %v1410_v53 = vmul.f32 %v6307_v30, %v6447_v31  ;;  %v1427_v38 = vadd.f32 %v1426_v36, %v1425_v15  ;;  %v1404_v16 = vmul.f32 %v6275_v59, %v6479_v26  ;;  %v1407_v55 = vmul.f32 %v6282_v20, %v6467_v32 }
 0x143   :  { %v1428_v19 = vsel %vm132_vm0, %v1395_v8, 0.0  ;;  %v1440_v7 = vadd.f32 %v1439_v41, %v1438_v28  ;;  %v1413_v37 = vmul.f32 %v6330_v2, %v6442_v17  ;;  %v1414_v49 = vmul.f32 %v6337_v23, %v6447_v31 }
 0x144   :  { %v1441_v39 = vsel %vm132_vm0, %v1399_v50, 0.0  ;;  %v1453_v46 = vadd.f32 %v1452_v29, %v1451_v62  ;;  %v1408_v30 = vmul.f32 %v6291_v63, %v6479_v26  ;;  %v1454_v15 = vsel %vm132_vm0, %v1403_v52, 0.0 }
 0x145   :  { %v1464_v36 = vsel %vm132_vm0, %v1405_v61, 0.0  ;;  %v1465_v20 = vsel %vm132_vm0, %v1406_v54, 0.0  ;;  %v1411_v8 = vmul.f32 %v6316_v34, %v6467_v32  ;;  %v1429_v28 = vadd.f32 %v1428_v19, %v1427_v38 }
 0x146   :  { %v1477_v2 = vsel %vm132_vm0, %v1409_v57, 0.0  ;;  %v1478_v23 = vsel %vm132_vm0, %v1410_v53, 0.0  ;;  %v1415_v50 = vmul.f32 %v6344_v3, %v6467_v32  ;;  %v1430_v41 = vsel %vm132_vm0, %v1396_v56, 0.0 }
 0x147   :  { %v1442_v62 = vadd.f32 %v1441_v39, %v1440_v7  ;;  %v1443_v52 = vsel %vm132_vm0, %v1400_v4, 0.0  ;;  %v1455_v29 = vadd.f32 %v1454_v15, %v1453_v46  ;;  %v1466_v61 = vadd.f32 %v1465_v20, %v1464_v36 }
 0x148   :  { %v1490_v54 = vsel %vm132_vm0, %v1413_v37, 0.0  ;;  %v1491_v63 = vsel %vm132_vm0, %v1414_v49, 0.0  ;;  %v1412_v34 = vmul.f32 %v6323_v21, %v6479_v26  ;;  %v1456_v57 = vsel %vm132_vm0, %v1404_v16, 0.0 }
 0x149   :  { %v1467_v53 = vsel %vm132_vm0, %v1407_v55, 0.0  ;;  %v1479_v38 = vadd.f32 %v1478_v23, %v1477_v2  ;;  %v1417_v3 = vmul.f32 %v6351_v14, %v6442_v17  ;;  %v1418_v7 = vmul.f32 %v6359_v11, %v6447_v31 }
 0x14a   :  { %v1431_v46 = vadd.f32 %v1430_v41, %v1429_v28  ;;  %v1480_v20 = vsel %vm132_vm0, %v1411_v8, 0.0  ;;  %v1361_v56 = vrot.slane %v6482_v43, 4  ;;  %v1374_v49 = vrot.slane %v6484_v48, 4 }
 0x14b   :  { %v1444_v4 = vadd.f32 %v1443_v52, %v1442_v62  ;;  %v1492_v21 = vadd.f32 %v1491_v63, %v1490_v54  ;;  %v1416_v16 = vmul.f32 %v6369_v51, %v6479_v26  ;;  %v1457_v55 = vadd.f32 %v1456_v57, %v1455_v29 }
 0x14c   :  { %v1468_v19 = vadd.f32 %v1467_v53, %v1466_v61  ;;  %v1493_v37 = vsel %vm132_vm0, %v1415_v50, 0.0  ;;  %v1387_v14 = vrot.slane %v6488_v27, 4  ;;  %v1419_v11 = vmul.f32 %v6390_v6, %v6467_v32 }
 0x14d   :  { %v1469_v39 = vsel %vm132_vm0, %v1408_v30, 0.0  ;;  %v1481_v15 = vadd.f32 %v1480_v20, %v1479_v38  ;;  %v1432_v36 = vrot.slane %v1431_v46, 4  ;;  %v1482_v8 = vsel %vm132_vm0, %v1412_v34, 0.0  ;;  %v11454_v20 = vld [vmem:[#allocation74_spill] sm:$0xff] }
 0x14e   :  { %v1503_v63 = vsel %vm132_vm0, %v1417_v3, 0.0  ;;  %v1504_v28 = vsel %vm132_vm0, %v1418_v7, 0.0  ;;  %v1300_v51 = vrot.slane %v6457_v18, 1  ;;  %v11451_v2 = vrot.slane %v6416_v0, 4 }
 0x14f   :  { %v1445_v50 = vrot.slane %v1444_v4, 4  ;;  %v1494_v41 = vadd.f32 %v1493_v37, %v1492_v21  ;;  %v11452_v6 = vrot.slane %v6450_v45, 4  ;;  %v1458_v62 = vrot.slane %v1457_v55, 4 }
 0x150   :  { %v1336_v23 = vadd.f32 %v11451_v2, %v6416_v0  ;;  %v1470_v52 = vadd.f32 %v1469_v39, %v1468_v19  ;;  %v1495_v29 = vsel %vm132_vm0, %v1416_v16, 0.0  ;;  %v1362_v61 = vadd.f32 %v1361_v56, %v6482_v43 }
 0x151   :  { %v1349_v30 = vadd.f32 %v11452_v6, %v6450_v45  ;;  %v1375_v54 = vadd.f32 %v1374_v49, %v6484_v48  ;;  %v1483_v34 = vadd.f32 %v1482_v8, %v1481_v15  ;;  %v1505_v57 = vadd.f32 %v1504_v28, %v1503_v63  ;;  %v11453_v45 = vld [vmem:[#allocation73_spill] sm:$0xff] }
 0x152   :  { %v1388_v53 = vadd.f32 %v1387_v14, %v6488_v27  ;;  %v1420_v0 = vmul.f32 %v6412_v40, %v6479_v26  ;;  %v1433_v38 = vadd.f32 %v1432_v36, %v1431_v46  ;;  %v1506_v3 = vsel %vm132_vm0, %v1419_v11, 0.0  ;;  %v11455_v46 = vld [vmem:[#allocation75_spill] sm:$0xff] }
 0x153   :  { %v1421_v7 = vmul.f32 %v11453_v45, %v6442_v17  ;;  %v1422_v21 = vmul.f32 %v11454_v20, %v6447_v31  ;;  %v1446_v16 = vadd.f32 %v1445_v50, %v1444_v4  ;;  %v1496_v43 = vadd.f32 %v1495_v29, %v1494_v41 }
 0x154   :  { %v1337_v56 = vrot.slane %v1336_v23, 2  ;;  %v1350_v48 = vrot.slane %v1349_v30, 2  ;;  %v1459_v49 = vadd.f32 %v1458_v62, %v1457_v55  ;;  %v1471_v19 = vrot.slane %v1470_v52, 4 }
 0x155   :  { %v1363_v37 = vrot.slane %v1362_v61, 2  ;;  %v1376_v27 = vrot.slane %v1375_v54, 2  ;;  %v1484_v14 = vrot.slane %v1483_v34, 4  ;;  %v1507_v39 = vadd.f32 %v1506_v3, %v1505_v57 }
 0x156   :  { %v1389_v40 = vrot.slane %v1388_v53, 2  ;;  %v1423_v11 = vmul.f32 %v11455_v46, %v6467_v32  ;;  %v1434_v15 = vrot.slane %v1433_v38, 2  ;;  %v1508_v17 = vsel %vm132_vm0, %v1420_v0, 0.0 }
 0x157   :  { %v1447_v36 = vrot.slane %v1446_v16, 2  ;;  %v1497_v8 = vrot.slane %v1496_v43, 4  ;;  %v1516_v31 = vsel %vm132_vm0, %v1421_v7, 0.0  ;;  %v1517_v4 = vsel %vm132_vm0, %v1422_v21, 0.0 }
 0x158   :  { %v11456_v55 = vrot.slane %v6436_v10, 2  ;;  %v1338_v28 = vadd.f32 %v1337_v56, %v1336_v23  ;;  %v1460_v2 = vrot.slane %v1459_v49, 2  ;;  %v1472_v50 = vadd.f32 %v1471_v19, %v1470_v52 }
 0x159   :  { %v1351_v32 = vadd.f32 %v1350_v48, %v1349_v30  ;;  %v1364_v41 = vadd.f32 %v1363_v37, %v1362_v61  ;;  %v1485_v6 = vadd.f32 %v1484_v14, %v1483_v34  ;;  %v1509_v62 = vadd.f32 %v1508_v17, %v1507_v39 }
 0x15a   :  { %v1325_v63 = vadd.f32 %v11456_v55, %v6436_v10  ;;  %v1377_v29 = vadd.f32 %v1376_v27, %v1375_v54  ;;  %v1390_v57 = vadd.f32 %v1389_v40, %v1388_v53  ;;  %v1424_v0 = vmul.f32 %v6429_v22, %v6479_v26  ;;  %v6633_v55 = vld [vmem:[%s10902_s4 + $0xc8] sm:$0xff] }
 0x15b   :  { %v1518_v3 = vadd.f32 %v1517_v4, %v1516_v31  ;;  %v1435_v45 = vadd.f32 %v1434_v15, %v1433_v38  ;;  %v1448_v7 = vadd.f32 %v1447_v36, %v1446_v16  ;;  %v1498_v20 = vadd.f32 %v1497_v8, %v1496_v43  ;;  %11471 = vst [vmem:[#allocation89_spill] sm:$0xff] %v6633_v55 }
 0x15c   :  { %v1519_v10 = vsel %vm132_vm0, %v1423_v11, 0.0  ;;  %v1313_v23 = vrot.slane %v6469_v44, 1  ;;  %v1326_v30 = vrot.slane %v1325_v63, 1  ;;  %v1461_v52 = vadd.f32 %v1460_v2, %v1459_v49  ;;  %v11507_v2 = vld [vmem:[#allocation16_spill] sm:$0xff] }
 0x15d   :  { %v1473_v61 = vrot.slane %v1472_v50, 2  ;;  %v1339_v54 = vrot.slane %v1338_v28, 1  ;;  %v1352_v34 = vrot.slane %v1351_v32, 1  ;;  %v1486_v53 = vrot.slane %v1485_v6, 2 }
 0x15e   :  { %v1510_v21 = vrot.slane %v1509_v62, 4  ;;  %v1365_v22 = vrot.slane %v1364_v41, 1  ;;  %v1378_v26 = vrot.slane %v1377_v29, 1  ;;  %v1391_v38 = vrot.slane %v1390_v57, 1 }
 0x15f   :  { %v1520_v16 = vadd.f32 %v1519_v10, %v1518_v3  ;;  %v1436_v43 = vrot.slane %v1435_v45, 1  ;;  %v1449_v56 = vrot.slane %v1448_v7, 1  ;;  %v1499_v48 = vrot.slane %v1498_v20, 2 }
 0x160   :  { %v1521_v19 = vsel %vm132_vm0, %v1424_v0, 0.0  ;;  %v6598_v37 = vadd.f32 %v1300_v51, %v6457_v18  ;;  %v6601_v49 = vadd.f32 %v1313_v23, %v6469_v44  ;;  %v1462_v27 = vrot.slane %v1461_v52, 1  ;;  %v6620_v44 = vld [vmem:[%s10902_s4 + $0xc0] sm:$0xff] }
 0x161   :  { %v6603_v14 = vadd.f32 %v1473_v61, %v1472_v50  ;;  %v6605_v39 = vadd.f32 %v1326_v30, %v1325_v63  ;;  %v6607_v40 = vadd.f32 %v1339_v54, %v1338_v28  ;;  %v6609_v46 = vadd.f32 %v1486_v53, %v1485_v6  ;;  %11466 = vst [vmem:[#allocation84_spill] sm:$0xff] %v6620_v44  ;;  %v6638_v63 = vld [vmem:[%s10902_s4 + $0xd0] sm:$0xff]  ;;  %v11496_v53 = vld [vmem:[#allocation13_spill] sm:$0xff] }
 0x162   :  { %11457 = vst [vmem:[#allocation73_spill] sm:$0xff] %v6598_v37  ;;  %11458 = vst [vmem:[#allocation74_spill] sm:$0xff] %v6601_v49  ;;  %v1511_v11 = vadd.f32 %v1510_v21, %v1509_v62  ;;  %v6611_v15 = vadd.f32 %v1352_v34, %v1351_v32  ;;  %v6613_v17 = vadd.f32 %v1365_v22, %v1364_v41  ;;  %v6645_v32 = vstv %s30_s23  ;;  %v6650_v41 = vld [vmem:[%s10902_s4 + $0xd8] sm:$0xff]  ;;  %v11491_v61 = vld [vmem:[#allocation71_spill] sm:$0xff] }
 0x163   :  { %11459 = vst [vmem:[#allocation75_spill] sm:$0xff] %v6603_v14  ;;  %11460 = vst [vmem:[#allocation78_spill] sm:$0xff] %v6605_v39  ;;  %v6615_v36 = vadd.f32 %v1378_v26, %v1377_v29  ;;  %v1522_v18 = vadd.f32 %v1521_v19, %v1520_v16  ;;  %v6622_v51 = vadd.f32 %v1391_v38, %v1390_v57  ;;  %v11499_v38 = vld [vmem:[#allocation5_spill] sm:$0xff]  ;;  %v11513_v37 = vld [vmem:[#allocation22_spill] sm:$0xff] }
 0x164   :  { %11461 = vst [vmem:[#allocation79_spill] sm:$0xff] %v6607_v40  ;;  %11462 = vst [vmem:[#allocation80_spill] sm:$0xff] %v6609_v46  ;;  %v6624_v8 = vadd.f32 %v1436_v43, %v1435_v45  ;;  %v6626_v31 = vadd.f32 %v1449_v56, %v1448_v7  ;;  %v6628_v4 = vadd.f32 %v1499_v48, %v1498_v20  ;;  %v1512_v62 = vrot.slane %v1511_v11, 2  ;;  %v11500_v43 = vld [vmem:[#allocation8_spill] sm:$0xff]  ;;  %v11501_v48 = vld [vmem:[#allocation9_spill] sm:$0xff] }
 0x165   :  { %11463 = vst [vmem:[#allocation81_spill] sm:$0xff] %v6611_v15  ;;  %11464 = vst [vmem:[#allocation82_spill] sm:$0xff] %v6613_v17  ;;  %v6640_v28 = vadd.f32 %v1462_v27, %v1461_v52  ;;  %v1529_v50 = vmul.f32 %v6148_v9, %v6620_v44  ;;  %v1530_v29 = vmul.f32 %v6155_v42, %v6633_v55  ;;  %v1523_v0 = vrot.slane %v1522_v18, 4  ;;  %v11502_v27 = vld [vmem:[#allocation10_spill] sm:$0xff]  ;;  %v11506_v7 = vld [vmem:[#allocation15_spill] sm:$0xff] }
 0x166   :  { %11465 = vst [vmem:[#allocation83_spill] sm:$0xff] %v6615_v36  ;;  %11467 = vst [vmem:[#allocation85_spill] sm:$0xff] %v6622_v51  ;;  %v6657_v57 = vmul.f32 %v6187_v47, %v6638_v63  ;;  %v6661_v9 = vmul.f32 %v6228_v33, %v6650_v41  ;;  %v6665_v3 = vmul.f32 %v6166_v60, %v6620_v44  ;;  %v11481_v33 = vld [vmem:[#allocation6_spill] sm:$0xff]  ;;  %v11510_v15 = vld [vmem:[#allocation19_spill] sm:$0xff] }
 0x167   :  { %11468 = vst [vmem:[#allocation86_spill] sm:$0xff] %v6624_v8  ;;  %11469 = vst [vmem:[#allocation87_spill] sm:$0xff] %v6626_v31  ;;  %v6669_v45 = vmul.f32 %v6173_v1, %v6633_v55  ;;  %v6674_v42 = vmul.f32 %v6194_v25, %v6638_v63  ;;  %v6678_v47 = vmul.f32 %v6235_v5, %v6650_v41  ;;  %v1801_v25 = vlaneseq  ;;  %v11508_v31 = vld [vmem:[#allocation17_spill] sm:$0xff]  ;;  %v11509_v36 = vld [vmem:[#allocation18_spill] sm:$0xff] }
 0x168   :  { %11470 = vst [vmem:[#allocation88_spill] sm:$0xff] %v6628_v4  ;;  %11472 = vst [vmem:[#allocation90_spill] sm:$0xff] %v6638_v63  ;;  %v1813_v20 = vadd.f32 %v6645_v32, %v11481_v33  ;;  %v6684_v60 = vmul.f32 %v6203_v24, %v6620_v44  ;;  %v6688_v1 = vmul.f32 %v6210_v12, %v6633_v55  ;;  %v11488_v24 = vld [vmem:[#allocation7_spill] sm:$0xff]  ;;  %v6726_v26 = vsel %vm132_vm0, %v1530_v29, 0.0  ;;  %v11512_v39 = vld [vmem:[#allocation21_spill] sm:$0xff] }
 0x169   :  { %11473 = vst [vmem:[#allocation91_spill] sm:$0xff] %v6640_v28  ;;  %11474 = vst [vmem:[#allocation92_spill] sm:$0xff] %v6650_v41  ;;  %v6692_v10 = vmul.f32 %v6242_v35, %v6638_v63  ;;  %v6694_v23 = vadd.f32 %v1512_v62, %v1511_v11  ;;  %v6698_v5 = vmul.f32 %v6275_v59, %v6650_v41  ;;  %v11493_v59 = vld [vmem:[#allocation72_spill] sm:$0xff]  ;;  %v11504_v29 = vld [vmem:[#allocation11_spill] sm:$0xff] }
 0x16a   :  { %11475 = vst [vmem:[#allocation93_spill] sm:$0xff] %v6657_v57  ;;  %11476 = vst [vmem:[#allocation94_spill] sm:$0xff] %v6661_v9  ;;  %v6702_v30 = vmul.f32 %v6259_v58, %v6620_v44  ;;  %v1814_v52 = vadd.f32 %v6645_v32, %v11488_v24  ;;  %v6706_v12 = vadd.f32 %v1523_v0, %v1522_v18  ;;  %v6721_v58 = vsel %vm132_vm0, %v1529_v50, 0.0  ;;  %v11503_v18 = vld [vmem:[#allocation14_spill] sm:$0xff]  ;;  %v11514_v14 = vld [vmem:[#allocation23_spill] sm:$0xff] }
 0x16b   :  { %11477 = vst [vmem:[#allocation95_spill] sm:$0xff] %v6665_v3  ;;  %11478 = vst [vmem:[#allocation96_spill] sm:$0xff] %v6669_v45  ;;  %v6710_v35 = vmul.f32 %v6266_v13, %v6633_v55  ;;  %v6714_v54 = vmul.f32 %v11491_v61, %v6638_v63  ;;  %v6718_v34 = vmul.f32 %v11493_v59, %v6650_v41  ;;  %v1900_v22 = vrot.slane %v1813_v20, 7  ;;  %v11516_v41 = vld [vmem:[#allocation25_spill] sm:$0xff]  ;;  %v11519_v9 = vld [vmem:[#allocation28_spill] sm:$0xff] }
 0x16c   :  { %11479 = vst [vmem:[#allocation97_spill] sm:$0xff] %v6674_v42  ;;  %11480 = vst [vmem:[#allocation98_spill] sm:$0xff] %v6678_v47  ;;  %v1820_v21 = vadd.f32 %v6645_v32, %v11496_v53  ;;  %v6728_v13 = vshrl.u32 %v1801_v25, 7  ;;  %v1812_v16 = vadd.f32 %v6645_v32, %v11499_v38  ;;  %v6734_v56 = vadd.f32 %v6645_v32, %v11500_v43  ;;  %v11505_v25 = vld [vmem:[#allocation12_spill] sm:$0xff]  ;;  %v11521_v42 = vld [vmem:[#allocation30_spill] sm:$0xff] }
 0x16d   :  { %11482 = vst [vmem:[#allocation6_spill] sm:$0xff] %v6684_v60  ;;  %11483 = vst [vmem:[#allocation99_spill] sm:$0xff] %v6688_v1  ;;  %v6738_v19 = vadd.f32 %v6645_v32, %v11501_v48  ;;  %v6742_v11 = vadd.f32 %v6645_v32, %v11502_v27  ;;  %v1821_v50 = vadd.f32 %v6645_v32, %v11503_v18  ;;  %v1903_v62 = vrot.slane %v1814_v52, 6  ;;  %v11520_v1 = vld [vmem:[#allocation29_spill] sm:$0xff] }
 0x16e   :  { %11484 = vst [vmem:[#allocation100_spill] sm:$0xff] %v6692_v10  ;;  %11485 = vst [vmem:[#allocation101_spill] sm:$0xff] %v6694_v23  ;;  %v6748_v0 = vadd.f32 %v6645_v32, %v11504_v29  ;;  %v6752_v61 = vadd.f32 %v6645_v32, %v11505_v25  ;;  %v1902_v59 = vsel %vm1901_vm1, %v1900_v22, %v1812_v16  ;;  %v1921_v51 = vrot.slane %v1820_v21, 7  ;;  %v11511_v16 = vld [vmem:[#allocation20_spill] sm:$0xff]  ;;  %v11523_v3 = vld [vmem:[#allocation33_spill] sm:$0xff] }
 0x16f   :  { %11486 = vst [vmem:[#allocation102_spill] sm:$0xff] %v6698_v5  ;;  %11487 = vst [vmem:[#allocation103_spill] sm:$0xff] %v6702_v30  ;;  %v6757_v6 = vadd.f32 %v6645_v32, %v11506_v7  ;;  %v6761_v28 = vadd.f32 %v6645_v32, %v11507_v2  ;;  %v6765_v8 = vadd.f32 %v6645_v32, %v11508_v31  ;;  %v1923_v46 = vrot.slane %v1821_v50, 6  ;;  %v11515_v5 = vld [vmem:[#allocation24_spill] sm:$0xff] }
 0x170   :  { %11489 = vst [vmem:[#allocation7_spill] sm:$0xff] %v6706_v12  ;;  %11490 = vst [vmem:[#allocation104_spill] sm:$0xff] %v6710_v35  ;;  %v6769_v17 = vadd.f32 %v6645_v32, %v11509_v36  ;;  %v6773_v22 = vadd.f32 %v6645_v32, %v11510_v15  ;;  %v1827_v40 = vadd.f32 %v6645_v32, %v11511_v16  ;;  %v1906_v10 = vrot.slane %v6734_v56, 5  ;;  %v11517_v35 = vld [vmem:[#allocation26_spill] sm:$0xff]  ;;  %v11524_v23 = vld [vmem:[#allocation36_spill] sm:$0xff] }
 0x171   :  { %11492 = vst [vmem:[#allocation71_spill] sm:$0xff] %v6714_v54  ;;  %11494 = vst [vmem:[#allocation72_spill] sm:$0xff] %v6718_v34  ;;  %v6779_v49 = vadd.f32 %v6645_v32, %v11512_v39  ;;  %v6783_v4 = vadd.f32 %v6645_v32, %v11513_v37  ;;  %v1905_v21 = vsel %vm1904_vm2, %v1903_v62, %v1902_v59  ;;  %v11518_v59 = vld [vmem:[#allocation27_spill] sm:$0xff]  ;;  %v1909_v55 = vrot.slane %v6738_v19, 4 }
 0x172   :  { %11495 = vst [vmem:[#allocation105_spill] sm:$0xff] %v6721_v58  ;;  %11497 = vst [vmem:[#allocation13_spill] sm:$0xff] %v6726_v26  ;;  %v6788_v34 = vadd.f32 %v6645_v32, %v11514_v14  ;;  %v6792_v54 = vadd.f32 %v6645_v32, %v11515_v5  ;;  %v1922_v47 = vsel %vm1901_vm1, %v1921_v51, %v1813_v20  ;;  %v1935_v20 = vrot.slane %v1821_v50, 7  ;;  %v11522_v26 = vld [vmem:[#allocation31_spill] sm:$0xff]  ;;  %v11525_v50 = vld [vmem:[#allocation37_spill] sm:$0xff] }
 0x173   :  { %11498 = vst [vmem:[#allocation106_spill] sm:$0xff] %v6728_v13  ;;  %v6798_v12 = vadd.f32 %v6645_v32, %v11516_v41  ;;  %v6802_v62 = vadd.f32 %v6645_v32, %v11517_v35  ;;  %v6806_v30 = vadd.f32 %v6645_v32, %v11518_v59  ;;  %v6810_v63 = vadd.f32 %v6645_v32, %v11519_v9  ;;  %v11526_v41 = vld [vmem:[#allocation46_spill] sm:$0xff]  ;;  %v11529_v14 = vld [vmem:[#allocation51_spill] sm:$0xff]  ;;  %v11530_v13 = vld [vmem:[#allocation52_spill] sm:$0xff] }
 0x174   :  { %v6814_v60 = vadd.f32 %v6645_v32, %v11520_v1  ;;  %v1908_v51 = vsel %vm1907_vm3, %v1906_v10, %v1905_v21  ;;  %v6819_v57 = vadd.f32 %v6645_v32, %v11521_v42  ;;  %v6823_v58 = vadd.f32 %v6645_v32, %v11522_v26 }
 0x175   :  { %v1924_v45 = vsel %vm1904_vm2, %v1923_v46, %v1922_v47  ;;  %v6829_v44 = vadd.f32 %v6645_v32, %v11523_v3  ;;  %v6833_v10 = vadd.f32 %v6645_v32, %v11524_v23  ;;  %v6837_v21 = vadd.f32 %v6645_v32, %v11525_v50  ;;  %v11527_v47 = vld [vmem:[#allocation47_spill] sm:$0xff]  ;;  %v11528_v50 = vld [vmem:[#allocation50_spill] sm:$0xff] }
 0x176   :  { %v1925_v42 = vrot.slane %v6757_v6, 5  ;;  %v1842_v15 = vadd.f32 %v6645_v32, %v11526_v41  ;;  %v1911_v1 = vsel %vm1910_vm4, %v1909_v55, %v1908_v51  ;;  %v1937_v46 = vrot.slane %v1827_v40, 6  ;;  %v11531_v51 = vld [vmem:[#allocation54_spill] sm:$0xff] }
 0x177   :  { %v1843_v5 = vadd.f32 %v6645_v32, %v11527_v47  ;;  %v1912_v26 = vrot.slane %v6742_v11, 3  ;;  %v1936_v3 = vsel %vm1901_vm1, %v1935_v20, %v1814_v52  ;;  %v6850_v9 = vadd.f32 %v6645_v32, %v11528_v50 }
 0x178   :  { %v1926_v23 = vsel %vm1907_vm3, %v1925_v42, %v1924_v45  ;;  %v1845_v41 = vadd.f32 %v6645_v32, %v11529_v14  ;;  %v6856_v55 = vadd.f32 %v6645_v32, %v11530_v13  ;;  %v1927_v40 = vrot.slane %v6761_v28, 4 }
 0x179   :  { %v6861_v47 = vadd.f32 %v6645_v32, %v11531_v51  ;;  %v1914_v45 = vsel %vm1913_vm5, %v1912_v26, %v1911_v1  ;;  %v1949_v42 = vrot.slane %v6757_v6, 7  ;;  %v1915_v52 = vrot.slane %v6748_v0, 2 }
 0x17a   :  { %v1928_v14 = vsel %vm1910_vm4, %v1927_v40, %v1926_v23  ;;  %v1938_v13 = vsel %vm1904_vm2, %v1937_v46, %v1936_v3  ;;  %v1929_v50 = vrot.slane %v6765_v8, 3  ;;  %v1939_v32 = vrot.slane %v6779_v49, 5 }
 0x17b   :  { %v1917_v1 = vsel %vm1916_vm6, %v1915_v52, %v1914_v45  ;;  %v1977_v6 = vrot.slane %v6765_v8, 7  ;;  %v1979_v51 = vrot.slane %v6788_v34, 6  ;;  %v1950_v3 = vsel %vm1901_vm1, %v1949_v42, %v6734_v56 }
 0x17c   :  { %v1930_v20 = vsel %vm1913_vm5, %v1929_v50, %v1928_v14  ;;  %v1940_v23 = vsel %vm1907_vm3, %v1939_v32, %v1938_v13  ;;  %v1951_v46 = vrot.slane %v6779_v49, 6  ;;  %v1963_v40 = vrot.slane %v6761_v28, 7 }
 0x17d   :  { %v1978_v45 = vsel %vm1901_vm1, %v1977_v6, %v6742_v11  ;;  %v1981_v52 = vrot.slane %v6810_v63, 5  ;;  %v1983_v8 = vrot.slane %v6829_v44, 4  ;;  %v1985_v59 = vrot.slane %v1842_v15, 3 }
 0x17e   :  { %v1980_v26 = vsel %vm1904_vm2, %v1979_v51, %v1978_v45  ;;  %v1991_v14 = vrot.slane %v6769_v17, 7  ;;  %v1993_v13 = vrot.slane %v6792_v54, 6  ;;  %v1987_v50 = vrot.slane %v1843_v5, 2 }
 0x17f   :  { %v1982_v56 = vsel %vm1907_vm3, %v1981_v52, %v1980_v26  ;;  %v1989_v49 = vrot.slane %v6850_v9, 1  ;;  %v1995_v28 = vrot.slane %v6814_v60, 5  ;;  %v1997_v32 = vrot.slane %v6833_v10, 4 }
 0x180   :  { %v1984_v11 = vsel %vm1910_vm4, %v1983_v8, %v1982_v56  ;;  %v1992_v42 = vsel %vm1901_vm1, %v1991_v14, %v6748_v0  ;;  %v1999_v51 = vrot.slane %v1843_v5, 3  ;;  %v2001_v45 = vrot.slane %v1845_v41, 2 }
 0x181   :  { %v1986_v15 = vsel %vm1913_vm5, %v1985_v59, %v1984_v11  ;;  %v1994_v6 = vsel %vm1904_vm2, %v1993_v13, %v1992_v42  ;;  %v2005_v26 = vrot.slane %v6773_v22, 7  ;;  %v2003_v37 = vrot.slane %v6856_v55, 1 }
 0x182   :  { %v1988_v52 = vsel %vm1916_vm6, %v1987_v50, %v1986_v15  ;;  %v1996_v36 = vsel %vm1907_vm3, %v1995_v28, %v1994_v6  ;;  %v2007_v8 = vrot.slane %v6798_v12, 6  ;;  %v2009_v41 = vrot.slane %v6819_v57, 5 }
 0x183   :  { %v6904_v0 = vsel %vm1919_vm7, %v1989_v49, %v1988_v52  ;;  %v1998_v5 = vsel %vm1910_vm4, %v1997_v32, %v1996_v36  ;;  %v2006_v59 = vsel %vm1901_vm1, %v2005_v26, %v6752_v61  ;;  %v2011_v56 = vrot.slane %v6837_v21, 4 }
 0x184   :  { %v2000_v14 = vsel %vm1913_vm5, %v1999_v51, %v1998_v5  ;;  %v2008_v13 = vsel %vm1904_vm2, %v2007_v8, %v2006_v59  ;;  %v2013_v50 = vrot.slane %v6850_v9, 3  ;;  %v2015_v11 = vrot.slane %v6856_v55, 2 }
 0x185   :  { %v2002_v28 = vsel %vm1916_vm6, %v2001_v45, %v2000_v14  ;;  %v2010_v49 = vsel %vm1907_vm3, %v2009_v41, %v2008_v13  ;;  %v2063_v36 = vrot.slane %v11481_v33, 7  ;;  %v2065_v51 = vrot.slane %v11488_v24, 6 }
 0x186   :  { %v6919_v42 = vsel %vm1919_vm7, %v2003_v37, %v2002_v28  ;;  %v2012_v32 = vsel %vm1910_vm4, %v2011_v56, %v2010_v49  ;;  %v2067_v15 = vrot.slane %v11500_v43, 5  ;;  %v1953_v6 = vrot.slane %v6802_v62, 5 }
 0x187   :  { %v2014_v9 = vsel %vm1913_vm5, %v2013_v50, %v2012_v32  ;;  %v2017_v45 = vrot.slane %v6861_v47, 1  ;;  %v2064_v55 = vsel %vm1901_vm1, %v2063_v36, %v11499_v38  ;;  %v1952_v26 = vsel %vm1904_vm2, %v1951_v46, %v1950_v3 }
 0x188   :  { %v1965_v37 = vrot.slane %v6783_v4, 6  ;;  %v2016_v52 = vsel %vm1916_vm6, %v2015_v11, %v2014_v9  ;;  %v2066_v8 = vsel %vm1904_vm2, %v2065_v51, %v2064_v55  ;;  %v1964_v5 = vsel %vm1901_vm1, %v1963_v40, %v6738_v19 }
 0x189   :  { %v6936_v62 = vsel %vm1919_vm7, %v2017_v45, %v2016_v52  ;;  %v2069_v59 = vrot.slane %v11501_v48, 4  ;;  %v2077_v47 = vrot.slane %v11496_v53, 7  ;;  %v11532_v38 = vrot.slane %v6752_v61, 1 }
 0x18a   :  { %v1943_v41 = vrot.slane %v6788_v34, 3  ;;  %v2068_v14 = vsel %vm1907_vm3, %v2067_v15, %v2066_v8  ;;  %v11533_v19 = vrot.slane %v6769_v17, 2  ;;  %v11534_v13 = vrot.slane %v6783_v4, 4 }
 0x18b   :  { %v6943_v3 = vsel %vm1919_vm7, %v11532_v38, %v1917_v1  ;;  %v1945_v61 = vrot.slane %v6792_v54, 2  ;;  %v1954_v1 = vsel %vm1907_vm3, %v1953_v6, %v1952_v26  ;;  %v1955_v56 = vrot.slane %v6806_v30, 4 }
 0x18c   :  { %v6951_v40 = vsel %vm1916_vm6, %v11533_v19, %v1930_v20  ;;  %v1942_v53 = vsel %vm1910_vm4, %v11534_v13, %v1940_v23  ;;  %v1966_v50 = vsel %vm1904_vm2, %v1965_v37, %v1964_v5  ;;  %v2071_v34 = vrot.slane %v11502_v27, 3  ;;  %v11536_v13 = vld [vmem:[#allocation18_spill] sm:$0xff] }
 0x18d   :  { %v2079_v28 = vrot.slane %v11503_v18, 6  ;;  %v1967_v17 = vrot.slane %v6806_v30, 5  ;;  %v2070_v20 = vsel %vm1910_vm4, %v2069_v59, %v2068_v14  ;;  %v2078_v4 = vsel %vm1901_vm1, %v2077_v47, %v11481_v33  ;;  %v11535_v14 = vld [vmem:[#allocation22_spill] sm:$0xff] }
 0x18e   :  { %v2091_v23 = vrot.slane %v11503_v18, 7  ;;  %v6968_v49 = vsel %vm1913_vm5, %v1943_v41, %v1942_v53  ;;  %v1956_v11 = vsel %vm1910_vm4, %v1955_v56, %v1954_v1  ;;  %v1957_v36 = vrot.slane %v6810_v63, 3  ;;  %v11537_v56 = vld [vmem:[#allocation27_spill] sm:$0xff]  ;;  %v11553_v53 = vld [vmem:[#allocation30_spill] sm:$0xff] }
 0x18f   :  { %v1968_v51 = vsel %vm1907_vm3, %v1967_v17, %v1966_v50  ;;  %v2073_v30 = vrot.slane %v11504_v29, 2  ;;  %v2081_v15 = vrot.slane %v11506_v7, 5  ;;  %v2105_v6 = vrot.slane %v11506_v7, 7 }
 0x190   :  { %v1969_v33 = vrot.slane %v6823_v58, 4  ;;  %v2072_v18 = vsel %vm1913_vm5, %v2071_v34, %v2070_v20  ;;  %v2080_v9 = vsel %vm1904_vm2, %v2079_v28, %v2078_v4  ;;  %v2093_v45 = vrot.slane %v11511_v16, 6  ;;  %v11539_v20 = vld [vmem:[#allocation23_spill] sm:$0xff] }
 0x191   :  { %v6982_v63 = vsel %vm1913_vm5, %v1957_v36, %v1956_v11  ;;  %v1971_v55 = vrot.slane %v6829_v44, 3  ;;  %v2092_v26 = vsel %vm1901_vm1, %v2091_v23, %v11488_v24  ;;  %v2107_v37 = vrot.slane %v11512_v39, 6 }
 0x192   :  { %v6989_v7 = vsel %vm1910_vm4, %v1969_v33, %v1968_v51  ;;  %v2075_v58 = vrot.slane %v11505_v25, 1  ;;  %v2083_v52 = vrot.slane %v11507_v2, 4  ;;  %v2106_v16 = vsel %vm1901_vm1, %v2105_v6, %v11500_v43  ;;  %v11540_v51 = vld [vmem:[#allocation28_spill] sm:$0xff] }
 0x193   :  { %v2074_v8 = vsel %vm1916_vm6, %v2073_v30, %v2072_v18  ;;  %v2082_v5 = vsel %vm1907_vm3, %v2081_v15, %v2080_v9  ;;  %v2095_v59 = vrot.slane %v11512_v39, 5  ;;  %v2119_v24 = vrot.slane %v11507_v2, 7  ;;  %v11538_v39 = vld [vmem:[#allocation106_spill] sm:$0xff]  ;;  %v11541_v15 = vld [vmem:[#allocation33_spill] sm:$0xff]  ;;  %v11542_v18 = vld [vmem:[#allocation31_spill] sm:$0xff] }
 0x194   :  { %v2085_v47 = vrot.slane %v11508_v31, 3  ;;  %v2094_v38 = vsel %vm1904_vm2, %v2093_v45, %v2092_v26  ;;  %v2109_v41 = vrot.slane %v11517_v35, 5  ;;  %v2121_v19 = vrot.slane %v11535_v14, 6  ;;  %v11543_v26 = vld [vmem:[#allocation46_spill] sm:$0xff] }
 0x195   :  { %v2108_v43 = vsel %vm1904_vm2, %v2107_v37, %v2106_v16  ;;  %v2120_v1 = vsel %vm1901_vm1, %v2119_v24, %v11501_v48  ;;  %v2123_v50 = vrot.slane %v11537_v56, 5  ;;  %vm1803_vm8 = vcmp.eq.s32.totalorder %v11538_v39, 0 }
 0x196   :  { %v2076_v2 = vsel %vm1919_vm7, %v2075_v58, %v2074_v8  ;;  %v7011_v34 = vsel %vm1910_vm4, %v2083_v52, %v2082_v5  ;;  %v2097_v35 = vrot.slane %v11535_v14, 4  ;;  %v2122_v28 = vsel %vm1904_vm2, %v2121_v19, %v2120_v1  ;;  %v11544_v52 = vld [vmem:[#allocation47_spill] sm:$0xff]  ;;  %v11545_v5 = vld [vmem:[#allocation24_spill] sm:$0xff]  ;;  %v11547_v14 = vld [vmem:[#allocation29_spill] sm:$0xff] }
 0x197   :  { %v2096_v17 = vsel %vm1907_vm3, %v2095_v59, %v2094_v38  ;;  %v2099_v4 = vrot.slane %v11539_v20, 3  ;;  %v2133_v23 = vrot.slane %v11508_v31, 7  ;;  %v2135_v48 = vrot.slane %v11539_v20, 6  ;;  %v11546_v38 = vld [vmem:[#allocation50_spill] sm:$0xff] }
 0x198   :  { %vm1808_vm9 = vcmp.eq.s32.totalorder %v11538_v39, 5  ;;  %v2110_v11 = vsel %vm1907_vm3, %v2109_v41, %v2108_v43  ;;  %v2111_v36 = vrot.slane %v11537_v56, 4  ;;  %v2137_v30 = vrot.slane %v11540_v51, 5  ;;  %v11548_v43 = vld [vmem:[#allocation36_spill] sm:$0xff] }
 0x199   :  { %v2139_v6 = vrot.slane %v11541_v15, 4  ;;  %vm1809_vm10 = vcmp.eq.s32.totalorder %v11538_v39, 6  ;;  %v2124_v33 = vsel %vm1907_vm3, %v2123_v50, %v2122_v28  ;;  %v2125_v9 = vrot.slane %v11542_v18, 4  ;;  %v11549_v28 = vld [vmem:[#allocation51_spill] sm:$0xff] }
 0x19a   :  { %v2134_v45 = vsel %vm1901_vm1, %v2133_v23, %v11502_v27  ;;  %v2141_v37 = vrot.slane %v11543_v26, 3  ;;  %v2143_v16 = vrot.slane %v11544_v52, 2  ;;  %v2147_v8 = vrot.slane %v11536_v13, 7  ;;  %v11551_v26 = vld [vmem:[#allocation19_spill] sm:$0xff] }
 0x19b   :  { %v2136_v58 = vsel %vm1904_vm2, %v2135_v48, %v2134_v45  ;;  %v2149_v59 = vrot.slane %v11545_v5, 6  ;;  %vm1810_vm11 = vcmp.eq.s32.totalorder %v11538_v39, 7  ;;  %v2145_v41 = vrot.slane %v11546_v38, 1 }
 0x19c   :  { %v2138_v24 = vsel %vm1907_vm3, %v2137_v30, %v2136_v58  ;;  %v2151_v19 = vrot.slane %v11547_v14, 5  ;;  %v2153_v27 = vrot.slane %v11548_v43, 4  ;;  %v2148_v56 = vsel %vm1901_vm1, %v2147_v8, %v11504_v29  ;;  %v11550_v30 = vld [vmem:[#allocation52_spill] sm:$0xff] }
 0x19d   :  { %v2140_v1 = vsel %vm1910_vm4, %v2139_v6, %v2138_v24  ;;  %v2155_v50 = vrot.slane %v11544_v52, 3  ;;  %v2157_v23 = vrot.slane %v11549_v28, 2  ;;  %v2150_v18 = vsel %vm1904_vm2, %v2149_v59, %v2148_v56  ;;  %v11552_v6 = vld [vmem:[#allocation25_spill] sm:$0xff] }
 0x19e   :  { %v2142_v48 = vsel %vm1913_vm5, %v2141_v37, %v2140_v1  ;;  %v2159_v45 = vrot.slane %v11550_v30, 1  ;;  %v2161_v58 = vrot.slane %v11551_v26, 7  ;;  %v2152_v32 = vsel %vm1907_vm3, %v2151_v19, %v2150_v18  ;;  %v11554_v59 = vld [vmem:[#allocation37_spill] sm:$0xff] }
 0x19f   :  { %v2144_v46 = vsel %vm1916_vm6, %v2143_v16, %v2142_v48  ;;  %v2163_v24 = vrot.slane %v11552_v6, 6  ;;  %v2165_v29 = vrot.slane %v11553_v53, 5  ;;  %v2154_v8 = vsel %vm1910_vm4, %v2153_v27, %v2152_v32 }
 0x1a0   :  { %v2146_v52 = vsel %vm1919_vm7, %v2145_v41, %v2144_v46  ;;  %v2162_v37 = vsel %vm1901_vm1, %v2161_v58, %v11505_v25  ;;  %v2167_v1 = vrot.slane %v11554_v59, 4  ;;  %v2156_v56 = vsel %vm1913_vm5, %v2155_v50, %v2154_v8  ;;  %v11555_v46 = vld [vmem:[#allocation54_spill] sm:$0xff] }
 0x1a1   :  { %v2164_v28 = vsel %vm1904_vm2, %v2163_v24, %v2162_v37  ;;  %v2169_v16 = vrot.slane %v11546_v38, 3  ;;  %v2171_v19 = vrot.slane %v11550_v30, 2  ;;  %v2158_v48 = vsel %vm1916_vm6, %v2157_v23, %v2156_v56  ;;  %v7156_v37 = vld [vmem:[%s10901_s3 + $0x80] sm:$0xff]  ;;  %v11564_v56 = vld [vmem:[#allocation95_spill] sm:$0xff] }
 0x1a2   :  { %v2166_v18 = vsel %vm1907_vm3, %v2165_v29, %v2164_v28  ;;  %v2173_v41 = vrot.slane %v11555_v46, 1  ;;  %v7067_v25 = vsel %vm1803_vm8, %v6943_v3, %v2076_v2  ;;  %v2098_v32 = vsel %vm1910_vm4, %v2097_v35, %v2096_v17  ;;  %11562 = vst [vmem:[#allocation9_spill] sm:$0xff] %v7156_v37 }
 0x1a3   :  { %v2113_v27 = vrot.slane %v11540_v51, 3  ;;  %v2160_v50 = vsel %vm1919_vm7, %v2159_v45, %v2158_v48  ;;  %v2168_v38 = vsel %vm1910_vm4, %v2167_v1, %v2166_v18  ;;  %vm1804_vm12 = vcmp.eq.s32.totalorder %v11538_v39, 1 }
 0x1a4   :  { %v2112_v23 = vsel %vm1910_vm4, %v2111_v36, %v2110_v11  ;;  %v2127_v30 = vrot.slane %v11541_v15, 3  ;;  %v2170_v58 = vsel %vm1913_vm5, %v2169_v16, %v2168_v38  ;;  %v7080_v3 = vsel %vm1808_vm9, %v6904_v0, %v2146_v52  ;;  %v11568_v38 = vld [vmem:[#allocation105_spill] sm:$0xff]  ;;  %v11596_v52 = vld [vmem:[#allocation99_spill] sm:$0xff] }
 0x1a5   :  { %11556 = vst [vmem:[#allocation5_spill] sm:$0xff] %v7080_v3  ;;  %vm1805_vm13 = vcmp.eq.s32.totalorder %v11538_v39, 2  ;;  %v2126_v2 = vsel %vm1910_vm4, %v2125_v9, %v2124_v33  ;;  %v2172_v35 = vsel %vm1916_vm6, %v2171_v19, %v2170_v58  ;;  %v7088_v17 = vsel %vm1809_vm10, %v6919_v42, %v2160_v50  ;;  %v11565_v19 = vld [vmem:[#allocation96_spill] sm:$0xff]  ;;  %v11570_v58 = vld [vmem:[#allocation93_spill] sm:$0xff] }
 0x1a6   :  { %4531 = vrcp.f32 %v7067_v25  ;;  %v2086_v11 = vsel %vm1913_vm5, %v2085_v47, %v7011_v34  ;;  %v2101_v0 = vrot.slane %v11545_v5, 2  ;;  %v2115_v36 = vrot.slane %v11547_v14, 2 }
 0x1a7   :  { %v2174_v51 = vsel %vm1919_vm7, %v2173_v41, %v2172_v35  ;;  %v2100_v15 = vsel %vm1913_vm5, %v2099_v4, %v2098_v32  ;;  %v2114_v42 = vsel %vm1913_vm5, %v2113_v27, %v2112_v23  ;;  %v2129_v33 = vrot.slane %v11548_v43, 2  ;;  %v7182_v32 = vld [vmem:[%s10901_s3 + $0x88] sm:$0xff]  ;;  %v11567_v27 = vld [vmem:[#allocation89_spill] sm:$0xff] }
 0x1a8   :  { %v7106_v31 = vsel %vm1810_vm11, %v6936_v62, %v2174_v51  ;;  %v1946_v47 = vsel %vm1916_vm6, %v1945_v61, %v6968_v49  ;;  %v1972_v34 = vsel %vm1913_vm5, %v1971_v55, %v6989_v7  ;;  %v2089_v20 = vrot.slane %v11551_v26, 1  ;;  %11566 = vst [vmem:[#allocation10_spill] sm:$0xff] %v7182_v32  ;;  %v11569_v23 = vld [vmem:[#allocation13_spill] sm:$0xff] }
 0x1a9   :  { %v2128_v4 = vsel %vm1913_vm5, %v2127_v30, %v2126_v2  ;;  %v1973_v9 = vrot.slane %v6833_v10, 2  ;;  %v11557_v5 = vrot.slane %v11536_v13, 2  ;;  %v2103_v14 = vrot.slane %v11552_v6, 1 }
 0x1aa   :  { %v2117_v54 = vrot.slane %v11553_v53, 1  ;;  %v11558_v61 = vrot.slane %v6814_v60, 2  ;;  %v2102_v49 = vsel %vm1916_vm6, %v2101_v0, %v2100_v15  ;;  %v2116_v55 = vsel %vm1916_vm6, %v2115_v36, %v2114_v42  ;;  %v7207_v36 = vld [vmem:[%s10901_s3 + $0x8] sm:$0xff]  ;;  %v7215_v15 = vld [vmem:[%s10901_s3 + $0x10] sm:$0xff] }
 0x1ab   :  { %v2088_v62 = vsel %vm1916_vm6, %v11557_v5, %v2086_v11  ;;  %v2131_v7 = vrot.slane %v11554_v59, 1  ;;  %v1947_v10 = vrot.slane %v6798_v12, 1  ;;  %v1961_v13 = vrot.slane %v6819_v57, 1  ;;  %v11563_v59 = vld [vmem:[#allocation84_spill] sm:$0xff]  ;;  %v7199_v11 = vld [vmem:[%s10901_s3] sm:$0xff]  ;;  %11573 = vst [vmem:[#allocation12_spill] sm:$0xff] %v7207_v36 }
 0x1ac   :  { %v1960_v44 = vsel %vm1916_vm6, %v11558_v61, %v6982_v63  ;;  %v1974_v43 = vsel %vm1916_vm6, %v1973_v9, %v1972_v34  ;;  %v2130_v45 = vsel %vm1916_vm6, %v2129_v33, %v2128_v4  ;;  %vm1806_vm14 = vcmp.eq.s32.totalorder %v11538_v39, 3  ;;  %11571 = vst [vmem:[#allocation14_spill] sm:$0xff] %v7199_v11  ;;  %11575 = vst [vmem:[#allocation16_spill] sm:$0xff] %v7215_v15  ;;  %v7225_v34 = vld [vmem:[%s10901_s3 + $0x18] sm:$0xff] }
 0x1ad   :  { %v11559_v60 = vrot.slane %v6773_v22, 1  ;;  %v1975_v53 = vrot.slane %v6837_v21, 1  ;;  %v2090_v26 = vsel %vm1919_vm7, %v2089_v20, %v2088_v62  ;;  %v1948_v6 = vsel %vm1919_vm7, %v1947_v10, %v1946_v47  ;;  %11577 = vst [vmem:[#allocation20_spill] sm:$0xff] %v7225_v34 }
 0x1ae   :  { %v1962_v12 = vsel %vm1919_vm7, %v1961_v13, %v1960_v44  ;;  %v2104_v57 = vsel %vm1919_vm7, %v2103_v14, %v2102_v49  ;;  %v2118_v24 = vsel %vm1919_vm7, %v2117_v54, %v2116_v55  ;;  %vm1807_vm15 = vcmp.eq.s32.totalorder %v11538_v39, 4 }
 0x1af   :  { %v1934_v63 = vsel %vm1919_vm7, %v11559_v60, %v6951_v40  ;;  %v1976_v29 = vsel %vm1919_vm7, %v1975_v53, %v1974_v43  ;;  %v2132_v22 = vsel %vm1919_vm7, %v2131_v7, %v2130_v45  ;;  %v7150_v40 = vsub.s32 0, %v11538_v39 }
 0x1b0   :  { %v4532_v21 = vpop.eup %4531  ;;  %v7160_v1 = vmul.f32 %v7156_v37, %v11563_v59  ;;  %v1574_v28 = vsel %vm132_vm0, %v11564_v56, 0.0  ;;  %v7166_v16 = vsel %vm1804_vm12, %v1934_v63, %v2090_v26  ;;  %v1575_v48 = vsel %vm132_vm0, %v11565_v19, 0.0 }
 0x1b1   :  { %11560 = vst [vmem:[#allocation8_spill] sm:$0xff] %v7150_v40  ;;  %v7172_v18 = vsel %vm1805_vm13, %v1948_v6, %v2104_v57  ;;  %v7176_v46 = vsel %vm1806_vm14, %v1962_v12, %v2118_v24  ;;  %v2195_v41 = vrot.slane %v4532_v21, %v7150_v40  ;;  %v7186_v50 = vmul.f32 %v7182_v32, %v11567_v27 }
 0x1b2   :  { %v1563_v30 = vadd.f32 %v11569_v23, %v11568_v38  ;;  %v1564_v2 = vsel %vm132_vm0, %v11570_v58, 0.0  ;;  %v7194_v35 = vsel %vm1807_vm15, %v1976_v29, %v2132_v22  ;;  %v2208_v33 = vrot.slane %v7166_v16, %v7150_v40  ;;  %v11591_v58 = vld [vmem:[#allocation97_spill] sm:$0xff] }
 0x1b3   :  { %v7202_v0 = vmul.f32 %v7199_v11, %v2195_v41  ;;  %v7210_v51 = vmul.f32 %v7207_v36, %v2195_v41  ;;  %v7218_v42 = vmul.f32 %v7215_v15, %v2195_v41  ;;  %v1576_v47 = vadd.f32 %v1575_v48, %v1574_v28 }
 0x1b4   :  { %v7228_v20 = vmul.f32 %v7225_v34, %v2195_v41  ;;  %v7232_v4 = vrot.slane %v7172_v18, %v7150_v40  ;;  %v7236_v9 = vrot.slane %v7176_v46, %v7150_v40  ;;  %v7240_v5 = vrot.slane %v7194_v35, %v7150_v40 }
 0x1b5   :  { %11572 = vst [vmem:[#allocation11_spill] sm:$0xff] %v7202_v0  ;;  %11574 = vst [vmem:[#allocation15_spill] sm:$0xff] %v7210_v51  ;;  %v7243_v62 = vmul.f32 %v2208_v33, %v7202_v0  ;;  %v7246_v14 = vmul.f32 %v2208_v33, %v7210_v51  ;;  %v7249_v54 = vmul.f32 %v2208_v33, %v7218_v42  ;;  %v1577_v8 = vsel %vm132_vm0, %v11591_v58, 0.0  ;;  %v7365_v58 = vld [vmem:[%s10901_s3 + $0x90] sm:$0xff] }
 0x1b6   :  { %11576 = vst [vmem:[#allocation17_spill] sm:$0xff] %v7218_v42  ;;  %11578 = vst [vmem:[#allocation21_spill] sm:$0xff] %v7228_v20  ;;  %v7253_v61 = vrot.slane %v7080_v3, %v7150_v40  ;;  %v7256_v44 = vmul.f32 %v2208_v33, %v7228_v20  ;;  %v7260_v49 = vmul.f32 %v7232_v4, %v7202_v0 }
 0x1b7   :  { %v7264_v55 = vmul.f32 %v7232_v4, %v7210_v51  ;;  %v7267_v7 = vmul.f32 %v2195_v41, %v7067_v25  ;;  %v7271_v10 = vmul.f32 %v7232_v4, %v7218_v42  ;;  %v7275_v13 = vmul.f32 %v7232_v4, %v7228_v20  ;;  %11597 = vst [vmem:[#allocation52_spill] sm:$0xff] %v7365_v58 }
 0x1b8   :  { %v7279_v43 = vmul.f32 %v7236_v9, %v7202_v0  ;;  %v2228_v45 = vrot.slane %v7088_v17, %v7150_v40  ;;  %v7285_v60 = vmul.f32 %v7236_v9, %v7210_v51  ;;  %v7289_v25 = vmul.f32 %v7236_v9, %v7218_v42 }
 0x1b9   :  { %v7293_v63 = vmul.f32 %v7236_v9, %v7228_v20  ;;  %v7297_v53 = vmul.f32 %v7240_v5, %v7202_v0  ;;  %v7301_v26 = vmul.f32 %v7240_v5, %v7210_v51  ;;  %v7305_v6 = vmul.f32 %v7240_v5, %v7218_v42 }
 0x1ba   :  { %v7309_v12 = vmul.f32 %v7240_v5, %v7228_v20  ;;  %v2232_v57 = vrot.slane %v7106_v31, %v7150_v40  ;;  %v7315_v24 = vmul.f32 %v7253_v61, %v7202_v0  ;;  %v7319_v29 = vmul.f32 %v7253_v61, %v7210_v51 }
 0x1bb   :  { %11579 = vst [vmem:[#allocation26_spill] sm:$0xff] %v7301_v26  ;;  %11580 = vst [vmem:[#allocation22_spill] sm:$0xff] %v7305_v6  ;;  %v7323_v22 = vmul.f32 %v7253_v61, %v7218_v42  ;;  %v7327_v21 = vmul.f32 %v7253_v61, %v7228_v20  ;;  %v2263_v56 = vmul.f32 %v2228_v45, %v7267_v7 }
 0x1bc   :  { %11581 = vst [vmem:[#allocation18_spill] sm:$0xff] %v7309_v12  ;;  %11582 = vst [vmem:[#allocation27_spill] sm:$0xff] %v7315_v24  ;;  %v7331_v28 = vmul.f32 %v2228_v45, %v7202_v0  ;;  %v7334_v19 = vmul.f32 %v2228_v45, %v7210_v51  ;;  %v7337_v48 = vmul.f32 %v2228_v45, %v7218_v42  ;;  %v7405_v12 = vsub.s32 1, %v11538_v39 }
 0x1bd   :  { %11583 = vst [vmem:[#allocation23_spill] sm:$0xff] %v7319_v29  ;;  %11584 = vst [vmem:[#allocation28_spill] sm:$0xff] %v7323_v22  ;;  %v7340_v41 = vmul.f32 %v2228_v45, %v7228_v20  ;;  %v2268_v38 = vmul.f32 %v2232_v57, %v7267_v7  ;;  %v7344_v23 = vmul.f32 %v2232_v57, %v7202_v0  ;;  %v11595_v45 = vld [vmem:[#allocation6_spill] sm:$0xff]  ;;  %v1588_v0 = vsel %vm132_vm0, %v11596_v52, 0.0  ;;  %v11602_v52 = vld [vmem:[#allocation7_spill] sm:$0xff] }
 0x1be   :  { %11585 = vst [vmem:[#allocation33_spill] sm:$0xff] %v7327_v21  ;;  %11586 = vst [vmem:[#allocation31_spill] sm:$0xff] %v7331_v28  ;;  %v7349_v40 = vmul.f32 %v2232_v57, %v7210_v51  ;;  %v7352_v34 = vmul.f32 %v2232_v57, %v7218_v42  ;;  %v7355_v15 = vmul.f32 %v2232_v57, %v7228_v20  ;;  %v1587_v11 = vsel %vm132_vm0, %v11595_v45, 0.0  ;;  %v11599_v42 = vld [vmem:[#allocation94_spill] sm:$0xff]  ;;  %v11601_v45 = vld [vmem:[#allocation104_spill] sm:$0xff] }
 0x1bf   :  { %11587 = vst [vmem:[#allocation46_spill] sm:$0xff] %v7334_v19  ;;  %11588 = vst [vmem:[#allocation47_spill] sm:$0xff] %v7337_v48  ;;  %v1565_v36 = vadd.f32 %v1564_v2, %v1563_v30  ;;  %v1566_v57 = vsel %vm132_vm0, %v11599_v42, 0.0  ;;  %v11600_v30 = vld [vmem:[#allocation103_spill] sm:$0xff]  ;;  %v1525_v20 = vrot.slane %v11602_v52, 2  ;;  %v11604_v51 = vld [vmem:[#allocation92_spill] sm:$0xff]  ;;  %v1578_v19 = vadd.f32 %v1577_v8, %v1576_v47 }
 0x1c0   :  { %11589 = vst [vmem:[#allocation24_spill] sm:$0xff] %v7340_v41  ;;  %11590 = vst [vmem:[#allocation50_spill] sm:$0xff] %v7344_v23  ;;  %v2238_v23 = vmul.f32 %v2208_v33, %v7267_v7  ;;  %v1600_v2 = vsel %vm132_vm0, %v11600_v30, 0.0  ;;  %v7379_v33 = vld [vmem:[%s10901_s3 + $0x98] sm:$0xff]  ;;  %v7386_v42 = vld [vmem:[%s10901_s3 + $0xa0] sm:$0xff]  ;;  %v1589_v22 = vadd.f32 %v1588_v0, %v1587_v11  ;;  %v1614_v47 = vsel %vm132_vm0, %v7186_v50, 0.0 }
 0x1c1   :  { %11592 = vst [vmem:[#allocation29_spill] sm:$0xff] %v7349_v40  ;;  %11593 = vst [vmem:[#allocation36_spill] sm:$0xff] %v7352_v34  ;;  %v11598_v40 = vld [vmem:[#allocation90_spill] sm:$0xff]  ;;  %v1548_v41 = vmul.f32 %v7379_v33, %v11604_v51  ;;  %v1549_v30 = vmul.f32 %v7386_v42, %v11563_v59  ;;  %v11608_v29 = vld [vmem:[#allocation100_spill] sm:$0xff]  ;;  %v1567_v3 = vadd.f32 %v1566_v57, %v1565_v36 }
 0x1c2   :  { %11594 = vst [vmem:[#allocation51_spill] sm:$0xff] %v7355_v15  ;;  %v1547_v34 = vmul.f32 %v7365_v58, %v11598_v40  ;;  %v1601_v15 = vsel %vm132_vm0, %v11601_v45, 0.0  ;;  %11603 = vst [vmem:[#allocation19_spill] sm:$0xff] %v7379_v33  ;;  %v7393_v45 = vld [vmem:[%s10901_s3 + $0xa8] sm:$0xff]  ;;  %v1590_v24 = vsel %vm132_vm0, %v11608_v29, 0.0  ;;  %v7417_v11 = vld [vmem:[%s10901_s3 + $0xb8] sm:$0xff]  ;;  %v7446_v50 = vsub.f32 %v7106_v31, %v2268_v38 }
 0x1c3   :  { %11605 = vst [vmem:[#allocation25_spill] sm:$0xff] %v7386_v42  ;;  %11606 = vst [vmem:[#allocation30_spill] sm:$0xff] %v7393_v45  ;;  %v1550_v48 = vmul.f32 %v7393_v45, %v11567_v27  ;;  %v11607_v28 = vld [vmem:[#allocation98_spill] sm:$0xff]  ;;  %v1602_v33 = vadd.f32 %v1601_v15, %v1600_v2  ;;  %v7402_v42 = vsub.f32 %v7166_v16, %v2238_v23  ;;  %v7410_v45 = vld [vmem:[%s10901_s3 + $0xb0] sm:$0xff]  ;;  %v1613_v15 = vsel %vm132_vm0, %v7160_v1, 0.0 }
 0x1c4   :  { %v1579_v21 = vsel %vm132_vm0, %v11607_v28, 0.0  ;;  %11609 = vst [vmem:[#allocation37_spill] sm:$0xff] %v7410_v45  ;;  %v1551_v8 = vmul.f32 %v7410_v45, %v11598_v40  ;;  %11610 = vst [vmem:[#allocation54_spill] sm:$0xff] %v7417_v11  ;;  %v7421_v16 = vmul.f32 %v7417_v11, %v11604_v51  ;;  %v11612_v0 = vld [vmem:[#allocation71_spill] sm:$0xff]  ;;  %v1626_v40 = vsel %vm132_vm0, %v1549_v30, 0.0  ;;  %v7437_v51 = vld [vmem:[%s10901_s3 + $0xc0] sm:$0xff] }
 0x1c5   :  { %v1603_v36 = vsel %vm132_vm0, %v11612_v0, 0.0  ;;  %v1627_v29 = vsel %vm132_vm0, %v1550_v48, 0.0  ;;  %v7432_v28 = vsub.f32 %v7088_v17, %v2263_v56  ;;  %11614 = vst [vmem:[#allocation96_spill] sm:$0xff] %v7437_v51  ;;  %v7441_v23 = vmul.f32 %v7437_v51, %v11563_v59  ;;  %11617 = vst [vmem:[#allocation13_spill] sm:$0xff] %v7446_v50  ;;  %v11618_v56 = vld [vmem:[#allocation102_spill] sm:$0xff]  ;;  %v11619_v0 = vld [vmem:[#allocation72_spill] sm:$0xff] }
 0x1c6   :  { %11611 = vst [vmem:[#allocation84_spill] sm:$0xff] %v7421_v16  ;;  %v7443_v1 = vadd.f32 %v1579_v21, %v1578_v19  ;;  %v1591_v57 = vadd.f32 %v1590_v24, %v1589_v22  ;;  %v1568_v2 = vrot.slane %v1567_v3, 4  ;;  %v1604_v48 = vadd.f32 %v1603_v36, %v1602_v33  ;;  %v7469_v33 = vld [vmem:[%s10901_s3 + $0xc8] sm:$0xff] }
 0x1c7   :  { %11613 = vst [vmem:[#allocation95_spill] sm:$0xff] %v7432_v28  ;;  %11615 = vst [vmem:[#allocation89_spill] sm:$0xff] %v7441_v23  ;;  %4533 = vrcp.f32 %v7402_v42  ;;  %v7451_v17 = vrot.slane %v7267_v7, %v7405_v12  ;;  %v1592_v30 = vsel %vm132_vm0, %v11618_v56, 0.0  ;;  %v1605_v59 = vsel %vm132_vm0, %v11619_v0, 0.0 }
 0x1c8   :  { %11616 = vst [vmem:[#allocation105_spill] sm:$0xff] %v7443_v1  ;;  %v1615_v21 = vadd.f32 %v1614_v47, %v1613_v15  ;;  %v1628_v19 = vadd.f32 %v1627_v29, %v1626_v40  ;;  %v7458_v24 = vadd.f32 %v1525_v20, %v11602_v52  ;;  %v1616_v31 = vsel %vm132_vm0, %v1547_v34, 0.0  ;;  %11621 = vst [vmem:[#allocation97_spill] sm:$0xff] %v7469_v33  ;;  %v7572_v20 = vld [vmem:[%s10901_s3 + $0x68] sm:$0xff] }
 0x1c9   :  { %v1629_v22 = vsel %vm132_vm0, %v1551_v8, 0.0  ;;  %v7464_v38 = vrot.slane %v7446_v50, %v7405_v12  ;;  %v7473_v36 = vmul.f32 %v7469_v33, %v11567_v27  ;;  %v7477_v52 = vsel %vm132_vm0, %v1548_v41, 0.0  ;;  %11640 = vst [vmem:[#allocation112_spill] sm:$0xff] %v7572_v20 }
 0x1ca   :  { %11620 = vst [vmem:[#allocation93_spill] sm:$0xff] %v7458_v24  ;;  %11623 = vst [vmem:[#allocation99_spill] sm:$0xff] %v7477_v52  ;;  %v2243_v34 = vmul.f32 %v7232_v4, %v7267_v7  ;;  %v7481_v8 = vadd.f32 %v1568_v2, %v1567_v3  ;;  %v7483_v15 = vadd.f32 %v1592_v30, %v1591_v57  ;;  %v7496_v56 = vsub.s32 2, %v11538_v39  ;;  %v7503_v4 = vld [vmem:[%s10901_s3 + $0x20] sm:$0xff]  ;;  %v7510_v57 = vld [vmem:[%s10901_s3 + $0x28] sm:$0xff] }
 0x1cb   :  { %11622 = vst [vmem:[#allocation6_spill] sm:$0xff] %v7473_v36  ;;  %v7485_v47 = vadd.f32 %v1605_v59, %v1604_v48  ;;  %v2248_v40 = vmul.f32 %v7236_v9, %v7267_v7  ;;  %v7489_v29 = vadd.f32 %v1616_v31, %v1615_v21  ;;  %v7491_v27 = vadd.f32 %v1629_v22, %v1628_v19  ;;  %v7555_v21 = vld [vmem:[%s10901_s3 + $0x58] sm:$0xff]  ;;  %v7565_v22 = vld [vmem:[%s10901_s3 + $0x60] sm:$0xff]  ;;  %v7629_v39 = vld [vmem:[%s10901_s3 + $0xd0] sm:$0xff] }
 0x1cc   :  { %11624 = vst [vmem:[#allocation90_spill] sm:$0xff] %v7481_v8  ;;  %11625 = vst [vmem:[#allocation94_spill] sm:$0xff] %v7483_v15  ;;  %v2253_v41 = vmul.f32 %v7240_v5, %v7267_v7  ;;  %v2258_v3 = vmul.f32 %v7253_v61, %v7267_v7  ;;  %v2279_v9 = vsub.f32 %v7503_v4, %v7243_v62  ;;  %v7517_v61 = vld [vmem:[%s10901_s3 + $0x30] sm:$0xff]  ;;  %v7524_v62 = vld [vmem:[%s10901_s3 + $0x38] sm:$0xff] }
 0x1cd   :  { %11626 = vst [vmem:[#allocation103_spill] sm:$0xff] %v7485_v47  ;;  %11627 = vst [vmem:[#allocation104_spill] sm:$0xff] %v7489_v29  ;;  %v2280_v5 = vsub.f32 %v7510_v57, %v7246_v14  ;;  %v2281_v2 = vsub.f32 %v7517_v61, %v7249_v54  ;;  %v2282_v48 = vsub.f32 %v7524_v62, %v7256_v44  ;;  %v7534_v14 = vld [vmem:[%s10901_s3 + $0x40] sm:$0xff]  ;;  %v7541_v54 = vld [vmem:[%s10901_s3 + $0x48] sm:$0xff] }
 0x1ce   :  { %11628 = vst [vmem:[#allocation7_spill] sm:$0xff] %v7491_v27  ;;  %11629 = vst [vmem:[#allocation92_spill] sm:$0xff] %v7496_v56  ;;  %v7529_v30 = vsub.f32 %v7172_v18, %v2243_v34  ;;  %v7548_v18 = vld [vmem:[%s10901_s3 + $0x50] sm:$0xff]  ;;  %v7560_v31 = vsub.f32 %v7176_v46, %v2248_v40  ;;  %v7586_v34 = vld [vmem:[%s10901_s3 + $0x78] sm:$0xff]  ;;  %v7591_v59 = vsub.f32 %v7194_v35, %v2253_v41 }
 0x1cf   :  { %11630 = vst [vmem:[#allocation98_spill] sm:$0xff] %v7503_v4  ;;  %11631 = vst [vmem:[#allocation100_spill] sm:$0xff] %v7510_v57  ;;  %v7579_v46 = vld [vmem:[%s10901_s3 + $0x70] sm:$0xff]  ;;  %v11646_v4 = vld [vmem:[#allocation5_spill] sm:$0xff]  ;;  %v11677_v6 = vsub.f32 %v7541_v54, %v7264_v55  ;;  %v11678_v26 = vsub.f32 %v7548_v18, %v7271_v10  ;;  %v11682_v55 = vsub.f32 %v7565_v22, %v7279_v43 }
 0x1d0   :  { %11632 = vst [vmem:[#allocation71_spill] sm:$0xff] %v7517_v61  ;;  %11633 = vst [vmem:[#allocation102_spill] sm:$0xff] %v7524_v62  ;;  %v7602_v36 = vsub.f32 %v11646_v4, %v2258_v3  ;;  %v7670_v50 = vrot.slane %v7591_v59, %v7405_v12  ;;  %v11683_v10 = vsub.f32 %v7572_v20, %v7285_v60 }
 0x1d1   :  { %11634 = vst [vmem:[#allocation72_spill] sm:$0xff] %v7534_v14  ;;  %11635 = vst [vmem:[#allocation107_spill] sm:$0xff] %v7541_v54  ;;  %v4534_v44 = vpop.eup %4533  ;;  %v11687_v43 = vsub.f32 %v7586_v34, %v7293_v63  ;;  %v11688_v60 = vsub.f32 %v7156_v37, %v7297_v53  ;;  %v11694_v63 = vld [vmem:[#allocation19_spill] sm:$0xff]  ;;  %v11697_v53 = vld [vmem:[#allocation25_spill] sm:$0xff] }
 0x1d2   :  { %11636 = vst [vmem:[#allocation108_spill] sm:$0xff] %v7548_v18  ;;  %11637 = vst [vmem:[#allocation109_spill] sm:$0xff] %v7555_v21  ;;  %v2357_v0 = vrot.slane %v4534_v44, %v7405_v12  ;;  %v11701_v37 = vld [vmem:[#allocation23_spill] sm:$0xff] }
 0x1d3   :  { %11638 = vst [vmem:[#allocation110_spill] sm:$0xff] %v7560_v31  ;;  %11639 = vst [vmem:[#allocation111_spill] sm:$0xff] %v7565_v22 }
 0x1d4   :  { %11641 = vst [vmem:[#allocation113_spill] sm:$0xff] %v7579_v46  ;;  %11642 = vst [vmem:[#allocation114_spill] sm:$0xff] %v7586_v34  ;;  %v7618_v4 = vmul.f32 %v2357_v0, %v7402_v42  ;;  %v7620_v35 = vmul.f32 %v2357_v0, %v2279_v9  ;;  %v7622_v8 = vmul.f32 %v2357_v0, %v2280_v5 }
 0x1d5   :  { %11643 = vst [vmem:[#allocation115_spill] sm:$0xff] %v7591_v59  ;;  %11647 = vst [vmem:[#allocation5_spill] sm:$0xff] %v7602_v36  ;;  %v7624_v44 = vmul.f32 %v2357_v0, %v2281_v2  ;;  %v7633_v16 = vmul.f32 %v2357_v0, %v2282_v48  ;;  %v2374_v42 = vrot.slane %v7529_v30, %v7405_v12  ;;  %v7658_v0 = vld [vmem:[%s10901_s3 + $0xd8] sm:$0xff] }
 0x1d6   :  { %11656 = vst [vmem:[#allocation116_spill] sm:$0xff] %v7618_v4  ;;  %11657 = vst [vmem:[#allocation117_spill] sm:$0xff] %v7620_v35  ;;  %v7639_v9 = vrot.slane %v7560_v31, %v7405_v12  ;;  %v2395_v5 = vmul.f32 %v7451_v17, %v7618_v4  ;;  %v7645_v2 = vmul.f32 %v7451_v17, %v7620_v35 }
 0x1d7   :  { %11658 = vst [vmem:[#allocation118_spill] sm:$0xff] %v7622_v8  ;;  %11659 = vst [vmem:[#allocation119_spill] sm:$0xff] %v7624_v44  ;;  %v7649_v3 = vmul.f32 %v7451_v17, %v7622_v8  ;;  %v7653_v48 = vmul.f32 %v7451_v17, %v7624_v44  ;;  %v7664_v15 = vmul.f32 %v7451_v17, %v7633_v16 }
 0x1d8   :  { %11660 = vst [vmem:[#allocation120_spill] sm:$0xff] %v7629_v39  ;;  %11662 = vst [vmem:[#allocation121_spill] sm:$0xff] %v7633_v16  ;;  %v2406_v1 = vmul.f32 %v2374_v42, %v7620_v35  ;;  %v2407_v56 = vmul.f32 %v2374_v42, %v7622_v8  ;;  %v2408_v40 = vmul.f32 %v2374_v42, %v7624_v44 }
 0x1d9   :  { %11663 = vst [vmem:[#allocation122_spill] sm:$0xff] %v7639_v9  ;;  %11664 = vst [vmem:[#allocation123_spill] sm:$0xff] %v7658_v0  ;;  %v2409_v39 = vmul.f32 %v2374_v42, %v7633_v16  ;;  %v2411_v24 = vmul.f32 %v7639_v9, %v7620_v35  ;;  %v7678_v31 = vrot.slane %v7602_v36, %v7405_v12 }
 0x1da   :  { %11666 = vst [vmem:[#allocation124_spill] sm:$0xff] %v7664_v15  ;;  %11667 = vst [vmem:[#allocation125_spill] sm:$0xff] %v7670_v50  ;;  %v2412_v17 = vmul.f32 %v7639_v9, %v7622_v8  ;;  %v2413_v57 = vmul.f32 %v7639_v9, %v7624_v44  ;;  %v2414_v59 = vmul.f32 %v7639_v9, %v7633_v16  ;;  %v7761_v15 = vld [vmem:[%s10901_s3 + $0xe8] sm:$0xff] }
 0x1db   :  { %11668 = vst [vmem:[#allocation126_spill] sm:$0xff] %v7678_v31  ;;  %v7688_v0 = vrot.slane %v7432_v28, %v7405_v12  ;;  %v2405_v33 = vmul.f32 %v2374_v42, %v7618_v4  ;;  %v2416_v47 = vmul.f32 %v7670_v50, %v7620_v35  ;;  %v2417_v36 = vmul.f32 %v7670_v50, %v7622_v8 }
 0x1dc   :  { %v2418_v51 = vmul.f32 %v7670_v50, %v7624_v44  ;;  %v2421_v29 = vmul.f32 %v7678_v31, %v7620_v35  ;;  %v2422_v9 = vmul.f32 %v7678_v31, %v7622_v8  ;;  %v2423_v12 = vmul.f32 %v7678_v31, %v7624_v44 }
 0x1dd   :  { %11669 = vst [vmem:[#allocation127_spill] sm:$0xff] %v7688_v0  ;;  %v2419_v42 = vmul.f32 %v7670_v50, %v7633_v16  ;;  %v2424_v28 = vmul.f32 %v7678_v31, %v7633_v16  ;;  %v2426_v11 = vmul.f32 %v7688_v0, %v7620_v35  ;;  %v2427_v52 = vmul.f32 %v7688_v0, %v7622_v8 }
 0x1de   :  { %v2428_v45 = vmul.f32 %v7688_v0, %v7624_v44  ;;  %v2429_v41 = vmul.f32 %v7688_v0, %v7633_v16  ;;  %v2430_v27 = vmul.f32 %v7464_v38, %v7618_v4  ;;  %v2431_v50 = vmul.f32 %v7464_v38, %v7620_v35  ;;  %v11670_v0 = vld [vmem:[#allocation11_spill] sm:$0xff]  ;;  %v11672_v35 = vld [vmem:[#allocation17_spill] sm:$0xff] }
 0x1df   :  { %v2432_v31 = vmul.f32 %v7464_v38, %v7622_v8  ;;  %v2433_v19 = vmul.f32 %v7464_v38, %v7624_v44  ;;  %v2434_v23 = vmul.f32 %v7464_v38, %v7633_v16  ;;  %v7726_v62 = vsub.f32 %v7267_v7, %v2395_v5  ;;  %v11671_v4 = vld [vmem:[#allocation15_spill] sm:$0xff]  ;;  %v11673_v8 = vld [vmem:[#allocation21_spill] sm:$0xff]  ;;  %v11675_v38 = vld [vmem:[#allocation50_spill] sm:$0xff] }
 0x1e0   :  { %v7739_v44 = vld [vmem:[%s10901_s3 + $0xe0] sm:$0xff]  ;;  %v11676_v5 = vsub.f32 %v7534_v14, %v7260_v49  ;;  %v7751_v58 = vsub.f32 %v11677_v6, %v2407_v56  ;;  %v7756_v16 = vsub.f32 %v11678_v26, %v2408_v40  ;;  %11679 = vst [vmem:[#allocation15_spill] sm:$0xff] %v7761_v15  ;;  %v7773_v6 = vsub.f32 %v11682_v55, %v2411_v24  ;;  %v7783_v56 = vld [vmem:[%s10901_s3 + $0xf0] sm:$0xff]  ;;  %v11685_v40 = vld [vmem:[#allocation36_spill] sm:$0xff] }
 0x1e1   :  { %11674 = vst [vmem:[#allocation11_spill] sm:$0xff] %v7739_v44  ;;  %v2309_v7 = vsub.f32 %v7739_v44, %v11675_v38  ;;  %v11680_v38 = vld [vmem:[#allocation29_spill] sm:$0xff]  ;;  %v7778_v26 = vsub.f32 %v11683_v10, %v2412_v17  ;;  %11684 = vst [vmem:[#allocation17_spill] sm:$0xff] %v7783_v56  ;;  %v7795_v24 = vsub.f32 %v11687_v43, %v2414_v59  ;;  %v11689_v55 = vld [vmem:[#allocation26_spill] sm:$0xff] }
 0x1e2   :  { %v7746_v61 = vsub.f32 %v11676_v5, %v2406_v1  ;;  %v2310_v49 = vsub.f32 %v7761_v15, %v11680_v38  ;;  %v11681_v1 = vsub.f32 %v7555_v21, %v7275_v13  ;;  %v2311_v13 = vsub.f32 %v7783_v56, %v11685_v40  ;;  %v11695_v59 = vld [vmem:[#allocation18_spill] sm:$0xff]  ;;  %v11754_v21 = vld [vmem:[#allocation93_spill] sm:$0xff] }
 0x1e3   :  { %v7800_v17 = vsub.f32 %v11688_v60, %v2416_v47  ;;  %v11690_v10 = vsub.f32 %v7182_v32, %v11689_v55  ;;  %v11696_v43 = vsub.f32 %v11694_v63, %v11695_v59  ;;  %v11698_v47 = vld [vmem:[#allocation27_spill] sm:$0xff]  ;;  %v11705_v32 = vld [vmem:[#allocation28_spill] sm:$0xff]  ;;  %v1527_v18 = vrot.slane %v11754_v21, 1 }
 0x1e4   :  { %v7768_v5 = vsub.f32 %v11681_v1, %v2409_v39  ;;  %v11686_v39 = vsub.f32 %v7579_v46, %v7289_v25  ;;  %v7803_v1 = vsub.f32 %v7529_v30, %v2405_v33  ;;  %v11691_v25 = vld [vmem:[#allocation52_spill] sm:$0xff]  ;;  %v11699_v60 = vsub.f32 %v11697_v53, %v11698_v47  ;;  %v11700_v30 = vld [vmem:[#allocation30_spill] sm:$0xff]  ;;  %v11715_v47 = vld [vmem:[#allocation31_spill] sm:$0xff] }
 0x1e5   :  { %v7808_v40 = vsub.f32 %v11690_v10, %v2417_v36  ;;  %v7818_v34 = vsub.f32 %v11696_v43, %v2419_v42  ;;  %v11702_v55 = vsub.f32 %v11700_v30, %v11701_v37  ;;  %v11704_v10 = vld [vmem:[#allocation37_spill] sm:$0xff]  ;;  %v11713_v43 = vld [vmem:[#allocation51_spill] sm:$0xff]  ;;  %v11727_v53 = vld [vmem:[#allocation24_spill] sm:$0xff] }
 0x1e6   :  { %v7790_v38 = vsub.f32 %v11686_v39, %v2413_v57  ;;  %v11692_v57 = vld [vmem:[#allocation22_spill] sm:$0xff]  ;;  %v7823_v33 = vsub.f32 %v11699_v60, %v2421_v29  ;;  %v7843_v29 = vld [vmem:[%s10901_s3 + $0xf8] sm:$0xff]  ;;  %v11726_v30 = vld [vmem:[#allocation123_spill] sm:$0xff]  ;;  %4535 = vrcp.f32 %v7803_v1 }
 0x1e7   :  { %v11693_v39 = vsub.f32 %v11691_v25, %v11692_v57  ;;  %v7828_v36 = vsub.f32 %v11702_v55, %v2422_v9  ;;  %v11706_v57 = vsub.f32 %v11704_v10, %v11705_v32  ;;  %v11709_v25 = vld [vmem:[#allocation33_spill] sm:$0xff]  ;;  %11712 = vst [vmem:[#allocation36_spill] sm:$0xff] %v7843_v29  ;;  %v2312_v37 = vsub.f32 %v7843_v29, %v11713_v43  ;;  %v11714_v9 = vld [vmem:[#allocation96_spill] sm:$0xff] }
 0x1e8   :  { %v11716_v60 = vsub.f32 %v11714_v9, %v11715_v47  ;;  %v11718_v32 = vld [vmem:[#allocation97_spill] sm:$0xff]  ;;  %v11728_v63 = vsub.f32 %v11726_v30, %v11727_v53  ;;  %v7872_v47 = vsub.f32 %v2310_v49, %v2432_v31 }
 0x1e9   :  { %v7813_v46 = vsub.f32 %v11693_v39, %v2418_v51  ;;  %11703 = vst [vmem:[#allocation21_spill] sm:$0xff] %v7828_v36  ;;  %v7833_v51 = vsub.f32 %v11706_v57, %v2423_v12  ;;  %v11708_v39 = vld [vmem:[#allocation54_spill] sm:$0xff]  ;;  %v11730_v43 = vld [vmem:[#allocation13_spill] sm:$0xff] }
 0x1ea   :  { %v11710_v59 = vsub.f32 %v11708_v39, %v11709_v25  ;;  %v7850_v55 = vsub.f32 %v11716_v60, %v2426_v11  ;;  %v11719_v12 = vld [vmem:[#allocation46_spill] sm:$0xff]  ;;  %v11723_v25 = vld [vmem:[#allocation47_spill] sm:$0xff]  ;;  %v7865_v20 = vsub.f32 %v11728_v63, %v2429_v41  ;;  %v7868_v22 = vsub.f32 %v11730_v43, %v2430_v27  ;;  %11733 = vst [vmem:[#allocation33_spill] sm:$0xff] %v7872_v47  ;;  %v11737_v53 = vld [vmem:[#allocation105_spill] sm:$0xff] }
 0x1eb   :  { %11707 = vst [vmem:[#allocation50_spill] sm:$0xff] %v7833_v51  ;;  %v11720_v57 = vsub.f32 %v11718_v32, %v11719_v12  ;;  %v7870_v11 = vsub.f32 %v2309_v7, %v2431_v50  ;;  %v7874_v60 = vsub.f32 %v2311_v13, %v2433_v19  ;;  %v11738_v41 = vrot.slane %v11737_v53, 4  ;;  %v11739_v27 = vld [vmem:[#allocation94_spill] sm:$0xff]  ;;  %v11740_v50 = vld [vmem:[#allocation84_spill] sm:$0xff] }
 0x1ec   :  { %v7838_v42 = vsub.f32 %v11710_v59, %v2424_v28  ;;  %11717 = vst [vmem:[#allocation26_spill] sm:$0xff] %v7850_v55  ;;  %v11722_v28 = vld [vmem:[#allocation120_spill] sm:$0xff]  ;;  %11729 = vst [vmem:[#allocation27_spill] sm:$0xff] %v7865_v20  ;;  %v1631_v31 = vsel %vm132_vm0, %v11740_v50, 0.0  ;;  %v11751_v50 = vld [vmem:[#allocation101_spill] sm:$0xff] }
 0x1ed   :  { %v7855_v10 = vsub.f32 %v11720_v57, %v2427_v52  ;;  %v11724_v59 = vsub.f32 %v11722_v28, %v11723_v25  ;;  %11731 = vst [vmem:[#allocation23_spill] sm:$0xff] %v7868_v22  ;;  %11732 = vst [vmem:[#allocation28_spill] sm:$0xff] %v7870_v11  ;;  %v7876_v52 = vsub.f32 %v2312_v37, %v2434_v23  ;;  %v1594_v57 = vrot.slane %v11739_v27, 4  ;;  %v11741_v19 = vld [vmem:[#allocation116_spill] sm:$0xff]  ;;  %v11742_v23 = vld [vmem:[#allocation75_spill] sm:$0xff] }
 0x1ee   :  { %11711 = vst [vmem:[#allocation29_spill] sm:$0xff] %v7838_v42  ;;  %11734 = vst [vmem:[#allocation51_spill] sm:$0xff] %v7874_v60  ;;  %v1582_v63 = vadd.f32 %v11738_v41, %v11737_v53  ;;  %v11743_v49 = vrot.slane %v11742_v23, 1  ;;  %v11745_v37 = vld [vmem:[#allocation80_spill] sm:$0xff]  ;;  %v11752_v32 = vrot.slane %v11751_v50, 1  ;;  %v4644_v60 = vld [vmem:[%s10902_s4 + $0xc0] sm:$0xff] }
 0x1ef   :  { %11721 = vst [vmem:[#allocation22_spill] sm:$0xff] %v7855_v10  ;;  %v7860_v39 = vsub.f32 %v11724_v59, %v2428_v45  ;;  %11735 = vst [vmem:[#allocation31_spill] sm:$0xff] %v7876_v52  ;;  %v11736_v45 = vld [vmem:[#allocation92_spill] sm:$0xff]  ;;  %v11746_v25 = vrot.slane %v11745_v37, 1  ;;  %v11760_v52 = vld [vmem:[#allocation89_spill] sm:$0xff] }
 0x1f0   :  { %v7881_v12 = vrot.slane %v7726_v62, %v11736_v45  ;;  %v7891_v7 = vrot.slane %v11741_v19, %v11736_v45  ;;  %v7896_v13 = vadd.f32 %v11743_v49, %v11742_v23  ;;  %v11748_v43 = vld [vmem:[#allocation88_spill] sm:$0xff]  ;;  %v7911_v9 = vadd.f32 %v11752_v32, %v11751_v50  ;;  %v4643_v23 = vld [vmem:[%s10902_s4 + $0xd0] sm:$0xff]  ;;  %v11761_v50 = vld [vmem:[#allocation6_spill] sm:$0xff] }
 0x1f1   :  { %11725 = vst [vmem:[#allocation18_spill] sm:$0xff] %v7860_v39  ;;  %v7901_v59 = vadd.f32 %v11746_v25, %v11745_v37  ;;  %v11749_v53 = vrot.slane %v11748_v43, 1  ;;  %v1555_v49 = vmul.f32 %v4643_v23, %v11722_v28  ;;  %v11755_v37 = vld [vmem:[#allocation103_spill] sm:$0xff]  ;;  %v1639_v32 = vsel %vm132_vm0, %v11760_v52, 0.0  ;;  %v4646_v52 = vld [vmem:[%s10902_s4 + $0xd8] sm:$0xff] }
 0x1f2   :  { %11744 = vst [vmem:[#allocation46_spill] sm:$0xff] %v7896_v13  ;;  %11753 = vst [vmem:[#allocation13_spill] sm:$0xff] %v7911_v9  ;;  %v1607_v25 = vrot.slane %v11755_v37, 4  ;;  %v11757_v13 = vld [vmem:[#allocation99_spill] sm:$0xff]  ;;  %v1640_v9 = vsel %vm132_vm0, %v11761_v50, 0.0  ;;  %v1557_v28 = vmul.f32 %v4644_v60, %v7739_v44  ;;  %v1583_v47 = vrot.slane %v1582_v63, 2 }
 0x1f3   :  { %11747 = vst [vmem:[#allocation47_spill] sm:$0xff] %v7901_v59  ;;  %v7906_v41 = vadd.f32 %v11749_v53, %v11748_v43  ;;  %v11756_v59 = vld [vmem:[#allocation104_spill] sm:$0xff]  ;;  %v11758_v43 = vld [vmem:[#allocation90_spill] sm:$0xff]  ;;  %v1559_v50 = vmul.f32 %v4643_v23, %v7783_v56  ;;  %v7944_v60 = vmul.f32 %v4646_v52, %v7843_v29  ;;  %v1642_v23 = vsel %vm132_vm0, %v1555_v49, 0.0  ;;  %v11770_v49 = vld [vmem:[#allocation127_spill] sm:$0xff] }
 0x1f4   :  { %v1619_v54 = vadd.f32 %v11757_v13, %v11756_v59  ;;  %v1570_v53 = vrot.slane %v11758_v43, 2  ;;  %v4645_v13 = vld [vmem:[%s10902_s4 + $0xc8] sm:$0xff]  ;;  %v7960_v56 = vadd.f32 %v1583_v47, %v1582_v63  ;;  %v8064_v47 = vrot.slane %v7868_v22, %v11736_v45 }
 0x1f5   :  { %11750 = vst [vmem:[#allocation24_spill] sm:$0xff] %v7906_v41  ;;  %v11759_v41 = vld [vmem:[#allocation7_spill] sm:$0xff]  ;;  %v1558_v59 = vmul.f32 %v4645_v13, %v7761_v15  ;;  %v11763_v44 = vld [vmem:[#allocation122_spill] sm:$0xff]  ;;  %v7949_v13 = vadd.f32 %v1527_v18, %v11754_v21  ;;  %v1641_v15 = vadd.f32 %v1640_v9, %v1639_v32  ;;  %v1652_v18 = vsel %vm132_vm0, %v1557_v28, 0.0 }
 0x1f6   :  { %v1632_v14 = vadd.f32 %v1631_v31, %v11759_v41  ;;  %v7936_v31 = vadd.f32 %v1594_v57, %v11739_v27  ;;  %v1556_v41 = vmul.f32 %v4646_v52, %v11726_v30  ;;  %v2410_v11 = vmul.f32 %v11763_v44, %v11741_v19  ;;  %v11767_v52 = vld [vmem:[#allocation125_spill] sm:$0xff]  ;;  %11768 = vst [vmem:[#allocation116_spill] sm:$0xff] %v7960_v56  ;;  %v11771_v32 = vld [vmem:[#allocation110_spill] sm:$0xff] }
 0x1f7   :  { %11764 = vst [vmem:[#allocation105_spill] sm:$0xff] %v7949_v13  ;;  %v7952_v27 = vadd.f32 %v1607_v25, %v11755_v37  ;;  %v1620_v57 = vrot.slane %v1619_v54, 4  ;;  %v7955_v20 = vadd.f32 %v1570_v53, %v11758_v43  ;;  %v2415_v29 = vmul.f32 %v11767_v52, %v11741_v19  ;;  %v4536_v37 = vpop.eup %4535  ;;  %v11769_v25 = vld [vmem:[#allocation126_spill] sm:$0xff]  ;;  %11788 = vst [vmem:[#allocation125_spill] sm:$0xff] %v8064_v47 }
 0x1f8   :  { %11762 = vst [vmem:[#allocation92_spill] sm:$0xff] %v7936_v31  ;;  %v1633_v30 = vrot.slane %v1632_v14, 4  ;;  %v1653_v21 = vsel %vm132_vm0, %v1558_v59, 0.0  ;;  %v7966_v9 = vsel %vm132_vm0, %v1556_v41, 0.0  ;;  %v2420_v43 = vmul.f32 %v11769_v25, %v11741_v19  ;;  %v11774_v25 = vld [vmem:[#allocation115_spill] sm:$0xff] }
 0x1f9   :  { %11765 = vst [vmem:[#allocation94_spill] sm:$0xff] %v7952_v27  ;;  %11766 = vst [vmem:[#allocation84_spill] sm:$0xff] %v7955_v20  ;;  %v2425_v53 = vmul.f32 %v11770_v49, %v11741_v19  ;;  %v7973_v52 = vsub.f32 %v11771_v32, %v2410_v11  ;;  %v7976_v63 = vadd.f32 %v1620_v57, %v1619_v54  ;;  %v1655_v13 = vsel %vm132_vm0, %v1559_v50, 0.0  ;;  %v11782_v57 = vld [vmem:[#allocation95_spill] sm:$0xff] }
 0x1fa   :  { %v7978_v28 = vadd.f32 %v1642_v23, %v1641_v15  ;;  %v2519_v59 = vrot.slane %v4536_v37, %v11736_v45  ;;  %v7981_v44 = vadd.f32 %v1633_v30, %v1632_v14  ;;  %v1654_v41 = vadd.f32 %v1653_v21, %v1652_v18  ;;  %v11780_v14 = vld [vmem:[#allocation5_spill] sm:$0xff] }
 0x1fb   :  { %11772 = vst [vmem:[#allocation75_spill] sm:$0xff] %v7976_v63  ;;  %v7985_v56 = vsub.f32 %v11774_v25, %v2415_v29  ;;  %v8000_v30 = vsub.f32 %v11780_v14, %v2420_v43  ;;  %v8003_v50 = vsub.f32 %v11782_v57, %v2425_v53 }
 0x1fc   :  { %11773 = vst [vmem:[#allocation80_spill] sm:$0xff] %v7981_v44  ;;  %v7988_v49 = vmul.f32 %v2519_v59, %v7803_v1  ;;  %v7991_v11 = vmul.f32 %v2519_v59, %v7746_v61  ;;  %v7994_v54 = vmul.f32 %v2519_v59, %v7751_v58  ;;  %v7997_v15 = vmul.f32 %v2519_v59, %v7756_v16 }
 0x1fd   :  { %11775 = vst [vmem:[#allocation88_spill] sm:$0xff] %v7985_v56  ;;  %11781 = vst [vmem:[#allocation99_spill] sm:$0xff] %v8000_v30  ;;  %v8006_v29 = vmul.f32 %v2519_v59, %v7768_v5  ;;  %v2540_v1 = vrot.slane %v7973_v52, %v11736_v45  ;;  %v8032_v43 = vrot.slane %v7985_v56, %v11736_v45 }
 0x1fe   :  { %11776 = vst [vmem:[#allocation101_spill] sm:$0xff] %v7988_v49  ;;  %11777 = vst [vmem:[#allocation93_spill] sm:$0xff] %v7991_v11  ;;  %v2557_v61 = vmul.f32 %v7881_v12, %v7988_v49  ;;  %v2558_v58 = vmul.f32 %v7881_v12, %v7991_v11  ;;  %v2559_v16 = vmul.f32 %v7881_v12, %v7994_v54 }
 0x1ff   :  { %11778 = vst [vmem:[#allocation103_spill] sm:$0xff] %v7994_v54  ;;  %11779 = vst [vmem:[#allocation104_spill] sm:$0xff] %v7997_v15  ;;  %v2560_v23 = vmul.f32 %v7881_v12, %v7997_v15  ;;  %v2561_v18 = vmul.f32 %v7881_v12, %v8006_v29  ;;  %v2562_v5 = vmul.f32 %v7891_v7, %v7988_v49 }
 0x200   :  { %11783 = vst [vmem:[#allocation90_spill] sm:$0xff] %v8003_v50  ;;  %11784 = vst [vmem:[#allocation7_spill] sm:$0xff] %v8006_v29  ;;  %v8024_v21 = vmul.f32 %v7891_v7, %v7991_v11  ;;  %v8028_v37 = vmul.f32 %v7891_v7, %v7994_v54  ;;  %v8036_v53 = vmul.f32 %v7891_v7, %v7997_v15 }
 0x201   :  { %11785 = vst [vmem:[#allocation89_spill] sm:$0xff] %v8032_v43  ;;  %v8040_v12 = vmul.f32 %v7891_v7, %v8006_v29  ;;  %v8043_v32 = vmul.f32 %v2540_v1, %v7991_v11  ;;  %v8047_v59 = vrot.slane %v8000_v30, %v11736_v45  ;;  %v8050_v25 = vmul.f32 %v2540_v1, %v7994_v54 }
 0x202   :  { %v8053_v14 = vmul.f32 %v2540_v1, %v7997_v15  ;;  %v8056_v57 = vmul.f32 %v2540_v1, %v8006_v29  ;;  %v8060_v7 = vrot.slane %v8003_v50, %v11736_v45  ;;  %v2572_v30 = vmul.f32 %v2540_v1, %v7988_v49 }
 0x203   :  { %11786 = vst [vmem:[#allocation6_spill] sm:$0xff] %v8047_v59  ;;  %v8069_v56 = vmul.f32 %v8032_v43, %v7991_v11  ;;  %v8073_v44 = vmul.f32 %v8032_v43, %v7994_v54  ;;  %v8077_v63 = vmul.f32 %v8047_v59, %v7991_v11  ;;  %v8081_v50 = vmul.f32 %v8047_v59, %v7994_v54 }
 0x204   :  { %11787 = vst [vmem:[#allocation122_spill] sm:$0xff] %v8060_v7  ;;  %v8085_v45 = vmul.f32 %v8047_v59, %v7997_v15  ;;  %v8089_v1 = vmul.f32 %v8032_v43, %v7997_v15  ;;  %v8093_v22 = vmul.f32 %v8047_v59, %v8006_v29  ;;  %v8097_v49 = vmul.f32 %v8060_v7, %v7991_v11 }
 0x205   :  { %11789 = vst [vmem:[#allocation126_spill] sm:$0xff] %v8081_v50  ;;  %v8101_v27 = vmul.f32 %v8060_v7, %v7994_v54  ;;  %v8105_v31 = vmul.f32 %v8032_v43, %v8006_v29  ;;  %v8109_v20 = vmul.f32 %v8060_v7, %v7997_v15  ;;  %v8113_v59 = vmul.f32 %v8060_v7, %v8006_v29 }
 0x206   :  { %11790 = vst [vmem:[#allocation127_spill] sm:$0xff] %v8085_v45  ;;  %11791 = vst [vmem:[#allocation110_spill] sm:$0xff] %v8093_v22  ;;  %v8117_v39 = vmul.f32 %v8064_v47, %v7991_v11  ;;  %v8121_v10 = vmul.f32 %v8064_v47, %v7994_v54  ;;  %v8125_v43 = vmul.f32 %v8064_v47, %v7997_v15  ;;  %v11881_v22 = vld [vmem:[#allocation106_spill] sm:$0xff] }
 0x207   :  { %11792 = vst [vmem:[#allocation115_spill] sm:$0xff] %v8097_v49  ;;  %11793 = vst [vmem:[#allocation5_spill] sm:$0xff] %v8101_v27  ;;  %v8129_v27 = vmul.f32 %v8064_v47, %v8006_v29  ;;  %v11801_v7 = vsub.f32 %v11670_v0, %v7645_v2  ;;  %v11802_v54 = vsub.f32 %v11671_v4, %v7649_v3  ;;  %v11804_v29 = vld [vmem:[#allocation124_spill] sm:$0xff]  ;;  %v11807_v2 = vld [vmem:[#allocation117_spill] sm:$0xff] }
 0x208   :  { %11794 = vst [vmem:[#allocation95_spill] sm:$0xff] %v8109_v20  ;;  %11795 = vst [vmem:[#allocation128_spill] sm:$0xff] %v8113_v59  ;;  %v8132_v20 = vsub.f32 %v7726_v62, %v2557_v61  ;;  %v11803_v15 = vsub.f32 %v11672_v35, %v7653_v48  ;;  %v11805_v47 = vsub.f32 %v11673_v8, %v11804_v29  ;;  %v11808_v3 = vld [vmem:[#allocation118_spill] sm:$0xff]  ;;  %v1657_v35 = vsel %vm132_vm0, %v7944_v60, 0.0  ;;  %v11810_v48 = vld [vmem:[#allocation121_spill] sm:$0xff] }
 0x209   :  { %11796 = vst [vmem:[#allocation129_spill] sm:$0xff] %v8117_v39  ;;  %11797 = vst [vmem:[#allocation130_spill] sm:$0xff] %v8121_v10  ;;  %v8137_v11 = vsub.f32 %v11801_v7, %v2558_v58  ;;  %v8142_v10 = vsub.f32 %v11802_v54, %v2559_v16  ;;  %v8155_v61 = vsub.f32 %v11741_v19, %v2562_v5  ;;  %v11809_v54 = vld [vmem:[#allocation119_spill] sm:$0xff]  ;;  %v8221_v0 = vld [vmem:[%s10902_s4 + $0xe0] sm:$0xff] }
 0x20a   :  { %11798 = vst [vmem:[#allocation131_spill] sm:$0xff] %v8125_v43  ;;  %11799 = vst [vmem:[#allocation132_spill] sm:$0xff] %v8129_v27  ;;  %v8147_v43 = vsub.f32 %v11803_v15, %v2560_v23  ;;  %v8152_v62 = vsub.f32 %v11805_v47, %v2561_v18  ;;  %v1656_v15 = vadd.f32 %v1655_v13, %v1654_v41  ;;  %v8226_v29 = vld [vmem:[%s10902_s4 + $0xe8] sm:$0xff]  ;;  %v8248_v49 = vld [vmem:[%s10902_s4 + $0xf8] sm:$0xff] }
 0x20b   :  { %11800 = vst [vmem:[#allocation133_spill] sm:$0xff] %v8132_v20  ;;  %11806 = vst [vmem:[#allocation124_spill] sm:$0xff] %v8155_v61  ;;  %v8178_v60 = vsub.f32 %v7973_v52, %v2572_v30  ;;  %v8196_v30 = vadd.f32 %v7966_v9, %v7978_v28  ;;  %v11831_v28 = vld [vmem:[#allocation94_spill] sm:$0xff]  ;;  %v11840_v27 = vld [vmem:[#allocation20_spill] sm:$0xff]  ;;  %v11917_v50 = vsub.f32 %v11808_v3, %v8028_v37 }
 0x20c   :  { %v8211_v47 = vadd.f32 %v1657_v35, %v1656_v15  ;;  %11825 = vst [vmem:[#allocation119_spill] sm:$0xff] %v8221_v0  ;;  %11826 = vst [vmem:[#allocation121_spill] sm:$0xff] %v8226_v29  ;;  %v8231_v35 = vld [vmem:[%s10902_s4 + $0xf0] sm:$0xff]  ;;  %v11828_v15 = vld [vmem:[#allocation92_spill] sm:$0xff]  ;;  %v11832_v16 = vrot.slane %v11831_v28, 2  ;;  %s4526_s4 = spop %4525 }
 0x20d   :  { %11811 = vst [vmem:[#allocation117_spill] sm:$0xff] %v8196_v30  ;;  %4537 = vrcp.f32 %v8178_v60  ;;  %11827 = vst [vmem:[#allocation134_spill] sm:$0xff] %v8231_v35  ;;  %v11829_v13 = vrot.slane %v11828_v15, 2  ;;  %v11837_v9 = vld [vmem:[#allocation14_spill] sm:$0xff]  ;;  %v11843_v7 = vld [vmem:[#allocation100_spill] sm:$0xff] }
 0x20e   :  { %11821 = vst [vmem:[#allocation118_spill] sm:$0xff] %v8211_v47  ;;  %v8241_v4 = vadd.f32 %v11832_v16, %v11831_v28  ;;  %11836 = vst [vmem:[#allocation135_spill] sm:$0xff] %v8248_v49  ;;  %v11839_v16 = vld [vmem:[#allocation16_spill] sm:$0xff]  ;;  %v11842_v5 = vld [vmem:[#allocation98_spill] sm:$0xff]  ;;  %v1670_v39 = vmul.f32 %v11843_v7, %v8226_v29 }
 0x20f   :  { %v8236_v55 = vadd.f32 %v11829_v13, %v11828_v15  ;;  %v1665_v13 = vmul.f32 %v11837_v9, %v8221_v0  ;;  %v11838_v15 = vld [vmem:[#allocation12_spill] sm:$0xff]  ;;  %v1667_v28 = vmul.f32 %v11839_v16, %v8231_v35  ;;  %v1669_v8 = vmul.f32 %v11842_v5, %v8221_v0  ;;  %v11844_v19 = vld [vmem:[#allocation71_spill] sm:$0xff]  ;;  %v11859_v23 = vld [vmem:[#allocation114_spill] sm:$0xff] }
 0x210   :  { %11833 = vst [vmem:[#allocation94_spill] sm:$0xff] %v8241_v4  ;;  %v8259_v4 = vmul.f32 %v11840_v27, %v8248_v49  ;;  %v8267_v30 = vmul.f32 %v11844_v19, %v8231_v35  ;;  %v11848_v16 = vld [vmem:[#allocation72_spill] sm:$0xff]  ;;  %v11852_v19 = vld [vmem:[#allocation109_spill] sm:$0xff]  ;;  %v11854_v9 = vld [vmem:[#allocation111_spill] sm:$0xff] }
 0x211   :  { %11830 = vst [vmem:[#allocation92_spill] sm:$0xff] %v8236_v55  ;;  %v1666_v55 = vmul.f32 %v11838_v15, %v8226_v29  ;;  %v11846_v15 = vld [vmem:[#allocation102_spill] sm:$0xff]  ;;  %v8276_v27 = vmul.f32 %v11848_v16, %v8221_v0  ;;  %v11850_v7 = vld [vmem:[#allocation108_spill] sm:$0xff]  ;;  %v11867_v58 = vld [vmem:[#allocation19_spill] sm:$0xff] }
 0x212   :  { %11841 = vst [vmem:[#allocation14_spill] sm:$0xff] %v8259_v4  ;;  %11845 = vst [vmem:[#allocation12_spill] sm:$0xff] %v8267_v30  ;;  %v8272_v52 = vmul.f32 %v11846_v15, %v8248_v49  ;;  %v11849_v4 = vld [vmem:[#allocation107_spill] sm:$0xff]  ;;  %v8284_v59 = vmul.f32 %v11850_v7, %v8231_v35  ;;  %v8288_v30 = vmul.f32 %v11852_v19, %v8248_v49  ;;  %v11855_v47 = vld [vmem:[#allocation112_spill] sm:$0xff] }
 0x213   :  { %v8280_v5 = vmul.f32 %v11849_v4, %v8226_v29  ;;  %v8292_v15 = vmul.f32 %v11854_v9, %v8221_v0  ;;  %v8296_v16 = vmul.f32 %v11855_v47, %v8226_v29  ;;  %v8304_v7 = vmul.f32 %v11859_v23, %v8248_v49  ;;  %v11865_v41 = vld [vmem:[#allocation52_spill] sm:$0xff]  ;;  %v11872_v18 = vld [vmem:[#allocation89_spill] sm:$0xff]  ;;  %v11921_v37 = vld [vmem:[#allocation103_spill] sm:$0xff] }
 0x214   :  { %11847 = vst [vmem:[#allocation16_spill] sm:$0xff] %v8272_v52  ;;  %11851 = vst [vmem:[#allocation20_spill] sm:$0xff] %v8284_v59  ;;  %v11857_v52 = vld [vmem:[#allocation113_spill] sm:$0xff]  ;;  %v8316_v47 = vmul.f32 %v11865_v41, %v8231_v35  ;;  %v11874_v41 = vld [vmem:[#allocation122_spill] sm:$0xff] }
 0x215   :  { %11853 = vst [vmem:[#allocation98_spill] sm:$0xff] %v8288_v30  ;;  %11856 = vst [vmem:[#allocation100_spill] sm:$0xff] %v8296_v16  ;;  %v8300_v4 = vmul.f32 %v11857_v52, %v8231_v35  ;;  %v11861_v59 = vld [vmem:[#allocation9_spill] sm:$0xff]  ;;  %v11863_v30 = vld [vmem:[#allocation10_spill] sm:$0xff]  ;;  %v8320_v52 = vmul.f32 %v11867_v58, %v8248_v49  ;;  %v1736_v3 = vsel %vm132_vm0, %v8292_v15, 0.0  ;;  %v11926_v15 = vsub.f32 %v7813_v46, %v8089_v1 }
 0x216   :  { %11860 = vst [vmem:[#allocation102_spill] sm:$0xff] %v8304_v7  ;;  %v8308_v19 = vmul.f32 %v11861_v59, %v8221_v0  ;;  %v8312_v9 = vmul.f32 %v11863_v30, %v8226_v29  ;;  %11866 = vst [vmem:[#allocation108_spill] sm:$0xff] %v8316_v47  ;;  %v1697_v7 = vsel %vm132_vm0, %v1665_v13, 0.0  ;;  %v1698_v59 = vsel %vm132_vm0, %v1666_v55, 0.0  ;;  %v11875_v58 = vld [vmem:[#allocation30_spill] sm:$0xff] }
 0x217   :  { %11858 = vst [vmem:[#allocation71_spill] sm:$0xff] %v8300_v4  ;;  %11868 = vst [vmem:[#allocation109_spill] sm:$0xff] %v8320_v52  ;;  %v11869_v4 = vld [vmem:[#allocation25_spill] sm:$0xff]  ;;  %v8336_v52 = vmul.f32 %v11875_v58, %v8226_v29  ;;  %v11879_v13 = vld [vmem:[#allocation54_spill] sm:$0xff]  ;;  %v4538_v42 = vpop.eup %4537 }
 0x218   :  { %11862 = vst [vmem:[#allocation72_spill] sm:$0xff] %v8308_v19  ;;  %11864 = vst [vmem:[#allocation107_spill] sm:$0xff] %v8312_v9  ;;  %v8324_v23 = vmul.f32 %v11869_v4, %v8221_v0  ;;  %v11871_v19 = vld [vmem:[#allocation101_spill] sm:$0xff]  ;;  %v11873_v9 = vld [vmem:[#allocation6_spill] sm:$0xff]  ;;  %v8344_v55 = vmul.f32 %v11879_v13, %v8248_v49 }
 0x219   :  { %v2577_v30 = vmul.f32 %v11872_v18, %v11871_v19  ;;  %v2582_v16 = vmul.f32 %v11873_v9, %v11871_v19  ;;  %v2587_v47 = vmul.f32 %v11874_v41, %v11871_v19  ;;  %11876 = vst [vmem:[#allocation112_spill] sm:$0xff] %v8336_v52  ;;  %v11877_v4 = vld [vmem:[#allocation37_spill] sm:$0xff]  ;;  %v2680_v18 = vsub.s32 3, %v11881_v22  ;;  %v11882_v9 = vld [vmem:[#allocation96_spill] sm:$0xff]  ;;  %v11889_v13 = vld [vmem:[#allocation123_spill] sm:$0xff] }
 0x21a   :  { %11870 = vst [vmem:[#allocation111_spill] sm:$0xff] %v8324_v23  ;;  %v8340_v23 = vmul.f32 %v11877_v4, %v8231_v35  ;;  %11880 = vst [vmem:[#allocation114_spill] sm:$0xff] %v8344_v55  ;;  %v8349_v45 = vmul.f32 %v11882_v9, %v8221_v0  ;;  %v11884_v41 = vld [vmem:[#allocation97_spill] sm:$0xff]  ;;  %v11886_v58 = vld [vmem:[#allocation120_spill] sm:$0xff]  ;;  %v8363_v55 = vmul.f32 %v11889_v13, %v8248_v49  ;;  %v8368_v9 = vsel %vm132_vm0, %v1667_v28, 0.0 }
 0x21b   :  { %v8353_v51 = vmul.f32 %v11884_v41, %v8226_v29  ;;  %v8357_v52 = vmul.f32 %v11886_v58, %v8231_v35  ;;  %v11888_v4 = vld [vmem:[#allocation125_spill] sm:$0xff]  ;;  %v8365_v22 = vadd.f32 %v1698_v59, %v1697_v7  ;;  %11892 = vst [vmem:[#allocation89_spill] sm:$0xff] %v8368_v9  ;;  %v1710_v41 = vsel %vm132_vm0, %v1669_v8, 0.0  ;;  %v11894_v58 = vld [vmem:[#allocation99_spill] sm:$0xff]  ;;  %v11896_v35 = vld [vmem:[#allocation90_spill] sm:$0xff] }
 0x21c   :  { %11878 = vst [vmem:[#allocation113_spill] sm:$0xff] %v8340_v23  ;;  %11883 = vst [vmem:[#allocation9_spill] sm:$0xff] %v8349_v45  ;;  %v2592_v23 = vmul.f32 %v11888_v4, %v11871_v19  ;;  %v2681_v45 = vrot.slane %v4538_v42, %v2680_v18  ;;  %v8378_v4 = vsub.f32 %v11896_v35, %v2587_v47  ;;  %v11905_v35 = vld [vmem:[#allocation23_spill] sm:$0xff] }
 0x21d   :  { %11885 = vst [vmem:[#allocation10_spill] sm:$0xff] %v8353_v51  ;;  %11887 = vst [vmem:[#allocation52_spill] sm:$0xff] %v8357_v52  ;;  %v11893_v51 = vld [vmem:[#allocation88_spill] sm:$0xff]  ;;  %v8375_v52 = vsub.f32 %v11894_v58, %v2582_v16  ;;  %v11898_v13 = vsub.f32 %v7773_v6, %v8043_v32  ;;  %v11900_v28 = vsub.f32 %v7778_v26, %v8050_v25 }
 0x21e   :  { %11890 = vst [vmem:[#allocation19_spill] sm:$0xff] %v8363_v55  ;;  %11891 = vst [vmem:[#allocation25_spill] sm:$0xff] %v8365_v22  ;;  %v8372_v29 = vsub.f32 %v11893_v51, %v2577_v30  ;;  %v11902_v51 = vsub.f32 %v7790_v38, %v8053_v14  ;;  %v8396_v16 = vrot.slane %v8132_v20, %v2680_v18 }
 0x21f   :  { %11895 = vst [vmem:[#allocation6_spill] sm:$0xff] %v8375_v52  ;;  %11897 = vst [vmem:[#allocation122_spill] sm:$0xff] %v8378_v4  ;;  %v8383_v7 = vmul.f32 %v2681_v45, %v11898_v13  ;;  %v8388_v42 = vmul.f32 %v2681_v45, %v11900_v28  ;;  %v8399_v47 = vsub.f32 %v11905_v35, %v2592_v23 }
 0x220   :  { %v8393_v8 = vmul.f32 %v2681_v45, %v11902_v51  ;;  %11904 = vst [vmem:[#allocation96_spill] sm:$0xff] %v8396_v16  ;;  %v11907_v6 = vsub.f32 %v7795_v24, %v8056_v57  ;;  %v8407_v26 = vrot.slane %v8155_v61, %v2680_v18  ;;  %v8410_v25 = vrot.slane %v11871_v19, %v2680_v18 }
 0x221   :  { %11899 = vst [vmem:[#allocation30_spill] sm:$0xff] %v8383_v7  ;;  %11901 = vst [vmem:[#allocation37_spill] sm:$0xff] %v8388_v42  ;;  %v8413_v38 = vmul.f32 %v2681_v45, %v8178_v60  ;;  %v8417_v14 = vmul.f32 %v8396_v16, %v8383_v7  ;;  %v8421_v23 = vmul.f32 %v8396_v16, %v8388_v42  ;;  %v1711_v57 = vsel %vm132_vm0, %v1670_v39, 0.0 }
 0x222   :  { %11903 = vst [vmem:[#allocation54_spill] sm:$0xff] %v8393_v8  ;;  %11906 = vst [vmem:[#allocation97_spill] sm:$0xff] %v8399_v47  ;;  %v8404_v32 = vmul.f32 %v2681_v45, %v11907_v6  ;;  %v8425_v24 = vmul.f32 %v8396_v16, %v8393_v8  ;;  %v2725_v45 = vmul.f32 %v8407_v26, %v8383_v7 }
 0x223   :  { %11909 = vst [vmem:[#allocation125_spill] sm:$0xff] %v8407_v26  ;;  %11910 = vst [vmem:[#allocation123_spill] sm:$0xff] %v8410_v25  ;;  %v2726_v60 = vmul.f32 %v8407_v26, %v8388_v42  ;;  %v2706_v30 = vrot.slane %v8372_v29, %v2680_v18  ;;  %v2727_v58 = vmul.f32 %v8407_v26, %v8393_v8 }
 0x224   :  { %11908 = vst [vmem:[#allocation120_spill] sm:$0xff] %v8404_v32  ;;  %11911 = vst [vmem:[#allocation88_spill] sm:$0xff] %v8413_v38  ;;  %v8430_v59 = vmul.f32 %v8396_v16, %v8404_v32  ;;  %v2728_v13 = vmul.f32 %v8407_v26, %v8404_v32  ;;  %v8443_v39 = vmul.f32 %v8410_v25, %v8383_v7 }
 0x225   :  { %v8446_v28 = vrot.slane %v8375_v52, %v2680_v18  ;;  %v8450_v51 = vmul.f32 %v8410_v25, %v8388_v42  ;;  %v8454_v35 = vmul.f32 %v8410_v25, %v8393_v8  ;;  %v8458_v6 = vmul.f32 %v8410_v25, %v8404_v32 }
 0x226   :  { %11912 = vst [vmem:[#allocation99_spill] sm:$0xff] %v8430_v59  ;;  %v8460_v55 = vadd.f32 %v1711_v57, %v1710_v41  ;;  %v8463_v19 = vrot.slane %v8378_v4, %v2680_v18  ;;  %v8466_v52 = vrot.slane %v8399_v47, %v2680_v18  ;;  %v2739_v61 = vmul.f32 %v2706_v30, %v8413_v38 }
 0x227   :  { %11913 = vst [vmem:[#allocation90_spill] sm:$0xff] %v8446_v28  ;;  %v2740_v20 = vmul.f32 %v2706_v30, %v8383_v7  ;;  %v2745_v26 = vmul.f32 %v8446_v28, %v8383_v7  ;;  %v2746_v49 = vmul.f32 %v8446_v28, %v8388_v42  ;;  %v2747_v41 = vmul.f32 %v8446_v28, %v8393_v8 }
 0x228   :  { %11914 = vst [vmem:[#allocation23_spill] sm:$0xff] %v8460_v55  ;;  %11915 = vst [vmem:[#allocation136_spill] sm:$0xff] %v8463_v19  ;;  %v2741_v57 = vmul.f32 %v2706_v30, %v8388_v42  ;;  %v2748_v4 = vmul.f32 %v8446_v28, %v8404_v32  ;;  %v2750_v18 = vmul.f32 %v8463_v19, %v8383_v7 }
 0x229   :  { %v2751_v47 = vmul.f32 %v8463_v19, %v8388_v42  ;;  %v2742_v25 = vmul.f32 %v2706_v30, %v8393_v8  ;;  %v2752_v16 = vmul.f32 %v8463_v19, %v8393_v8  ;;  %v2753_v38 = vmul.f32 %v8463_v19, %v8404_v32 }
 0x22a   :  { %v2755_v55 = vmul.f32 %v8466_v52, %v8383_v7  ;;  %v2743_v9 = vmul.f32 %v2706_v30, %v8404_v32  ;;  %v2756_v28 = vmul.f32 %v8466_v52, %v8388_v42  ;;  %v2757_v22 = vmul.f32 %v8466_v52, %v8393_v8 }
 0x22b   :  { %v2758_v0 = vmul.f32 %v8466_v52, %v8404_v32  ;;  %v1723_v42 = vsel %vm132_vm0, %v8276_v27, 0.0  ;;  %v11916_v8 = vsub.f32 %v11807_v2, %v8024_v21  ;;  %v8515_v32 = vsub.f32 %v11917_v50, %v2726_v60  ;;  %v11920_v21 = vld [vmem:[#allocation93_spill] sm:$0xff]  ;;  %v11989_v2 = vld [vmem:[#allocation108_spill] sm:$0xff] }
 0x22c   :  { %v11918_v19 = vsub.f32 %v11809_v54, %v8036_v53  ;;  %v1724_v30 = vsel %vm132_vm0, %v8280_v5, 0.0  ;;  %v11919_v27 = vsub.f32 %v11810_v48, %v8040_v12  ;;  %v11922_v53 = vld [vmem:[#allocation104_spill] sm:$0xff]  ;;  %v11924_v12 = vsub.f32 %v7800_v17, %v8069_v56  ;;  %v11929_v17 = vld [vmem:[#allocation21_spill] sm:$0xff] }
 0x22d   :  { %v8510_v36 = vsub.f32 %v11916_v8, %v2725_v45  ;;  %v8545_v8 = vsub.f32 %v8372_v29, %v2739_v61  ;;  %v11925_v45 = vsub.f32 %v7808_v40, %v8073_v44  ;;  %v11930_v61 = vld [vmem:[#allocation126_spill] sm:$0xff] }
 0x22e   :  { %v8520_v7 = vsub.f32 %v11918_v19, %v2727_v58  ;;  %v8527_v59 = vsub.f32 %v11919_v27, %v2728_v13  ;;  %v11923_v19 = vld [vmem:[#allocation7_spill] sm:$0xff]  ;;  %v8542_v48 = vsub.f32 %v11924_v12, %v2740_v20  ;;  %v8555_v58 = vsub.f32 %v11926_v15, %v2742_v25  ;;  %v11932_v29 = vld [vmem:[#allocation50_spill] sm:$0xff]  ;;  %v11935_v25 = vld [vmem:[#allocation29_spill] sm:$0xff] }
 0x22f   :  { %v8550_v60 = vsub.f32 %v11925_v45, %v2741_v57  ;;  %v11927_v13 = vsub.f32 %v7818_v34, %v8105_v31  ;;  %v11928_v20 = vsub.f32 %v7823_v33, %v8077_v63  ;;  %v11931_v40 = vsub.f32 %v11929_v17, %v11930_v61  ;;  %v11933_v57 = vld [vmem:[#allocation127_spill] sm:$0xff]  ;;  %v11936_v12 = vld [vmem:[#allocation110_spill] sm:$0xff] }
 0x230   :  { %v11934_v46 = vsub.f32 %v11932_v29, %v11933_v57  ;;  %v11937_v34 = vsub.f32 %v11935_v25, %v11936_v12  ;;  %v11939_v63 = vld [vmem:[#allocation26_spill] sm:$0xff]  ;;  %v11948_v61 = vld [vmem:[#allocation95_spill] sm:$0xff]  ;;  %v11953_v25 = vld [vmem:[#allocation128_spill] sm:$0xff]  ;;  %4539 = vrcp.f32 %v8545_v8 }
 0x231   :  { %v8560_v27 = vsub.f32 %v11927_v13, %v2743_v9  ;;  %v8565_v56 = vsub.f32 %v11928_v20, %v2745_v26  ;;  %v8570_v44 = vsub.f32 %v11931_v40, %v2746_v49  ;;  %v11938_v9 = vld [vmem:[#allocation100_spill] sm:$0xff]  ;;  %v11940_v26 = vld [vmem:[#allocation115_spill] sm:$0xff]  ;;  %v11943_v49 = vld [vmem:[#allocation22_spill] sm:$0xff] }
 0x232   :  { %v8575_v1 = vsub.f32 %v11934_v46, %v2747_v41  ;;  %v8580_v31 = vsub.f32 %v11937_v34, %v2748_v4  ;;  %v1737_v33 = vsel %vm132_vm0, %v11938_v9, 0.0  ;;  %v11941_v45 = vsub.f32 %v11939_v63, %v11940_v26  ;;  %v11944_v13 = vld [vmem:[#allocation5_spill] sm:$0xff]  ;;  %v11947_v41 = vld [vmem:[#allocation18_spill] sm:$0xff]  ;;  %v11951_v4 = vld [vmem:[#allocation72_spill] sm:$0xff] }
 0x233   :  { %v11945_v20 = vsub.f32 %v11943_v49, %v11944_v13  ;;  %v11949_v40 = vsub.f32 %v11947_v41, %v11948_v61  ;;  %v1749_v57 = vsel %vm132_vm0, %v11951_v4, 0.0  ;;  %v11952_v46 = vld [vmem:[#allocation27_spill] sm:$0xff]  ;;  %v11957_v9 = vld [vmem:[#allocation129_spill] sm:$0xff] }
 0x234   :  { %v8587_v15 = vsub.f32 %v11941_v45, %v2750_v18  ;;  %v11954_v12 = vsub.f32 %v11952_v46, %v11953_v25  ;;  %v11956_v18 = vld [vmem:[#allocation28_spill] sm:$0xff]  ;;  %v11961_v45 = vld [vmem:[#allocation130_spill] sm:$0xff]  ;;  %v11965_v41 = vld [vmem:[#allocation51_spill] sm:$0xff] }
 0x235   :  { %v8592_v17 = vsub.f32 %v11945_v20, %v2751_v47  ;;  %v8597_v29 = vsub.f32 %v11949_v40, %v2752_v16  ;;  %v11958_v63 = vsub.f32 %v11956_v18, %v11957_v9  ;;  %v11960_v47 = vld [vmem:[#allocation33_spill] sm:$0xff]  ;;  %v11964_v16 = vld [vmem:[#allocation107_spill] sm:$0xff]  ;;  %v11970_v46 = vld [vmem:[#allocation132_spill] sm:$0xff] }
 0x236   :  { %11942 = vst [vmem:[#allocation93_spill] sm:$0xff] %v8587_v15  ;;  %v8604_v34 = vsub.f32 %v11954_v12, %v2753_v38  ;;  %v11962_v49 = vsub.f32 %v11960_v47, %v11961_v45  ;;  %v1750_v20 = vsel %vm132_vm0, %v11964_v16, 0.0  ;;  %v11966_v61 = vld [vmem:[#allocation131_spill] sm:$0xff]  ;;  %v11975_v47 = vld [vmem:[#allocation112_spill] sm:$0xff] }
 0x237   :  { %11946 = vst [vmem:[#allocation103_spill] sm:$0xff] %v8592_v17  ;;  %11950 = vst [vmem:[#allocation104_spill] sm:$0xff] %v8597_v29  ;;  %v8609_v26 = vsub.f32 %v11958_v63, %v2755_v55  ;;  %v11967_v40 = vsub.f32 %v11965_v41, %v11966_v61  ;;  %v11969_v38 = vld [vmem:[#allocation31_spill] sm:$0xff]  ;;  %v11973_v55 = vld [vmem:[#allocation12_spill] sm:$0xff]  ;;  %v1763_v45 = vsel %vm132_vm0, %v11975_v47, 0.0 }
 0x238   :  { %11955 = vst [vmem:[#allocation7_spill] sm:$0xff] %v8604_v34  ;;  %v8614_v13 = vsub.f32 %v11962_v49, %v2756_v28  ;;  %v11971_v25 = vsub.f32 %v11969_v38, %v11970_v46  ;;  %v1713_v18 = vsel %vm132_vm0, %v11973_v55, 0.0  ;;  %v1725_v28 = vadd.f32 %v1724_v30, %v1723_v42  ;;  %v11974_v9 = vld [vmem:[#allocation111_spill] sm:$0xff]  ;;  %v11978_v41 = vld [vmem:[#allocation121_spill] sm:$0xff] }
 0x239   :  { %11959 = vst [vmem:[#allocation21_spill] sm:$0xff] %v8609_v26  ;;  %v8621_v4 = vsub.f32 %v11967_v40, %v2757_v22  ;;  %v1762_v63 = vsel %vm132_vm0, %v11974_v9, 0.0  ;;  %v11976_v49 = vld [vmem:[#allocation119_spill] sm:$0xff]  ;;  %v11980_v40 = vld [vmem:[#allocation20_spill] sm:$0xff]  ;;  %v1738_v46 = vadd.f32 %v1737_v33, %v1736_v3  ;;  %v11982_v42 = vld [vmem:[#allocation17_spill] sm:$0xff] }
 0x23a   :  { %11963 = vst [vmem:[#allocation126_spill] sm:$0xff] %v8614_v13  ;;  %v8626_v12 = vsub.f32 %v11971_v25, %v2758_v0  ;;  %v11977_v22 = vld [vmem:[#allocation11_spill] sm:$0xff]  ;;  %v1726_v38 = vsel %vm132_vm0, %v11980_v40, 0.0  ;;  %v11981_v25 = vld [vmem:[#allocation134_spill] sm:$0xff]  ;;  %v11984_v55 = vld [vmem:[#allocation25_spill] sm:$0xff]  ;;  %v1752_v40 = vsel %vm132_vm0, %v11989_v2, 0.0  ;;  %v1764_v3 = vadd.f32 %v1763_v45, %v1762_v63 }
 0x23b   :  { %11968 = vst [vmem:[#allocation50_spill] sm:$0xff] %v8621_v4  ;;  %v8637_v16 = vmul.f32 %v11977_v22, %v11976_v49  ;;  %v11979_v61 = vld [vmem:[#allocation15_spill] sm:$0xff]  ;;  %v8647_v30 = vmul.f32 %v11982_v42, %v11981_v25  ;;  %v11985_v9 = vld [vmem:[#allocation89_spill] sm:$0xff]  ;;  %v1751_v49 = vadd.f32 %v1750_v20, %v1749_v57  ;;  %v11987_v22 = vld [vmem:[#allocation14_spill] sm:$0xff]  ;;  %v1727_v42 = vadd.f32 %v1726_v38, %v1725_v28 }
 0x23c   :  { %11972 = vst [vmem:[#allocation127_spill] sm:$0xff] %v8626_v12  ;;  %v8641_v0 = vmul.f32 %v11979_v61, %v11978_v41  ;;  %v1701_v5 = vadd.f32 %v11985_v9, %v11984_v55  ;;  %v11986_v47 = vld [vmem:[#allocation71_spill] sm:$0xff]  ;;  %v1702_v50 = vsel %vm132_vm0, %v11987_v22, 0.0  ;;  %v11990_v33 = vld [vmem:[#allocation16_spill] sm:$0xff]  ;;  %v11991_v12 = vld [vmem:[#allocation113_spill] sm:$0xff] }
 0x23d   :  { %11983 = vst [vmem:[#allocation29_spill] sm:$0xff] %v8647_v30  ;;  %v1739_v54 = vsel %vm132_vm0, %v11986_v47, 0.0  ;;  %v11988_v41 = vld [vmem:[#allocation23_spill] sm:$0xff]  ;;  %v1715_v25 = vsel %vm132_vm0, %v11990_v33, 0.0  ;;  %v1765_v55 = vsel %vm132_vm0, %v11991_v12, 0.0  ;;  %v11992_v9 = vld [vmem:[#allocation88_spill] sm:$0xff]  ;;  %v1753_v12 = vadd.f32 %v1752_v40, %v1751_v49 }
 0x23e   :  { %v1714_v61 = vadd.f32 %v1713_v18, %v11988_v41  ;;  %v11993_v4 = vld [vmem:[#allocation96_spill] sm:$0xff]  ;;  %v11994_v57 = vld [vmem:[#allocation135_spill] sm:$0xff]  ;;  %v11997_v22 = vld [vmem:[#allocation98_spill] sm:$0xff]  ;;  %v1740_v41 = vadd.f32 %v1739_v54, %v1738_v46  ;;  %v8672_v45 = vadd.f32 %v1702_v50, %v1701_v5 }
 0x23f   :  { %v2719_v47 = vmul.f32 %v11993_v4, %v11992_v9  ;;  %v11995_v20 = vld [vmem:[#allocation36_spill] sm:$0xff]  ;;  %v1728_v18 = vsel %vm132_vm0, %v11997_v22, 0.0  ;;  %v11998_v2 = vld [vmem:[#allocation125_spill] sm:$0xff]  ;;  %v12000_v28 = vld [vmem:[#allocation102_spill] sm:$0xff] }
 0x240   :  { %v8666_v30 = vmul.f32 %v11995_v20, %v11994_v57  ;;  %v2724_v63 = vmul.f32 %v11998_v2, %v11992_v9  ;;  %11999 = vst [vmem:[#allocation100_spill] sm:$0xff] %v8672_v45  ;;  %v1741_v38 = vsel %vm132_vm0, %v12000_v28, 0.0  ;;  %v12001_v33 = vld [vmem:[#allocation123_spill] sm:$0xff]  ;;  %v8678_v13 = vadd.f32 %v1715_v25, %v1714_v61  ;;  %v12003_v57 = vld [vmem:[#allocation109_spill] sm:$0xff]  ;;  %v12004_v54 = vld [vmem:[#allocation90_spill] sm:$0xff] }
 0x241   :  { %v2729_v4 = vmul.f32 %v12001_v33, %v11992_v9  ;;  %v1754_v20 = vsel %vm132_vm0, %v12003_v57, 0.0  ;;  %v2744_v46 = vmul.f32 %v12004_v54, %v11992_v9  ;;  %v8684_v22 = vadd.f32 %v1728_v18, %v1727_v42  ;;  %v12006_v50 = vld [vmem:[#allocation114_spill] sm:$0xff]  ;;  %v12007_v2 = vld [vmem:[#allocation133_spill] sm:$0xff]  ;;  %v4540_v33 = vpop.eup %4539  ;;  %v12011_v25 = vld [vmem:[#allocation136_spill] sm:$0xff] }
 0x242   :  { %11996 = vst [vmem:[#allocation110_spill] sm:$0xff] %v8666_v30  ;;  %12002 = vst [vmem:[#allocation26_spill] sm:$0xff] %v8678_v13  ;;  %v1766_v30 = vadd.f32 %v1765_v55, %v1764_v3  ;;  %v1767_v5 = vsel %vm132_vm0, %v12006_v50, 0.0  ;;  %v8689_v28 = vsub.f32 %v12007_v2, %v2719_v47  ;;  %v12009_v49 = vld [vmem:[#allocation106_spill] sm:$0xff]  ;;  %v8692_v61 = vadd.f32 %v1741_v38, %v1740_v41  ;;  %v12012_v55 = vld [vmem:[#allocation124_spill] sm:$0xff] }
 0x243   :  { %12005 = vst [vmem:[#allocation115_spill] sm:$0xff] %v8684_v22  ;;  %v2842_v40 = vsub.s32 4, %v12009_v49  ;;  %v2749_v57 = vmul.f32 %v12011_v25, %v11992_v9  ;;  %v2754_v3 = vmul.f32 %v8466_v52, %v11992_v9  ;;  %v8699_v42 = vsub.f32 %v12012_v55, %v2724_v63  ;;  %v12015_v54 = vld [vmem:[#allocation9_spill] sm:$0xff]  ;;  %v12019_v38 = vld [vmem:[#allocation10_spill] sm:$0xff] }
 0x244   :  { %12008 = vst [vmem:[#allocation22_spill] sm:$0xff] %v8689_v28  ;;  %12010 = vst [vmem:[#allocation5_spill] sm:$0xff] %v8692_v61  ;;  %v8701_v18 = vadd.f32 %v1754_v20, %v1753_v12  ;;  %v1775_v47 = vsel %vm132_vm0, %v12015_v54, 0.0  ;;  %v12016_v50 = vld [vmem:[#allocation101_spill] sm:$0xff]  ;;  %v8708_v41 = vadd.f32 %v1767_v5, %v1766_v30  ;;  %v1776_v25 = vsel %vm132_vm0, %v12019_v38, 0.0  ;;  %v12020_v61 = vld [vmem:[#allocation52_spill] sm:$0xff] }
 0x245   :  { %12013 = vst [vmem:[#allocation18_spill] sm:$0xff] %v8699_v42  ;;  %v8706_v2 = vsub.f32 %v12016_v50, %v2729_v4  ;;  %v2843_v49 = vrot.slane %v4540_v33, %v2842_v40  ;;  %v8714_v52 = vsel %vm132_vm0, %v12020_v61, 0.0  ;;  %v12021_v63 = vld [vmem:[#allocation6_spill] sm:$0xff]  ;;  %v8729_v30 = vrot.slane %v8689_v28, %v2842_v40  ;;  %v12028_v61 = vld [vmem:[#allocation97_spill] sm:$0xff] }
 0x246   :  { %12014 = vst [vmem:[#allocation95_spill] sm:$0xff] %v8701_v18  ;;  %12018 = vst [vmem:[#allocation27_spill] sm:$0xff] %v8708_v41  ;;  %v8717_v55 = vsub.f32 %v12021_v63, %v2744_v46  ;;  %v12026_v5 = vld [vmem:[#allocation122_spill] sm:$0xff]  ;;  %v8735_v54 = vsub.f32 %v12028_v61, %v2754_v3  ;;  %v1777_v3 = vadd.f32 %v1776_v25, %v1775_v47 }
 0x247   :  { %12017 = vst [vmem:[#allocation72_spill] sm:$0xff] %v8706_v2  ;;  %v8720_v12 = vmul.f32 %v2843_v49, %v8542_v48  ;;  %v8723_v20 = vmul.f32 %v2843_v49, %v8550_v60  ;;  %v8726_v4 = vmul.f32 %v2843_v49, %v8555_v58  ;;  %12025 = vst [vmem:[#allocation33_spill] sm:$0xff] %v8729_v30 }
 0x248   :  { %v8732_v33 = vsub.f32 %v12026_v5, %v2749_v57  ;;  %12029 = vst [vmem:[#allocation107_spill] sm:$0xff] %v8735_v54  ;;  %v8738_v46 = vmul.f32 %v2843_v49, %v8560_v27  ;;  %v8741_v48 = vrot.slane %v8699_v42, %v2842_v40  ;;  %v8744_v60 = vrot.slane %v8706_v2, %v2842_v40 }
 0x249   :  { %12022 = vst [vmem:[#allocation128_spill] sm:$0xff] %v8720_v12  ;;  %12023 = vst [vmem:[#allocation28_spill] sm:$0xff] %v8723_v20  ;;  %v2882_v58 = vmul.f32 %v8729_v30, %v8720_v12  ;;  %v2883_v50 = vmul.f32 %v8729_v30, %v8723_v20  ;;  %v2884_v57 = vmul.f32 %v8729_v30, %v8726_v4 }
 0x24a   :  { %12024 = vst [vmem:[#allocation129_spill] sm:$0xff] %v8726_v4  ;;  %12027 = vst [vmem:[#allocation130_spill] sm:$0xff] %v8732_v33  ;;  %v2885_v27 = vmul.f32 %v8729_v30, %v8738_v46  ;;  %v8756_v38 = vmul.f32 %v8741_v48, %v8720_v12  ;;  %v8760_v63 = vmul.f32 %v8741_v48, %v8723_v20 }
 0x24b   :  { %12030 = vst [vmem:[#allocation51_spill] sm:$0xff] %v8738_v46  ;;  %12031 = vst [vmem:[#allocation131_spill] sm:$0xff] %v8741_v48  ;;  %v8763_v5 = vrot.slane %v11992_v9, %v2842_v40  ;;  %v8767_v61 = vmul.f32 %v8741_v48, %v8726_v4  ;;  %v8771_v47 = vmul.f32 %v8741_v48, %v8738_v46 }
 0x24c   :  { %12032 = vst [vmem:[#allocation31_spill] sm:$0xff] %v8744_v60  ;;  %v2892_v25 = vmul.f32 %v8744_v60, %v8720_v12  ;;  %v2872_v2 = vrot.slane %v8717_v55, %v2842_v40  ;;  %v2893_v42 = vmul.f32 %v8744_v60, %v8723_v20  ;;  %v2894_v9 = vmul.f32 %v8744_v60, %v8726_v4 }
 0x24d   :  { %12033 = vst [vmem:[#allocation132_spill] sm:$0xff] %v8763_v5  ;;  %v2895_v28 = vmul.f32 %v8744_v60, %v8738_v46  ;;  %v8783_v30 = vmul.f32 %v2843_v49, %v8545_v8  ;;  %v8786_v48 = vrot.slane %v8732_v33, %v2842_v40  ;;  %v8789_v41 = vrot.slane %v8735_v54, %v2842_v40 }
 0x24e   :  { %v8793_v18 = vmul.f32 %v8763_v5, %v8720_v12  ;;  %v8797_v22 = vmul.f32 %v8763_v5, %v8723_v20  ;;  %v8800_v13 = vmul.f32 %v2872_v2, %v8720_v12  ;;  %v8803_v8 = vmul.f32 %v2872_v2, %v8723_v20 }
 0x24f   :  { %12034 = vst [vmem:[#allocation12_spill] sm:$0xff] %v8783_v30  ;;  %12035 = vst [vmem:[#allocation111_spill] sm:$0xff] %v8786_v48  ;;  %v8806_v49 = vmul.f32 %v2872_v2, %v8726_v4  ;;  %v8810_v40 = vmul.f32 %v8763_v5, %v8726_v4  ;;  %v8813_v54 = vmul.f32 %v2872_v2, %v8738_v46 }
 0x250   :  { %12036 = vst [vmem:[#allocation112_spill] sm:$0xff] %v8789_v41  ;;  %12037 = vst [vmem:[#allocation119_spill] sm:$0xff] %v8797_v22  ;;  %v8817_v33 = vmul.f32 %v8786_v48, %v8720_v12  ;;  %v8821_v60 = vmul.f32 %v8786_v48, %v8723_v20  ;;  %v8825_v45 = vmul.f32 %v8763_v5, %v8738_v46 }
 0x251   :  { %12038 = vst [vmem:[#allocation11_spill] sm:$0xff] %v8810_v40  ;;  %v8829_v26 = vmul.f32 %v8786_v48, %v8726_v4  ;;  %v8833_v34 = vmul.f32 %v8786_v48, %v8738_v46  ;;  %v8837_v29 = vmul.f32 %v8789_v41, %v8720_v12  ;;  %v2906_v17 = vmul.f32 %v2872_v2, %v8783_v30 }
 0x252   :  { %12039 = vst [vmem:[#allocation121_spill] sm:$0xff] %v8817_v33  ;;  %12040 = vst [vmem:[#allocation15_spill] sm:$0xff] %v8821_v60  ;;  %v8842_v60 = vmul.f32 %v8789_v41, %v8723_v20  ;;  %v8846_v5 = vmul.f32 %v8789_v41, %v8726_v4  ;;  %v12048_v48 = vsub.f32 %v8137_v11, %v8417_v14  ;;  %v12051_v4 = vld [vmem:[#allocation99_spill] sm:$0xff] }
 0x253   :  { %12041 = vst [vmem:[#allocation20_spill] sm:$0xff] %v8825_v45  ;;  %12042 = vst [vmem:[#allocation134_spill] sm:$0xff] %v8829_v26  ;;  %v8850_v26 = vmul.f32 %v8789_v41, %v8738_v46  ;;  %v12049_v2 = vsub.f32 %v8142_v10, %v8421_v23  ;;  %v12050_v20 = vsub.f32 %v8147_v43, %v8425_v24  ;;  %v12053_v41 = vld [vmem:[#allocation19_spill] sm:$0xff]  ;;  %v1788_v43 = vsel %vm132_vm0, %v8637_v16, 0.0 }
 0x254   :  { %12043 = vst [vmem:[#allocation17_spill] sm:$0xff] %v8833_v34  ;;  %12044 = vst [vmem:[#allocation25_spill] sm:$0xff] %v8837_v29  ;;  %v8855_v34 = vsub.f32 %v12048_v48, %v2882_v58  ;;  %v1780_v11 = vsel %vm132_vm0, %v12053_v41, 0.0  ;;  %v12054_v24 = vsub.f32 %v11920_v21, %v8443_v39  ;;  %v12055_v41 = vsub.f32 %v11921_v37, %v8450_v51  ;;  %v12060_v39 = vld [vmem:[#allocation30_spill] sm:$0xff]  ;;  %v12061_v51 = vld [vmem:[#allocation37_spill] sm:$0xff] }
 0x255   :  { %12045 = vst [vmem:[#allocation89_spill] sm:$0xff] %v8842_v60  ;;  %12046 = vst [vmem:[#allocation71_spill] sm:$0xff] %v8846_v5  ;;  %v8860_v12 = vsub.f32 %v12049_v2, %v2883_v50  ;;  %v8865_v30 = vsub.f32 %v12050_v20, %v2884_v57  ;;  %v12052_v5 = vsub.f32 %v8152_v62, %v12051_v4  ;;  %v1789_v48 = vsel %vm132_vm0, %v8641_v0, 0.0  ;;  %v12079_v62 = vld [vmem:[#allocation100_spill] sm:$0xff]  ;;  %v12090_v29 = vld [vmem:[#allocation118_spill] sm:$0xff] }
 0x256   :  { %12047 = vst [vmem:[#allocation14_spill] sm:$0xff] %v8850_v26  ;;  %v8887_v20 = vsub.f32 %v12054_v24, %v2892_v25  ;;  %v8892_v4 = vsub.f32 %v12055_v41, %v2893_v42  ;;  %v12056_v58 = vsub.f32 %v11922_v53, %v8454_v35  ;;  %v12058_v50 = vsub.f32 %v11923_v19, %v8458_v6  ;;  %v12080_v53 = vld [vmem:[#allocation26_spill] sm:$0xff]  ;;  %v12081_v6 = vld [vmem:[#allocation115_spill] sm:$0xff]  ;;  %v12085_v25 = vld [vmem:[#allocation80_spill] sm:$0xff] }
 0x257   :  { %v8870_v46 = vsub.f32 %v12052_v5, %v2885_v27  ;;  %v8915_v35 = vsub.f32 %v8717_v55, %v2906_v17  ;;  %v1717_v10 = vrot.slane %v12080_v53, 4  ;;  %v1730_v60 = vrot.slane %v12081_v6, 4  ;;  %v12088_v55 = vld [vmem:[#allocation5_spill] sm:$0xff]  ;;  %v12093_v27 = vld [vmem:[#allocation27_spill] sm:$0xff] }
 0x258   :  { %v8899_v16 = vsub.f32 %v12056_v58, %v2894_v9  ;;  %v8904_v57 = vsub.f32 %v12058_v50, %v2895_v28  ;;  %v1779_v28 = vadd.f32 %v8714_v52, %v1777_v3  ;;  %v1790_v50 = vadd.f32 %v1789_v48, %v1788_v43  ;;  %v12072_v52 = vld [vmem:[#allocation29_spill] sm:$0xff]  ;;  %v12098_v33 = vld [vmem:[#allocation31_spill] sm:$0xff] }
 0x259   :  { %v1791_v3 = vsel %vm132_vm0, %v12072_v52, 0.0  ;;  %4541 = vrcp.f32 %v8915_v35  ;;  %v12076_v43 = vld [vmem:[#allocation117_spill] sm:$0xff]  ;;  %v1704_v58 = vrot.slane %v12079_v62, 4  ;;  %v12082_v52 = vld [vmem:[#allocation75_spill] sm:$0xff]  ;;  %v12086_v19 = vrot.slane %v12085_v25, 2 }
 0x25a   :  { %12057 = vst [vmem:[#allocation23_spill] sm:$0xff] %v8899_v16  ;;  %12059 = vst [vmem:[#allocation108_spill] sm:$0xff] %v8904_v57  ;;  %v12077_v48 = vrot.slane %v12076_v43, 4  ;;  %v12083_v23 = vrot.slane %v12082_v52, 2  ;;  %v1743_v14 = vrot.slane %v12088_v55, 4  ;;  %v12091_v21 = vrot.slane %v12090_v29, 4 }
 0x25b   :  { %v8961_v26 = vadd.f32 %v12086_v19, %v12085_v25  ;;  %v1769_v24 = vrot.slane %v12093_v27, 4  ;;  %v1781_v41 = vadd.f32 %v1780_v11, %v1779_v28  ;;  %v1792_v2 = vadd.f32 %v1791_v3, %v1790_v50  ;;  %v12096_v17 = vld [vmem:[#allocation33_spill] sm:$0xff]  ;;  %v12097_v25 = vld [vmem:[#allocation131_spill] sm:$0xff]  ;;  %v12104_v50 = vld [vmem:[#allocation132_spill] sm:$0xff] }
 0x25c   :  { %v8948_v37 = vadd.f32 %v12077_v48, %v12076_v43  ;;  %v8956_v9 = vadd.f32 %v12083_v23, %v12082_v52  ;;  %v12089_v43 = vld [vmem:[#allocation95_spill] sm:$0xff]  ;;  %v8968_v5 = vadd.f32 %v12091_v21, %v12090_v29  ;;  %v12094_v23 = vld [vmem:[#allocation110_spill] sm:$0xff]  ;;  %v8981_v29 = vadd.f32 %v1704_v58, %v12079_v62 }
 0x25d   :  { %12087 = vst [vmem:[#allocation96_spill] sm:$0xff] %v8961_v26  ;;  %v1756_v48 = vrot.slane %v12089_v43, 4  ;;  %v1793_v52 = vsel %vm132_vm0, %v12094_v23, 0.0  ;;  %v8984_v11 = vadd.f32 %v1717_v10, %v12080_v53  ;;  %v8987_v21 = vadd.f32 %v1730_v60, %v12081_v6  ;;  %v12105_v3 = vld [vmem:[#allocation111_spill] sm:$0xff] }
 0x25e   :  { %12078 = vst [vmem:[#allocation16_spill] sm:$0xff] %v8948_v37  ;;  %12084 = vst [vmem:[#allocation113_spill] sm:$0xff] %v8956_v9  ;;  %v12095_v9 = vld [vmem:[#allocation12_spill] sm:$0xff]  ;;  %v8990_v28 = vadd.f32 %v1743_v14, %v12088_v55  ;;  %v9001_v10 = vadd.f32 %v1769_v24, %v12093_v27  ;;  %v1782_v53 = vrot.slane %v1781_v41, 4  ;;  %v9003_v60 = vadd.f32 %v1793_v52, %v1792_v2  ;;  %v12108_v55 = vld [vmem:[#allocation22_spill] sm:$0xff] }
 0x25f   :  { %12092 = vst [vmem:[#allocation135_spill] sm:$0xff] %v8968_v5  ;;  %v2881_v19 = vmul.f32 %v12096_v17, %v12095_v9  ;;  %v2886_v26 = vmul.f32 %v12097_v25, %v12095_v9  ;;  %v2891_v15 = vmul.f32 %v12098_v33, %v12095_v9  ;;  %12099 = vst [vmem:[#allocation36_spill] sm:$0xff] %v8981_v29  ;;  %v12107_v14 = vld [vmem:[#allocation112_spill] sm:$0xff]  ;;  %v12111_v2 = vld [vmem:[#allocation106_spill] sm:$0xff] }
 0x260   :  { %12100 = vst [vmem:[#allocation98_spill] sm:$0xff] %v8984_v11  ;;  %12101 = vst [vmem:[#allocation125_spill] sm:$0xff] %v8987_v21  ;;  %v8993_v17 = vadd.f32 %v1756_v48, %v12089_v43  ;;  %v2896_v33 = vmul.f32 %v12104_v50, %v12095_v9  ;;  %v2911_v23 = vmul.f32 %v12105_v3, %v12095_v9  ;;  %v12109_v43 = vld [vmem:[#allocation18_spill] sm:$0xff]  ;;  %v12110_v25 = vld [vmem:[#allocation72_spill] sm:$0xff]  ;;  %v3004_v52 = vsub.s32 5, %v12111_v2 }
 0x261   :  { %12102 = vst [vmem:[#allocation102_spill] sm:$0xff] %v8990_v28  ;;  %12106 = vst [vmem:[#allocation109_spill] sm:$0xff] %v9001_v10  ;;  %v2916_v6 = vmul.f32 %v12107_v14, %v12095_v9  ;;  %v9008_v58 = vsub.f32 %v12108_v55, %v2881_v19  ;;  %v9011_v48 = vsub.f32 %v12109_v43, %v2886_v26  ;;  %v12112_v55 = vld [vmem:[#allocation88_spill] sm:$0xff]  ;;  %v12113_v26 = vld [vmem:[#allocation130_spill] sm:$0xff] }
 0x262   :  { %12103 = vst [vmem:[#allocation123_spill] sm:$0xff] %v8993_v17  ;;  %v9014_v50 = vsub.f32 %v12110_v25, %v2891_v15  ;;  %v9023_v45 = vsub.f32 %v12112_v55, %v2896_v33  ;;  %v9026_v43 = vsub.f32 %v12113_v26, %v2911_v23  ;;  %v9029_v25 = vadd.f32 %v1782_v53, %v1781_v41  ;;  %v12116_v3 = vld [vmem:[#allocation107_spill] sm:$0xff] }
 0x263   :  { %v4542_v62 = vpop.eup %4541  ;;  %v9033_v2 = vsub.f32 %v12116_v3, %v2916_v6  ;;  %v3014_v14 = vrot.slane %v9008_v58, %v3004_v52  ;;  %v3018_v19 = vrot.slane %v9011_v48, %v3004_v52  ;;  %v12118_v23 = vsub.f32 %v8565_v56, %v8800_v13 }
 0x264   :  { %12114 = vst [vmem:[#allocation90_spill] sm:$0xff] %v9026_v43  ;;  %12115 = vst [vmem:[#allocation114_spill] sm:$0xff] %v9029_v25  ;;  %v3005_v24 = vrot.slane %v4542_v62, %v3004_v52  ;;  %v3022_v33 = vrot.slane %v9014_v50, %v3004_v52  ;;  %v12120_v62 = vsub.f32 %v8570_v44, %v8803_v8 }
 0x265   :  { %12117 = vst [vmem:[#allocation133_spill] sm:$0xff] %v9033_v2  ;;  %v12122_v6 = vsub.f32 %v8575_v1, %v8806_v49  ;;  %v12124_v26 = vsub.f32 %v8580_v31, %v8813_v54  ;;  %v3026_v15 = vrot.slane %v9023_v45, %v3004_v52  ;;  %v9063_v56 = vrot.slane %v12095_v9, %v3004_v52 }
 0x266   :  { %v9039_v55 = vmul.f32 %v3005_v24, %v8915_v35  ;;  %v9044_v41 = vmul.f32 %v3005_v24, %v12118_v23  ;;  %v9049_v53 = vmul.f32 %v3005_v24, %v12120_v62  ;;  %v3038_v13 = vrot.slane %v9026_v43, %v3004_v52 }
 0x267   :  { %v9054_v3 = vmul.f32 %v3005_v24, %v12122_v6  ;;  %v9059_v35 = vmul.f32 %v3005_v24, %v12124_v26  ;;  %12126 = vst [vmem:[#allocation10_spill] sm:$0xff] %v9063_v56  ;;  %v3042_v11 = vrot.slane %v9033_v2, %v3004_v52  ;;  %v12135_v22 = vsub.f32 %v8520_v7, %v8767_v61 }
 0x268   :  { %12119 = vst [vmem:[#allocation136_spill] sm:$0xff] %v9044_v41  ;;  %12121 = vst [vmem:[#allocation124_spill] sm:$0xff] %v9049_v53  ;;  %v3043_v44 = vmul.f32 %v3014_v14, %v9039_v55  ;;  %v9068_v8 = vmul.f32 %v3014_v14, %v9044_v41  ;;  %v9071_v1 = vmul.f32 %v3014_v14, %v9049_v53  ;;  %v12139_v61 = vrot.slane %v9003_v60, 4 }
 0x269   :  { %12123 = vst [vmem:[#allocation9_spill] sm:$0xff] %v9054_v3  ;;  %12125 = vst [vmem:[#allocation101_spill] sm:$0xff] %v9059_v35  ;;  %v9074_v49 = vmul.f32 %v3014_v14, %v9054_v3  ;;  %v9077_v31 = vmul.f32 %v3014_v14, %v9059_v35  ;;  %v3048_v54 = vmul.f32 %v3018_v19, %v9039_v55 }
 0x26a   :  { %v3049_v24 = vmul.f32 %v3018_v19, %v9044_v41  ;;  %v3050_v23 = vmul.f32 %v3018_v19, %v9049_v53  ;;  %v3051_v62 = vmul.f32 %v3018_v19, %v9054_v3  ;;  %v3052_v6 = vmul.f32 %v3018_v19, %v9059_v35 }
 0x26b   :  { %v3053_v26 = vmul.f32 %v3022_v33, %v9039_v55  ;;  %v9086_v27 = vmul.f32 %v3022_v33, %v9044_v41  ;;  %v9089_v9 = vmul.f32 %v3022_v33, %v9049_v53  ;;  %v9092_v14 = vmul.f32 %v3022_v33, %v9054_v3 }
 0x26c   :  { %v9095_v25 = vmul.f32 %v3022_v33, %v9059_v35  ;;  %v3058_v10 = vmul.f32 %v3026_v15, %v9039_v55  ;;  %v3059_v17 = vmul.f32 %v3026_v15, %v9044_v41  ;;  %v3060_v19 = vmul.f32 %v3026_v15, %v9049_v53 }
 0x26d   :  { %12127 = vst [vmem:[#allocation52_spill] sm:$0xff] %v9092_v14  ;;  %v3061_v28 = vmul.f32 %v3026_v15, %v9054_v3  ;;  %v3062_v21 = vmul.f32 %v3026_v15, %v9059_v35  ;;  %v9105_v29 = vmul.f32 %v9063_v56, %v9044_v41  ;;  %v9109_v33 = vmul.f32 %v9063_v56, %v9049_v53 }
 0x26e   :  { %12128 = vst [vmem:[#allocation6_spill] sm:$0xff] %v9095_v25  ;;  %v9113_v5 = vmul.f32 %v9063_v56, %v9054_v3  ;;  %v9117_v37 = vmul.f32 %v9063_v56, %v9059_v35  ;;  %v3073_v15 = vmul.f32 %v3038_v13, %v9039_v55  ;;  %v3074_v52 = vmul.f32 %v3038_v13, %v9044_v41 }
 0x26f   :  { %12129 = vst [vmem:[#allocation122_spill] sm:$0xff] %v9105_v29  ;;  %12130 = vst [vmem:[#allocation97_spill] sm:$0xff] %v9109_v33  ;;  %v3075_v2 = vmul.f32 %v3038_v13, %v9049_v53  ;;  %v3076_v43 = vmul.f32 %v3038_v13, %v9054_v3  ;;  %v3077_v29 = vmul.f32 %v3038_v13, %v9059_v35 }
 0x270   :  { %12131 = vst [vmem:[#allocation99_spill] sm:$0xff] %v9113_v5  ;;  %12132 = vst [vmem:[#allocation19_spill] sm:$0xff] %v9117_v37  ;;  %v3078_v33 = vmul.f32 %v3042_v11, %v9039_v55  ;;  %v3079_v0 = vmul.f32 %v3042_v11, %v9044_v41  ;;  %v3080_v5 = vmul.f32 %v3042_v11, %v9049_v53 }
 0x271   :  { %v3081_v40 = vmul.f32 %v3042_v11, %v9054_v3  ;;  %v3082_v56 = vmul.f32 %v3042_v11, %v9059_v35  ;;  %v9130_v37 = vsub.f32 %v9008_v58, %v3043_v44  ;;  %v9141_v53 = vsub.f32 %v9011_v48, %v3048_v54  ;;  %v12167_v35 = vld [vmem:[#allocation134_spill] sm:$0xff] }
 0x272   :  { %v12133_v11 = vsub.f32 %v8510_v36, %v8756_v38  ;;  %v12134_v44 = vsub.f32 %v8515_v32, %v8760_v63  ;;  %v9156_v13 = vsub.f32 %v12135_v22, %v3051_v62  ;;  %v12136_v41 = vsub.f32 %v8527_v59, %v8771_v47  ;;  %v12144_v62 = vld [vmem:[#allocation11_spill] sm:$0xff] }
 0x273   :  { %v9164_v54 = vsub.f32 %v9014_v50, %v3053_v26  ;;  %v9175_v22 = vsub.f32 %v9023_v45, %v3058_v10  ;;  %v12137_v59 = vsub.f32 %v12060_v39, %v8793_v18  ;;  %v1796_v47 = vadd.f32 %v12139_v61, %v9003_v60  ;;  %v12140_v50 = vld [vmem:[#allocation119_spill] sm:$0xff]  ;;  %v12147_v45 = vld [vmem:[#allocation120_spill] sm:$0xff]  ;;  %v12170_v60 = vld [vmem:[#allocation17_spill] sm:$0xff] }
 0x274   :  { %v9146_v58 = vsub.f32 %v12133_v11, %v3049_v24  ;;  %v9151_v42 = vsub.f32 %v12134_v44, %v3050_v23  ;;  %v9161_v48 = vsub.f32 %v12136_v41, %v3052_v6  ;;  %v12141_v41 = vsub.f32 %v12061_v51, %v12140_v50  ;;  %v12143_v23 = vld [vmem:[#allocation54_spill] sm:$0xff]  ;;  %v12148_v10 = vld [vmem:[#allocation20_spill] sm:$0xff]  ;;  %v12172_v51 = vld [vmem:[#allocation133_spill] sm:$0xff] }
 0x275   :  { %v9180_v63 = vsub.f32 %v12137_v59, %v3059_v17  ;;  %v12145_v6 = vsub.f32 %v12143_v23, %v12144_v62  ;;  %v12149_v11 = vsub.f32 %v12147_v45, %v12148_v10  ;;  %v12159_v23 = vld [vmem:[#allocation90_spill] sm:$0xff]  ;;  %v12160_v62 = vld [vmem:[#allocation93_spill] sm:$0xff]  ;;  %v12164_v10 = vld [vmem:[#allocation15_spill] sm:$0xff]  ;;  %v9222_v38 = vsub.f32 %v12172_v51, %v3078_v33 }
 0x276   :  { %v9188_v24 = vsub.f32 %v12141_v41, %v3060_v19  ;;  %v12166_v44 = vld [vmem:[#allocation104_spill] sm:$0xff]  ;;  %v12169_v59 = vld [vmem:[#allocation7_spill] sm:$0xff] }
 0x277   :  { %12138 = vst [vmem:[#allocation30_spill] sm:$0xff] %v9180_v63  ;;  %v9193_v26 = vsub.f32 %v12145_v6, %v3061_v28  ;;  %v9198_v18 = vsub.f32 %v12149_v11, %v3062_v21  ;;  %v3113_v28 = vsub.f32 %v12159_v23, %v3073_v15  ;;  %v12161_v6 = vld [vmem:[#allocation121_spill] sm:$0xff]  ;;  %v12163_v21 = vld [vmem:[#allocation103_spill] sm:$0xff]  ;;  %v12168_v3 = vsub.f32 %v12166_v44, %v12167_v35  ;;  %v12184_v35 = vld [vmem:[#allocation50_spill] sm:$0xff] }
 0x278   :  { %12142 = vst [vmem:[#allocation37_spill] sm:$0xff] %v9188_v24  ;;  %v12162_v32 = vsub.f32 %v12160_v62, %v12161_v6  ;;  %v12165_v11 = vsub.f32 %v12163_v21, %v12164_v10  ;;  %v12171_v19 = vsub.f32 %v12169_v59, %v12170_v60  ;;  %12173 = vst [vmem:[#allocation100_spill] sm:$0xff] %v9222_v38  ;;  %v12174_v15 = vld [vmem:[#allocation21_spill] sm:$0xff]  ;;  %v12182_v21 = vld [vmem:[#allocation16_spill] sm:$0xff] }
 0x279   :  { %12146 = vst [vmem:[#allocation29_spill] sm:$0xff] %v9193_v26  ;;  %12150 = vst [vmem:[#allocation117_spill] sm:$0xff] %v9198_v18  ;;  %v3116_v61 = vsub.f32 %v12168_v3, %v3076_v43  ;;  %v12175_v23 = vld [vmem:[#allocation25_spill] sm:$0xff]  ;;  %v12183_v43 = vrot.slane %v12182_v21, 2  ;;  %v12185_v44 = vld [vmem:[#allocation71_spill] sm:$0xff]  ;;  %4543 = vrcp.f32 %v3113_v28 }
 0x27a   :  { %v3114_v45 = vsub.f32 %v12162_v32, %v3074_v52  ;;  %v3115_v36 = vsub.f32 %v12165_v11, %v3075_v2  ;;  %v3117_v7 = vsub.f32 %v12171_v19, %v3077_v29  ;;  %v12176_v50 = vsub.f32 %v12174_v15, %v12175_v23  ;;  %v12178_v52 = vld [vmem:[#allocation126_spill] sm:$0xff]  ;;  %v12179_v32 = vld [vmem:[#allocation89_spill] sm:$0xff]  ;;  %v12188_v33 = vld [vmem:[#allocation127_spill] sm:$0xff] }
 0x27b   :  { %v12180_v6 = vsub.f32 %v12178_v52, %v12179_v32  ;;  %v1649_v3 = vadd.f32 %v12183_v43, %v12182_v21  ;;  %v12186_v29 = vsub.f32 %v12184_v35, %v12185_v44  ;;  %v12189_v60 = vld [vmem:[#allocation14_spill] sm:$0xff]  ;;  %v12193_v10 = vld [vmem:[#allocation135_spill] sm:$0xff]  ;;  %v12195_v15 = vld [vmem:[#allocation36_spill] sm:$0xff] }
 0x27c   :  { %v9227_v62 = vsub.f32 %v12176_v50, %v3079_v0  ;;  %v12190_v51 = vsub.f32 %v12188_v33, %v12189_v60  ;;  %v12192_v0 = vld [vmem:[#allocation116_spill] sm:$0xff]  ;;  %v12196_v23 = vrot.slane %v12195_v15, 2  ;;  %v12197_v32 = vld [vmem:[#allocation98_spill] sm:$0xff]  ;;  %v12202_v35 = vld [vmem:[#allocation125_spill] sm:$0xff] }
 0x27d   :  { %v9232_v2 = vsub.f32 %v12180_v6, %v3080_v5  ;;  %v9240_v59 = vsub.f32 %v12186_v29, %v3081_v40  ;;  %v1585_v50 = vrot.slane %v12192_v0, 1  ;;  %v12194_v5 = vrot.slane %v12193_v10, 2  ;;  %v12199_v21 = vld [vmem:[#allocation84_spill] sm:$0xff]  ;;  %v12204_v33 = vld [vmem:[#allocation102_spill] sm:$0xff] }
 0x27e   :  { %12177 = vst [vmem:[#allocation26_spill] sm:$0xff] %v9227_v62  ;;  %v9245_v19 = vsub.f32 %v12190_v51, %v3082_v56  ;;  %v1707_v52 = vadd.f32 %v12196_v23, %v12195_v15  ;;  %v12198_v40 = vrot.slane %v12197_v32, 2  ;;  %v12200_v43 = vrot.slane %v12199_v21, 1  ;;  %v12208_v23 = vld [vmem:[#allocation92_spill] sm:$0xff] }
 0x27f   :  { %12181 = vst [vmem:[#allocation115_spill] sm:$0xff] %v9232_v2  ;;  %12187 = vst [vmem:[#allocation75_spill] sm:$0xff] %v9240_v59  ;;  %v1662_v11 = vadd.f32 %v12194_v5, %v12193_v10  ;;  %v12203_v44 = vrot.slane %v12202_v35, 2  ;;  %v12205_v60 = vrot.slane %v12204_v33, 2  ;;  %v12206_v10 = vld [vmem:[#allocation123_spill] sm:$0xff]  ;;  %v12212_v2 = vld [vmem:[#allocation94_spill] sm:$0xff] }
 0x280   :  { %12191 = vst [vmem:[#allocation80_spill] sm:$0xff] %v9245_v19  ;;  %v1720_v6 = vadd.f32 %v12198_v40, %v12197_v32  ;;  %v9260_v56 = vadd.f32 %v12200_v43, %v12199_v21  ;;  %v12207_v5 = vrot.slane %v12206_v10, 2  ;;  %v1598_v19 = vrot.slane %v12208_v23, 1  ;;  %v12209_v32 = vld [vmem:[#allocation109_spill] sm:$0xff]  ;;  %v12211_v21 = vld [vmem:[#allocation114_spill] sm:$0xff]  ;;  %v12214_v41 = vld [vmem:[#allocation96_spill] sm:$0xff] }
 0x281   :  { %v1733_v29 = vadd.f32 %v12203_v44, %v12202_v35  ;;  %v1746_v51 = vadd.f32 %v12205_v60, %v12204_v33  ;;  %v12210_v40 = vrot.slane %v12209_v32, 2  ;;  %v1784_v43 = vrot.slane %v12211_v21, 2  ;;  %v12213_v35 = vld [vmem:[#allocation113_spill] sm:$0xff] }
 0x282   :  { %12201 = vst [vmem:[#allocation5_spill] sm:$0xff] %v9260_v56  ;;  %v1759_v15 = vadd.f32 %v12207_v5, %v12206_v10  ;;  %v1797_v56 = vrot.slane %v1796_v47, 2  ;;  %v1611_v62 = vrot.slane %v12212_v2, 1  ;;  %v1624_v44 = vrot.slane %v12213_v35, 1 }
 0x283   :  { %v1772_v59 = vadd.f32 %v12210_v40, %v12209_v32  ;;  %v1637_v39 = vrot.slane %v12214_v41, 1  ;;  %v1650_v33 = vrot.slane %v1649_v3, 1  ;;  %v9280_v60 = vadd.f32 %v1585_v50, %v12192_v0  ;;  %v12216_v32 = vld [vmem:[#allocation10_spill] sm:$0xff] }
 0x284   :  { %v1663_v10 = vrot.slane %v1662_v11, 1  ;;  %v1708_v5 = vrot.slane %v1707_v52, 1  ;;  %v1721_v17 = vrot.slane %v1720_v6, 1  ;;  %v1734_v18 = vrot.slane %v1733_v29, 1 }
 0x285   :  { %12215 = vst [vmem:[#allocation95_spill] sm:$0xff] %v9280_v60  ;;  %v1747_v26 = vrot.slane %v1746_v51, 1  ;;  %v1760_v24 = vrot.slane %v1759_v15, 1  ;;  %v3063_v40 = vmul.f32 %v12216_v32, %v9039_v55  ;;  %v9285_v63 = vadd.f32 %v1598_v19, %v12208_v23 }
 0x286   :  { %v1773_v25 = vrot.slane %v1772_v59, 1  ;;  %v9288_v57 = vadd.f32 %v1784_v43, %v12211_v21  ;;  %v9290_v14 = vadd.f32 %v1797_v56, %v1796_v47  ;;  %v9293_v0 = vadd.f32 %v1611_v62, %v12212_v2  ;;  %v12227_v21 = vld [vmem:[#allocation106_spill] sm:$0xff]  ;;  %v4544_v56 = vpop.eup %4543 }
 0x287   :  { %12217 = vst [vmem:[#allocation118_spill] sm:$0xff] %v9285_v63  ;;  %v9296_v50 = vadd.f32 %v1624_v44, %v12213_v35  ;;  %v9299_v60 = vadd.f32 %v1637_v39, %v12214_v41  ;;  %v9301_v16 = vadd.f32 %v1650_v33, %v1649_v3  ;;  %v9303_v32 = vadd.f32 %v1663_v10, %v1662_v11  ;;  %v12231_v35 = vld [vmem:[#allocation12_spill] sm:$0xff] }
 0x288   :  { %12218 = vst [vmem:[#allocation27_spill] sm:$0xff] %v9288_v57  ;;  %12219 = vst [vmem:[#allocation110_spill] sm:$0xff] %v9290_v14  ;;  %v9305_v19 = vadd.f32 %v1708_v5, %v1707_v52  ;;  %v9307_v23 = vadd.f32 %v1721_v17, %v1720_v6  ;;  %v3166_v47 = vsub.s32 6, %v12227_v21  ;;  %v9310_v43 = vadd.f32 %v1734_v18, %v1733_v29 }
 0x289   :  { %12220 = vst [vmem:[#allocation33_spill] sm:$0xff] %v9293_v0  ;;  %12221 = vst [vmem:[#allocation131_spill] sm:$0xff] %v9296_v50  ;;  %v9312_v62 = vadd.f32 %v1747_v26, %v1746_v51  ;;  %v9314_v2 = vadd.f32 %v1760_v24, %v1759_v15  ;;  %v9317_v39 = vsub.f32 %v12231_v35, %v3063_v40 }
 0x28a   :  { %12222 = vst [vmem:[#allocation31_spill] sm:$0xff] %v9299_v60  ;;  %12223 = vst [vmem:[#allocation132_spill] sm:$0xff] %v9301_v16  ;;  %v9319_v41 = vadd.f32 %v1773_v25, %v1772_v59  ;;  %v3167_v17 = vrot.slane %v4544_v56, %v3166_v47  ;;  %v3176_v52 = vrot.slane %v9130_v37, %v3166_v47 }
 0x28b   :  { %12224 = vst [vmem:[#allocation111_spill] sm:$0xff] %v9303_v32  ;;  %12225 = vst [vmem:[#allocation112_spill] sm:$0xff] %v9305_v19  ;;  %v3180_v6 = vrot.slane %v9141_v53, %v3166_v47  ;;  %v3184_v18 = vrot.slane %v9164_v54, %v3166_v47  ;;  %v3188_v26 = vrot.slane %v9175_v22, %v3166_v47 }
 0x28c   :  { %12226 = vst [vmem:[#allocation22_spill] sm:$0xff] %v9307_v23  ;;  %12228 = vst [vmem:[#allocation18_spill] sm:$0xff] %v9310_v43  ;;  %v9327_v24 = vmul.f32 %v3167_v17, %v3113_v28  ;;  %v9329_v29 = vmul.f32 %v3167_v17, %v3114_v45  ;;  %v9331_v51 = vmul.f32 %v3167_v17, %v3115_v36 }
 0x28d   :  { %12229 = vst [vmem:[#allocation72_spill] sm:$0xff] %v9312_v62  ;;  %12230 = vst [vmem:[#allocation88_spill] sm:$0xff] %v9314_v2  ;;  %v9333_v25 = vmul.f32 %v3167_v17, %v3116_v61  ;;  %v9335_v59 = vmul.f32 %v3167_v17, %v3117_v7  ;;  %v3192_v15 = vrot.slane %v9317_v39, %v3166_v47 }
 0x28e   :  { %12232 = vst [vmem:[#allocation130_spill] sm:$0xff] %v9319_v41  ;;  %12233 = vst [vmem:[#allocation107_spill] sm:$0xff] %v9327_v24  ;;  %v3196_v44 = vrot.slane %v9039_v55, %v3166_v47  ;;  %v3204_v33 = vrot.slane %v9222_v38, %v3166_v47  ;;  %v9341_v10 = vmul.f32 %v3176_v52, %v9327_v24 }
 0x28f   :  { %12234 = vst [vmem:[#allocation119_spill] sm:$0xff] %v9329_v29  ;;  %12235 = vst [vmem:[#allocation54_spill] sm:$0xff] %v9331_v51  ;;  %v3206_v28 = vmul.f32 %v3176_v52, %v9329_v29  ;;  %v3207_v45 = vmul.f32 %v3176_v52, %v9331_v51  ;;  %v3208_v36 = vmul.f32 %v3176_v52, %v9333_v25 }
 0x290   :  { %12236 = vst [vmem:[#allocation11_spill] sm:$0xff] %v9333_v25  ;;  %12237 = vst [vmem:[#allocation120_spill] sm:$0xff] %v9335_v59  ;;  %v3209_v61 = vmul.f32 %v3176_v52, %v9335_v59  ;;  %v9348_v7 = vmul.f32 %v3180_v6, %v9327_v24  ;;  %v9351_v5 = vmul.f32 %v3180_v6, %v9329_v29 }
 0x291   :  { %v9354_v40 = vmul.f32 %v3180_v6, %v9331_v51  ;;  %v9357_v47 = vmul.f32 %v3180_v6, %v9333_v25  ;;  %v9360_v56 = vmul.f32 %v3180_v6, %v9335_v59  ;;  %v9363_v35 = vmul.f32 %v3184_v18, %v9327_v24 }
 0x292   :  { %v3216_v17 = vmul.f32 %v3184_v18, %v9329_v29  ;;  %v3217_v52 = vmul.f32 %v3184_v18, %v9331_v51  ;;  %v3218_v11 = vmul.f32 %v3184_v18, %v9333_v25  ;;  %v3219_v3 = vmul.f32 %v3184_v18, %v9335_v59 }
 0x293   :  { %v9370_v41 = vmul.f32 %v3188_v26, %v9327_v24  ;;  %v9373_v2 = vmul.f32 %v3188_v26, %v9329_v29  ;;  %v9376_v6 = vmul.f32 %v3188_v26, %v9331_v51  ;;  %v9379_v62 = vmul.f32 %v3188_v26, %v9333_v25 }
 0x294   :  { %v9382_v43 = vmul.f32 %v3188_v26, %v9335_v59  ;;  %v9385_v23 = vmul.f32 %v3192_v15, %v9327_v24  ;;  %v3226_v18 = vmul.f32 %v3192_v15, %v9329_v29  ;;  %v3227_v19 = vmul.f32 %v3192_v15, %v9331_v51 }
 0x295   :  { %v3228_v32 = vmul.f32 %v3192_v15, %v9333_v25  ;;  %v3229_v16 = vmul.f32 %v3192_v15, %v9335_v59  ;;  %v9392_v60 = vmul.f32 %v3196_v44, %v9327_v24  ;;  %v9395_v50 = vmul.f32 %v3196_v44, %v9329_v29 }
 0x296   :  { %v9398_v26 = vmul.f32 %v3196_v44, %v9331_v51  ;;  %v9401_v0 = vmul.f32 %v3196_v44, %v9333_v25  ;;  %v9404_v63 = vmul.f32 %v3196_v44, %v9335_v59  ;;  %v3240_v21 = vmul.f32 %v3204_v33, %v9327_v24 }
 0x297   :  { %12238 = vst [vmem:[#allocation20_spill] sm:$0xff] %v9395_v50  ;;  %v9408_v14 = vmul.f32 %v3204_v33, %v9329_v29  ;;  %v9411_v15 = vmul.f32 %v3204_v33, %v9331_v51  ;;  %v9414_v57 = vmul.f32 %v3204_v33, %v9333_v25  ;;  %v9417_v38 = vmul.f32 %v3204_v33, %v9335_v59 }
 0x298   :  { %12239 = vst [vmem:[#allocation90_spill] sm:$0xff] %v9398_v26  ;;  %12240 = vst [vmem:[#allocation93_spill] sm:$0xff] %v9401_v0  ;;  %v12242_v44 = vsub.f32 %v8855_v34, %v9068_v8  ;;  %v12243_v29 = vsub.f32 %v8860_v12, %v9071_v1  ;;  %v12244_v25 = vsub.f32 %v8865_v30, %v9074_v49  ;;  %v12268_v8 = vld [vmem:[#allocation51_spill] sm:$0xff] }
 0x299   :  { %12241 = vst [vmem:[#allocation121_spill] sm:$0xff] %v9404_v63  ;;  %v12245_v33 = vsub.f32 %v8870_v46, %v9077_v31  ;;  %v12246_v49 = vsub.f32 %v8887_v20, %v9086_v27  ;;  %v3260_v20 = vsub.f32 %v9175_v22, %v9370_v41  ;;  %v12254_v27 = vld [vmem:[#allocation30_spill] sm:$0xff]  ;;  %v12261_v22 = vld [vmem:[#allocation28_spill] sm:$0xff]  ;;  %v12262_v41 = vld [vmem:[#allocation97_spill] sm:$0xff] }
 0x29a   :  { %v9424_v63 = vsub.f32 %v12242_v44, %v3206_v28  ;;  %v9429_v24 = vsub.f32 %v12243_v29, %v3207_v45  ;;  %v9434_v51 = vsub.f32 %v12244_v25, %v3208_v36  ;;  %v12247_v29 = vsub.f32 %v8892_v4, %v9089_v9  ;;  %v12248_v28 = vld [vmem:[#allocation23_spill] sm:$0xff]  ;;  %v12249_v45 = vld [vmem:[#allocation52_spill] sm:$0xff]  ;;  %v12255_v4 = vld [vmem:[#allocation37_spill] sm:$0xff] }
 0x29b   :  { %v9439_v59 = vsub.f32 %v12245_v33, %v3209_v61  ;;  %v9456_v31 = vsub.f32 %v12246_v49, %v3216_v17  ;;  %v12250_v36 = vsub.f32 %v12248_v28, %v12249_v45  ;;  %v12251_v44 = vld [vmem:[#allocation108_spill] sm:$0xff]  ;;  %v12252_v33 = vld [vmem:[#allocation6_spill] sm:$0xff]  ;;  %v3265_v28 = vsub.f32 %v9317_v39, %v9385_v23  ;;  %v12264_v9 = vld [vmem:[#allocation129_spill] sm:$0xff] }
 0x29c   :  { %v9461_v25 = vsub.f32 %v12247_v29, %v3217_v52  ;;  %v12253_v30 = vsub.f32 %v12251_v44, %v12252_v33  ;;  %v12256_v52 = vld [vmem:[#allocation29_spill] sm:$0xff]  ;;  %v12263_v44 = vsub.f32 %v12261_v22, %v12262_v41  ;;  %v12265_v17 = vld [vmem:[#allocation99_spill] sm:$0xff]  ;;  %v3270_v23 = vsub.f32 %v9039_v55, %v9392_v60 }
 0x29d   :  { %v9466_v61 = vsub.f32 %v12250_v36, %v3218_v11  ;;  %v12257_v11 = vld [vmem:[#allocation117_spill] sm:$0xff]  ;;  %v12266_v12 = vsub.f32 %v12264_v9, %v12265_v17  ;;  %v12269_v29 = vld [vmem:[#allocation19_spill] sm:$0xff]  ;;  %v12278_v9 = vld [vmem:[#allocation100_spill] sm:$0xff] }
 0x29e   :  { %v9471_v1 = vsub.f32 %v12253_v30, %v3219_v3  ;;  %v12258_v3 = vld [vmem:[#allocation128_spill] sm:$0xff]  ;;  %v12259_v30 = vld [vmem:[#allocation122_spill] sm:$0xff]  ;;  %v9493_v33 = vsub.f32 %v12263_v44, %v3227_v19  ;;  %v12270_v46 = vsub.f32 %v12268_v8, %v12269_v29  ;;  %v3280_v41 = vsub.f32 %v12278_v9, %v3240_v21  ;;  %v12281_v60 = vld [vmem:[#allocation27_spill] sm:$0xff] }
 0x29f   :  { %v12260_v45 = vsub.f32 %v12258_v3, %v12259_v30  ;;  %v9498_v49 = vsub.f32 %v12266_v12, %v3228_v32  ;;  %v12282_v29 = vrot.slane %v12281_v60, 1  ;;  %v12284_v19 = vld [vmem:[#allocation110_spill] sm:$0xff]  ;;  %v12287_v12 = vld [vmem:[#allocation75_spill] sm:$0xff]  ;;  %v12288_v21 = vld [vmem:[#allocation80_spill] sm:$0xff] }
 0x2a0   :  { %v9503_v34 = vsub.f32 %v12270_v46, %v3229_v16  ;;  %v12279_v16 = vld [vmem:[#allocation26_spill] sm:$0xff]  ;;  %v12280_v46 = vld [vmem:[#allocation115_spill] sm:$0xff]  ;;  %v3283_v0 = vsub.f32 %v12287_v12, %v9414_v57  ;;  %v3284_v9 = vsub.f32 %v12288_v21, %v9417_v38  ;;  %4545 = vrcp.f32 %v3280_v41  ;;  %v12301_v21 = vld [vmem:[#allocation60_spill] sm:$0xff] }
 0x2a1   :  { %v9488_v36 = vsub.f32 %v12260_v45, %v3226_v18  ;;  %12267 = vst [vmem:[#allocation103_spill] sm:$0xff] %v9498_v49  ;;  %v3281_v8 = vsub.f32 %v12279_v16, %v9408_v14  ;;  %v3282_v55 = vsub.f32 %v12280_v46, %v9411_v15  ;;  %v9523_v44 = vadd.f32 %v12282_v29, %v12281_v60  ;;  %v12289_v14 = vld [vmem:[#allocation106_spill] sm:$0xff]  ;;  %v12290_v15 = vld [vmem:[#allocation8_spill] sm:$0xff]  ;;  %v12291_v46 = vld [vmem:[#allocation55_spill] sm:$0xff] }
 0x2a2   :  { %12271 = vst [vmem:[#allocation15_spill] sm:$0xff] %v9503_v34  ;;  %v12285_v18 = vrot.slane %v12284_v19, 1  ;;  %v3328_v16 = vsub.s32 7, %v12289_v14  ;;  %v9537_v17 = vrot.slane %v12291_v46, %v12290_v15  ;;  %v12293_v60 = vld [vmem:[#allocation56_spill] sm:$0xff]  ;;  %v12297_v57 = vld [vmem:[#allocation58_spill] sm:$0xff]  ;;  %v12299_v38 = vld [vmem:[#allocation59_spill] sm:$0xff]  ;;  %v9557_v14 = vrot.slane %v12301_v21, %v12290_v15 }
 0x2a3   :  { %12283 = vst [vmem:[#allocation104_spill] sm:$0xff] %v9523_v44  ;;  %v9541_v29 = vrot.slane %v12293_v60, %v12290_v15  ;;  %v9549_v12 = vrot.slane %v12297_v57, %v12290_v15  ;;  %v9553_v41 = vrot.slane %v12299_v38, %v12290_v15  ;;  %v12303_v46 = vld [vmem:[#allocation61_spill] sm:$0xff]  ;;  %v12307_v44 = vld [vmem:[#allocation34_spill] sm:$0xff] }
 0x2a4   :  { %v9528_v22 = vadd.f32 %v12285_v18, %v12284_v19  ;;  %12292 = vst [vmem:[#allocation7_spill] sm:$0xff] %v9537_v17  ;;  %v12295_v18 = vld [vmem:[#allocation57_spill] sm:$0xff]  ;;  %12302 = vst [vmem:[#allocation126_spill] sm:$0xff] %v9557_v14  ;;  %v9561_v60 = vrot.slane %v12303_v46, %v12290_v15  ;;  %v9569_v57 = vrot.slane %v12307_v44, %v12290_v15  ;;  %v12313_v14 = vld [vmem:[#allocation38_spill] sm:$0xff] }
 0x2a5   :  { %12294 = vst [vmem:[#allocation17_spill] sm:$0xff] %v9541_v29  ;;  %v9545_v19 = vrot.slane %v12295_v18, %v12290_v15  ;;  %12298 = vst [vmem:[#allocation21_spill] sm:$0xff] %v9549_v12  ;;  %v12309_v12 = vld [vmem:[#allocation63_spill] sm:$0xff]  ;;  %v9581_v46 = vrot.slane %v12313_v14, %v12290_v15 }
 0x2a6   :  { %12286 = vst [vmem:[#allocation134_spill] sm:$0xff] %v9528_v22  ;;  %12300 = vst [vmem:[#allocation25_spill] sm:$0xff] %v9553_v41  ;;  %v12305_v22 = vld [vmem:[#allocation32_spill] sm:$0xff]  ;;  %v9573_v38 = vrot.slane %v12309_v12, %v12290_v15  ;;  %v12311_v41 = vld [vmem:[#allocation35_spill] sm:$0xff] }
 0x2a7   :  { %12296 = vst [vmem:[#allocation133_spill] sm:$0xff] %v9545_v19  ;;  %12304 = vst [vmem:[#allocation89_spill] sm:$0xff] %v9561_v60  ;;  %v9565_v18 = vrot.slane %v12305_v22, %v12290_v15  ;;  %v9577_v21 = vrot.slane %v12311_v41, %v12290_v15  ;;  %v12315_v60 = vld [vmem:[#allocation62_spill] sm:$0xff]  ;;  %v3353_v19 = vrot.slane %v3265_v28, %v3328_v16  ;;  %v12367_v28 = vld [vmem:[#allocation81_spill] sm:$0xff] }
 0x2a8   :  { %12308 = vst [vmem:[#allocation50_spill] sm:$0xff] %v9569_v57  ;;  %12310 = vst [vmem:[#allocation71_spill] sm:$0xff] %v9573_v38  ;;  %v9585_v22 = vrot.slane %v12315_v60, %v12290_v15  ;;  %v12319_v57 = vld [vmem:[#allocation49_spill] sm:$0xff] }
 0x2a9   :  { %12306 = vst [vmem:[#allocation16_spill] sm:$0xff] %v9565_v18  ;;  %12312 = vst [vmem:[#allocation127_spill] sm:$0xff] %v9577_v21  ;;  %v12317_v18 = vld [vmem:[#allocation48_spill] sm:$0xff]  ;;  %v9593_v12 = vrot.slane %v12319_v57, %v12290_v15  ;;  %v12321_v38 = vld [vmem:[#allocation53_spill] sm:$0xff] }
 0x2aa   :  { %12314 = vst [vmem:[#allocation14_spill] sm:$0xff] %v9581_v46  ;;  %12316 = vst [vmem:[#allocation116_spill] sm:$0xff] %v9585_v22  ;;  %v9589_v44 = vrot.slane %v12317_v18, %v12290_v15  ;;  %v9597_v41 = vrot.slane %v12321_v38, %v12290_v15  ;;  %v12323_v21 = vld [vmem:[#allocation41_spill] sm:$0xff]  ;;  %v12325_v46 = vld [vmem:[#allocation64_spill] sm:$0xff] }
 0x2ab   :  { %12320 = vst [vmem:[#allocation36_spill] sm:$0xff] %v9593_v12  ;;  %v9601_v14 = vrot.slane %v12323_v21, %v12290_v15  ;;  %v9605_v60 = vrot.slane %v12325_v46, %v12290_v15  ;;  %v12327_v22 = vld [vmem:[#allocation42_spill] sm:$0xff]  ;;  %v12331_v12 = vld [vmem:[#allocation39_spill] sm:$0xff] }
 0x2ac   :  { %12318 = vst [vmem:[#allocation135_spill] sm:$0xff] %v9589_v44  ;;  %12322 = vst [vmem:[#allocation98_spill] sm:$0xff] %v9597_v41  ;;  %v9609_v18 = vrot.slane %v12327_v22, %v12290_v15  ;;  %v12329_v44 = vld [vmem:[#allocation40_spill] sm:$0xff]  ;;  %v9617_v38 = vrot.slane %v12331_v12, %v12290_v15  ;;  %v12333_v41 = vld [vmem:[#allocation43_spill] sm:$0xff] }
 0x2ad   :  { %12324 = vst [vmem:[#allocation84_spill] sm:$0xff] %v9601_v14  ;;  %12326 = vst [vmem:[#allocation125_spill] sm:$0xff] %v9605_v60  ;;  %v9613_v57 = vrot.slane %v12329_v44, %v12290_v15  ;;  %v9621_v21 = vrot.slane %v12333_v41, %v12290_v15  ;;  %v12335_v14 = vld [vmem:[#allocation45_spill] sm:$0xff]  ;;  %v12337_v60 = vld [vmem:[#allocation44_spill] sm:$0xff] }
 0x2ae   :  { %12328 = vst [vmem:[#allocation102_spill] sm:$0xff] %v9609_v18  ;;  %12332 = vst [vmem:[#allocation92_spill] sm:$0xff] %v9617_v38  ;;  %v9625_v46 = vrot.slane %v12335_v14, %v12290_v15  ;;  %v9629_v22 = vrot.slane %v12337_v60, %v12290_v15  ;;  %v12339_v18 = vld [vmem:[#allocation65_spill] sm:$0xff]  ;;  %v12343_v38 = vld [vmem:[#allocation67_spill] sm:$0xff] }
 0x2af   :  { %12330 = vst [vmem:[#allocation123_spill] sm:$0xff] %v9613_v57  ;;  %12334 = vst [vmem:[#allocation109_spill] sm:$0xff] %v9621_v21  ;;  %v9633_v44 = vrot.slane %v12339_v18, %v12290_v15  ;;  %v12341_v57 = vld [vmem:[#allocation66_spill] sm:$0xff]  ;;  %v9641_v41 = vrot.slane %v12343_v38, %v12290_v15  ;;  %v12345_v21 = vld [vmem:[#allocation68_spill] sm:$0xff]  ;;  %v12352_v38 = vsub.f32 %v9141_v53, %v9348_v7 }
 0x2b0   :  { %12336 = vst [vmem:[#allocation114_spill] sm:$0xff] %v9625_v46  ;;  %12338 = vst [vmem:[#allocation94_spill] sm:$0xff] %v9629_v22  ;;  %v9637_v12 = vrot.slane %v12341_v57, %v12290_v15  ;;  %v9645_v14 = vrot.slane %v12345_v21, %v12290_v15  ;;  %v12347_v46 = vld [vmem:[#allocation69_spill] sm:$0xff]  ;;  %v12349_v22 = vld [vmem:[#allocation70_spill] sm:$0xff]  ;;  %v12351_v57 = vsub.f32 %v9130_v37, %v9341_v10  ;;  %v4546_v10 = vpop.eup %4545 }
 0x2b1   :  { %12340 = vst [vmem:[#allocation113_spill] sm:$0xff] %v9633_v44  ;;  %12344 = vst [vmem:[#allocation10_spill] sm:$0xff] %v9641_v41  ;;  %v9649_v60 = vrot.slane %v12347_v46, %v12290_v15  ;;  %v9653_v18 = vrot.slane %v12349_v22, %v12290_v15  ;;  %v3341_v41 = vrot.slane %v12352_v38, %v3328_v16  ;;  %v12353_v44 = vld [vmem:[#allocation76_spill] sm:$0xff]  ;;  %v12359_v53 = vld [vmem:[#allocation73_spill] sm:$0xff] }
 0x2b2   :  { %12342 = vst [vmem:[#allocation96_spill] sm:$0xff] %v9637_v12  ;;  %12346 = vst [vmem:[#allocation12_spill] sm:$0xff] %v9645_v14  ;;  %v3337_v12 = vrot.slane %v12351_v57, %v3328_v16  ;;  %v9663_v21 = vrot.slane %v12353_v44, %v12290_v15  ;;  %v12355_v14 = vld [vmem:[#allocation77_spill] sm:$0xff]  ;;  %v12357_v22 = vsub.f32 %v9164_v54, %v9363_v35  ;;  %v12358_v57 = vld [vmem:[#allocation107_spill] sm:$0xff] }
 0x2b3   :  { %12348 = vst [vmem:[#allocation23_spill] sm:$0xff] %v9649_v60  ;;  %12350 = vst [vmem:[#allocation52_spill] sm:$0xff] %v9653_v18  ;;  %v9667_v46 = vrot.slane %v12355_v14, %v12290_v15  ;;  %v3349_v60 = vrot.slane %v3260_v20, %v3328_v16  ;;  %v3357_v37 = vrot.slane %v3270_v23, %v3328_v16  ;;  %v12361_v44 = vld [vmem:[#allocation74_spill] sm:$0xff]  ;;  %v12365_v35 = vld [vmem:[#allocation79_spill] sm:$0xff] }
 0x2b4   :  { %12354 = vst [vmem:[#allocation108_spill] sm:$0xff] %v9663_v21  ;;  %v3345_v18 = vrot.slane %v12357_v22, %v3328_v16  ;;  %v3361_v29 = vrot.slane %v12358_v57, %v3328_v16  ;;  %v9675_v7 = vrot.slane %v12359_v53, %v12290_v15  ;;  %v9679_v38 = vrot.slane %v12361_v44, %v12290_v15  ;;  %v12363_v14 = vld [vmem:[#allocation78_spill] sm:$0xff]  ;;  %v12371_v53 = vld [vmem:[#allocation83_spill] sm:$0xff] }
 0x2b5   :  { %12356 = vst [vmem:[#allocation6_spill] sm:$0xff] %v9667_v46  ;;  %v9683_v46 = vrot.slane %v12363_v14, %v12290_v15  ;;  %v3329_v54 = vrot.slane %v4546_v10, %v3328_v16  ;;  %v9687_v20 = vrot.slane %v12365_v35, %v12290_v15  ;;  %v9691_v23 = vrot.slane %v12367_v28, %v12290_v15  ;;  %v12369_v22 = vld [vmem:[#allocation82_spill] sm:$0xff]  ;;  %v12373_v14 = vld [vmem:[#allocation85_spill] sm:$0xff] }
 0x2b6   :  { %12360 = vst [vmem:[#allocation30_spill] sm:$0xff] %v9675_v7  ;;  %12362 = vst [vmem:[#allocation37_spill] sm:$0xff] %v9679_v38  ;;  %v9695_v57 = vrot.slane %v12369_v22, %v12290_v15  ;;  %v9699_v44 = vrot.slane %v12371_v53, %v12290_v15  ;;  %v12375_v16 = vld [vmem:[#allocation86_spill] sm:$0xff]  ;;  %v12377_v35 = vld [vmem:[#allocation105_spill] sm:$0xff] }
 0x2b7   :  { %12364 = vst [vmem:[#allocation29_spill] sm:$0xff] %v9683_v46  ;;  %12366 = vst [vmem:[#allocation117_spill] sm:$0xff] %v9687_v20  ;;  %v9703_v46 = vrot.slane %v12373_v14, %v12290_v15  ;;  %v9707_v10 = vrot.slane %v12375_v16, %v12290_v15  ;;  %v9711_v28 = vrot.slane %v12377_v35, %v12290_v15 }
 0x2b8   :  { %12368 = vst [vmem:[#allocation128_spill] sm:$0xff] %v9691_v23  ;;  %12370 = vst [vmem:[#allocation122_spill] sm:$0xff] %v9695_v57  ;;  %v9713_v23 = vmul.f32 %v3329_v54, %v3281_v8  ;;  %v9715_v22 = vmul.f32 %v3329_v54, %v3282_v55  ;;  %v9717_v57 = vmul.f32 %v3329_v54, %v3283_v0  ;;  %v12389_v8 = vld [vmem:[#allocation47_spill] sm:$0xff] }
 0x2b9   :  { %12372 = vst [vmem:[#allocation28_spill] sm:$0xff] %v9699_v44  ;;  %12374 = vst [vmem:[#allocation97_spill] sm:$0xff] %v9703_v46  ;;  %v9719_v53 = vmul.f32 %v3329_v54, %v3284_v9  ;;  %v12383_v44 = vld [vmem:[#allocation87_spill] sm:$0xff]  ;;  %v9735_v55 = vrot.slane %v12389_v8, %v12290_v15 }
 0x2ba   :  { %12376 = vst [vmem:[#allocation129_spill] sm:$0xff] %v9707_v10  ;;  %12378 = vst [vmem:[#allocation99_spill] sm:$0xff] %v9711_v28  ;;  %v9723_v14 = vrot.slane %v12383_v44, %v12290_v15  ;;  %v12385_v46 = vld [vmem:[#allocation91_spill] sm:$0xff]  ;;  %v12387_v10 = vld [vmem:[#allocation46_spill] sm:$0xff]  ;;  %v3366_v0 = vmul.f32 %v3337_v12, %v9713_v23  ;;  %v3367_v9 = vmul.f32 %v3337_v12, %v9715_v22 }
 0x2bb   :  { %12379 = vst [vmem:[#allocation51_spill] sm:$0xff] %v9713_v23  ;;  %12380 = vst [vmem:[#allocation19_spill] sm:$0xff] %v9715_v22  ;;  %v9727_v16 = vrot.slane %v12385_v46, %v12290_v15  ;;  %v9731_v35 = vrot.slane %v12387_v10, %v12290_v15  ;;  %v3368_v54 = vmul.f32 %v3337_v12, %v9717_v57 }
 0x2bc   :  { %12381 = vst [vmem:[#allocation100_spill] sm:$0xff] %v9717_v57  ;;  %12382 = vst [vmem:[#allocation26_spill] sm:$0xff] %v9719_v53  ;;  %v3369_v44 = vmul.f32 %v3337_v12, %v9719_v53  ;;  %v3370_v28 = vmul.f32 %v3341_v41, %v9713_v23  ;;  %v3371_v46 = vmul.f32 %v3341_v41, %v9715_v22 }
 0x2bd   :  { %12384 = vst [vmem:[#allocation115_spill] sm:$0xff] %v9723_v14  ;;  %12386 = vst [vmem:[#allocation27_spill] sm:$0xff] %v9727_v16  ;;  %v3372_v16 = vmul.f32 %v3341_v41, %v9717_v57  ;;  %v3373_v10 = vmul.f32 %v3341_v41, %v9719_v53  ;;  %v3375_v8 = vmul.f32 %v3345_v18, %v9715_v22 }
 0x2be   :  { %12388 = vst [vmem:[#allocation110_spill] sm:$0xff] %v9731_v35  ;;  %12390 = vst [vmem:[#allocation75_spill] sm:$0xff] %v9735_v55  ;;  %v3374_v35 = vmul.f32 %v3345_v18, %v9713_v23  ;;  %v3376_v55 = vmul.f32 %v3345_v18, %v9717_v57  ;;  %v3377_v14 = vmul.f32 %v3345_v18, %v9719_v53 }
 0x2bf   :  { %v3378_v20 = vmul.f32 %v3349_v60, %v9713_v23  ;;  %v3379_v12 = vmul.f32 %v3349_v60, %v9715_v22  ;;  %v3380_v38 = vmul.f32 %v3349_v60, %v9717_v57  ;;  %v3381_v7 = vmul.f32 %v3349_v60, %v9719_v53 }
 0x2c0   :  { %v3382_v21 = vmul.f32 %v3353_v19, %v9713_v23  ;;  %v3383_v41 = vmul.f32 %v3353_v19, %v9715_v22  ;;  %v3384_v15 = vmul.f32 %v3353_v19, %v9717_v57  ;;  %v3385_v17 = vmul.f32 %v3353_v19, %v9719_v53 }
 0x2c1   :  { %v3386_v32 = vmul.f32 %v3357_v37, %v9713_v23  ;;  %v3387_v18 = vmul.f32 %v3357_v37, %v9715_v22  ;;  %v3388_v30 = vmul.f32 %v3357_v37, %v9717_v57  ;;  %v3389_v45 = vmul.f32 %v3357_v37, %v9719_v53 }
 0x2c2   :  { %v3390_v26 = vmul.f32 %v3361_v29, %v9713_v23  ;;  %v3391_v60 = vmul.f32 %v3361_v29, %v9715_v22  ;;  %v3392_v3 = vmul.f32 %v3361_v29, %v9717_v57  ;;  %v3393_v50 = vmul.f32 %v3361_v29, %v9719_v53 }
 0x2c3   :  { %v9766_v39 = vsub.f32 %v9424_v63, %v3366_v0  ;;  %v9769_v19 = vsub.f32 %v9429_v24, %v3367_v9  ;;  %v9772_v34 = vsub.f32 %v9434_v51, %v3368_v54  ;;  %v9775_v49 = vsub.f32 %v9439_v59, %v3369_v44  ;;  %v12419_v9 = vld [vmem:[#allocation119_spill] sm:$0xff] }
 0x2c4   :  { %v12391_v37 = vsub.f32 %v9146_v58, %v9351_v5  ;;  %v12392_v29 = vsub.f32 %v9151_v42, %v9354_v40  ;;  %v12393_v63 = vsub.f32 %v9156_v13, %v9357_v47  ;;  %v12394_v51 = vsub.f32 %v9161_v48, %v9360_v56 }
 0x2c5   :  { %v9798_v0 = vsub.f32 %v9456_v31, %v3374_v35  ;;  %v9801_v58 = vsub.f32 %v9461_v25, %v3375_v8  ;;  %v9804_v42 = vsub.f32 %v9466_v61, %v3376_v55  ;;  %v9807_v5 = vsub.f32 %v9471_v1, %v3377_v14  ;;  %v12416_v35 = vld [vmem:[#allocation121_spill] sm:$0xff]  ;;  %v12425_v8 = vld [vmem:[#allocation120_spill] sm:$0xff] }
 0x2c6   :  { %v9780_v22 = vsub.f32 %v12391_v37, %v3370_v28  ;;  %v9785_v53 = vsub.f32 %v12392_v29, %v3371_v46  ;;  %v9790_v24 = vsub.f32 %v12393_v63, %v3372_v16  ;;  %v9795_v59 = vsub.f32 %v12394_v51, %v3373_v10  ;;  %v12423_v46 = vld [vmem:[#allocation11_spill] sm:$0xff]  ;;  %v12429_v37 = vld [vmem:[#allocation24_spill] sm:$0xff]  ;;  %v12433_v63 = vld [vmem:[#allocation17_spill] sm:$0xff] }
 0x2c7   :  { %v12395_v13 = vsub.f32 %v12254_v27, %v9373_v2  ;;  %v12396_v48 = vsub.f32 %v12255_v4, %v9376_v6  ;;  %v12397_v56 = vsub.f32 %v12256_v52, %v9379_v62  ;;  %v12398_v25 = vsub.f32 %v12257_v11, %v9382_v43  ;;  %v12399_v27 = vld [vmem:[#allocation103_spill] sm:$0xff]  ;;  %v12403_v62 = vld [vmem:[#allocation136_spill] sm:$0xff]  ;;  %v12408_v11 = vld [vmem:[#allocation90_spill] sm:$0xff] }
 0x2c8   :  { %v9830_v61 = vsub.f32 %v9488_v36, %v3382_v21  ;;  %v9833_v2 = vsub.f32 %v9493_v33, %v3383_v41  ;;  %v9836_v6 = vsub.f32 %v12399_v27, %v3384_v15  ;;  %v12401_v4 = vld [vmem:[#allocation15_spill] sm:$0xff]  ;;  %v12404_v52 = vld [vmem:[#allocation20_spill] sm:$0xff]  ;;  %v12411_v36 = vld [vmem:[#allocation9_spill] sm:$0xff]  ;;  %v9862_v54 = vsub.f32 %v12419_v9, %v3390_v26 }
 0x2c9   :  { %v9812_v40 = vsub.f32 %v12395_v13, %v3378_v20  ;;  %v9817_v47 = vsub.f32 %v12396_v48, %v3379_v12  ;;  %v9822_v31 = vsub.f32 %v12397_v56, %v3380_v38  ;;  %v9827_v1 = vsub.f32 %v12398_v25, %v3381_v7  ;;  %v12407_v43 = vld [vmem:[#allocation124_spill] sm:$0xff]  ;;  %v12412_v21 = vld [vmem:[#allocation93_spill] sm:$0xff]  ;;  %v12437_v9 = vld [vmem:[#allocation126_spill] sm:$0xff] }
 0x2ca   :  { %12400 = vst [vmem:[#allocation80_spill] sm:$0xff] %v9836_v6  ;;  %v9839_v20 = vsub.f32 %v12401_v4, %v3385_v17  ;;  %v12405_v38 = vsub.f32 %v12403_v62, %v12404_v52  ;;  %v12409_v7 = vsub.f32 %v12407_v43, %v12408_v11  ;;  %v12413_v33 = vsub.f32 %v12411_v36, %v12412_v21  ;;  %v12415_v15 = vld [vmem:[#allocation101_spill] sm:$0xff] }
 0x2cb   :  { %v12417_v55 = vsub.f32 %v12415_v15, %v12416_v35  ;;  %12420 = vst [vmem:[#allocation59_spill] sm:$0xff] %v9862_v54  ;;  %v9868_v10 = vsub.f32 %v12423_v46, %v3392_v3  ;;  %v9871_v12 = vsub.f32 %v12425_v8, %v3393_v50  ;;  %v12431_v26 = vld [vmem:[#allocation13_spill] sm:$0xff]  ;;  %v3498_v51 = vmul.f32 %v12433_v63, %v9780_v22 }
 0x2cc   :  { %12402 = vst [vmem:[#allocation106_spill] sm:$0xff] %v9839_v20  ;;  %v9844_v28 = vsub.f32 %v12405_v38, %v3386_v32  ;;  %v9849_v14 = vsub.f32 %v12409_v7, %v3387_v18  ;;  %v9854_v16 = vsub.f32 %v12413_v33, %v3388_v30  ;;  %v12421_v32 = vld [vmem:[#allocation54_spill] sm:$0xff]  ;;  %v12427_v30 = vld [vmem:[#allocation7_spill] sm:$0xff]  ;;  %v3499_v13 = vmul.f32 %v12433_v63, %v9785_v53  ;;  %v12434_v25 = vld [vmem:[#allocation133_spill] sm:$0xff] }
 0x2cd   :  { %v9859_v17 = vsub.f32 %v12417_v55, %v3389_v45  ;;  %v9865_v44 = vsub.f32 %v12421_v32, %v3391_v60  ;;  %12424 = vst [vmem:[#allocation61_spill] sm:$0xff] %v9868_v10  ;;  %12426 = vst [vmem:[#allocation32_spill] sm:$0xff] %v9871_v12  ;;  %v3494_v41 = vmul.f32 %v12427_v30, %v9766_v39  ;;  %v12428_v45 = vld [vmem:[#allocation8_spill] sm:$0xff]  ;;  %v12435_v38 = vld [vmem:[#allocation21_spill] sm:$0xff] }
 0x2ce   :  { %12406 = vst [vmem:[#allocation55_spill] sm:$0xff] %v9844_v28  ;;  %12410 = vst [vmem:[#allocation56_spill] sm:$0xff] %v9849_v14  ;;  %v3495_v18 = vmul.f32 %v12427_v30, %v9769_v19  ;;  %v9879_v29 = vrot.slane %v12429_v37, %v12428_v45  ;;  %v9883_v60 = vrot.slane %v12431_v26, %v12428_v45  ;;  %v12436_v21 = vld [vmem:[#allocation25_spill] sm:$0xff] }
 0x2cf   :  { %12414 = vst [vmem:[#allocation57_spill] sm:$0xff] %v9854_v16  ;;  %12418 = vst [vmem:[#allocation58_spill] sm:$0xff] %v9859_v17  ;;  %v3496_v3 = vmul.f32 %v12427_v30, %v9772_v34  ;;  %v3497_v50 = vmul.f32 %v12427_v30, %v9775_v49  ;;  %v3500_v48 = vmul.f32 %v12433_v63, %v9790_v24  ;;  %v12438_v37 = vld [vmem:[#allocation89_spill] sm:$0xff] }
 0x2d0   :  { %12422 = vst [vmem:[#allocation60_spill] sm:$0xff] %v9865_v44  ;;  %12430 = vst [vmem:[#allocation34_spill] sm:$0xff] %v9879_v29  ;;  %v3501_v56 = vmul.f32 %v12433_v63, %v9795_v59  ;;  %v3502_v27 = vmul.f32 %v12434_v25, %v9798_v0  ;;  %v3503_v4 = vmul.f32 %v12434_v25, %v9801_v58 }
 0x2d1   :  { %12432 = vst [vmem:[#allocation63_spill] sm:$0xff] %v9883_v60  ;;  %v3504_v62 = vmul.f32 %v12434_v25, %v9804_v42  ;;  %v3505_v52 = vmul.f32 %v12434_v25, %v9807_v5  ;;  %v3506_v43 = vmul.f32 %v12435_v38, %v9812_v40  ;;  %v3507_v11 = vmul.f32 %v12435_v38, %v9817_v47  ;;  %v12440_v60 = vld [vmem:[#allocation19_spill] sm:$0xff] }
 0x2d2   :  { %v3508_v7 = vmul.f32 %v12435_v38, %v9822_v31  ;;  %v3509_v36 = vmul.f32 %v12435_v38, %v9827_v1  ;;  %v3510_v33 = vmul.f32 %v12436_v21, %v9830_v61  ;;  %v3511_v15 = vmul.f32 %v12436_v21, %v9833_v2 }
 0x2d3   :  { %v3512_v35 = vmul.f32 %v12436_v21, %v9836_v6  ;;  %v3513_v55 = vmul.f32 %v12436_v21, %v9839_v20  ;;  %v3514_v32 = vmul.f32 %v12437_v9, %v9844_v28  ;;  %v3515_v46 = vmul.f32 %v12437_v9, %v9849_v14  ;;  %v12439_v21 = vld [vmem:[#allocation16_spill] sm:$0xff] }
 0x2d4   :  { %v3516_v8 = vmul.f32 %v12437_v9, %v9854_v16  ;;  %v3517_v30 = vmul.f32 %v12437_v9, %v9859_v17  ;;  %v3518_v26 = vmul.f32 %v12438_v37, %v9862_v54  ;;  %v3519_v63 = vmul.f32 %v12438_v37, %v9865_v44  ;;  %v12441_v17 = vld [vmem:[#allocation26_spill] sm:$0xff] }
 0x2d5   :  { %v3520_v25 = vmul.f32 %v12438_v37, %v9868_v10  ;;  %v3521_v38 = vmul.f32 %v12438_v37, %v9871_v12  ;;  %v3522_v45 = vmul.f32 %v12439_v21, %v9713_v23  ;;  %v3523_v29 = vmul.f32 %v12439_v21, %v12440_v60 }
 0x2d6   :  { %v3524_v9 = vmul.f32 %v12439_v21, %v9717_v57  ;;  %v3525_v54 = vmul.f32 %v12439_v21, %v12441_v17  ;;  %v3526_v44 = vsel %vm132_vm0, %v3494_v41, 0.0  ;;  %v3527_v16 = vsel %vm132_vm0, %v3498_v51, 0.0 }
 0x2d7   :  { %v3528_v10 = vadd.f32 %v3527_v16, %v3526_v44  ;;  %v3529_v14 = vsel %vm132_vm0, %v3502_v27, 0.0  ;;  %v3531_v37 = vsel %vm132_vm0, %v3506_v43, 0.0  ;;  %v3533_v23 = vsel %vm132_vm0, %v3510_v33, 0.0 }
 0x2d8   :  { %v3535_v12 = vsel %vm132_vm0, %v3514_v32, 0.0  ;;  %v3537_v60 = vsel %vm132_vm0, %v3518_v26, 0.0  ;;  %v3541_v57 = vsel %vm132_vm0, %v3495_v18, 0.0  ;;  %v3542_v28 = vsel %vm132_vm0, %v3499_v13, 0.0 }
 0x2d9   :  { %v3530_v21 = vadd.f32 %v3529_v14, %v3528_v10  ;;  %v3539_v41 = vsel %vm132_vm0, %v3522_v45, 0.0  ;;  %v3543_v17 = vadd.f32 %v3542_v28, %v3541_v57  ;;  %v3544_v16 = vsel %vm132_vm0, %v3503_v4, 0.0 }
 0x2da   :  { %v3546_v44 = vsel %vm132_vm0, %v3507_v11, 0.0  ;;  %v3548_v51 = vsel %vm132_vm0, %v3511_v15, 0.0  ;;  %v3550_v27 = vsel %vm132_vm0, %v3515_v46, 0.0  ;;  %v3556_v43 = vsel %vm132_vm0, %v3496_v3, 0.0 }
 0x2db   :  { %v3532_v33 = vadd.f32 %v3531_v37, %v3530_v21  ;;  %v3545_v32 = vadd.f32 %v3544_v16, %v3543_v17  ;;  %v3552_v18 = vsel %vm132_vm0, %v3519_v63, 0.0  ;;  %v3557_v13 = vsel %vm132_vm0, %v3500_v48, 0.0 }
 0x2dc   :  { %v3554_v14 = vsel %vm132_vm0, %v3523_v29, 0.0  ;;  %v3558_v10 = vadd.f32 %v3557_v13, %v3556_v43  ;;  %v3559_v57 = vsel %vm132_vm0, %v3504_v62, 0.0  ;;  %v3561_v28 = vsel %vm132_vm0, %v3508_v7, 0.0 }
 0x2dd   :  { %v3534_v45 = vadd.f32 %v3533_v23, %v3532_v33  ;;  %v3547_v4 = vadd.f32 %v3546_v44, %v3545_v32  ;;  %v3563_v11 = vsel %vm132_vm0, %v3512_v35, 0.0  ;;  %v3565_v15 = vsel %vm132_vm0, %v3516_v8, 0.0 }
 0x2de   :  { %v3560_v3 = vadd.f32 %v3559_v57, %v3558_v10  ;;  %v3567_v17 = vsel %vm132_vm0, %v3520_v25, 0.0  ;;  %v3571_v46 = vsel %vm132_vm0, %v3497_v50, 0.0  ;;  %v3572_v48 = vsel %vm132_vm0, %v3501_v56, 0.0  ;;  %v12446_v10 = vld [vmem:[#allocation14_spill] sm:$0xff] }
 0x2df   :  { %v3536_v26 = vadd.f32 %v3535_v12, %v3534_v45  ;;  %v3549_v29 = vadd.f32 %v3548_v51, %v3547_v4  ;;  %v3569_v63 = vsel %vm132_vm0, %v3524_v9, 0.0  ;;  %v3573_v62 = vadd.f32 %v3572_v48, %v3571_v46  ;;  %v12442_v9 = vld [vmem:[#allocation50_spill] sm:$0xff] }
 0x2e0   :  { %v3562_v37 = vadd.f32 %v3561_v28, %v3560_v3  ;;  %v3574_v23 = vsel %vm132_vm0, %v3505_v52, 0.0  ;;  %v3576_v7 = vsel %vm132_vm0, %v3509_v36, 0.0  ;;  %v3578_v35 = vsel %vm132_vm0, %v3513_v55, 0.0 }
 0x2e1   :  { %v3538_v8 = vadd.f32 %v3537_v60, %v3536_v26  ;;  %v3551_v21 = vadd.f32 %v3550_v27, %v3549_v29  ;;  %v3575_v16 = vadd.f32 %v3574_v23, %v3573_v62  ;;  %v3580_v25 = vsel %vm132_vm0, %v3517_v30, 0.0  ;;  %v12449_v29 = vld [vmem:[#allocation135_spill] sm:$0xff] }
 0x2e2   :  { %v3564_v50 = vadd.f32 %v3563_v11, %v3562_v37  ;;  %v3582_v56 = vsel %vm132_vm0, %v3521_v38, 0.0  ;;  %v3584_v12 = vsel %vm132_vm0, %v3525_v54, 0.0  ;;  %v3618_v44 = vmul.f32 %v12442_v9, %v9766_v39  ;;  %v12444_v54 = vld [vmem:[#allocation127_spill] sm:$0xff]  ;;  %v12447_v11 = vld [vmem:[#allocation116_spill] sm:$0xff] }
 0x2e3   :  { %v9979_v51 = vadd.f32 %v3539_v41, %v3538_v8  ;;  %v3553_v52 = vadd.f32 %v3552_v18, %v3551_v21  ;;  %v3577_v43 = vadd.f32 %v3576_v7, %v3575_v16  ;;  %v3619_v36 = vmul.f32 %v12442_v9, %v9769_v19  ;;  %v12450_v7 = vld [vmem:[#allocation55_spill] sm:$0xff]  ;;  %v12452_v21 = vld [vmem:[#allocation56_spill] sm:$0xff] }
 0x2e4   :  { %v3566_v60 = vadd.f32 %v3565_v15, %v3564_v50  ;;  %v3620_v55 = vmul.f32 %v12442_v9, %v9772_v34  ;;  %v9987_v30 = vmul.f32 %v12442_v9, %v9775_v49  ;;  %v3622_v38 = vmul.f32 %v12444_v54, %v9780_v22  ;;  %v12455_v9 = vld [vmem:[#allocation58_spill] sm:$0xff] }
 0x2e5   :  { %12443 = vst [vmem:[#allocation35_spill] sm:$0xff] %v9979_v51  ;;  %v9991_v27 = vadd.f32 %v3554_v14, %v3553_v52  ;;  %v3579_v41 = vadd.f32 %v3578_v35, %v3577_v43  ;;  %v3623_v33 = vmul.f32 %v12444_v54, %v9785_v53  ;;  %v3624_v32 = vmul.f32 %v12444_v54, %v9790_v24  ;;  %v12451_v35 = vld [vmem:[#allocation36_spill] sm:$0xff]  ;;  %v12456_v43 = vld [vmem:[#allocation59_spill] sm:$0xff] }
 0x2e6   :  { %v3568_v18 = vadd.f32 %v3567_v17, %v3566_v60  ;;  %v3625_v13 = vmul.f32 %v12444_v54, %v9795_v59  ;;  %v3626_v57 = vmul.f32 %v12446_v10, %v9798_v0  ;;  %v3627_v28 = vmul.f32 %v12446_v10, %v9801_v58  ;;  %v12457_v60 = vld [vmem:[#allocation98_spill] sm:$0xff] }
 0x2e7   :  { %12445 = vst [vmem:[#allocation38_spill] sm:$0xff] %v9991_v27  ;;  %v3581_v45 = vadd.f32 %v3580_v25, %v3579_v41  ;;  %v3628_v14 = vmul.f32 %v12446_v10, %v9804_v42  ;;  %v10007_v4 = vmul.f32 %v12446_v10, %v9807_v5  ;;  %v3630_v15 = vmul.f32 %v12447_v11, %v9812_v40  ;;  %v12453_v25 = vld [vmem:[#allocation57_spill] sm:$0xff]  ;;  %v12458_v41 = vld [vmem:[#allocation60_spill] sm:$0xff]  ;;  %v12462_v27 = vld [vmem:[#allocation71_spill] sm:$0xff] }
 0x2e8   :  { %v10011_v3 = vadd.f32 %v3569_v63, %v3568_v18  ;;  %v3631_v17 = vmul.f32 %v12447_v11, %v9817_v47  ;;  %v3632_v46 = vmul.f32 %v12447_v11, %v9822_v31  ;;  %v3633_v48 = vmul.f32 %v12447_v11, %v9827_v1  ;;  %v12459_v10 = vld [vmem:[#allocation61_spill] sm:$0xff]  ;;  %v12460_v11 = vld [vmem:[#allocation32_spill] sm:$0xff] }
 0x2e9   :  { %v3583_v26 = vadd.f32 %v3582_v56, %v3581_v45  ;;  %v3634_v62 = vmul.f32 %v12449_v29, %v9830_v61  ;;  %v3635_v37 = vmul.f32 %v12449_v29, %v9833_v2  ;;  %v3636_v63 = vmul.f32 %v12449_v29, %v9836_v6 }
 0x2ea   :  { %12448 = vst [vmem:[#allocation62_spill] sm:$0xff] %v10011_v3  ;;  %v3637_v23 = vmul.f32 %v12449_v29, %v9839_v20  ;;  %v3638_v8 = vmul.f32 %v12451_v35, %v12450_v7  ;;  %v3639_v16 = vmul.f32 %v12451_v35, %v12452_v21  ;;  %v3640_v50 = vmul.f32 %v12451_v35, %v12453_v25  ;;  %v12461_v3 = vld [vmem:[#allocation51_spill] sm:$0xff] }
 0x2eb   :  { %v10033_v56 = vadd.f32 %v3584_v12, %v3583_v26  ;;  %v3641_v52 = vmul.f32 %v12451_v35, %v12455_v9  ;;  %v3642_v54 = vmul.f32 %v12457_v60, %v12456_v43  ;;  %v3643_v18 = vmul.f32 %v12457_v60, %v12458_v41  ;;  %v12463_v12 = vld [vmem:[#allocation19_spill] sm:$0xff]  ;;  %v12465_v9 = vld [vmem:[#allocation26_spill] sm:$0xff] }
 0x2ec   :  { %v3644_v45 = vmul.f32 %v12457_v60, %v12459_v10  ;;  %v3645_v29 = vmul.f32 %v12457_v60, %v12460_v11  ;;  %v3646_v51 = vmul.f32 %v12462_v27, %v12461_v3  ;;  %v3647_v26 = vmul.f32 %v12462_v27, %v12463_v12 }
 0x2ed   :  { %12454 = vst [vmem:[#allocation48_spill] sm:$0xff] %v10033_v56  ;;  %v12464_v56 = vld [vmem:[#allocation100_spill] sm:$0xff]  ;;  %v3649_v43 = vmul.f32 %v12462_v27, %v12465_v9  ;;  %v3650_v41 = vsel %vm132_vm0, %v3618_v44, 0.0  ;;  %v3651_v25 = vsel %vm132_vm0, %v3622_v38, 0.0  ;;  %v3653_v21 = vsel %vm132_vm0, %v3626_v57, 0.0 }
 0x2ee   :  { %v3648_v35 = vmul.f32 %v12462_v27, %v12464_v56  ;;  %v3652_v10 = vadd.f32 %v3651_v25, %v3650_v41  ;;  %v3655_v60 = vsel %vm132_vm0, %v3630_v15, 0.0  ;;  %v3657_v3 = vsel %vm132_vm0, %v3634_v62, 0.0 }
 0x2ef   :  { %v3659_v11 = vsel %vm132_vm0, %v3638_v8, 0.0  ;;  %v3661_v12 = vsel %vm132_vm0, %v3642_v54, 0.0  ;;  %v3665_v56 = vsel %vm132_vm0, %v3619_v36, 0.0  ;;  %v3666_v7 = vsel %vm132_vm0, %v3623_v33, 0.0 }
 0x2f0   :  { %v3654_v27 = vadd.f32 %v3653_v21, %v3652_v10  ;;  %v3663_v44 = vsel %vm132_vm0, %v3646_v51, 0.0  ;;  %v3667_v9 = vadd.f32 %v3666_v7, %v3665_v56  ;;  %v3668_v38 = vsel %vm132_vm0, %v3627_v28, 0.0 }
 0x2f1   :  { %v3670_v57 = vsel %vm132_vm0, %v3631_v17, 0.0  ;;  %v3672_v15 = vsel %vm132_vm0, %v3635_v37, 0.0  ;;  %v3674_v62 = vsel %vm132_vm0, %v3639_v16, 0.0  ;;  %v3680_v8 = vsel %vm132_vm0, %v3620_v55, 0.0 }
 0x2f2   :  { %v3656_v25 = vadd.f32 %v3655_v60, %v3654_v27  ;;  %v3669_v54 = vadd.f32 %v3668_v38, %v3667_v9  ;;  %v3676_v36 = vsel %vm132_vm0, %v3643_v18, 0.0  ;;  %v3681_v33 = vsel %vm132_vm0, %v3624_v32, 0.0 }
 0x2f3   :  { %v3678_v21 = vsel %vm132_vm0, %v3647_v26, 0.0  ;;  %v3682_v51 = vadd.f32 %v3681_v33, %v3680_v8  ;;  %v3683_v7 = vsel %vm132_vm0, %v3628_v14, 0.0  ;;  %v3685_v28 = vsel %vm132_vm0, %v3632_v46, 0.0 }
 0x2f4   :  { %v3658_v17 = vadd.f32 %v3657_v3, %v3656_v25  ;;  %v3671_v56 = vadd.f32 %v3670_v57, %v3669_v54  ;;  %v3687_v37 = vsel %vm132_vm0, %v3636_v63, 0.0  ;;  %v3689_v16 = vsel %vm132_vm0, %v3640_v50, 0.0 }
 0x2f5   :  { %v3684_v55 = vadd.f32 %v3683_v7, %v3682_v51  ;;  %v3691_v9 = vsel %vm132_vm0, %v3644_v45, 0.0  ;;  %v3695_v41 = vsel %vm132_vm0, %v9987_v30, 0.0  ;;  %v3696_v32 = vsel %vm132_vm0, %v3625_v13, 0.0  ;;  %v12470_v51 = vld [vmem:[#allocation123_spill] sm:$0xff] }
 0x2f6   :  { %v3660_v18 = vadd.f32 %v3659_v11, %v3658_v17  ;;  %v3673_v10 = vadd.f32 %v3672_v15, %v3671_v56  ;;  %v3693_v14 = vsel %vm132_vm0, %v3648_v35, 0.0  ;;  %v3697_v26 = vadd.f32 %v3696_v32, %v3695_v41  ;;  %v12466_v35 = vld [vmem:[#allocation84_spill] sm:$0xff] }
 0x2f7   :  { %v3686_v46 = vadd.f32 %v3685_v28, %v3684_v55  ;;  %v3698_v3 = vsel %vm132_vm0, %v10007_v4, 0.0  ;;  %v3700_v63 = vsel %vm132_vm0, %v3633_v48, 0.0  ;;  %v3702_v50 = vsel %vm132_vm0, %v3637_v23, 0.0 }
 0x2f8   :  { %v3662_v60 = vadd.f32 %v3661_v12, %v3660_v18  ;;  %v3675_v45 = vadd.f32 %v3674_v62, %v3673_v10  ;;  %v3699_v27 = vadd.f32 %v3698_v3, %v3697_v26  ;;  %v3704_v30 = vsel %vm132_vm0, %v3641_v52, 0.0  ;;  %v12473_v10 = vld [vmem:[#allocation109_spill] sm:$0xff] }
 0x2f9   :  { %v3688_v38 = vadd.f32 %v3687_v37, %v3686_v46  ;;  %v3706_v13 = vsel %vm132_vm0, %v3645_v29, 0.0  ;;  %v3708_v11 = vsel %vm132_vm0, %v3649_v43, 0.0  ;;  %v3742_v57 = vmul.f32 %v12466_v35, %v9766_v39  ;;  %v12468_v43 = vld [vmem:[#allocation102_spill] sm:$0xff]  ;;  %v12471_v37 = vld [vmem:[#allocation92_spill] sm:$0xff] }
 0x2fa   :  { %v10089_v15 = vadd.f32 %v3663_v44, %v3662_v60  ;;  %v3677_v4 = vadd.f32 %v3676_v36, %v3675_v45  ;;  %v3701_v8 = vadd.f32 %v3700_v63, %v3699_v27  ;;  %v3743_v48 = vmul.f32 %v12466_v35, %v9769_v19  ;;  %v12474_v63 = vld [vmem:[#allocation55_spill] sm:$0xff]  ;;  %v12476_v45 = vld [vmem:[#allocation56_spill] sm:$0xff] }
 0x2fb   :  { %v3690_v23 = vadd.f32 %v3689_v16, %v3688_v38  ;;  %v3744_v12 = vmul.f32 %v12466_v35, %v9772_v34  ;;  %v10097_v52 = vmul.f32 %v12466_v35, %v9775_v49  ;;  %v3746_v29 = vmul.f32 %v12468_v43, %v9780_v22  ;;  %v12479_v35 = vld [vmem:[#allocation58_spill] sm:$0xff] }
 0x2fc   :  { %12467 = vst [vmem:[#allocation49_spill] sm:$0xff] %v10089_v15  ;;  %v10101_v62 = vadd.f32 %v3678_v21, %v3677_v4  ;;  %v3703_v44 = vadd.f32 %v3702_v50, %v3701_v8  ;;  %v3747_v25 = vmul.f32 %v12468_v43, %v9785_v53  ;;  %v3748_v54 = vmul.f32 %v12468_v43, %v9790_v24  ;;  %v12475_v50 = vld [vmem:[#allocation114_spill] sm:$0xff]  ;;  %v12480_v8 = vld [vmem:[#allocation59_spill] sm:$0xff] }
 0x2fd   :  { %v3692_v36 = vadd.f32 %v3691_v9, %v3690_v23  ;;  %v3749_v33 = vmul.f32 %v12468_v43, %v9795_v59  ;;  %v3750_v7 = vmul.f32 %v12470_v51, %v9798_v0  ;;  %v3751_v28 = vmul.f32 %v12470_v51, %v9801_v58  ;;  %v12481_v23 = vld [vmem:[#allocation94_spill] sm:$0xff] }
 0x2fe   :  { %12469 = vst [vmem:[#allocation53_spill] sm:$0xff] %v10101_v62  ;;  %v3705_v17 = vadd.f32 %v3704_v30, %v3703_v44  ;;  %v3752_v21 = vmul.f32 %v12470_v51, %v9804_v42  ;;  %v10117_v56 = vmul.f32 %v12470_v51, %v9807_v5  ;;  %v3754_v16 = vmul.f32 %v12471_v37, %v9812_v40  ;;  %v12477_v30 = vld [vmem:[#allocation57_spill] sm:$0xff]  ;;  %v12482_v44 = vld [vmem:[#allocation60_spill] sm:$0xff] }
 0x2ff   :  { %v10121_v55 = vadd.f32 %v3693_v14, %v3692_v36  ;;  %v3755_v9 = vmul.f32 %v12471_v37, %v9817_v47  ;;  %v3756_v41 = vmul.f32 %v12471_v37, %v9822_v31  ;;  %v3757_v32 = vmul.f32 %v12471_v37, %v9827_v1  ;;  %v12483_v51 = vld [vmem:[#allocation61_spill] sm:$0xff]  ;;  %v12484_v37 = vld [vmem:[#allocation32_spill] sm:$0xff] }
 0x300   :  { %v3707_v18 = vadd.f32 %v3706_v13, %v3705_v17  ;;  %v3758_v26 = vmul.f32 %v12473_v10, %v9830_v61  ;;  %v3759_v46 = vmul.f32 %v12473_v10, %v9833_v2  ;;  %v3760_v14 = vmul.f32 %v12473_v10, %v9836_v6  ;;  %v12486_v62 = vld [vmem:[#allocation125_spill] sm:$0xff] }
 0x301   :  { %12472 = vst [vmem:[#allocation41_spill] sm:$0xff] %v10121_v55  ;;  %v3761_v3 = vmul.f32 %v12473_v10, %v9839_v20  ;;  %v3762_v60 = vmul.f32 %v12475_v50, %v12474_v63  ;;  %v3763_v27 = vmul.f32 %v12475_v50, %v12476_v45  ;;  %v3764_v38 = vmul.f32 %v12475_v50, %v12477_v30  ;;  %v12485_v55 = vld [vmem:[#allocation51_spill] sm:$0xff] }
 0x302   :  { %v10143_v13 = vadd.f32 %v3708_v11, %v3707_v18  ;;  %v3765_v4 = vmul.f32 %v12475_v50, %v12479_v35  ;;  %v3766_v43 = vmul.f32 %v12481_v23, %v12480_v8  ;;  %v3767_v36 = vmul.f32 %v12481_v23, %v12482_v44  ;;  %v12487_v11 = vld [vmem:[#allocation19_spill] sm:$0xff]  ;;  %v12489_v35 = vld [vmem:[#allocation26_spill] sm:$0xff] }
 0x303   :  { %v3768_v17 = vmul.f32 %v12481_v23, %v12483_v51  ;;  %v3769_v10 = vmul.f32 %v12481_v23, %v12484_v37  ;;  %v3770_v15 = vmul.f32 %v12486_v62, %v12485_v55  ;;  %v3771_v18 = vmul.f32 %v12486_v62, %v12487_v11 }
 0x304   :  { %12478 = vst [vmem:[#allocation64_spill] sm:$0xff] %v10143_v13  ;;  %v12488_v13 = vld [vmem:[#allocation100_spill] sm:$0xff]  ;;  %v3773_v8 = vmul.f32 %v12486_v62, %v12489_v35  ;;  %v3774_v44 = vsel %vm132_vm0, %v3742_v57, 0.0  ;;  %v3775_v30 = vsel %vm132_vm0, %v3746_v29, 0.0  ;;  %v3777_v45 = vsel %vm132_vm0, %v3750_v7, 0.0 }
 0x305   :  { %v3772_v50 = vmul.f32 %v12486_v62, %v12488_v13  ;;  %v3776_v51 = vadd.f32 %v3775_v30, %v3774_v44  ;;  %v3779_v23 = vsel %vm132_vm0, %v3754_v16, 0.0  ;;  %v3781_v55 = vsel %vm132_vm0, %v3758_v26, 0.0 }
 0x306   :  { %v3783_v37 = vsel %vm132_vm0, %v3762_v60, 0.0  ;;  %v3785_v11 = vsel %vm132_vm0, %v3766_v43, 0.0  ;;  %v3789_v13 = vsel %vm132_vm0, %v3743_v48, 0.0  ;;  %v3790_v63 = vsel %vm132_vm0, %v3747_v25, 0.0 }
 0x307   :  { %v3778_v62 = vadd.f32 %v3777_v45, %v3776_v51  ;;  %v3787_v57 = vsel %vm132_vm0, %v3770_v15, 0.0  ;;  %v3791_v35 = vadd.f32 %v3790_v63, %v3789_v13  ;;  %v3792_v29 = vsel %vm132_vm0, %v3751_v28, 0.0 }
 0x308   :  { %v3794_v7 = vsel %vm132_vm0, %v3755_v9, 0.0  ;;  %v3796_v16 = vsel %vm132_vm0, %v3759_v46, 0.0  ;;  %v3798_v26 = vsel %vm132_vm0, %v3763_v27, 0.0  ;;  %v3804_v60 = vsel %vm132_vm0, %v3744_v12, 0.0 }
 0x309   :  { %v3780_v30 = vadd.f32 %v3779_v23, %v3778_v62  ;;  %v3793_v43 = vadd.f32 %v3792_v29, %v3791_v35  ;;  %v3800_v48 = vsel %vm132_vm0, %v3767_v36, 0.0  ;;  %v3805_v25 = vsel %vm132_vm0, %v3748_v54, 0.0 }
 0x30a   :  { %v3802_v45 = vsel %vm132_vm0, %v3771_v18, 0.0  ;;  %v3806_v15 = vadd.f32 %v3805_v25, %v3804_v60  ;;  %v3807_v63 = vsel %vm132_vm0, %v3752_v21, 0.0  ;;  %v3809_v28 = vsel %vm132_vm0, %v3756_v41, 0.0 }
 0x30b   :  { %v3782_v9 = vadd.f32 %v3781_v55, %v3780_v30  ;;  %v3795_v13 = vadd.f32 %v3794_v7, %v3793_v43  ;;  %v3811_v46 = vsel %vm132_vm0, %v3760_v14, 0.0  ;;  %v3813_v27 = vsel %vm132_vm0, %v3764_v38, 0.0 }
 0x30c   :  { %v3808_v12 = vadd.f32 %v3807_v63, %v3806_v15  ;;  %v3815_v35 = vsel %vm132_vm0, %v3768_v17, 0.0  ;;  %v3819_v44 = vsel %vm132_vm0, %v10097_v52, 0.0  ;;  %v3820_v54 = vsel %vm132_vm0, %v3749_v33, 0.0  ;;  %v12494_v15 = vld [vmem:[#allocation10_spill] sm:$0xff] }
 0x30d   :  { %v3784_v36 = vadd.f32 %v3783_v37, %v3782_v9  ;;  %v3797_v51 = vadd.f32 %v3796_v16, %v3795_v13  ;;  %v3817_v21 = vsel %vm132_vm0, %v3772_v50, 0.0  ;;  %v3821_v18 = vadd.f32 %v3820_v54, %v3819_v44  ;;  %v12490_v50 = vld [vmem:[#allocation113_spill] sm:$0xff] }
 0x30e   :  { %v3810_v41 = vadd.f32 %v3809_v28, %v3808_v12  ;;  %v3822_v55 = vsel %vm132_vm0, %v10117_v56, 0.0  ;;  %v3824_v14 = vsel %vm132_vm0, %v3757_v32, 0.0  ;;  %v3826_v38 = vsel %vm132_vm0, %v3761_v3, 0.0 }
 0x30f   :  { %v3786_v23 = vadd.f32 %v3785_v11, %v3784_v36  ;;  %v3799_v17 = vadd.f32 %v3798_v26, %v3797_v51  ;;  %v3823_v62 = vadd.f32 %v3822_v55, %v3821_v18  ;;  %v3828_v52 = vsel %vm132_vm0, %v3765_v4, 0.0  ;;  %v12497_v51 = vld [vmem:[#allocation23_spill] sm:$0xff] }
 0x310   :  { %v3812_v29 = vadd.f32 %v3811_v46, %v3810_v41  ;;  %v3830_v33 = vsel %vm132_vm0, %v3769_v10, 0.0  ;;  %v3832_v37 = vsel %vm132_vm0, %v3773_v8, 0.0  ;;  %v3866_v7 = vmul.f32 %v12490_v50, %v9766_v39  ;;  %v12492_v8 = vld [vmem:[#allocation96_spill] sm:$0xff] }
 0x311   :  { %v10199_v16 = vadd.f32 %v3787_v57, %v3786_v23  ;;  %v3801_v56 = vadd.f32 %v3800_v48, %v3799_v17  ;;  %v3825_v60 = vadd.f32 %v3824_v14, %v3823_v62  ;;  %v3867_v32 = vmul.f32 %v12490_v50, %v9769_v19  ;;  %v12495_v46 = vld [vmem:[#allocation12_spill] sm:$0xff]  ;;  %v12498_v14 = vld [vmem:[#allocation55_spill] sm:$0xff] }
 0x312   :  { %v3814_v3 = vadd.f32 %v3813_v27, %v3812_v29  ;;  %v3868_v11 = vmul.f32 %v12490_v50, %v9772_v34  ;;  %v10207_v4 = vmul.f32 %v12490_v50, %v9775_v49  ;;  %v3870_v10 = vmul.f32 %v12492_v8, %v9780_v22  ;;  %v12500_v17 = vld [vmem:[#allocation56_spill] sm:$0xff]  ;;  %v12503_v50 = vld [vmem:[#allocation58_spill] sm:$0xff] }
 0x313   :  { %12491 = vst [vmem:[#allocation42_spill] sm:$0xff] %v10199_v16  ;;  %v10211_v26 = vadd.f32 %v3802_v45, %v3801_v56  ;;  %v3827_v57 = vadd.f32 %v3826_v38, %v3825_v60  ;;  %v3871_v30 = vmul.f32 %v12492_v8, %v9785_v53  ;;  %v3872_v43 = vmul.f32 %v12492_v8, %v9790_v24  ;;  %v12499_v38 = vld [vmem:[#allocation52_spill] sm:$0xff]  ;;  %v12504_v60 = vld [vmem:[#allocation59_spill] sm:$0xff] }
 0x314   :  { %v3816_v48 = vadd.f32 %v3815_v35, %v3814_v3  ;;  %v3873_v25 = vmul.f32 %v12492_v8, %v9795_v59  ;;  %v3874_v63 = vmul.f32 %v12494_v15, %v9798_v0  ;;  %v3875_v28 = vmul.f32 %v12494_v15, %v9801_v58  ;;  %v12505_v3 = vld [vmem:[#allocation108_spill] sm:$0xff] }
 0x315   :  { %12493 = vst [vmem:[#allocation40_spill] sm:$0xff] %v10211_v26  ;;  %v3829_v9 = vadd.f32 %v3828_v52, %v3827_v57  ;;  %v3876_v45 = vmul.f32 %v12494_v15, %v9804_v42  ;;  %v10227_v13 = vmul.f32 %v12494_v15, %v9807_v5  ;;  %v3878_v27 = vmul.f32 %v12495_v46, %v9812_v40  ;;  %v12501_v52 = vld [vmem:[#allocation57_spill] sm:$0xff]  ;;  %v12506_v57 = vld [vmem:[#allocation60_spill] sm:$0xff]  ;;  %v12510_v26 = vld [vmem:[#allocation6_spill] sm:$0xff] }
 0x316   :  { %v10231_v12 = vadd.f32 %v3817_v21, %v3816_v48  ;;  %v3879_v35 = vmul.f32 %v12495_v46, %v9817_v47  ;;  %v3880_v44 = vmul.f32 %v12495_v46, %v9822_v31  ;;  %v3881_v54 = vmul.f32 %v12495_v46, %v9827_v1  ;;  %v12507_v15 = vld [vmem:[#allocation61_spill] sm:$0xff]  ;;  %v12508_v46 = vld [vmem:[#allocation32_spill] sm:$0xff] }
 0x317   :  { %v3831_v36 = vadd.f32 %v3830_v33, %v3829_v9  ;;  %v3882_v18 = vmul.f32 %v12497_v51, %v9830_v61  ;;  %v3883_v41 = vmul.f32 %v12497_v51, %v9833_v2  ;;  %v3884_v21 = vmul.f32 %v12497_v51, %v9836_v6 }
 0x318   :  { %12496 = vst [vmem:[#allocation39_spill] sm:$0xff] %v10231_v12  ;;  %v3885_v55 = vmul.f32 %v12497_v51, %v9839_v20  ;;  %v3886_v23 = vmul.f32 %v12499_v38, %v12498_v14  ;;  %v3887_v62 = vmul.f32 %v12499_v38, %v12500_v17  ;;  %v3888_v29 = vmul.f32 %v12499_v38, %v12501_v52  ;;  %v12509_v12 = vld [vmem:[#allocation51_spill] sm:$0xff] }
 0x319   :  { %v10253_v33 = vadd.f32 %v3832_v37, %v3831_v36  ;;  %v3889_v56 = vmul.f32 %v12499_v38, %v12503_v50  ;;  %v3890_v8 = vmul.f32 %v12505_v3, %v12504_v60  ;;  %v3891_v48 = vmul.f32 %v12505_v3, %v12506_v57  ;;  %v12511_v37 = vld [vmem:[#allocation19_spill] sm:$0xff]  ;;  %v12513_v50 = vld [vmem:[#allocation26_spill] sm:$0xff] }
 0x31a   :  { %v3892_v9 = vmul.f32 %v12505_v3, %v12507_v15  ;;  %v3893_v51 = vmul.f32 %v12505_v3, %v12508_v46  ;;  %v3894_v16 = vmul.f32 %v12510_v26, %v12509_v12  ;;  %v3895_v36 = vmul.f32 %v12510_v26, %v12511_v37 }
 0x31b   :  { %12502 = vst [vmem:[#allocation43_spill] sm:$0xff] %v10253_v33  ;;  %v12512_v33 = vld [vmem:[#allocation100_spill] sm:$0xff]  ;;  %v3897_v60 = vmul.f32 %v12510_v26, %v12513_v50  ;;  %v3898_v57 = vsel %vm132_vm0, %v3866_v7, 0.0  ;;  %v3899_v52 = vsel %vm132_vm0, %v3870_v10, 0.0  ;;  %v3901_v17 = vsel %vm132_vm0, %v3874_v63, 0.0 }
 0x31c   :  { %v3896_v38 = vmul.f32 %v12510_v26, %v12512_v33  ;;  %v3900_v15 = vadd.f32 %v3899_v52, %v3898_v57  ;;  %v3903_v3 = vsel %vm132_vm0, %v3878_v27, 0.0  ;;  %v3905_v12 = vsel %vm132_vm0, %v3882_v18, 0.0 }
 0x31d   :  { %v3907_v46 = vsel %vm132_vm0, %v3886_v23, 0.0  ;;  %v3909_v37 = vsel %vm132_vm0, %v3890_v8, 0.0  ;;  %v3913_v33 = vsel %vm132_vm0, %v3867_v32, 0.0  ;;  %v3914_v14 = vsel %vm132_vm0, %v3871_v30, 0.0 }
 0x31e   :  { %v3902_v26 = vadd.f32 %v3901_v17, %v3900_v15  ;;  %v3911_v7 = vsel %vm132_vm0, %v3894_v16, 0.0  ;;  %v3915_v50 = vadd.f32 %v3914_v14, %v3913_v33  ;;  %v3916_v10 = vsel %vm132_vm0, %v3875_v28, 0.0 }
 0x31f   :  { %v3918_v63 = vsel %vm132_vm0, %v3879_v35, 0.0  ;;  %v3920_v27 = vsel %vm132_vm0, %v3883_v41, 0.0  ;;  %v3922_v18 = vsel %vm132_vm0, %v3887_v62, 0.0  ;;  %v3928_v23 = vsel %vm132_vm0, %v3868_v11, 0.0 }
 0x320   :  { %v3904_v52 = vadd.f32 %v3903_v3, %v3902_v26  ;;  %v3917_v8 = vadd.f32 %v3916_v10, %v3915_v50  ;;  %v3924_v32 = vsel %vm132_vm0, %v3891_v48, 0.0  ;;  %v3929_v30 = vsel %vm132_vm0, %v3872_v43, 0.0 }
 0x321   :  { %v3926_v17 = vsel %vm132_vm0, %v3895_v36, 0.0  ;;  %v3930_v16 = vadd.f32 %v3929_v30, %v3928_v23  ;;  %v3931_v14 = vsel %vm132_vm0, %v3876_v45, 0.0  ;;  %v3933_v28 = vsel %vm132_vm0, %v3880_v44, 0.0 }
 0x322   :  { %v3906_v35 = vadd.f32 %v3905_v12, %v3904_v52  ;;  %v3919_v33 = vadd.f32 %v3918_v63, %v3917_v8  ;;  %v3935_v41 = vsel %vm132_vm0, %v3884_v21, 0.0  ;;  %v3937_v62 = vsel %vm132_vm0, %v3888_v29, 0.0 }
 0x323   :  { %v3932_v11 = vadd.f32 %v3931_v14, %v3930_v16  ;;  %v3939_v50 = vsel %vm132_vm0, %v3892_v9, 0.0  ;;  %v3943_v57 = vsel %vm132_vm0, %v10207_v4, 0.0  ;;  %v3944_v43 = vsel %vm132_vm0, %v3873_v25, 0.0  ;;  %v12518_v16 = vld [vmem:[#allocation29_spill] sm:$0xff] }
 0x324   :  { %v3908_v48 = vadd.f32 %v3907_v46, %v3906_v35  ;;  %v3921_v15 = vadd.f32 %v3920_v27, %v3919_v33  ;;  %v3941_v45 = vsel %vm132_vm0, %v3896_v38, 0.0  ;;  %v3945_v36 = vadd.f32 %v3944_v43, %v3943_v57  ;;  %v12514_v38 = vld [vmem:[#allocation30_spill] sm:$0xff] }
 0x325   :  { %v3934_v44 = vadd.f32 %v3933_v28, %v3932_v11  ;;  %v3946_v12 = vsel %vm132_vm0, %v10227_v13, 0.0  ;;  %v3948_v21 = vsel %vm132_vm0, %v3881_v54, 0.0  ;;  %v3950_v29 = vsel %vm132_vm0, %v3885_v55, 0.0 }
 0x326   :  { %v3910_v3 = vadd.f32 %v3909_v37, %v3908_v48  ;;  %v3923_v9 = vadd.f32 %v3922_v18, %v3921_v15  ;;  %v3947_v26 = vadd.f32 %v3946_v12, %v3945_v36  ;;  %v3952_v4 = vsel %vm132_vm0, %v3889_v56, 0.0  ;;  %v12521_v15 = vld [vmem:[#allocation128_spill] sm:$0xff] }
 0x327   :  { %v3936_v10 = vadd.f32 %v3935_v41, %v3934_v44  ;;  %v3954_v25 = vsel %vm132_vm0, %v3893_v51, 0.0  ;;  %v3956_v46 = vsel %vm132_vm0, %v3897_v60, 0.0  ;;  %v3990_v63 = vmul.f32 %v12514_v38, %v9766_v39  ;;  %v12516_v60 = vld [vmem:[#allocation37_spill] sm:$0xff] }
 0x328   :  { %v10309_v27 = vadd.f32 %v3911_v7, %v3910_v3  ;;  %v3925_v13 = vadd.f32 %v3924_v32, %v3923_v9  ;;  %v3949_v23 = vadd.f32 %v3948_v21, %v3947_v26  ;;  %v3991_v54 = vmul.f32 %v12514_v38, %v9769_v19  ;;  %v12519_v41 = vld [vmem:[#allocation117_spill] sm:$0xff]  ;;  %v12522_v21 = vld [vmem:[#allocation55_spill] sm:$0xff]  ;;  %v12524_v9 = vld [vmem:[#allocation56_spill] sm:$0xff] }
 0x329   :  { %v3938_v55 = vadd.f32 %v3937_v62, %v3936_v10  ;;  %v3992_v37 = vmul.f32 %v12514_v38, %v9772_v34  ;;  %v10317_v56 = vmul.f32 %v12514_v38, %v9775_v49  ;;  %v3994_v51 = vmul.f32 %v12516_v60, %v9780_v22  ;;  %v12527_v38 = vld [vmem:[#allocation58_spill] sm:$0xff] }
 0x32a   :  { %12515 = vst [vmem:[#allocation45_spill] sm:$0xff] %v10309_v27  ;;  %v10321_v18 = vadd.f32 %v3926_v17, %v3925_v13  ;;  %v3951_v7 = vadd.f32 %v3950_v29, %v3949_v23  ;;  %v3995_v52 = vmul.f32 %v12516_v60, %v9785_v53  ;;  %v3996_v8 = vmul.f32 %v12516_v60, %v9790_v24  ;;  %v12523_v29 = vld [vmem:[#allocation122_spill] sm:$0xff]  ;;  %v12528_v23 = vld [vmem:[#allocation59_spill] sm:$0xff] }
 0x32b   :  { %v3940_v32 = vadd.f32 %v3939_v50, %v3938_v55  ;;  %v3997_v30 = vmul.f32 %v12516_v60, %v9795_v59  ;;  %v3998_v14 = vmul.f32 %v12518_v16, %v9798_v0  ;;  %v3999_v28 = vmul.f32 %v12518_v16, %v9801_v58  ;;  %v12529_v55 = vld [vmem:[#allocation28_spill] sm:$0xff] }
 0x32c   :  { %12517 = vst [vmem:[#allocation44_spill] sm:$0xff] %v10321_v18  ;;  %v3953_v35 = vadd.f32 %v3952_v4, %v3951_v7  ;;  %v4000_v17 = vmul.f32 %v12518_v16, %v9804_v42  ;;  %v10337_v33 = vmul.f32 %v12518_v16, %v9807_v5  ;;  %v4002_v62 = vmul.f32 %v12519_v41, %v9812_v40  ;;  %v12525_v4 = vld [vmem:[#allocation57_spill] sm:$0xff]  ;;  %v12530_v7 = vld [vmem:[#allocation60_spill] sm:$0xff] }
 0x32d   :  { %v10341_v11 = vadd.f32 %v3941_v45, %v3940_v32  ;;  %v4003_v50 = vmul.f32 %v12519_v41, %v9817_v47  ;;  %v4004_v57 = vmul.f32 %v12519_v41, %v9822_v31  ;;  %v4005_v43 = vmul.f32 %v12519_v41, %v9827_v1  ;;  %v12531_v16 = vld [vmem:[#allocation61_spill] sm:$0xff]  ;;  %v12532_v41 = vld [vmem:[#allocation32_spill] sm:$0xff] }
 0x32e   :  { %v3955_v48 = vadd.f32 %v3954_v25, %v3953_v35  ;;  %v4006_v36 = vmul.f32 %v12521_v15, %v9830_v61  ;;  %v4007_v44 = vmul.f32 %v12521_v15, %v9833_v2  ;;  %v4008_v45 = vmul.f32 %v12521_v15, %v9836_v6  ;;  %v12534_v18 = vld [vmem:[#allocation97_spill] sm:$0xff] }
 0x32f   :  { %12520 = vst [vmem:[#allocation65_spill] sm:$0xff] %v10341_v11  ;;  %v4009_v12 = vmul.f32 %v12521_v15, %v9839_v20  ;;  %v4010_v3 = vmul.f32 %v12523_v29, %v12522_v21  ;;  %v4011_v26 = vmul.f32 %v12523_v29, %v12524_v9  ;;  %v4012_v10 = vmul.f32 %v12523_v29, %v12525_v4  ;;  %v12533_v11 = vld [vmem:[#allocation51_spill] sm:$0xff] }
 0x330   :  { %v10363_v25 = vadd.f32 %v3956_v46, %v3955_v48  ;;  %v4013_v13 = vmul.f32 %v12523_v29, %v12527_v38  ;;  %v4014_v60 = vmul.f32 %v12529_v55, %v12528_v23  ;;  %v4015_v32 = vmul.f32 %v12529_v55, %v12530_v7  ;;  %v12535_v46 = vld [vmem:[#allocation19_spill] sm:$0xff]  ;;  %v12537_v38 = vld [vmem:[#allocation26_spill] sm:$0xff] }
 0x331   :  { %v4016_v35 = vmul.f32 %v12529_v55, %v12531_v16  ;;  %v4017_v15 = vmul.f32 %v12529_v55, %v12532_v41  ;;  %v4018_v27 = vmul.f32 %v12534_v18, %v12533_v11  ;;  %v4019_v48 = vmul.f32 %v12534_v18, %v12535_v46 }
 0x332   :  { %12526 = vst [vmem:[#allocation66_spill] sm:$0xff] %v10363_v25  ;;  %v12536_v25 = vld [vmem:[#allocation100_spill] sm:$0xff]  ;;  %v4021_v23 = vmul.f32 %v12534_v18, %v12537_v38  ;;  %v4022_v7 = vsel %vm132_vm0, %v3990_v63, 0.0  ;;  %v4023_v4 = vsel %vm132_vm0, %v3994_v51, 0.0  ;;  %v4025_v9 = vsel %vm132_vm0, %v3998_v14, 0.0 }
 0x333   :  { %v4020_v29 = vmul.f32 %v12534_v18, %v12536_v25  ;;  %v4024_v16 = vadd.f32 %v4023_v4, %v4022_v7  ;;  %v4027_v55 = vsel %vm132_vm0, %v4002_v62, 0.0  ;;  %v4029_v11 = vsel %vm132_vm0, %v4006_v36, 0.0 }
 0x334   :  { %v4031_v41 = vsel %vm132_vm0, %v4010_v3, 0.0  ;;  %v4033_v46 = vsel %vm132_vm0, %v4014_v60, 0.0  ;;  %v4037_v25 = vsel %vm132_vm0, %v3991_v54, 0.0  ;;  %v4038_v21 = vsel %vm132_vm0, %v3995_v52, 0.0 }
 0x335   :  { %v4026_v18 = vadd.f32 %v4025_v9, %v4024_v16  ;;  %v4035_v63 = vsel %vm132_vm0, %v4018_v27, 0.0  ;;  %v4039_v38 = vadd.f32 %v4038_v21, %v4037_v25  ;;  %v4040_v51 = vsel %vm132_vm0, %v3999_v28, 0.0 }
 0x336   :  { %v4042_v14 = vsel %vm132_vm0, %v4003_v50, 0.0  ;;  %v4044_v62 = vsel %vm132_vm0, %v4007_v44, 0.0  ;;  %v4046_v36 = vsel %vm132_vm0, %v4011_v26, 0.0  ;;  %v4052_v3 = vsel %vm132_vm0, %v3992_v37, 0.0 }
 0x337   :  { %v4028_v4 = vadd.f32 %v4027_v55, %v4026_v18  ;;  %v4041_v60 = vadd.f32 %v4040_v51, %v4039_v38  ;;  %v4048_v54 = vsel %vm132_vm0, %v4015_v32, 0.0  ;;  %v4053_v52 = vsel %vm132_vm0, %v3996_v8, 0.0 }
 0x338   :  { %v4050_v9 = vsel %vm132_vm0, %v4019_v48, 0.0  ;;  %v4054_v27 = vadd.f32 %v4053_v52, %v4052_v3  ;;  %v4055_v21 = vsel %vm132_vm0, %v4000_v17, 0.0  ;;  %v4057_v28 = vsel %vm132_vm0, %v4004_v57, 0.0 }
 0x339   :  { %v4030_v50 = vadd.f32 %v4029_v11, %v4028_v4  ;;  %v4043_v25 = vadd.f32 %v4042_v14, %v4041_v60  ;;  %v4059_v44 = vsel %vm132_vm0, %v4008_v45, 0.0  ;;  %v4061_v26 = vsel %vm132_vm0, %v4012_v10, 0.0 }
 0x33a   :  { %v4056_v37 = vadd.f32 %v4055_v21, %v4054_v27  ;;  %v4063_v38 = vsel %vm132_vm0, %v4016_v35, 0.0  ;;  %v4067_v7 = vsel %vm132_vm0, %v10317_v56, 0.0  ;;  %v4068_v8 = vsel %vm132_vm0, %v3997_v30, 0.0  ;;  %v12542_v27 = vld [vmem:[#allocation27_spill] sm:$0xff] }
 0x33b   :  { %v4032_v32 = vadd.f32 %v4031_v41, %v4030_v50  ;;  %v4045_v16 = vadd.f32 %v4044_v62, %v4043_v25  ;;  %v4065_v17 = vsel %vm132_vm0, %v4020_v29, 0.0  ;;  %v4069_v48 = vadd.f32 %v4068_v8, %v4067_v7  ;;  %v12538_v29 = vld [vmem:[#allocation129_spill] sm:$0xff] }
 0x33c   :  { %v4058_v57 = vadd.f32 %v4057_v28, %v4056_v37  ;;  %v4070_v11 = vsel %vm132_vm0, %v10337_v33, 0.0  ;;  %v4072_v45 = vsel %vm132_vm0, %v4005_v43, 0.0  ;;  %v4074_v10 = vsel %vm132_vm0, %v4009_v12, 0.0 }
 0x33d   :  { %v4034_v55 = vadd.f32 %v4033_v46, %v4032_v32  ;;  %v4047_v35 = vadd.f32 %v4046_v36, %v4045_v16  ;;  %v4071_v18 = vadd.f32 %v4070_v11, %v4069_v48  ;;  %v4076_v56 = vsel %vm132_vm0, %v4013_v13, 0.0  ;;  %v12545_v16 = vld [vmem:[#allocation75_spill] sm:$0xff] }
 0x33e   :  { %v4060_v51 = vadd.f32 %v4059_v44, %v4058_v57  ;;  %v4078_v30 = vsel %vm132_vm0, %v4017_v15, 0.0  ;;  %v4080_v41 = vsel %vm132_vm0, %v4021_v23, 0.0  ;;  %v4114_v14 = vmul.f32 %v12538_v29, %v9766_v39  ;;  %v12540_v23 = vld [vmem:[#allocation115_spill] sm:$0xff]  ;;  %v12543_v44 = vld [vmem:[#allocation110_spill] sm:$0xff] }
 0x33f   :  { %v10419_v62 = vadd.f32 %v4035_v63, %v4034_v55  ;;  %v4049_v33 = vadd.f32 %v4048_v54, %v4047_v35  ;;  %v4073_v3 = vadd.f32 %v4072_v45, %v4071_v18  ;;  %v4115_v43 = vmul.f32 %v12538_v29, %v9769_v19  ;;  %v12546_v45 = vld [vmem:[#allocation55_spill] sm:$0xff]  ;;  %v12548_v35 = vld [vmem:[#allocation56_spill] sm:$0xff] }
 0x340   :  { %v4062_v12 = vadd.f32 %v4061_v26, %v4060_v51  ;;  %v4116_v46 = vmul.f32 %v12538_v29, %v9772_v34  ;;  %v10427_v13 = vmul.f32 %v12538_v29, %v9775_v49  ;;  %v4118_v15 = vmul.f32 %v12540_v23, %v9780_v22  ;;  %v12551_v29 = vld [vmem:[#allocation58_spill] sm:$0xff] }
 0x341   :  { %12539 = vst [vmem:[#allocation67_spill] sm:$0xff] %v10419_v62  ;;  %v10431_v36 = vadd.f32 %v4050_v9, %v4049_v33  ;;  %v4075_v63 = vadd.f32 %v4074_v10, %v4073_v3  ;;  %v4119_v4 = vmul.f32 %v12540_v23, %v9785_v53  ;;  %v4120_v60 = vmul.f32 %v12540_v23, %v9790_v24  ;;  %v12547_v10 = vld [vmem:[#allocation34_spill] sm:$0xff]  ;;  %v12552_v3 = vld [vmem:[#allocation59_spill] sm:$0xff] }
 0x342   :  { %v4064_v54 = vadd.f32 %v4063_v38, %v4062_v12  ;;  %v4121_v52 = vmul.f32 %v12540_v23, %v9795_v59  ;;  %v4122_v21 = vmul.f32 %v12542_v27, %v9798_v0  ;;  %v4123_v28 = vmul.f32 %v12542_v27, %v9801_v58  ;;  %v12553_v12 = vld [vmem:[#allocation63_spill] sm:$0xff] }
 0x343   :  { %12541 = vst [vmem:[#allocation68_spill] sm:$0xff] %v10431_v36  ;;  %v4077_v50 = vadd.f32 %v4076_v56, %v4075_v63  ;;  %v4124_v9 = vmul.f32 %v12542_v27, %v9804_v42  ;;  %v10447_v25 = vmul.f32 %v12542_v27, %v9807_v5  ;;  %v4126_v26 = vmul.f32 %v12543_v44, %v9812_v40  ;;  %v12549_v56 = vld [vmem:[#allocation57_spill] sm:$0xff]  ;;  %v12554_v63 = vld [vmem:[#allocation60_spill] sm:$0xff]  ;;  %v12558_v36 = vld [vmem:[#allocation99_spill] sm:$0xff] }
 0x344   :  { %v10451_v37 = vadd.f32 %v4065_v17, %v4064_v54  ;;  %v4127_v38 = vmul.f32 %v12543_v44, %v9817_v47  ;;  %v4128_v7 = vmul.f32 %v12543_v44, %v9822_v31  ;;  %v4129_v8 = vmul.f32 %v12543_v44, %v9827_v1  ;;  %v12555_v27 = vld [vmem:[#allocation61_spill] sm:$0xff]  ;;  %v12556_v44 = vld [vmem:[#allocation32_spill] sm:$0xff] }
 0x345   :  { %v4079_v32 = vadd.f32 %v4078_v30, %v4077_v50  ;;  %v4130_v48 = vmul.f32 %v12545_v16, %v9830_v61  ;;  %v4131_v57 = vmul.f32 %v12545_v16, %v9833_v2  ;;  %v4132_v17 = vmul.f32 %v12545_v16, %v9836_v6 }
 0x346   :  { %12544 = vst [vmem:[#allocation69_spill] sm:$0xff] %v10451_v37  ;;  %v4133_v11 = vmul.f32 %v12545_v16, %v9839_v20  ;;  %v4134_v55 = vmul.f32 %v12547_v10, %v12546_v45  ;;  %v4135_v18 = vmul.f32 %v12547_v10, %v12548_v35  ;;  %v4136_v51 = vmul.f32 %v12547_v10, %v12549_v56  ;;  %v12557_v37 = vld [vmem:[#allocation51_spill] sm:$0xff] }
 0x347   :  { %v10473_v30 = vadd.f32 %v4080_v41, %v4079_v32  ;;  %v4137_v33 = vmul.f32 %v12547_v10, %v12551_v29  ;;  %v4138_v23 = vmul.f32 %v12553_v12, %v12552_v3  ;;  %v4139_v54 = vmul.f32 %v12553_v12, %v12554_v63  ;;  %v12559_v41 = vld [vmem:[#allocation19_spill] sm:$0xff]  ;;  %v12561_v29 = vld [vmem:[#allocation26_spill] sm:$0xff] }
 0x348   :  { %v4140_v50 = vmul.f32 %v12553_v12, %v12555_v27  ;;  %v4141_v16 = vmul.f32 %v12553_v12, %v12556_v44  ;;  %v4142_v62 = vmul.f32 %v12558_v36, %v12557_v37  ;;  %v4143_v32 = vmul.f32 %v12558_v36, %v12559_v41 }
 0x349   :  { %12550 = vst [vmem:[#allocation70_spill] sm:$0xff] %v10473_v30  ;;  %v12560_v30 = vld [vmem:[#allocation100_spill] sm:$0xff]  ;;  %v4145_v3 = vmul.f32 %v12558_v36, %v12561_v29  ;;  %v4146_v63 = vsel %vm132_vm0, %v4114_v14, 0.0  ;;  %v4147_v56 = vsel %vm132_vm0, %v4118_v15, 0.0  ;;  %v4149_v35 = vsel %vm132_vm0, %v4122_v21, 0.0 }
 0x34a   :  { %v4144_v10 = vmul.f32 %v12558_v36, %v12560_v30  ;;  %v4148_v27 = vadd.f32 %v4147_v56, %v4146_v63  ;;  %v4151_v12 = vsel %vm132_vm0, %v4126_v26, 0.0  ;;  %v4153_v37 = vsel %vm132_vm0, %v4130_v48, 0.0 }
 0x34b   :  { %v4155_v44 = vsel %vm132_vm0, %v4134_v55, 0.0  ;;  %v4157_v41 = vsel %vm132_vm0, %v4138_v23, 0.0  ;;  %v4161_v30 = vsel %vm132_vm0, %v4115_v43, 0.0  ;;  %v4162_v45 = vsel %vm132_vm0, %v4119_v4, 0.0 }
 0x34c   :  { %v4150_v36 = vadd.f32 %v4149_v35, %v4148_v27  ;;  %v4159_v14 = vsel %vm132_vm0, %v4142_v62, 0.0  ;;  %v4163_v29 = vadd.f32 %v4162_v45, %v4161_v30  ;;  %v4164_v15 = vsel %vm132_vm0, %v4123_v28, 0.0 }
 0x34d   :  { %v4166_v21 = vsel %vm132_vm0, %v4127_v38, 0.0  ;;  %v4168_v26 = vsel %vm132_vm0, %v4131_v57, 0.0  ;;  %v4170_v48 = vsel %vm132_vm0, %v4135_v18, 0.0  ;;  %v4176_v55 = vsel %vm132_vm0, %v4116_v46, 0.0 }
 0x34e   :  { %v4152_v56 = vadd.f32 %v4151_v12, %v4150_v36  ;;  %v4165_v23 = vadd.f32 %v4164_v15, %v4163_v29  ;;  %v4172_v43 = vsel %vm132_vm0, %v4139_v54, 0.0  ;;  %v4177_v4 = vsel %vm132_vm0, %v4120_v60, 0.0 }
 0x34f   :  { %v4174_v35 = vsel %vm132_vm0, %v4143_v32, 0.0  ;;  %v4178_v62 = vadd.f32 %v4177_v4, %v4176_v55  ;;  %v4179_v45 = vsel %vm132_vm0, %v4124_v9, 0.0  ;;  %v4181_v28 = vsel %vm132_vm0, %v4128_v7, 0.0 }
 0x350   :  { %v4154_v38 = vadd.f32 %v4153_v37, %v4152_v56  ;;  %v4167_v30 = vadd.f32 %v4166_v21, %v4165_v23  ;;  %v4183_v57 = vsel %vm132_vm0, %v4132_v17, 0.0  ;;  %v4185_v18 = vsel %vm132_vm0, %v4136_v51, 0.0  ;;  %v12563_v21 = vld [vmem:[#allocation5_spill] sm:$0xff] }
 0x351   :  { %v4180_v46 = vadd.f32 %v4179_v45, %v4178_v62  ;;  %v4187_v29 = vsel %vm132_vm0, %v4140_v50, 0.0  ;;  %v4191_v63 = vsel %vm132_vm0, %v10427_v13, 0.0  ;;  %v4192_v60 = vsel %vm132_vm0, %v4121_v52, 0.0 }
 0x352   :  { %v4156_v54 = vadd.f32 %v4155_v44, %v4154_v38  ;;  %v4169_v27 = vadd.f32 %v4168_v26, %v4167_v30  ;;  %v4189_v9 = vsel %vm132_vm0, %v4144_v10, 0.0  ;;  %v4193_v32 = vadd.f32 %v4192_v60, %v4191_v63  ;;  %v12562_v10 = vld [vmem:[#allocation8_spill] sm:$0xff] }
 0x353   :  { %v4182_v7 = vadd.f32 %v4181_v28, %v4180_v46  ;;  %v4194_v37 = vsel %vm132_vm0, %v10447_v25, 0.0  ;;  %v4196_v17 = vsel %vm132_vm0, %v4129_v8, 0.0  ;;  %v4198_v51 = vsel %vm132_vm0, %v4133_v11, 0.0  ;;  %v12565_v8 = vld [vmem:[#allocation95_spill] sm:$0xff]  ;;  %v12571_v28 = vld [vmem:[#allocation132_spill] sm:$0xff] }
 0x354   :  { %v4158_v12 = vadd.f32 %v4157_v41, %v4156_v54  ;;  %v4171_v50 = vadd.f32 %v4170_v48, %v4169_v27  ;;  %v4195_v36 = vadd.f32 %v4194_v37, %v4193_v32  ;;  %v4200_v13 = vsel %vm132_vm0, %v4137_v33, 0.0  ;;  %v12566_v48 = vld [vmem:[#allocation118_spill] sm:$0xff]  ;;  %v12567_v33 = vld [vmem:[#allocation33_spill] sm:$0xff] }
 0x355   :  { %v4184_v15 = vadd.f32 %v4183_v57, %v4182_v7  ;;  %v4202_v52 = vsel %vm132_vm0, %v4141_v16, 0.0  ;;  %v4204_v44 = vsel %vm132_vm0, %v4145_v3, 0.0  ;;  %v4209_v26 = vrot.slane %v12563_v21, %v12562_v10  ;;  %v12568_v16 = vld [vmem:[#allocation131_spill] sm:$0xff] }
 0x356   :  { %v10529_v55 = vadd.f32 %v4159_v14, %v4158_v12  ;;  %v4173_v25 = vadd.f32 %v4172_v43, %v4171_v50  ;;  %v4197_v56 = vadd.f32 %v4196_v17, %v4195_v36  ;;  %v4213_v11 = vrot.slane %v12565_v8, %v12562_v10  ;;  %v12570_v14 = vld [vmem:[#allocation31_spill] sm:$0xff] }
 0x357   :  { %v4186_v41 = vadd.f32 %v4185_v18, %v4184_v15  ;;  %v4217_v23 = vrot.slane %v12566_v48, %v12562_v10  ;;  %v4221_v4 = vrot.slane %v12567_v33, %v12562_v10  ;;  %v4225_v3 = vrot.slane %v12568_v16, %v12562_v10  ;;  %v12572_v57 = vld [vmem:[#allocation111_spill] sm:$0xff]  ;;  %v12576_v48 = vld [vmem:[#allocation56_spill] sm:$0xff]  ;;  %v12577_v33 = vld [vmem:[#allocation57_spill] sm:$0xff] }
 0x358   :  { %12564 = vst [vmem:[#allocation76_spill] sm:$0xff] %v10529_v55  ;;  %v10539_v62 = vadd.f32 %v4174_v35, %v4173_v25  ;;  %v4199_v45 = vadd.f32 %v4198_v51, %v4197_v56  ;;  %v4229_v43 = vrot.slane %v12570_v14, %v12562_v10  ;;  %v4233_v38 = vrot.slane %v12571_v28, %v12562_v10  ;;  %v12584_v55 = vld [vmem:[#allocation19_spill] sm:$0xff] }
 0x359   :  { %v4188_v30 = vadd.f32 %v4187_v29, %v4186_v41  ;;  %v4237_v18 = vrot.slane %v12572_v57, %v12562_v10  ;;  %v4238_v46 = vmul.f32 %v4209_v26, %v9766_v39  ;;  %v4239_v63 = vmul.f32 %v4209_v26, %v9769_v19  ;;  %v12581_v57 = vld [vmem:[#allocation61_spill] sm:$0xff] }
 0x35a   :  { %12569 = vst [vmem:[#allocation77_spill] sm:$0xff] %v10539_v62  ;;  %v4201_v60 = vadd.f32 %v4200_v13, %v4199_v45  ;;  %v4240_v54 = vmul.f32 %v4209_v26, %v9772_v34  ;;  %v10551_v35 = vmul.f32 %v4209_v26, %v9775_v49  ;;  %v4242_v27 = vmul.f32 %v4213_v11, %v9780_v22  ;;  %v12578_v45 = vld [vmem:[#allocation58_spill] sm:$0xff] }
 0x35b   :  { %v10554_v32 = vadd.f32 %v4189_v9, %v4188_v30  ;;  %v4243_v7 = vmul.f32 %v4213_v11, %v9785_v53  ;;  %v4244_v29 = vmul.f32 %v4213_v11, %v9790_v24  ;;  %v4245_v37 = vmul.f32 %v4213_v11, %v9795_v59  ;;  %v12575_v11 = vld [vmem:[#allocation55_spill] sm:$0xff]  ;;  %v12580_v30 = vld [vmem:[#allocation60_spill] sm:$0xff] }
 0x35c   :  { %v4203_v17 = vadd.f32 %v4202_v52, %v4201_v60  ;;  %v4246_v51 = vmul.f32 %v4217_v23, %v9798_v0  ;;  %v4247_v12 = vmul.f32 %v4217_v23, %v9801_v58  ;;  %v4248_v50 = vmul.f32 %v4217_v23, %v9804_v42 }
 0x35d   :  { %12573 = vst [vmem:[#allocation107_spill] sm:$0xff] %v10554_v32  ;;  %v4249_v36 = vmul.f32 %v4217_v23, %v9807_v5  ;;  %v4250_v13 = vmul.f32 %v4221_v4, %v9812_v40  ;;  %v4251_v9 = vmul.f32 %v4221_v4, %v9817_v47  ;;  %v4252_v15 = vmul.f32 %v4221_v4, %v9822_v31  ;;  %v12583_v32 = vld [vmem:[#allocation51_spill] sm:$0xff] }
 0x35e   :  { %v10566_v21 = vadd.f32 %v4204_v44, %v4203_v17  ;;  %v4253_v26 = vmul.f32 %v4221_v4, %v9827_v1  ;;  %v4254_v52 = vmul.f32 %v4225_v3, %v9830_v61  ;;  %v4255_v25 = vmul.f32 %v4225_v3, %v9833_v2  ;;  %v12579_v44 = vld [vmem:[#allocation59_spill] sm:$0xff]  ;;  %v12582_v17 = vld [vmem:[#allocation32_spill] sm:$0xff] }
 0x35f   :  { %v4256_v56 = vmul.f32 %v4225_v3, %v9836_v6  ;;  %v4257_v8 = vmul.f32 %v4225_v3, %v9839_v20  ;;  %v4258_v41 = vmul.f32 %v4229_v43, %v12575_v11  ;;  %v4259_v23 = vmul.f32 %v4229_v43, %v12576_v48  ;;  %v12585_v20 = vld [vmem:[#allocation100_spill] sm:$0xff]  ;;  %v12586_v6 = vld [vmem:[#allocation26_spill] sm:$0xff] }
 0x360   :  { %12574 = vst [vmem:[#allocation73_spill] sm:$0xff] %v10566_v21  ;;  %v4260_v16 = vmul.f32 %v4229_v43, %v12577_v33  ;;  %v4261_v14 = vmul.f32 %v4229_v43, %v12578_v45  ;;  %v4262_v28 = vmul.f32 %v4233_v38, %v12579_v44  ;;  %v4263_v4 = vmul.f32 %v4233_v38, %v12580_v30 }
 0x361   :  { %v4264_v60 = vmul.f32 %v4233_v38, %v12581_v57  ;;  %v4265_v21 = vmul.f32 %v4233_v38, %v12582_v17  ;;  %v4266_v62 = vmul.f32 %v4237_v18, %v12583_v32  ;;  %v4267_v3 = vmul.f32 %v4237_v18, %v12584_v55 }
 0x362   :  { %v4268_v11 = vmul.f32 %v4237_v18, %v12585_v20  ;;  %v4269_v48 = vmul.f32 %v4237_v18, %v12586_v6  ;;  %v4270_v33 = vsel %vm132_vm0, %v4238_v46, 0.0  ;;  %v4271_v43 = vsel %vm132_vm0, %v4242_v27, 0.0 }
 0x363   :  { %v4272_v45 = vadd.f32 %v4271_v43, %v4270_v33  ;;  %v4273_v44 = vsel %vm132_vm0, %v4246_v51, 0.0  ;;  %v4275_v30 = vsel %vm132_vm0, %v4250_v13, 0.0  ;;  %v4277_v57 = vsel %vm132_vm0, %v4254_v52, 0.0 }
 0x364   :  { %v4279_v38 = vsel %vm132_vm0, %v4258_v41, 0.0  ;;  %v4281_v32 = vsel %vm132_vm0, %v4262_v28, 0.0  ;;  %v4285_v55 = vsel %vm132_vm0, %v4239_v63, 0.0  ;;  %v4286_v20 = vsel %vm132_vm0, %v4243_v7, 0.0 }
 0x365   :  { %v4274_v18 = vadd.f32 %v4273_v44, %v4272_v45  ;;  %v4283_v46 = vsel %vm132_vm0, %v4266_v62, 0.0  ;;  %v4287_v6 = vadd.f32 %v4286_v20, %v4285_v55  ;;  %v4288_v27 = vsel %vm132_vm0, %v4247_v12, 0.0 }
 0x366   :  { %v4290_v51 = vsel %vm132_vm0, %v4251_v9, 0.0  ;;  %v4292_v13 = vsel %vm132_vm0, %v4255_v25, 0.0  ;;  %v4294_v52 = vsel %vm132_vm0, %v4259_v23, 0.0  ;;  %v4300_v41 = vsel %vm132_vm0, %v4240_v54, 0.0 }
 0x367   :  { %v4276_v33 = vadd.f32 %v4275_v30, %v4274_v18  ;;  %v4289_v28 = vadd.f32 %v4288_v27, %v4287_v6  ;;  %v4296_v63 = vsel %vm132_vm0, %v4263_v4, 0.0  ;;  %v4301_v7 = vsel %vm132_vm0, %v4244_v29, 0.0 }
 0x368   :  { %v4298_v45 = vsel %vm132_vm0, %v4267_v3, 0.0  ;;  %v4302_v62 = vadd.f32 %v4301_v7, %v4300_v41  ;;  %v4303_v20 = vsel %vm132_vm0, %v4248_v50, 0.0  ;;  %v4305_v55 = vsel %vm132_vm0, %v4252_v15, 0.0 }
 0x369   :  { %v4278_v12 = vadd.f32 %v4277_v57, %v4276_v33  ;;  %v4291_v9 = vadd.f32 %v4290_v51, %v4289_v28  ;;  %v4307_v25 = vsel %vm132_vm0, %v4256_v56, 0.0  ;;  %v4309_v23 = vsel %vm132_vm0, %v4260_v16, 0.0 }
 0x36a   :  { %v4304_v54 = vadd.f32 %v4303_v20, %v4302_v62  ;;  %v4311_v6 = vsel %vm132_vm0, %v4264_v60, 0.0  ;;  %v4315_v44 = vsel %vm132_vm0, %v10551_v35, 0.0  ;;  %v4316_v29 = vsel %vm132_vm0, %v4245_v37, 0.0  ;;  %v12593_v20 = vld [vmem:[#allocation104_spill] sm:$0xff] }
 0x36b   :  { %v4280_v30 = vadd.f32 %v4279_v38, %v4278_v12  ;;  %v4293_v4 = vadd.f32 %v4292_v13, %v4291_v9  ;;  %v4313_v50 = vsel %vm132_vm0, %v4268_v11, 0.0  ;;  %v4317_v3 = vadd.f32 %v4316_v29, %v4315_v44  ;;  %v12587_v11 = vld [vmem:[#allocation112_spill] sm:$0xff]  ;;  %v12594_v9 = vld [vmem:[#allocation134_spill] sm:$0xff] }
 0x36c   :  { %v4306_v15 = vadd.f32 %v4305_v55, %v4304_v54  ;;  %v4318_v57 = vsel %vm132_vm0, %v4249_v36, 0.0  ;;  %v4320_v56 = vsel %vm132_vm0, %v4253_v26, 0.0  ;;  %v4322_v16 = vsel %vm132_vm0, %v4257_v8, 0.0  ;;  %v12588_v26 = vld [vmem:[#allocation22_spill] sm:$0xff] }
 0x36d   :  { %v4282_v43 = vadd.f32 %v4281_v32, %v4280_v30  ;;  %v4295_v18 = vadd.f32 %v4294_v52, %v4293_v4  ;;  %v4319_v60 = vadd.f32 %v4318_v57, %v4317_v3  ;;  %v4324_v27 = vsel %vm132_vm0, %v4261_v14, 0.0  ;;  %v12589_v52 = vld [vmem:[#allocation18_spill] sm:$0xff]  ;;  %v12590_v14 = vld [vmem:[#allocation72_spill] sm:$0xff] }
 0x36e   :  { %v4308_v35 = vadd.f32 %v4307_v25, %v4306_v15  ;;  %v4326_v37 = vsel %vm132_vm0, %v4265_v21, 0.0  ;;  %v4328_v38 = vsel %vm132_vm0, %v4269_v48, 0.0  ;;  %v4333_v51 = vrot.slane %v12587_v11, %v12562_v10  ;;  %v12591_v21 = vld [vmem:[#allocation88_spill] sm:$0xff]  ;;  %v12603_v11 = vld [vmem:[#allocation61_spill] sm:$0xff] }
 0x36f   :  { %v10620_v13 = vadd.f32 %v4283_v46, %v4282_v43  ;;  %v4297_v36 = vadd.f32 %v4296_v63, %v4295_v18  ;;  %v4321_v41 = vadd.f32 %v4320_v56, %v4319_v60  ;;  %v4337_v8 = vrot.slane %v12588_v26, %v12562_v10  ;;  %v12592_v46 = vld [vmem:[#allocation130_spill] sm:$0xff]  ;;  %v12595_v56 = vld [vmem:[#allocation80_spill] sm:$0xff]  ;;  %v12597_v43 = vld [vmem:[#allocation55_spill] sm:$0xff] }
 0x370   :  { %v4310_v32 = vadd.f32 %v4309_v23, %v4308_v35  ;;  %v4341_v33 = vrot.slane %v12589_v52, %v12562_v10  ;;  %v4345_v28 = vrot.slane %v12590_v14, %v12562_v10  ;;  %v4349_v48 = vrot.slane %v12591_v21, %v12562_v10  ;;  %v12598_v18 = vld [vmem:[#allocation56_spill] sm:$0xff]  ;;  %v12599_v60 = vld [vmem:[#allocation57_spill] sm:$0xff]  ;;  %v12601_v35 = vld [vmem:[#allocation59_spill] sm:$0xff] }
 0x371   :  { %v10630_v7 = vadd.f32 %v4298_v45, %v4297_v36  ;;  %v4323_v62 = vadd.f32 %v4322_v16, %v4321_v41  ;;  %v4353_v63 = vrot.slane %v12592_v46, %v12562_v10  ;;  %v4357_v55 = vrot.slane %v12593_v20, %v12562_v10  ;;  %v12596_v16 = vld [vmem:[#allocation106_spill] sm:$0xff]  ;;  %v12605_v41 = vld [vmem:[#allocation19_spill] sm:$0xff] }
 0x372   :  { %v4312_v12 = vadd.f32 %v4311_v6, %v4310_v32  ;;  %v4361_v25 = vrot.slane %v12594_v9, %v12562_v10  ;;  %v4362_v23 = vmul.f32 %v4333_v51, %v9766_v39  ;;  %v4363_v54 = vmul.f32 %v4333_v51, %v9769_v19  ;;  %v12607_v52 = vld [vmem:[#allocation26_spill] sm:$0xff] }
 0x373   :  { %v4325_v44 = vadd.f32 %v4324_v27, %v4323_v62  ;;  %v4364_v29 = vmul.f32 %v4333_v51, %v9772_v34  ;;  %v10642_v45 = vmul.f32 %v4333_v51, %v9775_v49  ;;  %v4366_v30 = vmul.f32 %v4337_v8, %v9780_v22  ;;  %v12600_v27 = vld [vmem:[#allocation58_spill] sm:$0xff]  ;;  %v12604_v51 = vld [vmem:[#allocation51_spill] sm:$0xff] }
 0x374   :  { %v10645_v4 = vadd.f32 %v4313_v50, %v4312_v12  ;;  %v4367_v3 = vmul.f32 %v4337_v8, %v9785_v53  ;;  %v4368_v6 = vmul.f32 %v4337_v8, %v9790_v24  ;;  %v4369_v10 = vmul.f32 %v4337_v8, %v9795_v59  ;;  %v12606_v8 = vld [vmem:[#allocation100_spill] sm:$0xff] }
 0x375   :  { %v4327_v15 = vadd.f32 %v4326_v37, %v4325_v44  ;;  %v4370_v39 = vmul.f32 %v4341_v33, %v9798_v0  ;;  %v4371_v19 = vmul.f32 %v4341_v33, %v9801_v58  ;;  %v4372_v34 = vmul.f32 %v4341_v33, %v9804_v42 }
 0x376   :  { %v4373_v49 = vmul.f32 %v4341_v33, %v9807_v5  ;;  %v4374_v57 = vmul.f32 %v4345_v28, %v9812_v40  ;;  %v4375_v22 = vmul.f32 %v4345_v28, %v9817_v47  ;;  %v4376_v50 = vmul.f32 %v4345_v28, %v9822_v31 }
 0x377   :  { %v10657_v53 = vadd.f32 %v4328_v38, %v4327_v15  ;;  %v4377_v24 = vmul.f32 %v4345_v28, %v9827_v1  ;;  %v4378_v59 = vmul.f32 %v4349_v48, %v9830_v61  ;;  %v4379_v0 = vmul.f32 %v4349_v48, %v9833_v2  ;;  %v12602_v38 = vld [vmem:[#allocation60_spill] sm:$0xff] }
 0x378   :  { %v4380_v58 = vmul.f32 %v4349_v48, %v12595_v56  ;;  %v4381_v42 = vmul.f32 %v4349_v48, %v12596_v16  ;;  %v4382_v5 = vmul.f32 %v4353_v63, %v12597_v43  ;;  %v4383_v40 = vmul.f32 %v4353_v63, %v12598_v18 }
 0x379   :  { %v4384_v47 = vmul.f32 %v4353_v63, %v12599_v60  ;;  %v4385_v31 = vmul.f32 %v4353_v63, %v12600_v27  ;;  %v4386_v37 = vmul.f32 %v4357_v55, %v12601_v35  ;;  %v4387_v1 = vmul.f32 %v4357_v55, %v12602_v38 }
 0x37a   :  { %v4388_v61 = vmul.f32 %v4357_v55, %v12603_v11  ;;  %v4389_v2 = vmul.f32 %v4357_v55, %v12582_v17  ;;  %v4390_v36 = vmul.f32 %v4361_v25, %v12604_v51  ;;  %v4391_v26 = vmul.f32 %v4361_v25, %v12605_v41 }
 0x37b   :  { %v4392_v32 = vmul.f32 %v4361_v25, %v12606_v8  ;;  %v4393_v33 = vmul.f32 %v4361_v25, %v12607_v52  ;;  %v4394_v14 = vsel %vm132_vm0, %v4362_v23, 0.0  ;;  %v4395_v28 = vsel %vm132_vm0, %v4366_v30, 0.0 }
 0x37c   :  { %v4396_v21 = vadd.f32 %v4395_v28, %v4394_v14  ;;  %v4397_v48 = vsel %vm132_vm0, %v4370_v39, 0.0  ;;  %v4399_v62 = vsel %vm132_vm0, %v4374_v57, 0.0  ;;  %v4401_v46 = vsel %vm132_vm0, %v4378_v59, 0.0  ;;  %v12610_v28 = vld [vmem:[#allocation62_spill] sm:$0xff] }
 0x37d   :  { %v4403_v17 = vsel %vm132_vm0, %v4382_v5, 0.0  ;;  %v4405_v63 = vsel %vm132_vm0, %v4386_v37, 0.0  ;;  %v4409_v20 = vsel %vm132_vm0, %v4363_v54, 0.0  ;;  %v4410_v55 = vsel %vm132_vm0, %v4367_v3, 0.0 }
 0x37e   :  { %v4398_v12 = vadd.f32 %v4397_v48, %v4396_v21  ;;  %v4407_v9 = vsel %vm132_vm0, %v4390_v36, 0.0  ;;  %v4411_v25 = vadd.f32 %v4410_v55, %v4409_v20  ;;  %v4412_v23 = vsel %vm132_vm0, %v4371_v19, 0.0  ;;  %v12611_v21 = vld [vmem:[#allocation48_spill] sm:$0xff]  ;;  %v12614_v55 = vld [vmem:[#allocation41_spill] sm:$0xff] }
 0x37f   :  { %v4414_v44 = vsel %vm132_vm0, %v4375_v22, 0.0  ;;  %v4416_v30 = vsel %vm132_vm0, %v4379_v0, 0.0  ;;  %v4418_v15 = vsel %vm132_vm0, %v4383_v40, 0.0  ;;  %v4424_v39 = vsel %vm132_vm0, %v4364_v29, 0.0 }
 0x380   :  { %v4400_v57 = vadd.f32 %v4399_v62, %v4398_v12  ;;  %v4413_v59 = vadd.f32 %v4412_v23, %v4411_v25  ;;  %v4420_v54 = vsel %vm132_vm0, %v4387_v1, 0.0  ;;  %v4425_v3 = vsel %vm132_vm0, %v4368_v6, 0.0  ;;  %v12612_v62 = vld [vmem:[#allocation49_spill] sm:$0xff]  ;;  %v12616_v23 = vld [vmem:[#allocation42_spill] sm:$0xff] }
 0x381   :  { %v4422_v56 = vsel %vm132_vm0, %v4391_v26, 0.0  ;;  %v4426_v16 = vadd.f32 %v4425_v3, %v4424_v39  ;;  %v4427_v43 = vsel %vm132_vm0, %v4372_v34, 0.0  ;;  %v4429_v19 = vsel %vm132_vm0, %v4376_v50, 0.0 }
 0x382   :  { %v4402_v22 = vadd.f32 %v4401_v46, %v4400_v57  ;;  %v4415_v5 = vadd.f32 %v4414_v44, %v4413_v59  ;;  %v4431_v0 = vsel %vm132_vm0, %v4380_v58, 0.0  ;;  %v4433_v18 = vsel %vm132_vm0, %v4384_v47, 0.0  ;;  %v12618_v57 = vld [vmem:[#allocation39_spill] sm:$0xff] }
 0x383   :  { %v4428_v29 = vadd.f32 %v4427_v43, %v4426_v16  ;;  %v4435_v40 = vsel %vm132_vm0, %v4388_v61, 0.0  ;;  %v4439_v60 = vsel %vm132_vm0, %v10642_v45, 0.0  ;;  %v4440_v6 = vsel %vm132_vm0, %v4369_v10, 0.0  ;;  %v12620_v16 = vld [vmem:[#allocation45_spill] sm:$0xff] }
 0x384   :  { %v4404_v27 = vadd.f32 %v4403_v17, %v4402_v22  ;;  %v4417_v35 = vadd.f32 %v4416_v30, %v4415_v5  ;;  %v4437_v34 = vsel %vm132_vm0, %v4392_v32, 0.0  ;;  %v4441_v50 = vadd.f32 %v4440_v6, %v4439_v60  ;;  %v12613_v17 = vld [vmem:[#allocation53_spill] sm:$0xff]  ;;  %v12624_v60 = vld [vmem:[#allocation67_spill] sm:$0xff] }
 0x385   :  { %v4430_v37 = vadd.f32 %v4429_v19, %v4428_v29  ;;  %v4442_v38 = vsel %vm132_vm0, %v4373_v49, 0.0  ;;  %v4444_v58 = vsel %vm132_vm0, %v4377_v24, 0.0  ;;  %v4446_v47 = vsel %vm132_vm0, %v4381_v42, 0.0  ;;  %v12608_v49 = vld [vmem:[#allocation35_spill] sm:$0xff]  ;;  %v12609_v42 = vld [vmem:[#allocation38_spill] sm:$0xff]  ;;  %v12621_v19 = vld [vmem:[#allocation44_spill] sm:$0xff] }
 0x386   :  { %v4406_v1 = vadd.f32 %v4405_v63, %v4404_v27  ;;  %v4419_v11 = vadd.f32 %v4418_v15, %v4417_v35  ;;  %v4443_v61 = vadd.f32 %v4442_v38, %v4441_v50  ;;  %v4448_v45 = vsel %vm132_vm0, %v4385_v31, 0.0  ;;  %v12617_v15 = vld [vmem:[#allocation40_spill] sm:$0xff]  ;;  %v12622_v5 = vld [vmem:[#allocation65_spill] sm:$0xff]  ;;  %v12623_v29 = vld [vmem:[#allocation66_spill] sm:$0xff] }
 0x387   :  { %v4432_v51 = vadd.f32 %v4431_v0, %v4430_v37  ;;  %v4450_v10 = vsel %vm132_vm0, %v4389_v2, 0.0  ;;  %v4452_v36 = vsel %vm132_vm0, %v4393_v33, 0.0  ;;  %v10709_v41 = vstv %s4526_s4  ;;  %v12625_v27 = vld [vmem:[#allocation68_spill] sm:$0xff]  ;;  %v12627_v37 = vld [vmem:[#allocation70_spill] sm:$0xff] }
 0x388   :  { %v4408_v26 = vadd.f32 %v4407_v9, %v4406_v1  ;;  %v4421_v8 = vadd.f32 %v4420_v54, %v4419_v11  ;;  %v4445_v32 = vadd.f32 %v4444_v58, %v4443_v61  ;;  %v4455_v24 = vmul.f32 %v10709_v41, %v12608_v49  ;;  %v12615_v9 = vld [vmem:[#allocation64_spill] sm:$0xff]  ;;  %v12619_v54 = vld [vmem:[#allocation43_spill] sm:$0xff]  ;;  %v12629_v1 = vld [vmem:[#allocation77_spill] sm:$0xff] }
 0x389   :  { %v4434_v52 = vadd.f32 %v4433_v18, %v4432_v51  ;;  %v4456_v14 = vmul.f32 %v10709_v41, %v12609_v42  ;;  %v4457_v31 = vmul.f32 %v10709_v41, %v12610_v28  ;;  %v4458_v2 = vmul.f32 %v10709_v41, %v12611_v21  ;;  %v12628_v58 = vld [vmem:[#allocation76_spill] sm:$0xff] }
 0x38a   :  { %v4423_v48 = vadd.f32 %v4422_v56, %v4421_v8  ;;  %v4447_v33 = vadd.f32 %v4446_v47, %v4445_v32  ;;  %v4459_v46 = vmul.f32 %v10709_v41, %v12612_v62  ;;  %v4460_v63 = vmul.f32 %v10709_v41, %v12613_v17  ;;  %4487 = vst.msk [vmem:[%s10904_s5] sm:$0xff] %vm132_vm0, %v4455_v24 }
 0x38b   :  { %v4436_v20 = vadd.f32 %v4435_v40, %v4434_v52  ;;  %v4461_v12 = vmul.f32 %v10709_v41, %v12614_v55  ;;  %v4462_v25 = vmul.f32 %v10709_v41, %v12615_v9  ;;  %v4463_v44 = vmul.f32 %v10709_v41, %v12616_v23  ;;  %4488 = vst.msk [vmem:[%s10904_s5 + $0x8] sm:$0xff] %vm132_vm0, %v4456_v14 }
 0x38c   :  { %4489 = vst.msk [vmem:[%s10904_s5 + $0x10] sm:$0xff] %vm132_vm0, %v4457_v31  ;;  %4490 = vst.msk [vmem:[%s10904_s5 + $0x18] sm:$0xff] %vm132_vm0, %v4458_v2  ;;  %v4449_v30 = vadd.f32 %v4448_v45, %v4447_v33  ;;  %v4464_v39 = vmul.f32 %v10709_v41, %v12617_v15  ;;  %v4465_v59 = vmul.f32 %v10709_v41, %v12618_v57  ;;  %v12630_v45 = vld [vmem:[#allocation107_spill] sm:$0xff] }
 0x38d   :  { %v4466_v3 = vmul.f32 %v10709_v41, %v12619_v54  ;;  %4491 = vst.msk [vmem:[%s10904_s5 + $0x20] sm:$0xff] %vm132_vm0, %v4459_v46  ;;  %4492 = vst.msk [vmem:[%s10904_s5 + $0x28] sm:$0xff] %vm132_vm0, %v4460_v63  ;;  %v4438_v56 = vadd.f32 %v4437_v34, %v4436_v20  ;;  %v4467_v43 = vmul.f32 %v10709_v41, %v12620_v16  ;;  %v12626_v34 = vld [vmem:[#allocation69_spill] sm:$0xff] }
 0x38e   :  { %v4468_v22 = vmul.f32 %v10709_v41, %v12621_v19  ;;  %v4469_v0 = vmul.f32 %v10709_v41, %v12622_v5  ;;  %4493 = vst.msk [vmem:[%s10904_s5 + $0x30] sm:$0xff] %vm132_vm0, %v4461_v12  ;;  %4494 = vst.msk [vmem:[%s10904_s5 + $0x38] sm:$0xff] %vm132_vm0, %v4462_v25  ;;  %v4451_v18 = vadd.f32 %v4450_v10, %v4449_v30  ;;  %v12631_v10 = vld [vmem:[#allocation73_spill] sm:$0xff] }
 0x38f   :  { %4495 = vst.msk [vmem:[%s10904_s5 + $0x40] sm:$0xff] %vm132_vm0, %v4463_v44  ;;  %v4470_v40 = vmul.f32 %v10709_v41, %v12623_v29  ;;  %v4471_v6 = vmul.f32 %v10709_v41, %v12624_v60  ;;  %v4472_v35 = vmul.f32 %v10709_v41, %v12625_v27  ;;  %4496 = vst.msk [vmem:[%s10904_s5 + $0x48] sm:$0xff] %vm132_vm0, %v4464_v39 }
 0x390   :  { %4497 = vst.msk [vmem:[%s10904_s5 + $0x50] sm:$0xff] %vm132_vm0, %v4465_v59  ;;  %4498 = vst.msk [vmem:[%s10904_s5 + $0x58] sm:$0xff] %vm132_vm0, %v4466_v3  ;;  %v4473_v50 = vmul.f32 %v10709_v41, %v12626_v34  ;;  %v4474_v38 = vmul.f32 %v10709_v41, %v12627_v37  ;;  %v4475_v47 = vmul.f32 %v10709_v41, %v12628_v58 }
 0x391   :  { %v4476_v11 = vmul.f32 %v10709_v41, %v12629_v1  ;;  %4499 = vst.msk [vmem:[%s10904_s5 + $0x60] sm:$0xff] %vm132_vm0, %v4467_v43  ;;  %4500 = vst.msk [vmem:[%s10904_s5 + $0x68] sm:$0xff] %vm132_vm0, %v4468_v22  ;;  %v4453_v61 = vadd.f32 %v4452_v36, %v4451_v18  ;;  %v4477_v51 = vmul.f32 %v10709_v41, %v12630_v45 }
 0x392   :  { %4501 = vst.msk [vmem:[%s10904_s5 + $0x70] sm:$0xff] %vm132_vm0, %v4469_v0  ;;  %v4478_v8 = vmul.f32 %v10709_v41, %v12631_v10  ;;  %v4479_v32 = vmul.f32 %v10709_v41, %v10620_v13  ;;  %4502 = vst.msk [vmem:[%s10904_s5 + $0x78] sm:$0xff] %vm132_vm0, %v4470_v40  ;;  %v4480_v36 = vmul.f32 %v10709_v41, %v10630_v7 }
 0x393   :  { %4503 = vst.msk [vmem:[%s10904_s5 + $0x80] sm:$0xff] %vm132_vm0, %v4471_v6  ;;  %4504 = vst.msk [vmem:[%s10904_s5 + $0x88] sm:$0xff] %vm132_vm0, %v4472_v35  ;;  %v4481_v13 = vmul.f32 %v10709_v41, %v10645_v4  ;;  %v4482_v49 = vmul.f32 %v10709_v41, %v10657_v53  ;;  %v4483_v24 = vmul.f32 %v10709_v41, %v4408_v26 }
 0x394   :  { %4505 = vst.msk [vmem:[%s10904_s5 + $0x90] sm:$0xff] %vm132_vm0, %v4473_v50  ;;  %4506 = vst.msk [vmem:[%s10904_s5 + $0x98] sm:$0xff] %vm132_vm0, %v4474_v38  ;;  %v4484_v7 = vmul.f32 %v10709_v41, %v4423_v48  ;;  %v4485_v4 = vmul.f32 %v10709_v41, %v4438_v56  ;;  %v4486_v53 = vmul.f32 %v10709_v41, %v4453_v61 }
 0x395   :  { %4507 = vst.msk [vmem:[%s10904_s5 + $0xa0] sm:$0xff] %vm132_vm0, %v4475_v47  ;;  %4508 = vst.msk [vmem:[%s10904_s5 + $0xa8] sm:$0xff] %vm132_vm0, %v4476_v11 }
 0x396   :  { %4509 = vst.msk [vmem:[%s10904_s5 + $0xb0] sm:$0xff] %vm132_vm0, %v4477_v51  ;;  %4510 = vst.msk [vmem:[%s10904_s5 + $0xb8] sm:$0xff] %vm132_vm0, %v4478_v8 }
 0x397   :  { %4511 = vst.msk [vmem:[%s10904_s5 + $0xc0] sm:$0xff] %vm132_vm0, %v4479_v32  ;;  %4512 = vst.msk [vmem:[%s10904_s5 + $0xc8] sm:$0xff] %vm132_vm0, %v4480_v36 }
 0x398   :  { %4513 = vst.msk [vmem:[%s10904_s5 + $0xd0] sm:$0xff] %vm132_vm0, %v4481_v13  ;;  %4514 = vst.msk [vmem:[%s10904_s5 + $0xd8] sm:$0xff] %vm132_vm0, %v4482_v49 }
 0x399   :  { %4515 = vst.msk [vmem:[%s10904_s5 + $0xe0] sm:$0xff] %vm132_vm0, %v4483_v24  ;;  %4516 = vst.msk [vmem:[%s10904_s5 + $0xe8] sm:$0xff] %vm132_vm0, %v4484_v7 }
 0x39a   :  { %4517 = vst.msk [vmem:[%s10904_s5 + $0xf0] sm:$0xff] %vm132_vm0, %v4485_v4  ;;  %4518 = vst.msk [vmem:[%s10904_s5 + $0xf8] sm:$0xff] %vm132_vm0, %v4486_v53 }

</bundles_post_ra>
